<compile_context>
chip_gen: v7x
topology: tpu7x:2x2x1
jax: 0.10.0
libtpu: 0.0.40
codegen_flags: <defaults>
</compile_context>

<pallas_src>
import numpy as np
import jax
import jax.numpy as jnp
from jax import lax
from jax.experimental import pallas as pl
from jax.experimental.pallas import tpu as pltpu

EPS = 1e-5
_VMEM = pl.BlockSpec(memory_space=pltpu.MemorySpace.VMEM)

# spe_feat_extract16 conv layers: (Cin, Cout, k, s, p, d, Hin, Win)
CONV_CONFIG = [
    (9, 32, 3, 2, 1, 1, 16, 16),
    (32, 32, 3, 1, 1, 1, 8, 8),
    (32, 32, 3, 2, 1, 1, 8, 8),
    (32, 32, 3, 1, 1, 2, 4, 4),
]
# GCN_RESBLOCK stack (last entry = out_layer with actf='none')
LAYERS_CONFIG = [(192, 32), (32, 48), (48, 64), (64, 80),
                 (80, 96), (96, 112), (112, 128), (128, 144)]

SWC_DIM = 64                                     # layer_input output width
N_CONV = len(CONV_CONFIG)
N_T = sum(c[2] for c in CONV_CONFIG)             # one Toeplitz matrix per kernel row
N_GCN_W = 5 + 3 * (len(LAYERS_CONFIG) - 1)       # block 0 pre-split into swc/spe halves


def _out_size(nv, k, s, p, d):
    return (nv + 2 * p - d * (k - 1) - 1) // s + 1


def _conv_hw_out(cfg):
    _, _, k, s, p, d, hin, win = cfg
    return _out_size(hin, k, s, p, d), _out_size(win, k, s, p, d)


def _bf(x):
    return x.astype(jnp.bfloat16)


def _mm(a, b):
    return jnp.dot(a, b, preferred_element_type=jnp.float32)


def _bn_rows(y, nf):
    """BatchNorm1d (affine=False, batch stats, biased var) over rows; f32 math."""
    mean = jnp.sum(y, axis=0, keepdims=True) * (1.0 / nf)
    msq = jnp.sum(y * y, axis=0, keepdims=True) * (1.0 / nf)
    var = jnp.maximum(msq - mean * mean, 0.0)
    return (y - mean) * lax.rsqrt(var + EPS)


def encoder_kernel(*refs):
    xyz_ref, adj_ref, slab0_ref, w_in_ref = refs[:4]
    pos = 4
    t_refs = refs[pos:pos + N_T]; pos += N_T          # Toeplitz mats (bf16)
    r_refs = refs[pos:pos + N_CONV]; pos += N_CONV    # wo-reduce 0/1 mats (f32)
    b_refs = refs[pos:pos + N_CONV]; pos += N_CONV    # channel-broadcast mats (f32)
    g_refs = refs[pos:pos + N_GCN_W]; pos += N_GCN_W  # GCN weights (bf16)
    out_ref = refs[pos]; pos += 1
    slabs = (slab0_ref,) + tuple(refs[pos:])          # 2-D conv activation slabs

    n = xyz_ref.shape[0]
    nf = float(n)

    # ---------------- layer_input: Linear(3,64) + BN1d + ReLU -----------------
    swc = _mm(_bf(xyz_ref[...]), w_in_ref[...])
    swc = jnp.maximum(_bn_rows(swc, nf), 0.0)

    # Zero only the H-halo rows of the scratch slabs (interior is overwritten).
    for li in range(1, N_CONV):
        p_li, hin_li = CONV_CONFIG[li][4], CONV_CONFIG[li][6]
        s_ref = slabs[li]
        zrow = jnp.zeros((p_li * n, s_ref.shape[1]), jnp.float32)
        s_ref[0:p_li * n] = zrow
        s_ref[(p_li + hin_li) * n:(2 * p_li + hin_li) * n] = zrow

    # ------------- spe_feat_extract16: 4 x (conv + BN2d + ReLU) ---------------
    spe = None
    ti = 0
    for li, (cin, cout, k, s, p, d, hin, win) in enumerate(CONV_CONFIG):
        ho_n, wo_n = _conv_hw_out(CONV_CONFIG[li])
        woc = wo_n * cout
        slab = slabs[li]

        # pass 1: conv == sum over kernel rows of ONE stacked (Ho*N, Win*Cin) matmul
        acc = None
        for ki in range(k):
            if s == 1:                                 # contiguous sublane slice
                lhs = slab[(ki * d) * n:(ki * d + ho_n) * n]
            else:                                      # stride-2: small strided gather
                lhs = jnp.concatenate(
                    [slab[(s * ho + ki * d) * n:(s * ho + ki * d + 1) * n]
                     for ho in range(ho_n)], axis=0)
            c = _mm(_bf(lhs), t_refs[ti + ki][...])
            acc = c if acc is None else acc + c
        ti += k

        # BN2d batch stats per channel over (N, Ho, Wo); reduce/broadcast on MXU
        inv_cnt = 1.0 / float(n * ho_n * wo_n)
        col_sum = jnp.sum(acc, axis=0, keepdims=True)          # (1, Wo*Cout)
        col_sq = jnp.sum(acc * acc, axis=0, keepdims=True)
        rmat, bmat = r_refs[li][...], b_refs[li][...]
        mean = _mm(col_sum, rmat) * inv_cnt                    # (1, Cout)
        msq = _mm(col_sq, rmat) * inv_cnt
        var = jnp.maximum(msq - mean * mean, 0.0)
        inv = lax.rsqrt(var + EPS)
        scale_f = _mm(inv, bmat)                               # (1, Wo*Cout)
        shift_f = _mm(-mean * inv, bmat)
        y = jnp.maximum(acc * scale_f + shift_f, 0.0)          # (Ho*N, Wo*Cout)

        if li + 1 < N_CONV:
            p_nxt = CONV_CONFIG[li + 1][4]
            slabs[li + 1][p_nxt * n:(p_nxt + ho_n) * n] = y    # single aligned store
        else:
            # spe kept in (H,W,C)-block order; CHW permutation folded into wg0/w20
            spe = jnp.concatenate([y[h * n:(h + 1) * n, :] for h in range(ho_n)],
                                  axis=1)                       # (N, Ho*Wo*Cout)

    # -------- GCN stack: 7 x GCN_RESBLOCK(+ReLU) + out_layer (actf='none') ----
    adj = adj_ref[...]
    swcb, speb = _bf(swc), _bf(spe)

    # block 0: x = [swc | spe] handled by pre-split weights (no misaligned concat)
    cout0 = LAYERS_CONFIG[0][1]
    wg_swc, wg_spe, w1p, w2p_swc, w2p_spe = (g_refs[j][...] for j in range(5))
    support = _mm(swcb, wg_swc) + _mm(speb, wg_spe)
    g = jnp.maximum(_bn_rows(_mm(adj, support), nf), 0.0)
    z = _bn_rows(_mm(_bf(g), w1p) + _mm(swcb, w2p_swc) + _mm(speb, w2p_spe), nf)
    x = jnp.maximum(z[:, :cout0] + z[:, cout0:], 0.0)

    gi = 5
    nb = len(LAYERS_CONFIG)
    for i in range(1, nb):
        cout = LAYERS_CONFIG[i][1]
        wg, w1p, w2p = g_refs[gi][...], g_refs[gi + 1][...], g_refs[gi + 2][...]
        gi += 3
        xb = _bf(x)
        support = _mm(xb, wg)
        g = jnp.maximum(_bn_rows(_mm(adj, support), nf), 0.0)     # GCNLayer: BN+ReLU
        # joint BN over [g@w1 | x@w2] (exact: BN is per-column)
        z = _bn_rows(_mm(_bf(g), w1p) + _mm(xb, w2p), nf)
        x = z[:, :cout] + z[:, cout:]
        if i + 1 < nb:
            x = jnp.maximum(x, 0.0)
    out_ref[...] = x


# -----------------------------------------------------------------------------
# XLA-side constant construction (runs under jit, outside the kernel)
# -----------------------------------------------------------------------------
def _row_toeplitz(w, s, p, d, win, wo):
    """Per-kernel-row matrices T_ki of shape (Win*Cin, Wo*Cout) over the UNPADDED
    width (W zero-padding folded away):
      T_ki[(s*wo + kj*d - p)*Cin + ci, wo*Cout + co] = w[co, ci, ki, kj]."""
    cout, cin, k, _ = w.shape
    mats = []
    for ki in range(k):
        t = jnp.zeros((win * cin, wo * cout), jnp.float32)
        for kj in range(k):
            sel = np.zeros((win, wo), np.float32)
            nz = False
            for o in range(wo):
                wi = s * o + kj * d - p
                if 0 <= wi < win:
                    sel[wi, o] = 1.0
                    nz = True
            if nz:
                t = t + jnp.kron(jnp.asarray(sel), w[:, :, ki, kj].T)
        mats.append(t.astype(jnp.bfloat16))
    return mats


@jax.jit
def encoder_ife_forward(params, feat_xyz, adj, feat_sp):
    n, cin0, h0, w0 = feat_sp.shape
    p0 = CONV_CONFIG[0][4]

    # conv1 input slab: 2-D (Hpad*N, Win*Cin), channel-minor, H-halo zero padded
    slab0 = jnp.transpose(feat_sp, (2, 0, 3, 1)).reshape(h0, n, w0 * cin0)
    slab0 = jnp.pad(slab0, ((p0, p0), (0, 0), (0, 0)))
    slab0 = slab0.reshape((h0 + 2 * p0) * n, w0 * cin0)

    t_mats, r_mats, b_mats, slab_shapes = [], [], [], []
    for li, (ci, co, k, s, p, d, hin, win) in enumerate(CONV_CONFIG):
        ho_n, wo_n = _conv_hw_out(CONV_CONFIG[li])
        t_mats += _row_toeplitz(params[f"conv{li + 1}_w"], s, p, d, win, wo_n)
        red = np.zeros((wo_n * co, co), np.float32)            # 0/1 wo-reduce matrix
        for wo in range(wo_n):
            red[wo * co:(wo + 1) * co, :] = np.eye(co, dtype=np.float32)
        r_mats.append(jnp.asarray(red))
        b_mats.append(jnp.asarray(red.T))                      # channel broadcast
        if li + 1 < N_CONV:
            p_nxt = CONV_CONFIG[li + 1][4]
            slab_shapes.append(((ho_n + 2 * p_nxt) * n, wo_n * co))

    # Fold PyTorch's NCHW .view flatten order of the last conv into the spe rows
    # of the first GCN block's weights (removes the old P_h gather matmuls).
    co4 = CONV_CONFIG[-1][1]
    ho4, wo4 = _conv_hw_out(CONV_CONFIG[-1])
    perm = np.empty(co4 * ho4 * wo4, np.int32)
    for h in range(ho4):
        for w in range(wo4):
            for c in range(co4):
                perm[(h * wo4 + w) * co4 + c] = (c * ho4 + h) * wo4 + w

    def pad_l(w, co):   # [w | 0]
        return jnp.concatenate([w, jnp.zeros((w.shape[0], co), w.dtype)], axis=1)

    def pad_r(w, co):   # [0 | w]
        return jnp.concatenate([jnp.zeros((w.shape[0], co), w.dtype), w], axis=1)

    gcn_flat = []
    for i, blk in enumerate(params["gcn"]):
        cin, cout = LAYERS_CONFIG[i]
        wg, w1, w2 = blk["wg"], blk["w1"], blk["w2"]
        if i == 0:
            gcn_flat += [wg[:SWC_DIM], wg[SWC_DIM:][perm], pad_l(w1, cout),
                         pad_r(w2[:SWC_DIM], cout), pad_r(w2[SWC_DIM:][perm], cout)]
        else:
            gcn_flat += [wg, pad_l(w1, cout), pad_r(w2, cout)]
    gcn_flat = [w.astype(jnp.bfloat16) for w in gcn_flat]

    inputs = ([feat_xyz, adj, slab0, params["in_w"].astype(jnp.bfloat16)]
              + t_mats + r_mats + b_mats + gcn_flat)

    return pl.pallas_call(
        encoder_kernel,
        out_shape=jax.ShapeDtypeStruct((n, LAYERS_CONFIG[-1][1]), jnp.float32),
        in_specs=[_VMEM] * len(inputs),
        out_specs=_VMEM,
        scratch_shapes=[pltpu.VMEM(shp, jnp.float32) for shp in slab_shapes],
    )(*inputs)


# -----------------------------------------------------------------------------
# Deterministic parameter init (shapes from Encoder_IFE.__init__).
# Linear/Conv biases omitted: exactly cancelled by the affine-free batch-stats
# BatchNorm that follows each of them.
# -----------------------------------------------------------------------------
def init_params(key):
    keys = iter(jax.random.split(key, 64))

    def u(shape, scale):
        return jax.random.uniform(next(keys), shape, jnp.float32, -scale, scale)

    p = {}
    p["in_w"] = u((3, 64), 1.0 / 3 ** 0.5)
    for i, (cin, cout, k, *_rest) in enumerate(CONV_CONFIG, start=1):
        fan = cin * k * k
        p[f"conv{i}_w"] = u((cout, cin, k, k), 1.0 / fan ** 0.5)
    p["gcn"] = []
    for cin, cout in LAYERS_CONFIG:
        p["gcn"].append({
            "wg": u((cin, cout), 1.0 / cout ** 0.5),   # GCNLayer weights (in, out)
            "w1": u((cout, cout), 1.0 / cout ** 0.5),  # LinearLayer1 (in, out)
            "w2": u((cin, cout), 1.0 / cin ** 0.5),    # LinearLayer2 (in, out)
        })
    return p


if __name__ == "__main__":
    key = jax.random.PRNGKey(0)
    k1, k2, k3, kp = jax.random.split(key, 4)

    N = 8  # number of graph nodes (BN1d batch)
    feat_xyz = jax.random.normal(k1, (N, 3), jnp.float32)
    adj = jax.random.uniform(k2, (N, N), jnp.float32)
    feat_sp = jax.random.normal(k3, (N, 9, 16, 16), jnp.float32)

    params = init_params(kp)

    out = jax.block_until_ready(encoder_ife_forward(params, feat_xyz, adj, feat_sp))
    assert out.shape == (N, 144), out.shape
    assert bool(jnp.all(jnp.isfinite(out)))
    print("KERNEL_OK")
</pallas_src>

<mosaic_0001>
module attributes {stable_mosaic.version = 11 : i64} {
  func.func @encoder_kernel(%arg0: memref<8x3xf32, #tpu.memory_space<vmem>>, %arg1: memref<8x8xf32, #tpu.memory_space<vmem>>, %arg2: memref<144x144xf32, #tpu.memory_space<vmem>>, %arg3: memref<3x64xbf16, #tpu.memory_space<vmem>>, %arg4: memref<144x256xbf16, #tpu.memory_space<vmem>>, %arg5: memref<144x256xbf16, #tpu.memory_space<vmem>>, %arg6: memref<144x256xbf16, #tpu.memory_space<vmem>>, %arg7: memref<256x256xbf16, #tpu.memory_space<vmem>>, %arg8: memref<256x256xbf16, #tpu.memory_space<vmem>>, %arg9: memref<256x256xbf16, #tpu.memory_space<vmem>>, %arg10: memref<256x128xbf16, #tpu.memory_space<vmem>>, %arg11: memref<256x128xbf16, #tpu.memory_space<vmem>>, %arg12: memref<256x128xbf16, #tpu.memory_space<vmem>>, %arg13: memref<128x64xbf16, #tpu.memory_space<vmem>>, %arg14: memref<128x64xbf16, #tpu.memory_space<vmem>>, %arg15: memref<128x64xbf16, #tpu.memory_space<vmem>>, %arg16: memref<256x32xf32, #tpu.memory_space<vmem>>, %arg17: memref<256x32xf32, #tpu.memory_space<vmem>>, %arg18: memref<128x32xf32, #tpu.memory_space<vmem>>, %arg19: memref<64x32xf32, #tpu.memory_space<vmem>>, %arg20: memref<32x256xf32, #tpu.memory_space<vmem>>, %arg21: memref<32x256xf32, #tpu.memory_space<vmem>>, %arg22: memref<32x128xf32, #tpu.memory_space<vmem>>, %arg23: memref<32x64xf32, #tpu.memory_space<vmem>>, %arg24: memref<64x32xbf16, #tpu.memory_space<vmem>>, %arg25: memref<128x32xbf16, #tpu.memory_space<vmem>>, %arg26: memref<32x64xbf16, #tpu.memory_space<vmem>>, %arg27: memref<64x64xbf16, #tpu.memory_space<vmem>>, %arg28: memref<128x64xbf16, #tpu.memory_space<vmem>>, %arg29: memref<32x48xbf16, #tpu.memory_space<vmem>>, %arg30: memref<48x96xbf16, #tpu.memory_space<vmem>>, %arg31: memref<32x96xbf16, #tpu.memory_space<vmem>>, %arg32: memref<48x64xbf16, #tpu.memory_space<vmem>>, %arg33: memref<64x128xbf16, #tpu.memory_space<vmem>>, %arg34: memref<48x128xbf16, #tpu.memory_space<vmem>>, %arg35: memref<64x80xbf16, #tpu.memory_space<vmem>>, %arg36: memref<80x160xbf16, #tpu.memory_space<vmem>>, %arg37: memref<64x160xbf16, #tpu.memory_space<vmem>>, %arg38: memref<80x96xbf16, #tpu.memory_space<vmem>>, %arg39: memref<96x192xbf16, #tpu.memory_space<vmem>>, %arg40: memref<80x192xbf16, #tpu.memory_space<vmem>>, %arg41: memref<96x112xbf16, #tpu.memory_space<vmem>>, %arg42: memref<112x224xbf16, #tpu.memory_space<vmem>>, %arg43: memref<96x224xbf16, #tpu.memory_space<vmem>>, %arg44: memref<112x128xbf16, #tpu.memory_space<vmem>>, %arg45: memref<128x256xbf16, #tpu.memory_space<vmem>>, %arg46: memref<112x256xbf16, #tpu.memory_space<vmem>>, %arg47: memref<128x144xbf16, #tpu.memory_space<vmem>>, %arg48: memref<144x288xbf16, #tpu.memory_space<vmem>>, %arg49: memref<128x288xbf16, #tpu.memory_space<vmem>>, %arg50: memref<8x144xf32, #tpu.memory_space<vmem>>, %arg51: memref<80x256xf32, #tpu.memory_space<vmem>>, %arg52: memref<80x256xf32, #tpu.memory_space<vmem>>, %arg53: memref<48x128xf32, #tpu.memory_space<vmem>>) attributes {dimension_semantics = [], scalar_prefetch = 0 : i64, scratch_operands = 3 : i64, tpu.core_type = #tpu.core_type<tc>} {
    %c0 = arith.constant 0 : index
    %c0_0 = arith.constant 0 : index
    %0 = vector.load %arg0[%c0, %c0_0] : memref<8x3xf32, #tpu.memory_space<vmem>>, vector<8x3xf32>
    %1 = arith.truncf %0 : vector<8x3xf32> to vector<8x3xbf16>
    %c0_1 = arith.constant 0 : index
    %c0_2 = arith.constant 0 : index
    %2 = vector.load %arg3[%c0_1, %c0_2] : memref<3x64xbf16, #tpu.memory_space<vmem>>, vector<3x64xbf16>
    %cst = arith.constant dense<0.000000e+00> : vector<8x64xf32>
    %3 = tpu.matmul %1, %2, %cst {dimension_numbers = #tpu.dot_dimension_numbers<[1], [0], [0], [1], [0, 0, 1, 1], [], []>} : vector<8x3xbf16>, vector<3x64xbf16>, vector<8x64xf32> -> vector<8x64xf32>
    %cst_3 = arith.constant dense<0.000000e+00> : vector<64xf32>
    %4 = vector.multi_reduction <add>, %3, %cst_3 [0] : vector<8x64xf32> to vector<64xf32>
    %5 = vector.shape_cast %4 : vector<64xf32> to vector<1x64xf32>
    %cst_4 = arith.constant 1.250000e-01 : f32
    %6 = vector.broadcast %cst_4 : f32 to vector<1x64xf32>
    %7 = arith.mulf %5, %6 : vector<1x64xf32>
    %8 = arith.mulf %3, %3 : vector<8x64xf32>
    %cst_5 = arith.constant dense<0.000000e+00> : vector<64xf32>
    %9 = vector.multi_reduction <add>, %8, %cst_5 [0] : vector<8x64xf32> to vector<64xf32>
    %10 = vector.shape_cast %9 : vector<64xf32> to vector<1x64xf32>
    %cst_6 = arith.constant 1.250000e-01 : f32
    %11 = vector.broadcast %cst_6 : f32 to vector<1x64xf32>
    %12 = arith.mulf %10, %11 : vector<1x64xf32>
    %13 = arith.mulf %7, %7 : vector<1x64xf32>
    %14 = arith.subf %12, %13 : vector<1x64xf32>
    %cst_7 = arith.constant 0.000000e+00 : f32
    %15 = vector.broadcast %cst_7 : f32 to vector<1x64xf32>
    %16 = arith.maximumf %14, %15 : vector<1x64xf32>
    %17 = vector.broadcast %7 : vector<1x64xf32> to vector<8x64xf32>
    %18 = arith.subf %3, %17 : vector<8x64xf32>
    %cst_8 = arith.constant 9.99999974E-6 : f32
    %19 = vector.broadcast %cst_8 : f32 to vector<1x64xf32>
    %20 = arith.addf %16, %19 : vector<1x64xf32>
    %21 = math.rsqrt %20 : vector<1x64xf32>
    %22 = vector.broadcast %21 : vector<1x64xf32> to vector<8x64xf32>
    %23 = arith.mulf %18, %22 : vector<8x64xf32>
    %cst_9 = arith.constant 0.000000e+00 : f32
    %24 = vector.broadcast %cst_9 : f32 to vector<8x64xf32>
    %25 = arith.maximumf %23, %24 : vector<8x64xf32>
    %cst_10 = arith.constant 0.000000e+00 : f32
    %26 = vector.broadcast %cst_10 : f32 to vector<8x256xf32>
    %c0_11 = arith.constant 0 : index
    %c0_12 = arith.constant 0 : index
    %27 = vector.load %arg51[%c0_11, %c0_12] : memref<80x256xf32, #tpu.memory_space<vmem>>, vector<8x256xf32>
    tpu.vector_store %arg51[%c0_11, %c0_12], %26 {strides = array<i32>} : memref<80x256xf32, #tpu.memory_space<vmem>>, vector<8x256xf32>,
    %c72 = arith.constant 72 : index
    %c0_13 = arith.constant 0 : index
    %28 = vector.load %arg51[%c72, %c0_13] : memref<80x256xf32, #tpu.memory_space<vmem>>, vector<8x256xf32>
    tpu.vector_store %arg51[%c72, %c0_13], %26 {strides = array<i32>} : memref<80x256xf32, #tpu.memory_space<vmem>>, vector<8x256xf32>,
    %cst_14 = arith.constant 0.000000e+00 : f32
    %29 = vector.broadcast %cst_14 : f32 to vector<8x256xf32>
    %c0_15 = arith.constant 0 : index
    %c0_16 = arith.constant 0 : index
    %30 = vector.load %arg52[%c0_15, %c0_16] : memref<80x256xf32, #tpu.memory_space<vmem>>, vector<8x256xf32>
    tpu.vector_store %arg52[%c0_15, %c0_16], %29 {strides = array<i32>} : memref<80x256xf32, #tpu.memory_space<vmem>>, vector<8x256xf32>,
    %c72_17 = arith.constant 72 : index
    %c0_18 = arith.constant 0 : index
    %31 = vector.load %arg52[%c72_17, %c0_18] : memref<80x256xf32, #tpu.memory_space<vmem>>, vector<8x256xf32>
    tpu.vector_store %arg52[%c72_17, %c0_18], %29 {strides = array<i32>} : memref<80x256xf32, #tpu.memory_space<vmem>>, vector<8x256xf32>,
    %cst_19 = arith.constant 0.000000e+00 : f32
    %32 = vector.broadcast %cst_19 : f32 to vector<8x128xf32>
    %c0_20 = arith.constant 0 : index
    %c0_21 = arith.constant 0 : index
    %33 = vector.load %arg53[%c0_20, %c0_21] : memref<48x128xf32, #tpu.memory_space<vmem>>, vector<8x128xf32>
    tpu.vector_store %arg53[%c0_20, %c0_21], %32 {strides = array<i32>} : memref<48x128xf32, #tpu.memory_space<vmem>>, vector<8x128xf32>,
    %c40 = arith.constant 40 : index
    %c0_22 = arith.constant 0 : index
    %34 = vector.load %arg53[%c40, %c0_22] : memref<48x128xf32, #tpu.memory_space<vmem>>, vector<8x128xf32>
    tpu.vector_store %arg53[%c40, %c0_22], %32 {strides = array<i32>} : memref<48x128xf32, #tpu.memory_space<vmem>>, vector<8x128xf32>,
    %c0_23 = arith.constant 0 : index
    %c0_24 = arith.constant 0 : index
    %35 = vector.load %arg2[%c0_23, %c0_24] : memref<144x144xf32, #tpu.memory_space<vmem>>, vector<8x144xf32>
    %c16 = arith.constant 16 : index
    %c0_25 = arith.constant 0 : index
    %36 = vector.load %arg2[%c16, %c0_25] : memref<144x144xf32, #tpu.memory_space<vmem>>, vector<8x144xf32>
    %c32 = arith.constant 32 : index
    %c0_26 = arith.constant 0 : index
    %37 = vector.load %arg2[%c32, %c0_26] : memref<144x144xf32, #tpu.memory_space<vmem>>, vector<8x144xf32>
    %c48 = arith.constant 48 : index
    %c0_27 = arith.constant 0 : index
    %38 = vector.load %arg2[%c48, %c0_27] : memref<144x144xf32, #tpu.memory_space<vmem>>, vector<8x144xf32>
    %c64 = arith.constant 64 : index
    %c0_28 = arith.constant 0 : index
    %39 = vector.load %arg2[%c64, %c0_28] : memref<144x144xf32, #tpu.memory_space<vmem>>, vector<8x144xf32>
    %c80 = arith.constant 80 : index
    %c0_29 = arith.constant 0 : index
    %40 = vector.load %arg2[%c80, %c0_29] : memref<144x144xf32, #tpu.memory_space<vmem>>, vector<8x144xf32>
    %c96 = arith.constant 96 : index
    %c0_30 = arith.constant 0 : index
    %41 = vector.load %arg2[%c96, %c0_30] : memref<144x144xf32, #tpu.memory_space<vmem>>, vector<8x144xf32>
    %c112 = arith.constant 112 : index
    %c0_31 = arith.constant 0 : index
    %42 = vector.load %arg2[%c112, %c0_31] : memref<144x144xf32, #tpu.memory_space<vmem>>, vector<8x144xf32>
    %43 = tpu.concatenate %35, %36, %37, %38, %39, %40, %41, %42 in 0 : vector<8x144xf32>, vector<8x144xf32>, vector<8x144xf32>, vector<8x144xf32>, vector<8x144xf32>, vector<8x144xf32>, vector<8x144xf32>, vector<8x144xf32> -> vector<64x144xf32>
    %44 = arith.truncf %43 : vector<64x144xf32> to vector<64x144xbf16>
    %c0_32 = arith.constant 0 : index
    %c0_33 = arith.constant 0 : index
    %45 = vector.load %arg4[%c0_32, %c0_33] : memref<144x256xbf16, #tpu.memory_space<vmem>>, vector<144x256xbf16>
    %cst_34 = arith.constant dense<0.000000e+00> : vector<64x256xf32>
    %46 = tpu.matmul %44, %45, %cst_34 {dimension_numbers = #tpu.dot_dimension_numbers<[1], [0], [0], [1], [0, 0, 1, 1], [], []>} : vector<64x144xbf16>, vector<144x256xbf16>, vector<64x256xf32> -> vector<64x256xf32>
    %c8 = arith.constant 8 : index
    %c0_35 = arith.constant 0 : index
    %47 = vector.load %arg2[%c8, %c0_35] : memref<144x144xf32, #tpu.memory_space<vmem>>, vector<8x144xf32>
    %c24 = arith.constant 24 : index
    %c0_36 = arith.constant 0 : index
    %48 = vector.load %arg2[%c24, %c0_36] : memref<144x144xf32, #tpu.memory_space<vmem>>, vector<8x144xf32>
    %c40_37 = arith.constant 40 : index
    %c0_38 = arith.constant 0 : index
    %49 = vector.load %arg2[%c40_37, %c0_38] : memref<144x144xf32, #tpu.memory_space<vmem>>, vector<8x144xf32>
    %c56 = arith.constant 56 : index
    %c0_39 = arith.constant 0 : index
    %50 = vector.load %arg2[%c56, %c0_39] : memref<144x144xf32, #tpu.memory_space<vmem>>, vector<8x144xf32>
    %c72_40 = arith.constant 72 : index
    %c0_41 = arith.constant 0 : index
    %51 = vector.load %arg2[%c72_40, %c0_41] : memref<144x144xf32, #tpu.memory_space<vmem>>, vector<8x144xf32>
    %c88 = arith.constant 88 : index
    %c0_42 = arith.constant 0 : index
    %52 = vector.load %arg2[%c88, %c0_42] : memref<144x144xf32, #tpu.memory_space<vmem>>, vector<8x144xf32>
    %c104 = arith.constant 104 : index
    %c0_43 = arith.constant 0 : index
    %53 = vector.load %arg2[%c104, %c0_43] : memref<144x144xf32, #tpu.memory_space<vmem>>, vector<8x144xf32>
    %c120 = arith.constant 120 : index
    %c0_44 = arith.constant 0 : index
    %54 = vector.load %arg2[%c120, %c0_44] : memref<144x144xf32, #tpu.memory_space<vmem>>, vector<8x144xf32>
    %55 = tpu.concatenate %47, %48, %49, %50, %51, %52, %53, %54 in 0 : vector<8x144xf32>, vector<8x144xf32>, vector<8x144xf32>, vector<8x144xf32>, vector<8x144xf32>, vector<8x144xf32>, vector<8x144xf32>, vector<8x144xf32> -> vector<64x144xf32>
    %56 = arith.truncf %55 : vector<64x144xf32> to vector<64x144xbf16>
    %c0_45 = arith.constant 0 : index
    %c0_46 = arith.constant 0 : index
    %57 = vector.load %arg5[%c0_45, %c0_46] : memref<144x256xbf16, #tpu.memory_space<vmem>>, vector<144x256xbf16>
    %cst_47 = arith.constant dense<0.000000e+00> : vector<64x256xf32>
    %58 = tpu.matmul %56, %57, %cst_47 {dimension_numbers = #tpu.dot_dimension_numbers<[1], [0], [0], [1], [0, 0, 1, 1], [], []>} : vector<64x144xbf16>, vector<144x256xbf16>, vector<64x256xf32> -> vector<64x256xf32>
    %59 = arith.addf %46, %58 : vector<64x256xf32>
    %c16_48 = arith.constant 16 : index
    %c0_49 = arith.constant 0 : index
    %60 = vector.load %arg2[%c16_48, %c0_49] : memref<144x144xf32, #tpu.memory_space<vmem>>, vector<8x144xf32>
    %c32_50 = arith.constant 32 : index
    %c0_51 = arith.constant 0 : index
    %61 = vector.load %arg2[%c32_50, %c0_51] : memref<144x144xf32, #tpu.memory_space<vmem>>, vector<8x144xf32>
    %c48_52 = arith.constant 48 : index
    %c0_53 = arith.constant 0 : index
    %62 = vector.load %arg2[%c48_52, %c0_53] : memref<144x144xf32, #tpu.memory_space<vmem>>, vector<8x144xf32>
    %c64_54 = arith.constant 64 : index
    %c0_55 = arith.constant 0 : index
    %63 = vector.load %arg2[%c64_54, %c0_55] : memref<144x144xf32, #tpu.memory_space<vmem>>, vector<8x144xf32>
    %c80_56 = arith.constant 80 : index
    %c0_57 = arith.constant 0 : index
    %64 = vector.load %arg2[%c80_56, %c0_57] : memref<144x144xf32, #tpu.memory_space<vmem>>, vector<8x144xf32>
    %c96_58 = arith.constant 96 : index
    %c0_59 = arith.constant 0 : index
    %65 = vector.load %arg2[%c96_58, %c0_59] : memref<144x144xf32, #tpu.memory_space<vmem>>, vector<8x144xf32>
    %c112_60 = arith.constant 112 : index
    %c0_61 = arith.constant 0 : index
    %66 = vector.load %arg2[%c112_60, %c0_61] : memref<144x144xf32, #tpu.memory_space<vmem>>, vector<8x144xf32>
    %c128 = arith.constant 128 : index
    %c0_62 = arith.constant 0 : index
    %67 = vector.load %arg2[%c128, %c0_62] : memref<144x144xf32, #tpu.memory_space<vmem>>, vector<8x144xf32>
    %68 = tpu.concatenate %60, %61, %62, %63, %64, %65, %66, %67 in 0 : vector<8x144xf32>, vector<8x144xf32>, vector<8x144xf32>, vector<8x144xf32>, vector<8x144xf32>, vector<8x144xf32>, vector<8x144xf32>, vector<8x144xf32> -> vector<64x144xf32>
    %69 = arith.truncf %68 : vector<64x144xf32> to vector<64x144xbf16>
    %c0_63 = arith.constant 0 : index
    %c0_64 = arith.constant 0 : index
    %70 = vector.load %arg6[%c0_63, %c0_64] : memref<144x256xbf16, #tpu.memory_space<vmem>>, vector<144x256xbf16>
    %cst_65 = arith.constant dense<0.000000e+00> : vector<64x256xf32>
    %71 = tpu.matmul %69, %70, %cst_65 {dimension_numbers = #tpu.dot_dimension_numbers<[1], [0], [0], [1], [0, 0, 1, 1], [], []>} : vector<64x144xbf16>, vector<144x256xbf16>, vector<64x256xf32> -> vector<64x256xf32>
    %72 = arith.addf %59, %71 : vector<64x256xf32>
    %cst_66 = arith.constant dense<0.000000e+00> : vector<256xf32>
    %73 = vector.multi_reduction <add>, %72, %cst_66 [0] : vector<64x256xf32> to vector<256xf32>
    %74 = vector.shape_cast %73 : vector<256xf32> to vector<1x256xf32>
    %75 = arith.mulf %72, %72 : vector<64x256xf32>
    %cst_67 = arith.constant dense<0.000000e+00> : vector<256xf32>
    %76 = vector.multi_reduction <add>, %75, %cst_67 [0] : vector<64x256xf32> to vector<256xf32>
    %77 = vector.shape_cast %76 : vector<256xf32> to vector<1x256xf32>
    %c0_68 = arith.constant 0 : index
    %c0_69 = arith.constant 0 : index
    %78 = vector.load %arg16[%c0_68, %c0_69] : memref<256x32xf32, #tpu.memory_space<vmem>>, vector<256x32xf32>
    %c0_70 = arith.constant 0 : index
    %c0_71 = arith.constant 0 : index
    %79 = vector.load %arg20[%c0_70, %c0_71] : memref<32x256xf32, #tpu.memory_space<vmem>>, vector<32x256xf32>
    %cst_72 = arith.constant dense<0.000000e+00> : vector<1x32xf32>
    %80 = tpu.matmul %74, %78, %cst_72 {dimension_numbers = #tpu.dot_dimension_numbers<[1], [0], [0], [1], [0, 0, 1, 1], [], []>} : vector<1x256xf32>, vector<256x32xf32>, vector<1x32xf32> -> vector<1x32xf32>
    %cst_73 = arith.constant 0.001953125 : f32
    %81 = vector.broadcast %cst_73 : f32 to vector<1x32xf32>
    %82 = arith.mulf %80, %81 : vector<1x32xf32>
    %cst_74 = arith.constant dense<0.000000e+00> : vector<1x32xf32>
    %83 = tpu.matmul %77, %78, %cst_74 {dimension_numbers = #tpu.dot_dimension_numbers<[1], [0], [0], [1], [0, 0, 1, 1], [], []>} : vector<1x256xf32>, vector<256x32xf32>, vector<1x32xf32> -> vector<1x32xf32>
    %cst_75 = arith.constant 0.001953125 : f32
    %84 = vector.broadcast %cst_75 : f32 to vector<1x32xf32>
    %85 = arith.mulf %83, %84 : vector<1x32xf32>
    %86 = arith.mulf %82, %82 : vector<1x32xf32>
    %87 = arith.subf %85, %86 : vector<1x32xf32>
    %cst_76 = arith.constant 0.000000e+00 : f32
    %88 = vector.broadcast %cst_76 : f32 to vector<1x32xf32>
    %89 = arith.maximumf %87, %88 : vector<1x32xf32>
    %cst_77 = arith.constant 9.99999974E-6 : f32
    %90 = vector.broadcast %cst_77 : f32 to vector<1x32xf32>
    %91 = arith.addf %89, %90 : vector<1x32xf32>
    %92 = math.rsqrt %91 : vector<1x32xf32>
    %cst_78 = arith.constant dense<0.000000e+00> : vector<1x256xf32>
    %93 = tpu.matmul %92, %79, %cst_78 {dimension_numbers = #tpu.dot_dimension_numbers<[1], [0], [0], [1], [0, 0, 1, 1], [], []>} : vector<1x32xf32>, vector<32x256xf32>, vector<1x256xf32> -> vector<1x256xf32>
    %cst_79 = arith.constant 0.000000e+00 : f32
    %94 = vector.broadcast %cst_79 : f32 to vector<1x32xf32>
    %95 = arith.subf %94, %82 : vector<1x32xf32>
    %96 = arith.mulf %95, %92 : vector<1x32xf32>
    %cst_80 = arith.constant dense<0.000000e+00> : vector<1x256xf32>
    %97 = tpu.matmul %96, %79, %cst_80 {dimension_numbers = #tpu.dot_dimension_numbers<[1], [0], [0], [1], [0, 0, 1, 1], [], []>} : vector<1x32xf32>, vector<32x256xf32>, vector<1x256xf32> -> vector<1x256xf32>
    %98 = vector.broadcast %93 : vector<1x256xf32> to vector<64x256xf32>
    %99 = arith.mulf %72, %98 : vector<64x256xf32>
    %100 = vector.broadcast %97 : vector<1x256xf32> to vector<64x256xf32>
    %101 = arith.addf %99, %100 : vector<64x256xf32>
    %cst_81 = arith.constant 0.000000e+00 : f32
    %102 = vector.broadcast %cst_81 : f32 to vector<64x256xf32>
    %103 = arith.maximumf %101, %102 : vector<64x256xf32>
    %c8_82 = arith.constant 8 : index
    %c0_83 = arith.constant 0 : index
    %104 = vector.load %arg51[%c8_82, %c0_83] : memref<80x256xf32, #tpu.memory_space<vmem>>, vector<64x256xf32>
    tpu.vector_store %arg51[%c8_82, %c0_83], %103 {strides = array<i32>} : memref<80x256xf32, #tpu.memory_space<vmem>>, vector<64x256xf32>,
    %c0_84 = arith.constant 0 : index
    %c0_85 = arith.constant 0 : index
    %105 = vector.load %arg51[%c0_84, %c0_85] : memref<80x256xf32, #tpu.memory_space<vmem>>, vector<64x256xf32>
    %106 = arith.truncf %105 : vector<64x256xf32> to vector<64x256xbf16>
    %c0_86 = arith.constant 0 : index
    %c0_87 = arith.constant 0 : index
    %107 = vector.load %arg7[%c0_86, %c0_87] : memref<256x256xbf16, #tpu.memory_space<vmem>>, vector<256x256xbf16>
    %cst_88 = arith.constant dense<0.000000e+00> : vector<64x256xf32>
    %108 = tpu.matmul %106, %107, %cst_88 {dimension_numbers = #tpu.dot_dimension_numbers<[1], [0], [0], [1], [0, 0, 1, 1], [], []>} : vector<64x256xbf16>, vector<256x256xbf16>, vector<64x256xf32> -> vector<64x256xf32>
    %c8_89 = arith.constant 8 : index
    %c0_90 = arith.constant 0 : index
    %109 = vector.load %arg51[%c8_89, %c0_90] : memref<80x256xf32, #tpu.memory_space<vmem>>, vector<64x256xf32>
    %110 = arith.truncf %109 : vector<64x256xf32> to vector<64x256xbf16>
    %c0_91 = arith.constant 0 : index
    %c0_92 = arith.constant 0 : index
    %111 = vector.load %arg8[%c0_91, %c0_92] : memref<256x256xbf16, #tpu.memory_space<vmem>>, vector<256x256xbf16>
    %cst_93 = arith.constant dense<0.000000e+00> : vector<64x256xf32>
    %112 = tpu.matmul %110, %111, %cst_93 {dimension_numbers = #tpu.dot_dimension_numbers<[1], [0], [0], [1], [0, 0, 1, 1], [], []>} : vector<64x256xbf16>, vector<256x256xbf16>, vector<64x256xf32> -> vector<64x256xf32>
    %113 = arith.addf %108, %112 : vector<64x256xf32>
    %c16_94 = arith.constant 16 : index
    %c0_95 = arith.constant 0 : index
    %114 = vector.load %arg51[%c16_94, %c0_95] : memref<80x256xf32, #tpu.memory_space<vmem>>, vector<64x256xf32>
    %115 = arith.truncf %114 : vector<64x256xf32> to vector<64x256xbf16>
    %c0_96 = arith.constant 0 : index
    %c0_97 = arith.constant 0 : index
    %116 = vector.load %arg9[%c0_96, %c0_97] : memref<256x256xbf16, #tpu.memory_space<vmem>>, vector<256x256xbf16>
    %cst_98 = arith.constant dense<0.000000e+00> : vector<64x256xf32>
    %117 = tpu.matmul %115, %116, %cst_98 {dimension_numbers = #tpu.dot_dimension_numbers<[1], [0], [0], [1], [0, 0, 1, 1], [], []>} : vector<64x256xbf16>, vector<256x256xbf16>, vector<64x256xf32> -> vector<64x256xf32>
    %118 = arith.addf %113, %117 : vector<64x256xf32>
    %cst_99 = arith.constant dense<0.000000e+00> : vector<256xf32>
    %119 = vector.multi_reduction <add>, %118, %cst_99 [0] : vector<64x256xf32> to vector<256xf32>
    %120 = vector.shape_cast %119 : vector<256xf32> to vector<1x256xf32>
    %121 = arith.mulf %118, %118 : vector<64x256xf32>
    %cst_100 = arith.constant dense<0.000000e+00> : vector<256xf32>
    %122 = vector.multi_reduction <add>, %121, %cst_100 [0] : vector<64x256xf32> to vector<256xf32>
    %123 = vector.shape_cast %122 : vector<256xf32> to vector<1x256xf32>
    %c0_101 = arith.constant 0 : index
    %c0_102 = arith.constant 0 : index
    %124 = vector.load %arg17[%c0_101, %c0_102] : memref<256x32xf32, #tpu.memory_space<vmem>>, vector<256x32xf32>
    %c0_103 = arith.constant 0 : index
    %c0_104 = arith.constant 0 : index
    %125 = vector.load %arg21[%c0_103, %c0_104] : memref<32x256xf32, #tpu.memory_space<vmem>>, vector<32x256xf32>
    %cst_105 = arith.constant dense<0.000000e+00> : vector<1x32xf32>
    %126 = tpu.matmul %120, %124, %cst_105 {dimension_numbers = #tpu.dot_dimension_numbers<[1], [0], [0], [1], [0, 0, 1, 1], [], []>} : vector<1x256xf32>, vector<256x32xf32>, vector<1x32xf32> -> vector<1x32xf32>
    %cst_106 = arith.constant 0.001953125 : f32
    %127 = vector.broadcast %cst_106 : f32 to vector<1x32xf32>
    %128 = arith.mulf %126, %127 : vector<1x32xf32>
    %cst_107 = arith.constant dense<0.000000e+00> : vector<1x32xf32>
    %129 = tpu.matmul %123, %124, %cst_107 {dimension_numbers = #tpu.dot_dimension_numbers<[1], [0], [0], [1], [0, 0, 1, 1], [], []>} : vector<1x256xf32>, vector<256x32xf32>, vector<1x32xf32> -> vector<1x32xf32>
    %cst_108 = arith.constant 0.001953125 : f32
    %130 = vector.broadcast %cst_108 : f32 to vector<1x32xf32>
    %131 = arith.mulf %129, %130 : vector<1x32xf32>
    %132 = arith.mulf %128, %128 : vector<1x32xf32>
    %133 = arith.subf %131, %132 : vector<1x32xf32>
    %cst_109 = arith.constant 0.000000e+00 : f32
    %134 = vector.broadcast %cst_109 : f32 to vector<1x32xf32>
    %135 = arith.maximumf %133, %134 : vector<1x32xf32>
    %cst_110 = arith.constant 9.99999974E-6 : f32
    %136 = vector.broadcast %cst_110 : f32 to vector<1x32xf32>
    %137 = arith.addf %135, %136 : vector<1x32xf32>
    %138 = math.rsqrt %137 : vector<1x32xf32>
    %cst_111 = arith.constant dense<0.000000e+00> : vector<1x256xf32>
    %139 = tpu.matmul %138, %125, %cst_111 {dimension_numbers = #tpu.dot_dimension_numbers<[1], [0], [0], [1], [0, 0, 1, 1], [], []>} : vector<1x32xf32>, vector<32x256xf32>, vector<1x256xf32> -> vector<1x256xf32>
    %cst_112 = arith.constant 0.000000e+00 : f32
    %140 = vector.broadcast %cst_112 : f32 to vector<1x32xf32>
    %141 = arith.subf %140, %128 : vector<1x32xf32>
    %142 = arith.mulf %141, %138 : vector<1x32xf32>
    %cst_113 = arith.constant dense<0.000000e+00> : vector<1x256xf32>
    %143 = tpu.matmul %142, %125, %cst_113 {dimension_numbers = #tpu.dot_dimension_numbers<[1], [0], [0], [1], [0, 0, 1, 1], [], []>} : vector<1x32xf32>, vector<32x256xf32>, vector<1x256xf32> -> vector<1x256xf32>
    %144 = vector.broadcast %139 : vector<1x256xf32> to vector<64x256xf32>
    %145 = arith.mulf %118, %144 : vector<64x256xf32>
    %146 = vector.broadcast %143 : vector<1x256xf32> to vector<64x256xf32>
    %147 = arith.addf %145, %146 : vector<64x256xf32>
    %cst_114 = arith.constant 0.000000e+00 : f32
    %148 = vector.broadcast %cst_114 : f32 to vector<64x256xf32>
    %149 = arith.maximumf %147, %148 : vector<64x256xf32>
    %c8_115 = arith.constant 8 : index
    %c0_116 = arith.constant 0 : index
    %150 = vector.load %arg52[%c8_115, %c0_116] : memref<80x256xf32, #tpu.memory_space<vmem>>, vector<64x256xf32>
    tpu.vector_store %arg52[%c8_115, %c0_116], %149 {strides = array<i32>} : memref<80x256xf32, #tpu.memory_space<vmem>>, vector<64x256xf32>,
    %c0_117 = arith.constant 0 : index
    %c0_118 = arith.constant 0 : index
    %151 = vector.load %arg52[%c0_117, %c0_118] : memref<80x256xf32, #tpu.memory_space<vmem>>, vector<8x256xf32>
    %c16_119 = arith.constant 16 : index
    %c0_120 = arith.constant 0 : index
    %152 = vector.load %arg52[%c16_119, %c0_120] : memref<80x256xf32, #tpu.memory_space<vmem>>, vector<8x256xf32>
    %c32_121 = arith.constant 32 : index
    %c0_122 = arith.constant 0 : index
    %153 = vector.load %arg52[%c32_121, %c0_122] : memref<80x256xf32, #tpu.memory_space<vmem>>, vector<8x256xf32>
    %c48_123 = arith.constant 48 : index
    %c0_124 = arith.constant 0 : index
    %154 = vector.load %arg52[%c48_123, %c0_124] : memref<80x256xf32, #tpu.memory_space<vmem>>, vector<8x256xf32>
    %155 = tpu.concatenate %151, %152, %153, %154 in 0 : vector<8x256xf32>, vector<8x256xf32>, vector<8x256xf32>, vector<8x256xf32> -> vector<32x256xf32>
    %156 = arith.truncf %155 : vector<32x256xf32> to vector<32x256xbf16>
    %c0_125 = arith.constant 0 : index
    %c0_126 = arith.constant 0 : index
    %157 = vector.load %arg10[%c0_125, %c0_126] : memref<256x128xbf16, #tpu.memory_space<vmem>>, vector<256x128xbf16>
    %cst_127 = arith.constant dense<0.000000e+00> : vector<32x128xf32>
    %158 = tpu.matmul %156, %157, %cst_127 {dimension_numbers = #tpu.dot_dimension_numbers<[1], [0], [0], [1], [0, 0, 1, 1], [], []>} : vector<32x256xbf16>, vector<256x128xbf16>, vector<32x128xf32> -> vector<32x128xf32>
    %c8_128 = arith.constant 8 : index
    %c0_129 = arith.constant 0 : index
    %159 = vector.load %arg52[%c8_128, %c0_129] : memref<80x256xf32, #tpu.memory_space<vmem>>, vector<8x256xf32>
    %c24_130 = arith.constant 24 : index
    %c0_131 = arith.constant 0 : index
    %160 = vector.load %arg52[%c24_130, %c0_131] : memref<80x256xf32, #tpu.memory_space<vmem>>, vector<8x256xf32>
    %c40_132 = arith.constant 40 : index
    %c0_133 = arith.constant 0 : index
    %161 = vector.load %arg52[%c40_132, %c0_133] : memref<80x256xf32, #tpu.memory_space<vmem>>, vector<8x256xf32>
    %c56_134 = arith.constant 56 : index
    %c0_135 = arith.constant 0 : index
    %162 = vector.load %arg52[%c56_134, %c0_135] : memref<80x256xf32, #tpu.memory_space<vmem>>, vector<8x256xf32>
    %163 = tpu.concatenate %159, %160, %161, %162 in 0 : vector<8x256xf32>, vector<8x256xf32>, vector<8x256xf32>, vector<8x256xf32> -> vector<32x256xf32>
    %164 = arith.truncf %163 : vector<32x256xf32> to vector<32x256xbf16>
    %c0_136 = arith.constant 0 : index
    %c0_137 = arith.constant 0 : index
    %165 = vector.load %arg11[%c0_136, %c0_137] : memref<256x128xbf16, #tpu.memory_space<vmem>>, vector<256x128xbf16>
    %cst_138 = arith.constant dense<0.000000e+00> : vector<32x128xf32>
    %166 = tpu.matmul %164, %165, %cst_138 {dimension_numbers = #tpu.dot_dimension_numbers<[1], [0], [0], [1], [0, 0, 1, 1], [], []>} : vector<32x256xbf16>, vector<256x128xbf16>, vector<32x128xf32> -> vector<32x128xf32>
    %167 = arith.addf %158, %166 : vector<32x128xf32>
    %c16_139 = arith.constant 16 : index
    %c0_140 = arith.constant 0 : index
    %168 = vector.load %arg52[%c16_139, %c0_140] : memref<80x256xf32, #tpu.memory_space<vmem>>, vector<8x256xf32>
    %c32_141 = arith.constant 32 : index
    %c0_142 = arith.constant 0 : index
    %169 = vector.load %arg52[%c32_141, %c0_142] : memref<80x256xf32, #tpu.memory_space<vmem>>, vector<8x256xf32>
    %c48_143 = arith.constant 48 : index
    %c0_144 = arith.constant 0 : index
    %170 = vector.load %arg52[%c48_143, %c0_144] : memref<80x256xf32, #tpu.memory_space<vmem>>, vector<8x256xf32>
    %c64_145 = arith.constant 64 : index
    %c0_146 = arith.constant 0 : index
    %171 = vector.load %arg52[%c64_145, %c0_146] : memref<80x256xf32, #tpu.memory_space<vmem>>, vector<8x256xf32>
    %172 = tpu.concatenate %168, %169, %170, %171 in 0 : vector<8x256xf32>, vector<8x256xf32>, vector<8x256xf32>, vector<8x256xf32> -> vector<32x256xf32>
    %173 = arith.truncf %172 : vector<32x256xf32> to vector<32x256xbf16>
    %c0_147 = arith.constant 0 : index
    %c0_148 = arith.constant 0 : index
    %174 = vector.load %arg12[%c0_147, %c0_148] : memref<256x128xbf16, #tpu.memory_space<vmem>>, vector<256x128xbf16>
    %cst_149 = arith.constant dense<0.000000e+00> : vector<32x128xf32>
    %175 = tpu.matmul %173, %174, %cst_149 {dimension_numbers = #tpu.dot_dimension_numbers<[1], [0], [0], [1], [0, 0, 1, 1], [], []>} : vector<32x256xbf16>, vector<256x128xbf16>, vector<32x128xf32> -> vector<32x128xf32>
    %176 = arith.addf %167, %175 : vector<32x128xf32>
    %cst_150 = arith.constant dense<0.000000e+00> : vector<128xf32>
    %177 = vector.multi_reduction <add>, %176, %cst_150 [0] : vector<32x128xf32> to vector<128xf32>
    %178 = vector.shape_cast %177 : vector<128xf32> to vector<1x128xf32>
    %179 = arith.mulf %176, %176 : vector<32x128xf32>
    %cst_151 = arith.constant dense<0.000000e+00> : vector<128xf32>
    %180 = vector.multi_reduction <add>, %179, %cst_151 [0] : vector<32x128xf32> to vector<128xf32>
    %181 = vector.shape_cast %180 : vector<128xf32> to vector<1x128xf32>
    %c0_152 = arith.constant 0 : index
    %c0_153 = arith.constant 0 : index
    %182 = vector.load %arg18[%c0_152, %c0_153] : memref<128x32xf32, #tpu.memory_space<vmem>>, vector<128x32xf32>
    %c0_154 = arith.constant 0 : index
    %c0_155 = arith.constant 0 : index
    %183 = vector.load %arg22[%c0_154, %c0_155] : memref<32x128xf32, #tpu.memory_space<vmem>>, vector<32x128xf32>
    %cst_156 = arith.constant dense<0.000000e+00> : vector<1x32xf32>
    %184 = tpu.matmul %178, %182, %cst_156 {dimension_numbers = #tpu.dot_dimension_numbers<[1], [0], [0], [1], [0, 0, 1, 1], [], []>} : vector<1x128xf32>, vector<128x32xf32>, vector<1x32xf32> -> vector<1x32xf32>
    %cst_157 = arith.constant 7.812500e-03 : f32
    %185 = vector.broadcast %cst_157 : f32 to vector<1x32xf32>
    %186 = arith.mulf %184, %185 : vector<1x32xf32>
    %cst_158 = arith.constant dense<0.000000e+00> : vector<1x32xf32>
    %187 = tpu.matmul %181, %182, %cst_158 {dimension_numbers = #tpu.dot_dimension_numbers<[1], [0], [0], [1], [0, 0, 1, 1], [], []>} : vector<1x128xf32>, vector<128x32xf32>, vector<1x32xf32> -> vector<1x32xf32>
    %cst_159 = arith.constant 7.812500e-03 : f32
    %188 = vector.broadcast %cst_159 : f32 to vector<1x32xf32>
    %189 = arith.mulf %187, %188 : vector<1x32xf32>
    %190 = arith.mulf %186, %186 : vector<1x32xf32>
    %191 = arith.subf %189, %190 : vector<1x32xf32>
    %cst_160 = arith.constant 0.000000e+00 : f32
    %192 = vector.broadcast %cst_160 : f32 to vector<1x32xf32>
    %193 = arith.maximumf %191, %192 : vector<1x32xf32>
    %cst_161 = arith.constant 9.99999974E-6 : f32
    %194 = vector.broadcast %cst_161 : f32 to vector<1x32xf32>
    %195 = arith.addf %193, %194 : vector<1x32xf32>
    %196 = math.rsqrt %195 : vector<1x32xf32>
    %cst_162 = arith.constant dense<0.000000e+00> : vector<1x128xf32>
    %197 = tpu.matmul %196, %183, %cst_162 {dimension_numbers = #tpu.dot_dimension_numbers<[1], [0], [0], [1], [0, 0, 1, 1], [], []>} : vector<1x32xf32>, vector<32x128xf32>, vector<1x128xf32> -> vector<1x128xf32>
    %cst_163 = arith.constant 0.000000e+00 : f32
    %198 = vector.broadcast %cst_163 : f32 to vector<1x32xf32>
    %199 = arith.subf %198, %186 : vector<1x32xf32>
    %200 = arith.mulf %199, %196 : vector<1x32xf32>
    %cst_164 = arith.constant dense<0.000000e+00> : vector<1x128xf32>
    %201 = tpu.matmul %200, %183, %cst_164 {dimension_numbers = #tpu.dot_dimension_numbers<[1], [0], [0], [1], [0, 0, 1, 1], [], []>} : vector<1x32xf32>, vector<32x128xf32>, vector<1x128xf32> -> vector<1x128xf32>
    %202 = vector.broadcast %197 : vector<1x128xf32> to vector<32x128xf32>
    %203 = arith.mulf %176, %202 : vector<32x128xf32>
    %204 = vector.broadcast %201 : vector<1x128xf32> to vector<32x128xf32>
    %205 = arith.addf %203, %204 : vector<32x128xf32>
    %cst_165 = arith.constant 0.000000e+00 : f32
    %206 = vector.broadcast %cst_165 : f32 to vector<32x128xf32>
    %207 = arith.maximumf %205, %206 : vector<32x128xf32>
    %c8_166 = arith.constant 8 : index
    %c0_167 = arith.constant 0 : index
    %208 = vector.load %arg53[%c8_166, %c0_167] : memref<48x128xf32, #tpu.memory_space<vmem>>, vector<32x128xf32>
    tpu.vector_store %arg53[%c8_166, %c0_167], %207 {strides = array<i32>} : memref<48x128xf32, #tpu.memory_space<vmem>>, vector<32x128xf32>,
    %c0_168 = arith.constant 0 : index
    %c0_169 = arith.constant 0 : index
    %209 = vector.load %arg53[%c0_168, %c0_169] : memref<48x128xf32, #tpu.memory_space<vmem>>, vector<16x128xf32>
    %210 = arith.truncf %209 : vector<16x128xf32> to vector<16x128xbf16>
    %c0_170 = arith.constant 0 : index
    %c0_171 = arith.constant 0 : index
    %211 = vector.load %arg13[%c0_170, %c0_171] : memref<128x64xbf16, #tpu.memory_space<vmem>>, vector<128x64xbf16>
    %cst_172 = arith.constant dense<0.000000e+00> : vector<16x64xf32>
    %212 = tpu.matmul %210, %211, %cst_172 {dimension_numbers = #tpu.dot_dimension_numbers<[1], [0], [0], [1], [0, 0, 1, 1], [], []>} : vector<16x128xbf16>, vector<128x64xbf16>, vector<16x64xf32> -> vector<16x64xf32>
    %c16_173 = arith.constant 16 : index
    %c0_174 = arith.constant 0 : index
    %213 = vector.load %arg53[%c16_173, %c0_174] : memref<48x128xf32, #tpu.memory_space<vmem>>, vector<16x128xf32>
    %214 = arith.truncf %213 : vector<16x128xf32> to vector<16x128xbf16>
    %c0_175 = arith.constant 0 : index
    %c0_176 = arith.constant 0 : index
    %215 = vector.load %arg14[%c0_175, %c0_176] : memref<128x64xbf16, #tpu.memory_space<vmem>>, vector<128x64xbf16>
    %cst_177 = arith.constant dense<0.000000e+00> : vector<16x64xf32>
    %216 = tpu.matmul %214, %215, %cst_177 {dimension_numbers = #tpu.dot_dimension_numbers<[1], [0], [0], [1], [0, 0, 1, 1], [], []>} : vector<16x128xbf16>, vector<128x64xbf16>, vector<16x64xf32> -> vector<16x64xf32>
    %217 = arith.addf %212, %216 : vector<16x64xf32>
    %c32_178 = arith.constant 32 : index
    %c0_179 = arith.constant 0 : index
    %218 = vector.load %arg53[%c32_178, %c0_179] : memref<48x128xf32, #tpu.memory_space<vmem>>, vector<16x128xf32>
    %219 = arith.truncf %218 : vector<16x128xf32> to vector<16x128xbf16>
    %c0_180 = arith.constant 0 : index
    %c0_181 = arith.constant 0 : index
    %220 = vector.load %arg15[%c0_180, %c0_181] : memref<128x64xbf16, #tpu.memory_space<vmem>>, vector<128x64xbf16>
    %cst_182 = arith.constant dense<0.000000e+00> : vector<16x64xf32>
    %221 = tpu.matmul %219, %220, %cst_182 {dimension_numbers = #tpu.dot_dimension_numbers<[1], [0], [0], [1], [0, 0, 1, 1], [], []>} : vector<16x128xbf16>, vector<128x64xbf16>, vector<16x64xf32> -> vector<16x64xf32>
    %222 = arith.addf %217, %221 : vector<16x64xf32>
    %cst_183 = arith.constant dense<0.000000e+00> : vector<64xf32>
    %223 = vector.multi_reduction <add>, %222, %cst_183 [0] : vector<16x64xf32> to vector<64xf32>
    %224 = vector.shape_cast %223 : vector<64xf32> to vector<1x64xf32>
    %225 = arith.mulf %222, %222 : vector<16x64xf32>
    %cst_184 = arith.constant dense<0.000000e+00> : vector<64xf32>
    %226 = vector.multi_reduction <add>, %225, %cst_184 [0] : vector<16x64xf32> to vector<64xf32>
    %227 = vector.shape_cast %226 : vector<64xf32> to vector<1x64xf32>
    %c0_185 = arith.constant 0 : index
    %c0_186 = arith.constant 0 : index
    %228 = vector.load %arg19[%c0_185, %c0_186] : memref<64x32xf32, #tpu.memory_space<vmem>>, vector<64x32xf32>
    %c0_187 = arith.constant 0 : index
    %c0_188 = arith.constant 0 : index
    %229 = vector.load %arg23[%c0_187, %c0_188] : memref<32x64xf32, #tpu.memory_space<vmem>>, vector<32x64xf32>
    %cst_189 = arith.constant dense<0.000000e+00> : vector<1x32xf32>
    %230 = tpu.matmul %224, %228, %cst_189 {dimension_numbers = #tpu.dot_dimension_numbers<[1], [0], [0], [1], [0, 0, 1, 1], [], []>} : vector<1x64xf32>, vector<64x32xf32>, vector<1x32xf32> -> vector<1x32xf32>
    %cst_190 = arith.constant 3.125000e-02 : f32
    %231 = vector.broadcast %cst_190 : f32 to vector<1x32xf32>
    %232 = arith.mulf %230, %231 : vector<1x32xf32>
    %cst_191 = arith.constant dense<0.000000e+00> : vector<1x32xf32>
    %233 = tpu.matmul %227, %228, %cst_191 {dimension_numbers = #tpu.dot_dimension_numbers<[1], [0], [0], [1], [0, 0, 1, 1], [], []>} : vector<1x64xf32>, vector<64x32xf32>, vector<1x32xf32> -> vector<1x32xf32>
    %cst_192 = arith.constant 3.125000e-02 : f32
    %234 = vector.broadcast %cst_192 : f32 to vector<1x32xf32>
    %235 = arith.mulf %233, %234 : vector<1x32xf32>
    %236 = arith.mulf %232, %232 : vector<1x32xf32>
    %237 = arith.subf %235, %236 : vector<1x32xf32>
    %cst_193 = arith.constant 0.000000e+00 : f32
    %238 = vector.broadcast %cst_193 : f32 to vector<1x32xf32>
    %239 = arith.maximumf %237, %238 : vector<1x32xf32>
    %cst_194 = arith.constant 9.99999974E-6 : f32
    %240 = vector.broadcast %cst_194 : f32 to vector<1x32xf32>
    %241 = arith.addf %239, %240 : vector<1x32xf32>
    %242 = math.rsqrt %241 : vector<1x32xf32>
    %cst_195 = arith.constant dense<0.000000e+00> : vector<1x64xf32>
    %243 = tpu.matmul %242, %229, %cst_195 {dimension_numbers = #tpu.dot_dimension_numbers<[1], [0], [0], [1], [0, 0, 1, 1], [], []>} : vector<1x32xf32>, vector<32x64xf32>, vector<1x64xf32> -> vector<1x64xf32>
    %cst_196 = arith.constant 0.000000e+00 : f32
    %244 = vector.broadcast %cst_196 : f32 to vector<1x32xf32>
    %245 = arith.subf %244, %232 : vector<1x32xf32>
    %246 = arith.mulf %245, %242 : vector<1x32xf32>
    %cst_197 = arith.constant dense<0.000000e+00> : vector<1x64xf32>
    %247 = tpu.matmul %246, %229, %cst_197 {dimension_numbers = #tpu.dot_dimension_numbers<[1], [0], [0], [1], [0, 0, 1, 1], [], []>} : vector<1x32xf32>, vector<32x64xf32>, vector<1x64xf32> -> vector<1x64xf32>
    %248 = vector.broadcast %243 : vector<1x64xf32> to vector<16x64xf32>
    %249 = arith.mulf %222, %248 : vector<16x64xf32>
    %250 = vector.broadcast %247 : vector<1x64xf32> to vector<16x64xf32>
    %251 = arith.addf %249, %250 : vector<16x64xf32>
    %cst_198 = arith.constant 0.000000e+00 : f32
    %252 = vector.broadcast %cst_198 : f32 to vector<16x64xf32>
    %253 = arith.maximumf %251, %252 : vector<16x64xf32>
    %254 = vector.extract_strided_slice %253 {offsets = [0, 0], sizes = [8, 64], strides = [1, 1]} : vector<16x64xf32> to vector<8x64xf32>
    %255 = vector.extract_strided_slice %253 {offsets = [8, 0], sizes = [8, 64], strides = [1, 1]} : vector<16x64xf32> to vector<8x64xf32>
    %256 = tpu.concatenate %254, %255 in 1 : vector<8x64xf32>, vector<8x64xf32> -> vector<8x128xf32>
    %c0_199 = arith.constant 0 : index
    %c0_200 = arith.constant 0 : index
    %257 = vector.load %arg1[%c0_199, %c0_200] : memref<8x8xf32, #tpu.memory_space<vmem>>, vector<8x8xf32>
    %258 = arith.truncf %25 : vector<8x64xf32> to vector<8x64xbf16>
    %259 = arith.truncf %256 : vector<8x128xf32> to vector<8x128xbf16>
    %c0_201 = arith.constant 0 : index
    %c0_202 = arith.constant 0 : index
    %260 = vector.load %arg24[%c0_201, %c0_202] : memref<64x32xbf16, #tpu.memory_space<vmem>>, vector<64x32xbf16>
    %c0_203 = arith.constant 0 : index
    %c0_204 = arith.constant 0 : index
    %261 = vector.load %arg25[%c0_203, %c0_204] : memref<128x32xbf16, #tpu.memory_space<vmem>>, vector<128x32xbf16>
    %c0_205 = arith.constant 0 : index
    %c0_206 = arith.constant 0 : index
    %262 = vector.load %arg26[%c0_205, %c0_206] : memref<32x64xbf16, #tpu.memory_space<vmem>>, vector<32x64xbf16>
    %c0_207 = arith.constant 0 : index
    %c0_208 = arith.constant 0 : index
    %263 = vector.load %arg27[%c0_207, %c0_208] : memref<64x64xbf16, #tpu.memory_space<vmem>>, vector<64x64xbf16>
    %c0_209 = arith.constant 0 : index
    %c0_210 = arith.constant 0 : index
    %264 = vector.load %arg28[%c0_209, %c0_210] : memref<128x64xbf16, #tpu.memory_space<vmem>>, vector<128x64xbf16>
    %cst_211 = arith.constant dense<0.000000e+00> : vector<8x32xf32>
    %265 = tpu.matmul %258, %260, %cst_211 {dimension_numbers = #tpu.dot_dimension_numbers<[1], [0], [0], [1], [0, 0, 1, 1], [], []>} : vector<8x64xbf16>, vector<64x32xbf16>, vector<8x32xf32> -> vector<8x32xf32>
    %cst_212 = arith.constant dense<0.000000e+00> : vector<8x32xf32>
    %266 = tpu.matmul %259, %261, %cst_212 {dimension_numbers = #tpu.dot_dimension_numbers<[1], [0], [0], [1], [0, 0, 1, 1], [], []>} : vector<8x128xbf16>, vector<128x32xbf16>, vector<8x32xf32> -> vector<8x32xf32>
    %267 = arith.addf %265, %266 : vector<8x32xf32>
    %cst_213 = arith.constant dense<0.000000e+00> : vector<8x32xf32>
    %268 = tpu.matmul %257, %267, %cst_213 {dimension_numbers = #tpu.dot_dimension_numbers<[1], [0], [0], [1], [0, 0, 1, 1], [], []>} : vector<8x8xf32>, vector<8x32xf32>, vector<8x32xf32> -> vector<8x32xf32>
    %cst_214 = arith.constant dense<0.000000e+00> : vector<32xf32>
    %269 = vector.multi_reduction <add>, %268, %cst_214 [0] : vector<8x32xf32> to vector<32xf32>
    %270 = vector.shape_cast %269 : vector<32xf32> to vector<1x32xf32>
    %cst_215 = arith.constant 1.250000e-01 : f32
    %271 = vector.broadcast %cst_215 : f32 to vector<1x32xf32>
    %272 = arith.mulf %270, %271 : vector<1x32xf32>
    %273 = arith.mulf %268, %268 : vector<8x32xf32>
    %cst_216 = arith.constant dense<0.000000e+00> : vector<32xf32>
    %274 = vector.multi_reduction <add>, %273, %cst_216 [0] : vector<8x32xf32> to vector<32xf32>
    %275 = vector.shape_cast %274 : vector<32xf32> to vector<1x32xf32>
    %cst_217 = arith.constant 1.250000e-01 : f32
    %276 = vector.broadcast %cst_217 : f32 to vector<1x32xf32>
    %277 = arith.mulf %275, %276 : vector<1x32xf32>
    %278 = arith.mulf %272, %272 : vector<1x32xf32>
    %279 = arith.subf %277, %278 : vector<1x32xf32>
    %cst_218 = arith.constant 0.000000e+00 : f32
    %280 = vector.broadcast %cst_218 : f32 to vector<1x32xf32>
    %281 = arith.maximumf %279, %280 : vector<1x32xf32>
    %282 = vector.broadcast %272 : vector<1x32xf32> to vector<8x32xf32>
    %283 = arith.subf %268, %282 : vector<8x32xf32>
    %cst_219 = arith.constant 9.99999974E-6 : f32
    %284 = vector.broadcast %cst_219 : f32 to vector<1x32xf32>
    %285 = arith.addf %281, %284 : vector<1x32xf32>
    %286 = math.rsqrt %285 : vector<1x32xf32>
    %287 = vector.broadcast %286 : vector<1x32xf32> to vector<8x32xf32>
    %288 = arith.mulf %283, %287 : vector<8x32xf32>
    %cst_220 = arith.constant 0.000000e+00 : f32
    %289 = vector.broadcast %cst_220 : f32 to vector<8x32xf32>
    %290 = arith.maximumf %288, %289 : vector<8x32xf32>
    %291 = arith.truncf %290 : vector<8x32xf32> to vector<8x32xbf16>
    %cst_221 = arith.constant dense<0.000000e+00> : vector<8x64xf32>
    %292 = tpu.matmul %291, %262, %cst_221 {dimension_numbers = #tpu.dot_dimension_numbers<[1], [0], [0], [1], [0, 0, 1, 1], [], []>} : vector<8x32xbf16>, vector<32x64xbf16>, vector<8x64xf32> -> vector<8x64xf32>
    %cst_222 = arith.constant dense<0.000000e+00> : vector<8x64xf32>
    %293 = tpu.matmul %258, %263, %cst_222 {dimension_numbers = #tpu.dot_dimension_numbers<[1], [0], [0], [1], [0, 0, 1, 1], [], []>} : vector<8x64xbf16>, vector<64x64xbf16>, vector<8x64xf32> -> vector<8x64xf32>
    %294 = arith.addf %292, %293 : vector<8x64xf32>
    %cst_223 = arith.constant dense<0.000000e+00> : vector<8x64xf32>
    %295 = tpu.matmul %259, %264, %cst_223 {dimension_numbers = #tpu.dot_dimension_numbers<[1], [0], [0], [1], [0, 0, 1, 1], [], []>} : vector<8x128xbf16>, vector<128x64xbf16>, vector<8x64xf32> -> vector<8x64xf32>
    %296 = arith.addf %294, %295 : vector<8x64xf32>
    %cst_224 = arith.constant dense<0.000000e+00> : vector<64xf32>
    %297 = vector.multi_reduction <add>, %296, %cst_224 [0] : vector<8x64xf32> to vector<64xf32>
    %298 = vector.shape_cast %297 : vector<64xf32> to vector<1x64xf32>
    %cst_225 = arith.constant 1.250000e-01 : f32
    %299 = vector.broadcast %cst_225 : f32 to vector<1x64xf32>
    %300 = arith.mulf %298, %299 : vector<1x64xf32>
    %301 = arith.mulf %296, %296 : vector<8x64xf32>
    %cst_226 = arith.constant dense<0.000000e+00> : vector<64xf32>
    %302 = vector.multi_reduction <add>, %301, %cst_226 [0] : vector<8x64xf32> to vector<64xf32>
    %303 = vector.shape_cast %302 : vector<64xf32> to vector<1x64xf32>
    %cst_227 = arith.constant 1.250000e-01 : f32
    %304 = vector.broadcast %cst_227 : f32 to vector<1x64xf32>
    %305 = arith.mulf %303, %304 : vector<1x64xf32>
    %306 = arith.mulf %300, %300 : vector<1x64xf32>
    %307 = arith.subf %305, %306 : vector<1x64xf32>
    %cst_228 = arith.constant 0.000000e+00 : f32
    %308 = vector.broadcast %cst_228 : f32 to vector<1x64xf32>
    %309 = arith.maximumf %307, %308 : vector<1x64xf32>
    %310 = vector.broadcast %300 : vector<1x64xf32> to vector<8x64xf32>
    %311 = arith.subf %296, %310 : vector<8x64xf32>
    %cst_229 = arith.constant 9.99999974E-6 : f32
    %312 = vector.broadcast %cst_229 : f32 to vector<1x64xf32>
    %313 = arith.addf %309, %312 : vector<1x64xf32>
    %314 = math.rsqrt %313 : vector<1x64xf32>
    %315 = vector.broadcast %314 : vector<1x64xf32> to vector<8x64xf32>
    %316 = arith.mulf %311, %315 : vector<8x64xf32>
    %317 = vector.extract_strided_slice %316 {offsets = [0, 0], sizes = [8, 32], strides = [1, 1]} : vector<8x64xf32> to vector<8x32xf32>
    %318 = vector.extract_strided_slice %316 {offsets = [0, 32], sizes = [8, 32], strides = [1, 1]} : vector<8x64xf32> to vector<8x32xf32>
    %319 = arith.addf %317, %318 : vector<8x32xf32>
    %cst_230 = arith.constant 0.000000e+00 : f32
    %320 = vector.broadcast %cst_230 : f32 to vector<8x32xf32>
    %321 = arith.maximumf %319, %320 : vector<8x32xf32>
    %c0_231 = arith.constant 0 : index
    %c0_232 = arith.constant 0 : index
    %322 = vector.load %arg29[%c0_231, %c0_232] : memref<32x48xbf16, #tpu.memory_space<vmem>>, vector<32x48xbf16>
    %c0_233 = arith.constant 0 : index
    %c0_234 = arith.constant 0 : index
    %323 = vector.load %arg30[%c0_233, %c0_234] : memref<48x96xbf16, #tpu.memory_space<vmem>>, vector<48x96xbf16>
    %c0_235 = arith.constant 0 : index
    %c0_236 = arith.constant 0 : index
    %324 = vector.load %arg31[%c0_235, %c0_236] : memref<32x96xbf16, #tpu.memory_space<vmem>>, vector<32x96xbf16>
    %325 = arith.truncf %321 : vector<8x32xf32> to vector<8x32xbf16>
    %cst_237 = arith.constant dense<0.000000e+00> : vector<8x48xf32>
    %326 = tpu.matmul %325, %322, %cst_237 {dimension_numbers = #tpu.dot_dimension_numbers<[1], [0], [0], [1], [0, 0, 1, 1], [], []>} : vector<8x32xbf16>, vector<32x48xbf16>, vector<8x48xf32> -> vector<8x48xf32>
    %cst_238 = arith.constant dense<0.000000e+00> : vector<8x48xf32>
    %327 = tpu.matmul %257, %326, %cst_238 {dimension_numbers = #tpu.dot_dimension_numbers<[1], [0], [0], [1], [0, 0, 1, 1], [], []>} : vector<8x8xf32>, vector<8x48xf32>, vector<8x48xf32> -> vector<8x48xf32>
    %cst_239 = arith.constant dense<0.000000e+00> : vector<48xf32>
    %328 = vector.multi_reduction <add>, %327, %cst_239 [0] : vector<8x48xf32> to vector<48xf32>
    %329 = vector.shape_cast %328 : vector<48xf32> to vector<1x48xf32>
    %cst_240 = arith.constant 1.250000e-01 : f32
    %330 = vector.broadcast %cst_240 : f32 to vector<1x48xf32>
    %331 = arith.mulf %329, %330 : vector<1x48xf32>
    %332 = arith.mulf %327, %327 : vector<8x48xf32>
    %cst_241 = arith.constant dense<0.000000e+00> : vector<48xf32>
    %333 = vector.multi_reduction <add>, %332, %cst_241 [0] : vector<8x48xf32> to vector<48xf32>
    %334 = vector.shape_cast %333 : vector<48xf32> to vector<1x48xf32>
    %cst_242 = arith.constant 1.250000e-01 : f32
    %335 = vector.broadcast %cst_242 : f32 to vector<1x48xf32>
    %336 = arith.mulf %334, %335 : vector<1x48xf32>
    %337 = arith.mulf %331, %331 : vector<1x48xf32>
    %338 = arith.subf %336, %337 : vector<1x48xf32>
    %cst_243 = arith.constant 0.000000e+00 : f32
    %339 = vector.broadcast %cst_243 : f32 to vector<1x48xf32>
    %340 = arith.maximumf %338, %339 : vector<1x48xf32>
    %341 = vector.broadcast %331 : vector<1x48xf32> to vector<8x48xf32>
    %342 = arith.subf %327, %341 : vector<8x48xf32>
    %cst_244 = arith.constant 9.99999974E-6 : f32
    %343 = vector.broadcast %cst_244 : f32 to vector<1x48xf32>
    %344 = arith.addf %340, %343 : vector<1x48xf32>
    %345 = math.rsqrt %344 : vector<1x48xf32>
    %346 = vector.broadcast %345 : vector<1x48xf32> to vector<8x48xf32>
    %347 = arith.mulf %342, %346 : vector<8x48xf32>
    %cst_245 = arith.constant 0.000000e+00 : f32
    %348 = vector.broadcast %cst_245 : f32 to vector<8x48xf32>
    %349 = arith.maximumf %347, %348 : vector<8x48xf32>
    %350 = arith.truncf %349 : vector<8x48xf32> to vector<8x48xbf16>
    %cst_246 = arith.constant dense<0.000000e+00> : vector<8x96xf32>
    %351 = tpu.matmul %350, %323, %cst_246 {dimension_numbers = #tpu.dot_dimension_numbers<[1], [0], [0], [1], [0, 0, 1, 1], [], []>} : vector<8x48xbf16>, vector<48x96xbf16>, vector<8x96xf32> -> vector<8x96xf32>
    %cst_247 = arith.constant dense<0.000000e+00> : vector<8x96xf32>
    %352 = tpu.matmul %325, %324, %cst_247 {dimension_numbers = #tpu.dot_dimension_numbers<[1], [0], [0], [1], [0, 0, 1, 1], [], []>} : vector<8x32xbf16>, vector<32x96xbf16>, vector<8x96xf32> -> vector<8x96xf32>
    %353 = arith.addf %351, %352 : vector<8x96xf32>
    %cst_248 = arith.constant dense<0.000000e+00> : vector<96xf32>
    %354 = vector.multi_reduction <add>, %353, %cst_248 [0] : vector<8x96xf32> to vector<96xf32>
    %355 = vector.shape_cast %354 : vector<96xf32> to vector<1x96xf32>
    %cst_249 = arith.constant 1.250000e-01 : f32
    %356 = vector.broadcast %cst_249 : f32 to vector<1x96xf32>
    %357 = arith.mulf %355, %356 : vector<1x96xf32>
    %358 = arith.mulf %353, %353 : vector<8x96xf32>
    %cst_250 = arith.constant dense<0.000000e+00> : vector<96xf32>
    %359 = vector.multi_reduction <add>, %358, %cst_250 [0] : vector<8x96xf32> to vector<96xf32>
    %360 = vector.shape_cast %359 : vector<96xf32> to vector<1x96xf32>
    %cst_251 = arith.constant 1.250000e-01 : f32
    %361 = vector.broadcast %cst_251 : f32 to vector<1x96xf32>
    %362 = arith.mulf %360, %361 : vector<1x96xf32>
    %363 = arith.mulf %357, %357 : vector<1x96xf32>
    %364 = arith.subf %362, %363 : vector<1x96xf32>
    %cst_252 = arith.constant 0.000000e+00 : f32
    %365 = vector.broadcast %cst_252 : f32 to vector<1x96xf32>
    %366 = arith.maximumf %364, %365 : vector<1x96xf32>
    %367 = vector.broadcast %357 : vector<1x96xf32> to vector<8x96xf32>
    %368 = arith.subf %353, %367 : vector<8x96xf32>
    %cst_253 = arith.constant 9.99999974E-6 : f32
    %369 = vector.broadcast %cst_253 : f32 to vector<1x96xf32>
    %370 = arith.addf %366, %369 : vector<1x96xf32>
    %371 = math.rsqrt %370 : vector<1x96xf32>
    %372 = vector.broadcast %371 : vector<1x96xf32> to vector<8x96xf32>
    %373 = arith.mulf %368, %372 : vector<8x96xf32>
    %374 = vector.extract_strided_slice %373 {offsets = [0, 0], sizes = [8, 48], strides = [1, 1]} : vector<8x96xf32> to vector<8x48xf32>
    %375 = vector.extract_strided_slice %373 {offsets = [0, 48], sizes = [8, 48], strides = [1, 1]} : vector<8x96xf32> to vector<8x48xf32>
    %376 = arith.addf %374, %375 : vector<8x48xf32>
    %cst_254 = arith.constant 0.000000e+00 : f32
    %377 = vector.broadcast %cst_254 : f32 to vector<8x48xf32>
    %378 = arith.maximumf %376, %377 : vector<8x48xf32>
    %c0_255 = arith.constant 0 : index
    %c0_256 = arith.constant 0 : index
    %379 = vector.load %arg32[%c0_255, %c0_256] : memref<48x64xbf16, #tpu.memory_space<vmem>>, vector<48x64xbf16>
    %c0_257 = arith.constant 0 : index
    %c0_258 = arith.constant 0 : index
    %380 = vector.load %arg33[%c0_257, %c0_258] : memref<64x128xbf16, #tpu.memory_space<vmem>>, vector<64x128xbf16>
    %c0_259 = arith.constant 0 : index
    %c0_260 = arith.constant 0 : index
    %381 = vector.load %arg34[%c0_259, %c0_260] : memref<48x128xbf16, #tpu.memory_space<vmem>>, vector<48x128xbf16>
    %382 = arith.truncf %378 : vector<8x48xf32> to vector<8x48xbf16>
    %cst_261 = arith.constant dense<0.000000e+00> : vector<8x64xf32>
    %383 = tpu.matmul %382, %379, %cst_261 {dimension_numbers = #tpu.dot_dimension_numbers<[1], [0], [0], [1], [0, 0, 1, 1], [], []>} : vector<8x48xbf16>, vector<48x64xbf16>, vector<8x64xf32> -> vector<8x64xf32>
    %cst_262 = arith.constant dense<0.000000e+00> : vector<8x64xf32>
    %384 = tpu.matmul %257, %383, %cst_262 {dimension_numbers = #tpu.dot_dimension_numbers<[1], [0], [0], [1], [0, 0, 1, 1], [], []>} : vector<8x8xf32>, vector<8x64xf32>, vector<8x64xf32> -> vector<8x64xf32>
    %cst_263 = arith.constant dense<0.000000e+00> : vector<64xf32>
    %385 = vector.multi_reduction <add>, %384, %cst_263 [0] : vector<8x64xf32> to vector<64xf32>
    %386 = vector.shape_cast %385 : vector<64xf32> to vector<1x64xf32>
    %cst_264 = arith.constant 1.250000e-01 : f32
    %387 = vector.broadcast %cst_264 : f32 to vector<1x64xf32>
    %388 = arith.mulf %386, %387 : vector<1x64xf32>
    %389 = arith.mulf %384, %384 : vector<8x64xf32>
    %cst_265 = arith.constant dense<0.000000e+00> : vector<64xf32>
    %390 = vector.multi_reduction <add>, %389, %cst_265 [0] : vector<8x64xf32> to vector<64xf32>
    %391 = vector.shape_cast %390 : vector<64xf32> to vector<1x64xf32>
    %cst_266 = arith.constant 1.250000e-01 : f32
    %392 = vector.broadcast %cst_266 : f32 to vector<1x64xf32>
    %393 = arith.mulf %391, %392 : vector<1x64xf32>
    %394 = arith.mulf %388, %388 : vector<1x64xf32>
    %395 = arith.subf %393, %394 : vector<1x64xf32>
    %cst_267 = arith.constant 0.000000e+00 : f32
    %396 = vector.broadcast %cst_267 : f32 to vector<1x64xf32>
    %397 = arith.maximumf %395, %396 : vector<1x64xf32>
    %398 = vector.broadcast %388 : vector<1x64xf32> to vector<8x64xf32>
    %399 = arith.subf %384, %398 : vector<8x64xf32>
    %cst_268 = arith.constant 9.99999974E-6 : f32
    %400 = vector.broadcast %cst_268 : f32 to vector<1x64xf32>
    %401 = arith.addf %397, %400 : vector<1x64xf32>
    %402 = math.rsqrt %401 : vector<1x64xf32>
    %403 = vector.broadcast %402 : vector<1x64xf32> to vector<8x64xf32>
    %404 = arith.mulf %399, %403 : vector<8x64xf32>
    %cst_269 = arith.constant 0.000000e+00 : f32
    %405 = vector.broadcast %cst_269 : f32 to vector<8x64xf32>
    %406 = arith.maximumf %404, %405 : vector<8x64xf32>
    %407 = arith.truncf %406 : vector<8x64xf32> to vector<8x64xbf16>
    %cst_270 = arith.constant dense<0.000000e+00> : vector<8x128xf32>
    %408 = tpu.matmul %407, %380, %cst_270 {dimension_numbers = #tpu.dot_dimension_numbers<[1], [0], [0], [1], [0, 0, 1, 1], [], []>} : vector<8x64xbf16>, vector<64x128xbf16>, vector<8x128xf32> -> vector<8x128xf32>
    %cst_271 = arith.constant dense<0.000000e+00> : vector<8x128xf32>
    %409 = tpu.matmul %382, %381, %cst_271 {dimension_numbers = #tpu.dot_dimension_numbers<[1], [0], [0], [1], [0, 0, 1, 1], [], []>} : vector<8x48xbf16>, vector<48x128xbf16>, vector<8x128xf32> -> vector<8x128xf32>
    %410 = arith.addf %408, %409 : vector<8x128xf32>
    %cst_272 = arith.constant dense<0.000000e+00> : vector<128xf32>
    %411 = vector.multi_reduction <add>, %410, %cst_272 [0] : vector<8x128xf32> to vector<128xf32>
    %412 = vector.shape_cast %411 : vector<128xf32> to vector<1x128xf32>
    %cst_273 = arith.constant 1.250000e-01 : f32
    %413 = vector.broadcast %cst_273 : f32 to vector<1x128xf32>
    %414 = arith.mulf %412, %413 : vector<1x128xf32>
    %415 = arith.mulf %410, %410 : vector<8x128xf32>
    %cst_274 = arith.constant dense<0.000000e+00> : vector<128xf32>
    %416 = vector.multi_reduction <add>, %415, %cst_274 [0] : vector<8x128xf32> to vector<128xf32>
    %417 = vector.shape_cast %416 : vector<128xf32> to vector<1x128xf32>
    %cst_275 = arith.constant 1.250000e-01 : f32
    %418 = vector.broadcast %cst_275 : f32 to vector<1x128xf32>
    %419 = arith.mulf %417, %418 : vector<1x128xf32>
    %420 = arith.mulf %414, %414 : vector<1x128xf32>
    %421 = arith.subf %419, %420 : vector<1x128xf32>
    %cst_276 = arith.constant 0.000000e+00 : f32
    %422 = vector.broadcast %cst_276 : f32 to vector<1x128xf32>
    %423 = arith.maximumf %421, %422 : vector<1x128xf32>
    %424 = vector.broadcast %414 : vector<1x128xf32> to vector<8x128xf32>
    %425 = arith.subf %410, %424 : vector<8x128xf32>
    %cst_277 = arith.constant 9.99999974E-6 : f32
    %426 = vector.broadcast %cst_277 : f32 to vector<1x128xf32>
    %427 = arith.addf %423, %426 : vector<1x128xf32>
    %428 = math.rsqrt %427 : vector<1x128xf32>
    %429 = vector.broadcast %428 : vector<1x128xf32> to vector<8x128xf32>
    %430 = arith.mulf %425, %429 : vector<8x128xf32>
    %431 = vector.extract_strided_slice %430 {offsets = [0, 0], sizes = [8, 64], strides = [1, 1]} : vector<8x128xf32> to vector<8x64xf32>
    %432 = vector.extract_strided_slice %430 {offsets = [0, 64], sizes = [8, 64], strides = [1, 1]} : vector<8x128xf32> to vector<8x64xf32>
    %433 = arith.addf %431, %432 : vector<8x64xf32>
    %cst_278 = arith.constant 0.000000e+00 : f32
    %434 = vector.broadcast %cst_278 : f32 to vector<8x64xf32>
    %435 = arith.maximumf %433, %434 : vector<8x64xf32>
    %c0_279 = arith.constant 0 : index
    %c0_280 = arith.constant 0 : index
    %436 = vector.load %arg35[%c0_279, %c0_280] : memref<64x80xbf16, #tpu.memory_space<vmem>>, vector<64x80xbf16>
    %c0_281 = arith.constant 0 : index
    %c0_282 = arith.constant 0 : index
    %437 = vector.load %arg36[%c0_281, %c0_282] : memref<80x160xbf16, #tpu.memory_space<vmem>>, vector<80x160xbf16>
    %c0_283 = arith.constant 0 : index
    %c0_284 = arith.constant 0 : index
    %438 = vector.load %arg37[%c0_283, %c0_284] : memref<64x160xbf16, #tpu.memory_space<vmem>>, vector<64x160xbf16>
    %439 = arith.truncf %435 : vector<8x64xf32> to vector<8x64xbf16>
    %cst_285 = arith.constant dense<0.000000e+00> : vector<8x80xf32>
    %440 = tpu.matmul %439, %436, %cst_285 {dimension_numbers = #tpu.dot_dimension_numbers<[1], [0], [0], [1], [0, 0, 1, 1], [], []>} : vector<8x64xbf16>, vector<64x80xbf16>, vector<8x80xf32> -> vector<8x80xf32>
    %cst_286 = arith.constant dense<0.000000e+00> : vector<8x80xf32>
    %441 = tpu.matmul %257, %440, %cst_286 {dimension_numbers = #tpu.dot_dimension_numbers<[1], [0], [0], [1], [0, 0, 1, 1], [], []>} : vector<8x8xf32>, vector<8x80xf32>, vector<8x80xf32> -> vector<8x80xf32>
    %cst_287 = arith.constant dense<0.000000e+00> : vector<80xf32>
    %442 = vector.multi_reduction <add>, %441, %cst_287 [0] : vector<8x80xf32> to vector<80xf32>
    %443 = vector.shape_cast %442 : vector<80xf32> to vector<1x80xf32>
    %cst_288 = arith.constant 1.250000e-01 : f32
    %444 = vector.broadcast %cst_288 : f32 to vector<1x80xf32>
    %445 = arith.mulf %443, %444 : vector<1x80xf32>
    %446 = arith.mulf %441, %441 : vector<8x80xf32>
    %cst_289 = arith.constant dense<0.000000e+00> : vector<80xf32>
    %447 = vector.multi_reduction <add>, %446, %cst_289 [0] : vector<8x80xf32> to vector<80xf32>
    %448 = vector.shape_cast %447 : vector<80xf32> to vector<1x80xf32>
    %cst_290 = arith.constant 1.250000e-01 : f32
    %449 = vector.broadcast %cst_290 : f32 to vector<1x80xf32>
    %450 = arith.mulf %448, %449 : vector<1x80xf32>
    %451 = arith.mulf %445, %445 : vector<1x80xf32>
    %452 = arith.subf %450, %451 : vector<1x80xf32>
    %cst_291 = arith.constant 0.000000e+00 : f32
    %453 = vector.broadcast %cst_291 : f32 to vector<1x80xf32>
    %454 = arith.maximumf %452, %453 : vector<1x80xf32>
    %455 = vector.broadcast %445 : vector<1x80xf32> to vector<8x80xf32>
    %456 = arith.subf %441, %455 : vector<8x80xf32>
    %cst_292 = arith.constant 9.99999974E-6 : f32
    %457 = vector.broadcast %cst_292 : f32 to vector<1x80xf32>
    %458 = arith.addf %454, %457 : vector<1x80xf32>
    %459 = math.rsqrt %458 : vector<1x80xf32>
    %460 = vector.broadcast %459 : vector<1x80xf32> to vector<8x80xf32>
    %461 = arith.mulf %456, %460 : vector<8x80xf32>
    %cst_293 = arith.constant 0.000000e+00 : f32
    %462 = vector.broadcast %cst_293 : f32 to vector<8x80xf32>
    %463 = arith.maximumf %461, %462 : vector<8x80xf32>
    %464 = arith.truncf %463 : vector<8x80xf32> to vector<8x80xbf16>
    %cst_294 = arith.constant dense<0.000000e+00> : vector<8x160xf32>
    %465 = tpu.matmul %464, %437, %cst_294 {dimension_numbers = #tpu.dot_dimension_numbers<[1], [0], [0], [1], [0, 0, 1, 1], [], []>} : vector<8x80xbf16>, vector<80x160xbf16>, vector<8x160xf32> -> vector<8x160xf32>
    %cst_295 = arith.constant dense<0.000000e+00> : vector<8x160xf32>
    %466 = tpu.matmul %439, %438, %cst_295 {dimension_numbers = #tpu.dot_dimension_numbers<[1], [0], [0], [1], [0, 0, 1, 1], [], []>} : vector<8x64xbf16>, vector<64x160xbf16>, vector<8x160xf32> -> vector<8x160xf32>
    %467 = arith.addf %465, %466 : vector<8x160xf32>
    %cst_296 = arith.constant dense<0.000000e+00> : vector<160xf32>
    %468 = vector.multi_reduction <add>, %467, %cst_296 [0] : vector<8x160xf32> to vector<160xf32>
    %469 = vector.shape_cast %468 : vector<160xf32> to vector<1x160xf32>
    %cst_297 = arith.constant 1.250000e-01 : f32
    %470 = vector.broadcast %cst_297 : f32 to vector<1x160xf32>
    %471 = arith.mulf %469, %470 : vector<1x160xf32>
    %472 = arith.mulf %467, %467 : vector<8x160xf32>
    %cst_298 = arith.constant dense<0.000000e+00> : vector<160xf32>
    %473 = vector.multi_reduction <add>, %472, %cst_298 [0] : vector<8x160xf32> to vector<160xf32>
    %474 = vector.shape_cast %473 : vector<160xf32> to vector<1x160xf32>
    %cst_299 = arith.constant 1.250000e-01 : f32
    %475 = vector.broadcast %cst_299 : f32 to vector<1x160xf32>
    %476 = arith.mulf %474, %475 : vector<1x160xf32>
    %477 = arith.mulf %471, %471 : vector<1x160xf32>
    %478 = arith.subf %476, %477 : vector<1x160xf32>
    %cst_300 = arith.constant 0.000000e+00 : f32
    %479 = vector.broadcast %cst_300 : f32 to vector<1x160xf32>
    %480 = arith.maximumf %478, %479 : vector<1x160xf32>
    %481 = vector.broadcast %471 : vector<1x160xf32> to vector<8x160xf32>
    %482 = arith.subf %467, %481 : vector<8x160xf32>
    %cst_301 = arith.constant 9.99999974E-6 : f32
    %483 = vector.broadcast %cst_301 : f32 to vector<1x160xf32>
    %484 = arith.addf %480, %483 : vector<1x160xf32>
    %485 = math.rsqrt %484 : vector<1x160xf32>
    %486 = vector.broadcast %485 : vector<1x160xf32> to vector<8x160xf32>
    %487 = arith.mulf %482, %486 : vector<8x160xf32>
    %488 = vector.extract_strided_slice %487 {offsets = [0, 0], sizes = [8, 80], strides = [1, 1]} : vector<8x160xf32> to vector<8x80xf32>
    %489 = vector.extract_strided_slice %487 {offsets = [0, 80], sizes = [8, 80], strides = [1, 1]} : vector<8x160xf32> to vector<8x80xf32>
    %490 = arith.addf %488, %489 : vector<8x80xf32>
    %cst_302 = arith.constant 0.000000e+00 : f32
    %491 = vector.broadcast %cst_302 : f32 to vector<8x80xf32>
    %492 = arith.maximumf %490, %491 : vector<8x80xf32>
    %c0_303 = arith.constant 0 : index
    %c0_304 = arith.constant 0 : index
    %493 = vector.load %arg38[%c0_303, %c0_304] : memref<80x96xbf16, #tpu.memory_space<vmem>>, vector<80x96xbf16>
    %c0_305 = arith.constant 0 : index
    %c0_306 = arith.constant 0 : index
    %494 = vector.load %arg39[%c0_305, %c0_306] : memref<96x192xbf16, #tpu.memory_space<vmem>>, vector<96x192xbf16>
    %c0_307 = arith.constant 0 : index
    %c0_308 = arith.constant 0 : index
    %495 = vector.load %arg40[%c0_307, %c0_308] : memref<80x192xbf16, #tpu.memory_space<vmem>>, vector<80x192xbf16>
    %496 = arith.truncf %492 : vector<8x80xf32> to vector<8x80xbf16>
    %cst_309 = arith.constant dense<0.000000e+00> : vector<8x96xf32>
    %497 = tpu.matmul %496, %493, %cst_309 {dimension_numbers = #tpu.dot_dimension_numbers<[1], [0], [0], [1], [0, 0, 1, 1], [], []>} : vector<8x80xbf16>, vector<80x96xbf16>, vector<8x96xf32> -> vector<8x96xf32>
    %cst_310 = arith.constant dense<0.000000e+00> : vector<8x96xf32>
    %498 = tpu.matmul %257, %497, %cst_310 {dimension_numbers = #tpu.dot_dimension_numbers<[1], [0], [0], [1], [0, 0, 1, 1], [], []>} : vector<8x8xf32>, vector<8x96xf32>, vector<8x96xf32> -> vector<8x96xf32>
    %cst_311 = arith.constant dense<0.000000e+00> : vector<96xf32>
    %499 = vector.multi_reduction <add>, %498, %cst_311 [0] : vector<8x96xf32> to vector<96xf32>
    %500 = vector.shape_cast %499 : vector<96xf32> to vector<1x96xf32>
    %cst_312 = arith.constant 1.250000e-01 : f32
    %501 = vector.broadcast %cst_312 : f32 to vector<1x96xf32>
    %502 = arith.mulf %500, %501 : vector<1x96xf32>
    %503 = arith.mulf %498, %498 : vector<8x96xf32>
    %cst_313 = arith.constant dense<0.000000e+00> : vector<96xf32>
    %504 = vector.multi_reduction <add>, %503, %cst_313 [0] : vector<8x96xf32> to vector<96xf32>
    %505 = vector.shape_cast %504 : vector<96xf32> to vector<1x96xf32>
    %cst_314 = arith.constant 1.250000e-01 : f32
    %506 = vector.broadcast %cst_314 : f32 to vector<1x96xf32>
    %507 = arith.mulf %505, %506 : vector<1x96xf32>
    %508 = arith.mulf %502, %502 : vector<1x96xf32>
    %509 = arith.subf %507, %508 : vector<1x96xf32>
    %cst_315 = arith.constant 0.000000e+00 : f32
    %510 = vector.broadcast %cst_315 : f32 to vector<1x96xf32>
    %511 = arith.maximumf %509, %510 : vector<1x96xf32>
    %512 = vector.broadcast %502 : vector<1x96xf32> to vector<8x96xf32>
    %513 = arith.subf %498, %512 : vector<8x96xf32>
    %cst_316 = arith.constant 9.99999974E-6 : f32
    %514 = vector.broadcast %cst_316 : f32 to vector<1x96xf32>
    %515 = arith.addf %511, %514 : vector<1x96xf32>
    %516 = math.rsqrt %515 : vector<1x96xf32>
    %517 = vector.broadcast %516 : vector<1x96xf32> to vector<8x96xf32>
    %518 = arith.mulf %513, %517 : vector<8x96xf32>
    %cst_317 = arith.constant 0.000000e+00 : f32
    %519 = vector.broadcast %cst_317 : f32 to vector<8x96xf32>
    %520 = arith.maximumf %518, %519 : vector<8x96xf32>
    %521 = arith.truncf %520 : vector<8x96xf32> to vector<8x96xbf16>
    %cst_318 = arith.constant dense<0.000000e+00> : vector<8x192xf32>
    %522 = tpu.matmul %521, %494, %cst_318 {dimension_numbers = #tpu.dot_dimension_numbers<[1], [0], [0], [1], [0, 0, 1, 1], [], []>} : vector<8x96xbf16>, vector<96x192xbf16>, vector<8x192xf32> -> vector<8x192xf32>
    %cst_319 = arith.constant dense<0.000000e+00> : vector<8x192xf32>
    %523 = tpu.matmul %496, %495, %cst_319 {dimension_numbers = #tpu.dot_dimension_numbers<[1], [0], [0], [1], [0, 0, 1, 1], [], []>} : vector<8x80xbf16>, vector<80x192xbf16>, vector<8x192xf32> -> vector<8x192xf32>
    %524 = arith.addf %522, %523 : vector<8x192xf32>
    %cst_320 = arith.constant dense<0.000000e+00> : vector<192xf32>
    %525 = vector.multi_reduction <add>, %524, %cst_320 [0] : vector<8x192xf32> to vector<192xf32>
    %526 = vector.shape_cast %525 : vector<192xf32> to vector<1x192xf32>
    %cst_321 = arith.constant 1.250000e-01 : f32
    %527 = vector.broadcast %cst_321 : f32 to vector<1x192xf32>
    %528 = arith.mulf %526, %527 : vector<1x192xf32>
    %529 = arith.mulf %524, %524 : vector<8x192xf32>
    %cst_322 = arith.constant dense<0.000000e+00> : vector<192xf32>
    %530 = vector.multi_reduction <add>, %529, %cst_322 [0] : vector<8x192xf32> to vector<192xf32>
    %531 = vector.shape_cast %530 : vector<192xf32> to vector<1x192xf32>
    %cst_323 = arith.constant 1.250000e-01 : f32
    %532 = vector.broadcast %cst_323 : f32 to vector<1x192xf32>
    %533 = arith.mulf %531, %532 : vector<1x192xf32>
    %534 = arith.mulf %528, %528 : vector<1x192xf32>
    %535 = arith.subf %533, %534 : vector<1x192xf32>
    %cst_324 = arith.constant 0.000000e+00 : f32
    %536 = vector.broadcast %cst_324 : f32 to vector<1x192xf32>
    %537 = arith.maximumf %535, %536 : vector<1x192xf32>
    %538 = vector.broadcast %528 : vector<1x192xf32> to vector<8x192xf32>
    %539 = arith.subf %524, %538 : vector<8x192xf32>
    %cst_325 = arith.constant 9.99999974E-6 : f32
    %540 = vector.broadcast %cst_325 : f32 to vector<1x192xf32>
    %541 = arith.addf %537, %540 : vector<1x192xf32>
    %542 = math.rsqrt %541 : vector<1x192xf32>
    %543 = vector.broadcast %542 : vector<1x192xf32> to vector<8x192xf32>
    %544 = arith.mulf %539, %543 : vector<8x192xf32>
    %545 = vector.extract_strided_slice %544 {offsets = [0, 0], sizes = [8, 96], strides = [1, 1]} : vector<8x192xf32> to vector<8x96xf32>
    %546 = vector.extract_strided_slice %544 {offsets = [0, 96], sizes = [8, 96], strides = [1, 1]} : vector<8x192xf32> to vector<8x96xf32>
    %547 = arith.addf %545, %546 : vector<8x96xf32>
    %cst_326 = arith.constant 0.000000e+00 : f32
    %548 = vector.broadcast %cst_326 : f32 to vector<8x96xf32>
    %549 = arith.maximumf %547, %548 : vector<8x96xf32>
    %c0_327 = arith.constant 0 : index
    %c0_328 = arith.constant 0 : index
    %550 = vector.load %arg41[%c0_327, %c0_328] : memref<96x112xbf16, #tpu.memory_space<vmem>>, vector<96x112xbf16>
    %c0_329 = arith.constant 0 : index
    %c0_330 = arith.constant 0 : index
    %551 = vector.load %arg42[%c0_329, %c0_330] : memref<112x224xbf16, #tpu.memory_space<vmem>>, vector<112x224xbf16>
    %c0_331 = arith.constant 0 : index
    %c0_332 = arith.constant 0 : index
    %552 = vector.load %arg43[%c0_331, %c0_332] : memref<96x224xbf16, #tpu.memory_space<vmem>>, vector<96x224xbf16>
    %553 = arith.truncf %549 : vector<8x96xf32> to vector<8x96xbf16>
    %cst_333 = arith.constant dense<0.000000e+00> : vector<8x112xf32>
    %554 = tpu.matmul %553, %550, %cst_333 {dimension_numbers = #tpu.dot_dimension_numbers<[1], [0], [0], [1], [0, 0, 1, 1], [], []>} : vector<8x96xbf16>, vector<96x112xbf16>, vector<8x112xf32> -> vector<8x112xf32>
    %cst_334 = arith.constant dense<0.000000e+00> : vector<8x112xf32>
    %555 = tpu.matmul %257, %554, %cst_334 {dimension_numbers = #tpu.dot_dimension_numbers<[1], [0], [0], [1], [0, 0, 1, 1], [], []>} : vector<8x8xf32>, vector<8x112xf32>, vector<8x112xf32> -> vector<8x112xf32>
    %cst_335 = arith.constant dense<0.000000e+00> : vector<112xf32>
    %556 = vector.multi_reduction <add>, %555, %cst_335 [0] : vector<8x112xf32> to vector<112xf32>
    %557 = vector.shape_cast %556 : vector<112xf32> to vector<1x112xf32>
    %cst_336 = arith.constant 1.250000e-01 : f32
    %558 = vector.broadcast %cst_336 : f32 to vector<1x112xf32>
    %559 = arith.mulf %557, %558 : vector<1x112xf32>
    %560 = arith.mulf %555, %555 : vector<8x112xf32>
    %cst_337 = arith.constant dense<0.000000e+00> : vector<112xf32>
    %561 = vector.multi_reduction <add>, %560, %cst_337 [0] : vector<8x112xf32> to vector<112xf32>
    %562 = vector.shape_cast %561 : vector<112xf32> to vector<1x112xf32>
    %cst_338 = arith.constant 1.250000e-01 : f32
    %563 = vector.broadcast %cst_338 : f32 to vector<1x112xf32>
    %564 = arith.mulf %562, %563 : vector<1x112xf32>
    %565 = arith.mulf %559, %559 : vector<1x112xf32>
    %566 = arith.subf %564, %565 : vector<1x112xf32>
    %cst_339 = arith.constant 0.000000e+00 : f32
    %567 = vector.broadcast %cst_339 : f32 to vector<1x112xf32>
    %568 = arith.maximumf %566, %567 : vector<1x112xf32>
    %569 = vector.broadcast %559 : vector<1x112xf32> to vector<8x112xf32>
    %570 = arith.subf %555, %569 : vector<8x112xf32>
    %cst_340 = arith.constant 9.99999974E-6 : f32
    %571 = vector.broadcast %cst_340 : f32 to vector<1x112xf32>
    %572 = arith.addf %568, %571 : vector<1x112xf32>
    %573 = math.rsqrt %572 : vector<1x112xf32>
    %574 = vector.broadcast %573 : vector<1x112xf32> to vector<8x112xf32>
    %575 = arith.mulf %570, %574 : vector<8x112xf32>
    %cst_341 = arith.constant 0.000000e+00 : f32
    %576 = vector.broadcast %cst_341 : f32 to vector<8x112xf32>
    %577 = arith.maximumf %575, %576 : vector<8x112xf32>
    %578 = arith.truncf %577 : vector<8x112xf32> to vector<8x112xbf16>
    %cst_342 = arith.constant dense<0.000000e+00> : vector<8x224xf32>
    %579 = tpu.matmul %578, %551, %cst_342 {dimension_numbers = #tpu.dot_dimension_numbers<[1], [0], [0], [1], [0, 0, 1, 1], [], []>} : vector<8x112xbf16>, vector<112x224xbf16>, vector<8x224xf32> -> vector<8x224xf32>
    %cst_343 = arith.constant dense<0.000000e+00> : vector<8x224xf32>
    %580 = tpu.matmul %553, %552, %cst_343 {dimension_numbers = #tpu.dot_dimension_numbers<[1], [0], [0], [1], [0, 0, 1, 1], [], []>} : vector<8x96xbf16>, vector<96x224xbf16>, vector<8x224xf32> -> vector<8x224xf32>
    %581 = arith.addf %579, %580 : vector<8x224xf32>
    %cst_344 = arith.constant dense<0.000000e+00> : vector<224xf32>
    %582 = vector.multi_reduction <add>, %581, %cst_344 [0] : vector<8x224xf32> to vector<224xf32>
    %583 = vector.shape_cast %582 : vector<224xf32> to vector<1x224xf32>
    %cst_345 = arith.constant 1.250000e-01 : f32
    %584 = vector.broadcast %cst_345 : f32 to vector<1x224xf32>
    %585 = arith.mulf %583, %584 : vector<1x224xf32>
    %586 = arith.mulf %581, %581 : vector<8x224xf32>
    %cst_346 = arith.constant dense<0.000000e+00> : vector<224xf32>
    %587 = vector.multi_reduction <add>, %586, %cst_346 [0] : vector<8x224xf32> to vector<224xf32>
    %588 = vector.shape_cast %587 : vector<224xf32> to vector<1x224xf32>
    %cst_347 = arith.constant 1.250000e-01 : f32
    %589 = vector.broadcast %cst_347 : f32 to vector<1x224xf32>
    %590 = arith.mulf %588, %589 : vector<1x224xf32>
    %591 = arith.mulf %585, %585 : vector<1x224xf32>
    %592 = arith.subf %590, %591 : vector<1x224xf32>
    %cst_348 = arith.constant 0.000000e+00 : f32
    %593 = vector.broadcast %cst_348 : f32 to vector<1x224xf32>
    %594 = arith.maximumf %592, %593 : vector<1x224xf32>
    %595 = vector.broadcast %585 : vector<1x224xf32> to vector<8x224xf32>
    %596 = arith.subf %581, %595 : vector<8x224xf32>
    %cst_349 = arith.constant 9.99999974E-6 : f32
    %597 = vector.broadcast %cst_349 : f32 to vector<1x224xf32>
    %598 = arith.addf %594, %597 : vector<1x224xf32>
    %599 = math.rsqrt %598 : vector<1x224xf32>
    %600 = vector.broadcast %599 : vector<1x224xf32> to vector<8x224xf32>
    %601 = arith.mulf %596, %600 : vector<8x224xf32>
    %602 = vector.extract_strided_slice %601 {offsets = [0, 0], sizes = [8, 112], strides = [1, 1]} : vector<8x224xf32> to vector<8x112xf32>
    %603 = vector.extract_strided_slice %601 {offsets = [0, 112], sizes = [8, 112], strides = [1, 1]} : vector<8x224xf32> to vector<8x112xf32>
    %604 = arith.addf %602, %603 : vector<8x112xf32>
    %cst_350 = arith.constant 0.000000e+00 : f32
    %605 = vector.broadcast %cst_350 : f32 to vector<8x112xf32>
    %606 = arith.maximumf %604, %605 : vector<8x112xf32>
    %c0_351 = arith.constant 0 : index
    %c0_352 = arith.constant 0 : index
    %607 = vector.load %arg44[%c0_351, %c0_352] : memref<112x128xbf16, #tpu.memory_space<vmem>>, vector<112x128xbf16>
    %c0_353 = arith.constant 0 : index
    %c0_354 = arith.constant 0 : index
    %608 = vector.load %arg45[%c0_353, %c0_354] : memref<128x256xbf16, #tpu.memory_space<vmem>>, vector<128x256xbf16>
    %c0_355 = arith.constant 0 : index
    %c0_356 = arith.constant 0 : index
    %609 = vector.load %arg46[%c0_355, %c0_356] : memref<112x256xbf16, #tpu.memory_space<vmem>>, vector<112x256xbf16>
    %610 = arith.truncf %606 : vector<8x112xf32> to vector<8x112xbf16>
    %cst_357 = arith.constant dense<0.000000e+00> : vector<8x128xf32>
    %611 = tpu.matmul %610, %607, %cst_357 {dimension_numbers = #tpu.dot_dimension_numbers<[1], [0], [0], [1], [0, 0, 1, 1], [], []>} : vector<8x112xbf16>, vector<112x128xbf16>, vector<8x128xf32> -> vector<8x128xf32>
    %cst_358 = arith.constant dense<0.000000e+00> : vector<8x128xf32>
    %612 = tpu.matmul %257, %611, %cst_358 {dimension_numbers = #tpu.dot_dimension_numbers<[1], [0], [0], [1], [0, 0, 1, 1], [], []>} : vector<8x8xf32>, vector<8x128xf32>, vector<8x128xf32> -> vector<8x128xf32>
    %cst_359 = arith.constant dense<0.000000e+00> : vector<128xf32>
    %613 = vector.multi_reduction <add>, %612, %cst_359 [0] : vector<8x128xf32> to vector<128xf32>
    %614 = vector.shape_cast %613 : vector<128xf32> to vector<1x128xf32>
    %cst_360 = arith.constant 1.250000e-01 : f32
    %615 = vector.broadcast %cst_360 : f32 to vector<1x128xf32>
    %616 = arith.mulf %614, %615 : vector<1x128xf32>
    %617 = arith.mulf %612, %612 : vector<8x128xf32>
    %cst_361 = arith.constant dense<0.000000e+00> : vector<128xf32>
    %618 = vector.multi_reduction <add>, %617, %cst_361 [0] : vector<8x128xf32> to vector<128xf32>
    %619 = vector.shape_cast %618 : vector<128xf32> to vector<1x128xf32>
    %cst_362 = arith.constant 1.250000e-01 : f32
    %620 = vector.broadcast %cst_362 : f32 to vector<1x128xf32>
    %621 = arith.mulf %619, %620 : vector<1x128xf32>
    %622 = arith.mulf %616, %616 : vector<1x128xf32>
    %623 = arith.subf %621, %622 : vector<1x128xf32>
    %cst_363 = arith.constant 0.000000e+00 : f32
    %624 = vector.broadcast %cst_363 : f32 to vector<1x128xf32>
    %625 = arith.maximumf %623, %624 : vector<1x128xf32>
    %626 = vector.broadcast %616 : vector<1x128xf32> to vector<8x128xf32>
    %627 = arith.subf %612, %626 : vector<8x128xf32>
    %cst_364 = arith.constant 9.99999974E-6 : f32
    %628 = vector.broadcast %cst_364 : f32 to vector<1x128xf32>
    %629 = arith.addf %625, %628 : vector<1x128xf32>
    %630 = math.rsqrt %629 : vector<1x128xf32>
    %631 = vector.broadcast %630 : vector<1x128xf32> to vector<8x128xf32>
    %632 = arith.mulf %627, %631 : vector<8x128xf32>
    %cst_365 = arith.constant 0.000000e+00 : f32
    %633 = vector.broadcast %cst_365 : f32 to vector<8x128xf32>
    %634 = arith.maximumf %632, %633 : vector<8x128xf32>
    %635 = arith.truncf %634 : vector<8x128xf32> to vector<8x128xbf16>
    %cst_366 = arith.constant dense<0.000000e+00> : vector<8x256xf32>
    %636 = tpu.matmul %635, %608, %cst_366 {dimension_numbers = #tpu.dot_dimension_numbers<[1], [0], [0], [1], [0, 0, 1, 1], [], []>} : vector<8x128xbf16>, vector<128x256xbf16>, vector<8x256xf32> -> vector<8x256xf32>
    %cst_367 = arith.constant dense<0.000000e+00> : vector<8x256xf32>
    %637 = tpu.matmul %610, %609, %cst_367 {dimension_numbers = #tpu.dot_dimension_numbers<[1], [0], [0], [1], [0, 0, 1, 1], [], []>} : vector<8x112xbf16>, vector<112x256xbf16>, vector<8x256xf32> -> vector<8x256xf32>
    %638 = arith.addf %636, %637 : vector<8x256xf32>
    %cst_368 = arith.constant dense<0.000000e+00> : vector<256xf32>
    %639 = vector.multi_reduction <add>, %638, %cst_368 [0] : vector<8x256xf32> to vector<256xf32>
    %640 = vector.shape_cast %639 : vector<256xf32> to vector<1x256xf32>
    %cst_369 = arith.constant 1.250000e-01 : f32
    %641 = vector.broadcast %cst_369 : f32 to vector<1x256xf32>
    %642 = arith.mulf %640, %641 : vector<1x256xf32>
    %643 = arith.mulf %638, %638 : vector<8x256xf32>
    %cst_370 = arith.constant dense<0.000000e+00> : vector<256xf32>
    %644 = vector.multi_reduction <add>, %643, %cst_370 [0] : vector<8x256xf32> to vector<256xf32>
    %645 = vector.shape_cast %644 : vector<256xf32> to vector<1x256xf32>
    %cst_371 = arith.constant 1.250000e-01 : f32
    %646 = vector.broadcast %cst_371 : f32 to vector<1x256xf32>
    %647 = arith.mulf %645, %646 : vector<1x256xf32>
    %648 = arith.mulf %642, %642 : vector<1x256xf32>
    %649 = arith.subf %647, %648 : vector<1x256xf32>
    %cst_372 = arith.constant 0.000000e+00 : f32
    %650 = vector.broadcast %cst_372 : f32 to vector<1x256xf32>
    %651 = arith.maximumf %649, %650 : vector<1x256xf32>
    %652 = vector.broadcast %642 : vector<1x256xf32> to vector<8x256xf32>
    %653 = arith.subf %638, %652 : vector<8x256xf32>
    %cst_373 = arith.constant 9.99999974E-6 : f32
    %654 = vector.broadcast %cst_373 : f32 to vector<1x256xf32>
    %655 = arith.addf %651, %654 : vector<1x256xf32>
    %656 = math.rsqrt %655 : vector<1x256xf32>
    %657 = vector.broadcast %656 : vector<1x256xf32> to vector<8x256xf32>
    %658 = arith.mulf %653, %657 : vector<8x256xf32>
    %659 = vector.extract_strided_slice %658 {offsets = [0, 0], sizes = [8, 128], strides = [1, 1]} : vector<8x256xf32> to vector<8x128xf32>
    %660 = vector.extract_strided_slice %658 {offsets = [0, 128], sizes = [8, 128], strides = [1, 1]} : vector<8x256xf32> to vector<8x128xf32>
    %661 = arith.addf %659, %660 : vector<8x128xf32>
    %cst_374 = arith.constant 0.000000e+00 : f32
    %662 = vector.broadcast %cst_374 : f32 to vector<8x128xf32>
    %663 = arith.maximumf %661, %662 : vector<8x128xf32>
    %c0_375 = arith.constant 0 : index
    %c0_376 = arith.constant 0 : index
    %664 = vector.load %arg47[%c0_375, %c0_376] : memref<128x144xbf16, #tpu.memory_space<vmem>>, vector<128x144xbf16>
    %c0_377 = arith.constant 0 : index
    %c0_378 = arith.constant 0 : index
    %665 = vector.load %arg48[%c0_377, %c0_378] : memref<144x288xbf16, #tpu.memory_space<vmem>>, vector<144x288xbf16>
    %c0_379 = arith.constant 0 : index
    %c0_380 = arith.constant 0 : index
    %666 = vector.load %arg49[%c0_379, %c0_380] : memref<128x288xbf16, #tpu.memory_space<vmem>>, vector<128x288xbf16>
    %667 = arith.truncf %663 : vector<8x128xf32> to vector<8x128xbf16>
    %cst_381 = arith.constant dense<0.000000e+00> : vector<8x144xf32>
    %668 = tpu.matmul %667, %664, %cst_381 {dimension_numbers = #tpu.dot_dimension_numbers<[1], [0], [0], [1], [0, 0, 1, 1], [], []>} : vector<8x128xbf16>, vector<128x144xbf16>, vector<8x144xf32> -> vector<8x144xf32>
    %cst_382 = arith.constant dense<0.000000e+00> : vector<8x144xf32>
    %669 = tpu.matmul %257, %668, %cst_382 {dimension_numbers = #tpu.dot_dimension_numbers<[1], [0], [0], [1], [0, 0, 1, 1], [], []>} : vector<8x8xf32>, vector<8x144xf32>, vector<8x144xf32> -> vector<8x144xf32>
    %cst_383 = arith.constant dense<0.000000e+00> : vector<144xf32>
    %670 = vector.multi_reduction <add>, %669, %cst_383 [0] : vector<8x144xf32> to vector<144xf32>
    %671 = vector.shape_cast %670 : vector<144xf32> to vector<1x144xf32>
    %cst_384 = arith.constant 1.250000e-01 : f32
    %672 = vector.broadcast %cst_384 : f32 to vector<1x144xf32>
    %673 = arith.mulf %671, %672 : vector<1x144xf32>
    %674 = arith.mulf %669, %669 : vector<8x144xf32>
    %cst_385 = arith.constant dense<0.000000e+00> : vector<144xf32>
    %675 = vector.multi_reduction <add>, %674, %cst_385 [0] : vector<8x144xf32> to vector<144xf32>
    %676 = vector.shape_cast %675 : vector<144xf32> to vector<1x144xf32>
    %cst_386 = arith.constant 1.250000e-01 : f32
    %677 = vector.broadcast %cst_386 : f32 to vector<1x144xf32>
    %678 = arith.mulf %676, %677 : vector<1x144xf32>
    %679 = arith.mulf %673, %673 : vector<1x144xf32>
    %680 = arith.subf %678, %679 : vector<1x144xf32>
    %cst_387 = arith.constant 0.000000e+00 : f32
    %681 = vector.broadcast %cst_387 : f32 to vector<1x144xf32>
    %682 = arith.maximumf %680, %681 : vector<1x144xf32>
    %683 = vector.broadcast %673 : vector<1x144xf32> to vector<8x144xf32>
    %684 = arith.subf %669, %683 : vector<8x144xf32>
    %cst_388 = arith.constant 9.99999974E-6 : f32
    %685 = vector.broadcast %cst_388 : f32 to vector<1x144xf32>
    %686 = arith.addf %682, %685 : vector<1x144xf32>
    %687 = math.rsqrt %686 : vector<1x144xf32>
    %688 = vector.broadcast %687 : vector<1x144xf32> to vector<8x144xf32>
    %689 = arith.mulf %684, %688 : vector<8x144xf32>
    %cst_389 = arith.constant 0.000000e+00 : f32
    %690 = vector.broadcast %cst_389 : f32 to vector<8x144xf32>
    %691 = arith.maximumf %689, %690 : vector<8x144xf32>
    %692 = arith.truncf %691 : vector<8x144xf32> to vector<8x144xbf16>
    %cst_390 = arith.constant dense<0.000000e+00> : vector<8x288xf32>
    %693 = tpu.matmul %692, %665, %cst_390 {dimension_numbers = #tpu.dot_dimension_numbers<[1], [0], [0], [1], [0, 0, 1, 1], [], []>} : vector<8x144xbf16>, vector<144x288xbf16>, vector<8x288xf32> -> vector<8x288xf32>
    %cst_391 = arith.constant dense<0.000000e+00> : vector<8x288xf32>
    %694 = tpu.matmul %667, %666, %cst_391 {dimension_numbers = #tpu.dot_dimension_numbers<[1], [0], [0], [1], [0, 0, 1, 1], [], []>} : vector<8x128xbf16>, vector<128x288xbf16>, vector<8x288xf32> -> vector<8x288xf32>
    %695 = arith.addf %693, %694 : vector<8x288xf32>
    %cst_392 = arith.constant dense<0.000000e+00> : vector<288xf32>
    %696 = vector.multi_reduction <add>, %695, %cst_392 [0] : vector<8x288xf32> to vector<288xf32>
    %697 = vector.shape_cast %696 : vector<288xf32> to vector<1x288xf32>
    %cst_393 = arith.constant 1.250000e-01 : f32
    %698 = vector.broadcast %cst_393 : f32 to vector<1x288xf32>
    %699 = arith.mulf %697, %698 : vector<1x288xf32>
    %700 = arith.mulf %695, %695 : vector<8x288xf32>
    %cst_394 = arith.constant dense<0.000000e+00> : vector<288xf32>
    %701 = vector.multi_reduction <add>, %700, %cst_394 [0] : vector<8x288xf32> to vector<288xf32>
    %702 = vector.shape_cast %701 : vector<288xf32> to vector<1x288xf32>
    %cst_395 = arith.constant 1.250000e-01 : f32
    %703 = vector.broadcast %cst_395 : f32 to vector<1x288xf32>
    %704 = arith.mulf %702, %703 : vector<1x288xf32>
    %705 = arith.mulf %699, %699 : vector<1x288xf32>
    %706 = arith.subf %704, %705 : vector<1x288xf32>
    %cst_396 = arith.constant 0.000000e+00 : f32
    %707 = vector.broadcast %cst_396 : f32 to vector<1x288xf32>
    %708 = arith.maximumf %706, %707 : vector<1x288xf32>
    %709 = vector.broadcast %699 : vector<1x288xf32> to vector<8x288xf32>
    %710 = arith.subf %695, %709 : vector<8x288xf32>
    %cst_397 = arith.constant 9.99999974E-6 : f32
    %711 = vector.broadcast %cst_397 : f32 to vector<1x288xf32>
    %712 = arith.addf %708, %711 : vector<1x288xf32>
    %713 = math.rsqrt %712 : vector<1x288xf32>
    %714 = vector.broadcast %713 : vector<1x288xf32> to vector<8x288xf32>
    %715 = arith.mulf %710, %714 : vector<8x288xf32>
    %716 = vector.extract_strided_slice %715 {offsets = [0, 0], sizes = [8, 144], strides = [1, 1]} : vector<8x288xf32> to vector<8x144xf32>
    %717 = vector.extract_strided_slice %715 {offsets = [0, 144], sizes = [8, 144], strides = [1, 1]} : vector<8x288xf32> to vector<8x144xf32>
    %718 = arith.addf %716, %717 : vector<8x144xf32>
    %c0_398 = arith.constant 0 : index
    %c0_399 = arith.constant 0 : index
    %719 = vector.load %arg50[%c0_398, %c0_399] : memref<8x144xf32, #tpu.memory_space<vmem>>, vector<8x144xf32>
    tpu.vector_store %arg50[%c0_398, %c0_399], %718 {strides = array<i32>} : memref<8x144xf32, #tpu.memory_space<vmem>>, vector<8x144xf32>,
    return
  }
}

</mosaic_0001>

<bundles_post_ra>
// kernel: encoder_ife_forward.1
= control target key start
LH: loop header
LB: loop body
LE: loop exit
PB: predicated region body
PF: predicated region fallthrough
CT: control target
= control target key end

     0   :  { %s10866_s6 = smov 1   ;;  %s10867_s10 = smov 2   ;;  %s12588_s0 = inlined_call_operand.smem [shape: u32[51], index: -1, kind: input, shape index: {}] }
   0x1   :  { %s10937_s5 = sld [smem:[%s12588_s0]]   ;;  %s10868_s14 = smov 3  }
   0x2   :  { %s10942_s9 = sld [smem:[%s12588_s0 + %s10866_s6]]   ;;  %s10869_s18 = smov 4  }
   0x3   :  { %s10947_s13 = sld [smem:[%s12588_s0 + %s10867_s10]]   ;;  %s10870_s22 = smov 5  }
   0x4   :  { %s10952_s17 = sld [smem:[%s12588_s0 + %s10868_s14]]   ;;  %s10871_s26 = smov 6  }
   0x5   :  { %s10957_s21 = sld [smem:[%s12588_s0 + %s10869_s18]]   ;;  %s10872_s30 = smov 7  }
   0x6   :  { %s10962_s25 = sld [smem:[%s12588_s0 + %s10870_s22]]   ;;  %s10873_s4 = smov 8  }
   0x7   :  { %s10967_s29 = sld [smem:[%s12588_s0 + %s10871_s26]]   ;;  %s10874_s10 = smov 9  }
   0x8   :  { %12622 = sst [smem:[#allocation8_spill]] %s10942_s9  ;;  %s10875_s15 = smov 10  }
   0x9   :  { %s10972_s3 = sld [smem:[%s12588_s0 + %s10872_s30]]   ;;  %s10876_s20 = smov 11  }
   0xa   :  { %s10977_s8 = sld [smem:[%s12588_s0 + %s10873_s4]]   ;;  %s10877_s26 = smov 12  }
   0xb   :  { %s10982_s14 = sld [smem:[%s12588_s0 + %s10874_s10]]   ;;  %s10878_s1 = smov 13  }
   0xc   :  { %s10987_s19 = sld [smem:[%s12588_s0 + %s10875_s15]]   ;;  %s10879_s7 = smov 14  }
   0xd   :  { %s10992_s24 = sld [smem:[%s12588_s0 + %s10876_s20]]   ;;  %s10880_s15 = smov 15  }
   0xe   :  { %s10997_s30 = sld [smem:[%s12588_s0 + %s10877_s26]]   ;;  %s10881_s22 = smov 16  }
   0xf   :  { %s11002_s6 = sld [smem:[%s12588_s0 + %s10878_s1]]   ;;  %s10882_s28 = smov 17  }
  0x10   :  { %s11007_s12 = sld [smem:[%s12588_s0 + %s10879_s7]]   ;;  %s10883_s7 = smov 18  }
  0x11   :  { %s11012_s20 = sld [smem:[%s12588_s0 + %s10880_s15]]   ;;  %s10884_s15 = smov 19  }
  0x12   :  { %12623 = sst [smem:[#allocation9_spill]] %s10987_s19 }
  0x13   :  { %s11017_s27 = sld [smem:[%s12588_s0 + %s10881_s22]]   ;;  %s10885_s22 = smov 20  }
  0x14   :  { %12624 = sst [smem:[#allocation10_spill]] %s10997_s30 }
  0x15   :  { %12625 = sst [smem:[#allocation11_spill]] %s11002_s6 }
  0x16   :  { %12626 = sst [smem:[#allocation12_spill]] %s11007_s12 }
  0x17   :  { %12627 = sst [smem:[#allocation13_spill]] %s11012_s20 }
  0x18   :  { %s11022_s4 = sld [smem:[%s12588_s0 + %s10882_s28]]   ;;  %s10886_s28 = smov 21  }
  0x19   :  { %s11027_s9 = sld [smem:[%s12588_s0 + %s10883_s7]]   ;;  %s10887_s7 = smov 22  }
  0x1a   :  { %s11032_s20 = sld [smem:[%s12588_s0 + %s10884_s15]]   ;;  %s10888_s15 = smov 23  }
  0x1b   :  { %s11037_s6 = sld [smem:[%s12588_s0 + %s10885_s22]]   ;;  %s10889_s22 = smov 24  }
  0x1c   :  { %s11042_s12 = sld [smem:[%s12588_s0 + %s10886_s28]]   ;;  %s10890_s28 = smov 25  }
  0x1d   :  { %s11057_s30 = sld [smem:[%s12588_s0 + %s10889_s22]]   ;;  %s10893_s22 = smov 28  }
  0x1e   :  { %s11062_s19 = sld [smem:[%s12588_s0 + %s10890_s28]]   ;;  %s10894_s28 = smov 29  }
  0x1f   :  { %12628 = sst [smem:[#allocation14_spill]] %s11027_s9 }
  0x20   :  { %12629 = sst [smem:[#allocation15_spill]] %s11032_s20 }
  0x21   :  { %s11047_s9 = sld [smem:[%s12588_s0 + %s10887_s7]]   ;;  %s10891_s7 = smov 26  }
  0x22   :  { %s11052_s20 = sld [smem:[%s12588_s0 + %s10888_s15]]   ;;  %s10892_s15 = smov 27  }
  0x23   :  { %12632 = sst [smem:[#allocation18_spill]] %s11057_s30 }
  0x24   :  { %12633 = sst [smem:[#allocation19_spill]] %s11062_s19 }
  0x25   :  { %s11077_s30 = sld [smem:[%s12588_s0 + %s10893_s22]]   ;;  %s10897_s22 = smov 32  }
  0x26   :  { %s11082_s19 = sld [smem:[%s12588_s0 + %s10894_s28]]   ;;  %s10898_s28 = smov 33  }
  0x27   :  { %12630 = sst [smem:[#allocation16_spill]] %s11047_s9 }
  0x28   :  { %12631 = sst [smem:[#allocation17_spill]] %s11052_s20 }
  0x29   :  { %s11067_s9 = sld [smem:[%s12588_s0 + %s10891_s7]]   ;;  %s10895_s7 = smov 30  }
  0x2a   :  { %s11072_s20 = sld [smem:[%s12588_s0 + %s10892_s15]]   ;;  %s10896_s15 = smov 31  }
  0x2b   :  { %12636 = sst [smem:[#allocation22_spill]] %s11077_s30 }
  0x2c   :  { %12637 = sst [smem:[#allocation23_spill]] %s11082_s19 }
  0x2d   :  { %s11097_s30 = sld [smem:[%s12588_s0 + %s10897_s22]]   ;;  %s10901_s22 = smov 36  }
  0x2e   :  { %s11102_s19 = sld [smem:[%s12588_s0 + %s10898_s28]]   ;;  %s10902_s28 = smov 37  }
  0x2f   :  { %12634 = sst [smem:[#allocation20_spill]] %s11067_s9 }
  0x30   :  { %12635 = sst [smem:[#allocation21_spill]] %s11072_s20 }
  0x31   :  { %s11087_s9 = sld [smem:[%s12588_s0 + %s10895_s7]]   ;;  %s10899_s7 = smov 34  }
  0x32   :  { %s11092_s20 = sld [smem:[%s12588_s0 + %s10896_s15]]   ;;  %s10900_s15 = smov 35  }
  0x33   :  { %12640 = sst [smem:[#allocation26_spill]] %s11097_s30 }
  0x34   :  { %12641 = sst [smem:[#allocation27_spill]] %s11102_s19 }
  0x35   :  { %s11117_s30 = sld [smem:[%s12588_s0 + %s10901_s22]]   ;;  %s10905_s22 = smov 40  }
  0x36   :  { %s11122_s19 = sld [smem:[%s12588_s0 + %s10902_s28]]   ;;  %s10906_s28 = smov 41  }
  0x37   :  { %12638 = sst [smem:[#allocation24_spill]] %s11087_s9 }
  0x38   :  { %12639 = sst [smem:[#allocation25_spill]] %s11092_s20 }
  0x39   :  { %s11107_s9 = sld [smem:[%s12588_s0 + %s10899_s7]]   ;;  %s10903_s7 = smov 38  }
  0x3a   :  { %s11112_s20 = sld [smem:[%s12588_s0 + %s10900_s15]]   ;;  %s10904_s15 = smov 39  }
  0x3b   :  { %12644 = sst [smem:[#allocation30_spill]] %s11117_s30 }
  0x3c   :  { %12645 = sst [smem:[#allocation31_spill]] %s11122_s19 }
  0x3d   :  { %s11137_s30 = sld [smem:[%s12588_s0 + %s10905_s22]]   ;;  %s10909_s22 = smov 44  }
  0x3e   :  { %s11142_s19 = sld [smem:[%s12588_s0 + %s10906_s28]]   ;;  %s10910_s28 = smov 45  }
  0x3f   :  { %12642 = sst [smem:[#allocation28_spill]] %s11107_s9 }
  0x40   :  { %12643 = sst [smem:[#allocation29_spill]] %s11112_s20 }
  0x41   :  { %s11127_s9 = sld [smem:[%s12588_s0 + %s10903_s7]]   ;;  %s10907_s7 = smov 42  }
  0x42   :  { %s11132_s20 = sld [smem:[%s12588_s0 + %s10904_s15]]   ;;  %s10908_s15 = smov 43  }
  0x43   :  { %12648 = sst [smem:[#allocation34_spill]] %s11137_s30 }
  0x44   :  { %12649 = sst [smem:[#allocation35_spill]] %s11142_s19 }
  0x45   :  { %s11157_s30 = sld [smem:[%s12588_s0 + %s10909_s22]]   ;;  %s10913_s22 = smov 48  }
  0x46   :  { %s11162_s19 = sld [smem:[%s12588_s0 + %s10910_s28]]   ;;  %s10914_s28 = smov 49  }
  0x47   :  { %12646 = sst [smem:[#allocation32_spill]] %s11127_s9 }
  0x48   :  { %12647 = sst [smem:[#allocation33_spill]] %s11132_s20 }
  0x49   :  { %s11147_s9 = sld [smem:[%s12588_s0 + %s10907_s7]]   ;;  %s10911_s7 = smov 46  }
  0x4a   :  { %s11152_s20 = sld [smem:[%s12588_s0 + %s10908_s15]]   ;;  %s10912_s15 = smov 47  }
  0x4b   :  { %12652 = sst [smem:[#allocation38_spill]] %s11157_s30 }
  0x4c   :  { %12653 = sst [smem:[#allocation39_spill]] %s11162_s19 }
  0x4d   :  { %s11177_s30 = sld [smem:[%s12588_s0 + %s10913_s22]]  }
  0x4e   :  { %s11182_s19 = sld [smem:[%s12588_s0 + %s10914_s28]]  }
  0x4f   :  { %12650 = sst [smem:[#allocation36_spill]] %s11147_s9 }
  0x50   :  { %12651 = sst [smem:[#allocation37_spill]] %s11152_s20 }
  0x51   :  { %s11167_s9 = sld [smem:[%s12588_s0 + %s10911_s7]]   ;;  %s10915_s7 = smov 50  }
  0x52   :  { %s11172_s20 = sld [smem:[%s12588_s0 + %s10912_s15]]  }
  0x57   :  { %12654 = sst [smem:[#allocation40_spill]] %s11167_s9 }
  0x58   :  { %s11187_s9 = sld [smem:[%s12588_s0 + %s10915_s7]]  }
  0x59   :  { %v10187_v0 = vld [vmem:[%s10962_s25 + $0x4] ss:$8 sps:$4 sm:$0xff]   ;;  %v10189_v1 = vld [vmem:[%s10962_s25] ss:$8 sps:$4 sm:$0xff]   ;;  %v10190_v2 = vld [vmem:[%s10962_s25 + $0x14] ss:$8 sps:$4 sm:$0xff]  }
  0x5a   :  { %485 = vmatprep.subr.bf16.mxu1 %v10187_v0  ;;  %v10192_v3 = vld [vmem:[%s10962_s25 + $0x10] ss:$8 sps:$4 sm:$0xff]   ;;  %v10193_v4 = vld [vmem:[%s10962_s25 + $0x24] ss:$8 sps:$4 sm:$0xff]   ;;  %v10195_v5 = vld [vmem:[%s10962_s25 + $0x20] ss:$8 sps:$4 sm:$0xff]  }
  0x5b   :  { %486 = vmatpush1.bf16.msra.mxu1 %v10189_v1  ;;  %v10916_v6 = vmov 0.0   ;;  %v10196_v7 = vld [vmem:[%s10962_s25 + $0x34] ss:$8 sps:$4 sm:$0xff]   ;;  %vm10917_vm0 = vmmov 0   ;;  %v10198_v8 = vld [vmem:[%s10962_s25 + $0x30] ss:$8 sps:$4 sm:$0xff]  }
  0x5c   :  { %487 = vmatprep.subr.bf16.mxu1 %v10190_v2  ;;  %9289 = vmatprep.subr.bf16.mxu0 %v10916_v6  ;;  %v10199_v9 = vld [vmem:[%s10962_s25 + $0x44] ss:$8 sps:$4 sm:$0xff]   ;;  %v341_v10 = vld [vmem:[%s10947_s13 + $0x18] sm:$0xff]  ;;  %vm472_vm1 = vcmask 130048   ;;  %v10201_v13 = vld [vmem:[%s10962_s25 + $0x40] ss:$8 sps:$4 sm:$0xff]  }
  0x5d   :  { %9291 = vmatprep.mubr.msk.bf16.mxu0 %vm10917_vm0, %v10916_v6  ;;  %v343_v11 = vld [vmem:[%s10947_s13 + $0x38] sm:$0xff]  ;;  %v10205_v16 = vld [vmem:[%s10962_s25 + $0x64] ss:$8 sps:$4 sm:$0xff]   ;;  %v10207_v17 = vld [vmem:[%s10962_s25 + $0x60] ss:$8 sps:$4 sm:$0xff]   ;;  %vm215_vm2 = vcmask 1040384  }
  0x5e   :  { %v357_v12 = vpack.c.bf16 %v343_v11, %v341_v10  ;;  %v10202_v14 = vld [vmem:[%s10962_s25 + $0x54] ss:$8 sps:$4 sm:$0xff]   ;;  %v10204_v15 = vld [vmem:[%s10962_s25 + $0x50] ss:$8 sps:$4 sm:$0xff]   ;;  %v10211_v20 = vld [vmem:[%s10962_s25 + $0x84] ss:$8 sps:$4 sm:$0xff]  }
  0x5f   :  { %488 = vmatpush1.bf16.msra.mxu1 %v10192_v3  ;;  %v10208_v18 = vld [vmem:[%s10962_s25 + $0x74] ss:$8 sps:$4 sm:$0xff]   ;;  %v10210_v19 = vld [vmem:[%s10962_s25 + $0x70] ss:$8 sps:$4 sm:$0xff]   ;;  %v10213_v21 = vld [vmem:[%s10962_s25 + $0x80] ss:$8 sps:$4 sm:$0xff]  }
  0x60   :  { %489 = vmatprep.subr.bf16.mxu1 %v10193_v4  ;;  %8377 = vmatprep.mubr.msk.bf16.mxu1 %vm472_vm1, %v357_v12  ;;  %v10216_v22 = vld [vmem:[%s10957_s21 + $0x4] ss:$8 sps:$4 sm:$0xff]   ;;  %v340_v23 = vld [vmem:[%s10947_s13 + $0x10] sm:$0xff]  ;;  %v345_v25 = vld [vmem:[%s10947_s13 + $0x58] sm:$0xff]  ;;  %vm216_vm3 = vcmask 1041408   ;;  %v10918_v38 = vmov 65535  }
  0x61   :  { %v342_v24 = vld [vmem:[%s10947_s13 + $0x30] sm:$0xff]  ;;  %v347_v26 = vld [vmem:[%s10947_s13 + $0x78] sm:$0xff]  ;;  %v10214_v28 = vld [vmem:[%s10957_s21] ss:$8 sps:$4 sm:$0xff]   ;;  %v217_v39 = vsel %vm215_vm2, 4294967295, %v10918_v38  ;;  %vm211_vm4 = vcmask 23552  }
  0x62   :  { %v356_v27 = vpack.c.bf16 %v342_v24, %v340_v23  ;;  %v359_v29 = vpack.c.bf16 %v347_v26, %v345_v25  ;;  %v10219_v30 = vld [vmem:[%s10957_s21 + $0x14] ss:$8 sps:$4 sm:$0xff]   ;;  %v10217_v31 = vld [vmem:[%s10957_s21 + $0x10] ss:$8 sps:$4 sm:$0xff]   ;;  %v10222_v32 = vld [vmem:[%s10957_s21 + $0x24] ss:$8 sps:$4 sm:$0xff]  }
  0x63   :  { %490 = vmatpush1.bf16.msra.mxu1 %v10195_v5  ;;  %v344_v33 = vld [vmem:[%s10947_s13 + $0x50] sm:$0xff]  ;;  %v349_v35 = vld [vmem:[%s10947_s13 + $0x98] sm:$0xff]  ;;  %v10220_v40 = vld [vmem:[%s10957_s21 + $0x20] ss:$8 sps:$4 sm:$0xff]   ;;  %v218_v44 = vsel %vm216_vm3, %v217_v39, 0 }
  0x64   :  { %491 = vmatprep.subr.bf16.mxu1 %v10196_v7  ;;  %v346_v34 = vld [vmem:[%s10947_s13 + $0x70] sm:$0xff]  ;;  %v351_v36 = vld [vmem:[%s10947_s13 + $0xb8] sm:$0xff]  ;;  %v10228_v45 = vld [vmem:[%s10957_s21 + $0x44] ss:$8 sps:$4 sm:$0xff]  }
  0x65   :  { %v358_v37 = vpack.c.bf16 %v346_v34, %v344_v33  ;;  %v361_v41 = vpack.c.bf16 %v351_v36, %v349_v35  ;;  %v10225_v42 = vld [vmem:[%s10957_s21 + $0x34] ss:$8 sps:$4 sm:$0xff]   ;;  %v10223_v43 = vld [vmem:[%s10957_s21 + $0x30] ss:$8 sps:$4 sm:$0xff]   ;;  %v210_v50 = vld [vmem:[%s10952_s17] sm:$0x3] }
  0x66   :  { %v348_v46 = vld [vmem:[%s10947_s13 + $0x90] sm:$0xff]  ;;  %v353_v48 = vld [vmem:[%s10947_s13 + $0xd8] sm:$0xff]  ;;  %v208_v51 = vld [vmem:[%s10937_s5] sm:$0xff]  ;;  %v220_v52 = vand.u32 %v218_v44, %v210_v50 }
  0x67   :  { %492 = vmatpush1.bf16.msra.mxu1 %v10198_v8  ;;  %v350_v47 = vld [vmem:[%s10947_s13 + $0xb0] sm:$0xff]  ;;  %v355_v49 = vld [vmem:[%s10947_s13 + $0xf8] sm:$0xff]  ;;  %v10226_v53 = vld [vmem:[%s10957_s21 + $0x40] ss:$8 sps:$4 sm:$0xff]   ;;  %v209_v54 = vpack.c.bf16 %v208_v51, %v208_v51 }
  0x68   :  { %493 = vmatprep.subr.bf16.mxu1 %v10199_v9  ;;  %v10231_v55 = vld [vmem:[%s10957_s21 + $0x54] ss:$8 sps:$4 sm:$0xff]   ;;  %v360_v56 = vpack.c.bf16 %v350_v47, %v348_v46  ;;  %9290 = vmatpush3.bf16.msra.mxu0 %v220_v52  ;;  %v363_v57 = vpack.c.bf16 %v355_v49, %v353_v48  ;;  %v10229_v58 = vld [vmem:[%s10957_s21 + $0x50] ss:$8 sps:$4 sm:$0xff]   ;;  %v10234_v61 = vld [vmem:[%s10957_s21 + $0x64] ss:$8 sps:$4 sm:$0xff]  }
  0x69   :  { %v352_v59 = vld [vmem:[%s10947_s13 + $0xd0] sm:$0xff]  ;;  %v299_v62 = vld [vmem:[%s10947_s13 + $0x8] sm:$0xff]  ;;  %v298_v8 = vld [vmem:[%s10947_s13] sm:$0xff] }
  0x6a   :  { %v354_v60 = vld [vmem:[%s10947_s13 + $0xf0] sm:$0xff]  ;;  %v11246_v63 = vld [vmem:[%s10947_s13 + $0x28] sm:$0xff]  ;;  %v11258_v9 = vld [vmem:[%s10947_s13 + $0x20] sm:$0xff] }
  0x6b   :  { %494 = vmatpush1.bf16.msra.mxu1 %v10201_v13  ;;  %9292 = vmatmul.mubr.msk.bf16.vlgmr.msra.gmra.mrb[0].mxu0 %vm211_vm4, %v209_v54  ;;  %v10232_v0 = vld [vmem:[%s10957_s21 + $0x60] ss:$8 sps:$4 sm:$0xff]   ;;  %v10237_v1 = vld [vmem:[%s10957_s21 + $0x74] ss:$8 sps:$4 sm:$0xff]   ;;  %v362_v2 = vpack.c.bf16 %v354_v60, %v352_v59  ;;  %v315_v3 = vpack.c.bf16 %v11246_v63, %v299_v62  ;;  %v10235_v4 = vld [vmem:[%s10957_s21 + $0x70] ss:$8 sps:$4 sm:$0xff]  }
  0x6c   :  { %495 = vmatprep.subr.bf16.mxu1 %v10202_v14  ;;  %v10240_v5 = vld [vmem:[%s10957_s21 + $0x84] ss:$8 sps:$4 sm:$0xff]   ;;  %v10238_v7 = vld [vmem:[%s10957_s21 + $0x80] ss:$8 sps:$4 sm:$0xff]   ;;  %v314_v14 = vpack.c.bf16 %v11258_v9, %v298_v8  ;;  %v10252_v25 = vld [vmem:[%s10967_s29 + $0x34] ss:$8 sps:$4 sm:$0xff]  }
  0x6d   :  { %v10243_v10 = vld [vmem:[%s10967_s29 + $0x4] ss:$8 sps:$4 sm:$0xff]   ;;  %v10241_v13 = vld [vmem:[%s10967_s29] ss:$8 sps:$4 sm:$0xff]   ;;  %v10258_v35 = vld [vmem:[%s10967_s29 + $0x54] ss:$8 sps:$4 sm:$0xff]  }
  0x6e   :  { %v303_v11 = vld [vmem:[%s10947_s13 + $0x48] sm:$0xff]  ;;  %v310_v38 = vld [vmem:[%s10947_s13 + $0xc0] sm:$0xff] }
  0x6f   :  { %496 = vmatpush1.bf16.msra.mxu1 %v10204_v15  ;;  %v11263_v12 = vld [vmem:[%s10947_s13 + $0x68] sm:$0xff]  ;;  %v10246_v15 = vld [vmem:[%s10967_s29 + $0x14] ss:$8 sps:$4 sm:$0xff]   ;;  %v312_v39 = vld [vmem:[%s10947_s13 + $0xe0] sm:$0xff]  ;;  %v736_v44 = vpack.c.bf16 %v303_v11, %v11246_v63 }
  0x70   :  { %497 = vmatprep.subr.bf16.mxu1 %v10205_v16  ;;  %v317_v16 = vpack.c.bf16 %v11263_v12, %v303_v11  ;;  %v10247_v23 = vld [vmem:[%s10967_s29 + $0x20] ss:$8 sps:$4 sm:$0xff]   ;;  %v10267_v46 = vld [vmem:[%s10967_s29 + $0x84] ss:$8 sps:$4 sm:$0xff]   ;;  %v1038_v63 = vld [vmem:[%s11017_s27 + $0x90] sm:$0xff] }
  0x71   :  { %v10253_v33 = vld [vmem:[%s10967_s29 + $0x40] ss:$8 sps:$4 sm:$0xff]  }
  0x72   :  { %v10265_v47 = vld [vmem:[%s10967_s29 + $0x80] ss:$8 sps:$4 sm:$0xff]  }
  0x73   :  { %498 = vmatpush1.bf16.msra.mxu1 %v10207_v17  ;;  %v10244_v17 = vld [vmem:[%s10967_s29 + $0x10] ss:$8 sps:$4 sm:$0xff]   ;;  %v734_v52 = vld [vmem:[%s10947_s13 + $0x108] sm:$0xff]  ;;  %v1020_v60 = vld [vmem:[%s11017_s27] sm:$0xff] }
  0x74   :  { %499 = vmatprep.subr.bf16.mxu1 %v10208_v18  ;;  %v302_v18 = vld [vmem:[%s10947_s13 + $0x40] sm:$0xff] }
  0x75   :  { %v735_v48 = vpack.c.bf16 %v302_v18, %v11258_v9  ;;  %v1024_v9 = vld [vmem:[%s11017_s27 + $0x20] sm:$0xff] }
  0x77   :  { %500 = vmatpush1.bf16.msra.mxu1 %v10210_v19  ;;  %v304_v19 = vld [vmem:[%s10947_s13 + $0x60] sm:$0xff] }
  0x78   :  { %501 = vmatprep.subr.bf16.mxu1 %v10211_v20  ;;  %v10249_v20 = vld [vmem:[%s10967_s29 + $0x24] ss:$8 sps:$4 sm:$0xff]   ;;  %v316_v24 = vpack.c.bf16 %v304_v19, %v302_v18 }
  0x79   :  { %v1044_v18 = vld [vmem:[%s11017_s27 + $0xc0] sm:$0xff] }
  0x7b   :  { %502 = vmatpush1.bf16.msra.mxu1 %v10213_v21  ;;  %v307_v21 = vld [vmem:[%s10947_s13 + $0x88] sm:$0xff] }
  0x7c   :  { %660 = vmatprep.subr.bf16.mxu1 %v10216_v22  ;;  %v309_v22 = vld [vmem:[%s10947_s13 + $0xa8] sm:$0xff]  ;;  %v738_v49 = vpack.c.bf16 %v307_v21, %v11263_v12  ;;  %v1042_v12 = vld [vmem:[%s11017_s27 + $0xb0] sm:$0xff] }
  0x7d   :  { %v319_v26 = vpack.c.bf16 %v309_v22, %v307_v21  ;;  %v1028_v21 = vld [vmem:[%s11017_s27 + $0x40] sm:$0xff] }
  0x7e   :  { %518 = vmatmul.mubr.bf16.vlgmr.msra.gmra.mrb[0].mxu1 %v356_v27  ;;  %v10250_v27 = vld [vmem:[%s10967_s29 + $0x30] ss:$8 sps:$4 sm:$0xff]  }
  0x7f   :  { %661 = vmatpush1.bf16.msra.mxu1 %v10214_v28  ;;  %8378 = vmatprep.mubr.msk.bf16.mxu1 %vm472_vm1, %v359_v29  ;;  %v306_v28 = vld [vmem:[%s10947_s13 + $0x80] sm:$0xff] }
  0x80   :  { %662 = vmatprep.subr.bf16.mxu1 %v10219_v30  ;;  %v308_v29 = vld [vmem:[%s10947_s13 + $0xa0] sm:$0xff]  ;;  %v737_v50 = vpack.c.bf16 %v306_v28, %v304_v19  ;;  %v1045_v19 = vld [vmem:[%s11017_s27 + $0xc8] sm:$0xff] }
  0x81   :  { %v10255_v30 = vld [vmem:[%s10967_s29 + $0x44] ss:$8 sps:$4 sm:$0xff]   ;;  %v318_v34 = vpack.c.bf16 %v308_v29, %v306_v28  ;;  %v1031_v28 = vld [vmem:[%s11017_s27 + $0x58] sm:$0xff] }
  0x83   :  { %663 = vmatpush1.bf16.msra.mxu1 %v10217_v31  ;;  %v311_v31 = vld [vmem:[%s10947_s13 + $0xc8] sm:$0xff] }
  0x84   :  { %664 = vmatprep.subr.bf16.mxu1 %v10222_v32  ;;  %v313_v32 = vld [vmem:[%s10947_s13 + $0xe8] sm:$0xff]  ;;  %v740_v51 = vpack.c.bf16 %v311_v31, %v309_v22 }
  0x85   :  { %v321_v36 = vpack.c.bf16 %v313_v32, %v311_v31  ;;  %v742_v54 = vpack.c.bf16 %v734_v52, %v313_v32  ;;  %v1029_v22 = vld [vmem:[%s11017_s27 + $0x48] sm:$0xff] }
  0x86   :  { %528 = vmatmul.mubr.bf16.gmra.mrb[4].mxu1 %v358_v37  ;;  %v10256_v37 = vld [vmem:[%s10967_s29 + $0x50] ss:$8 sps:$4 sm:$0xff]   ;;  %v1049_v31 = vld [vmem:[%s11017_s27 + $0xe8] sm:$0xff] }
  0x87   :  { %665 = vmatpush1.bf16.msra.mxu1 %v10220_v40  ;;  %8379 = vmatprep.mubr.msk.bf16.mxu1 %vm472_vm1, %v361_v41  ;;  %v10261_v40 = vld [vmem:[%s10967_s29 + $0x64] ss:$8 sps:$4 sm:$0xff]   ;;  %v10259_v41 = vld [vmem:[%s10967_s29 + $0x60] ss:$8 sps:$4 sm:$0xff]  }
  0x88   :  { %666 = vmatprep.subr.bf16.mxu1 %v10225_v42  ;;  %v320_v42 = vpack.c.bf16 %v312_v39, %v310_v38 }
  0x8b   :  { %667 = vmatpush1.bf16.msra.mxu1 %v10223_v43  ;;  %v10264_v43 = vld [vmem:[%s10967_s29 + $0x74] ss:$8 sps:$4 sm:$0xff]  }
  0x8c   :  { %668 = vmatprep.subr.bf16.mxu1 %v10228_v45  ;;  %v10262_v45 = vld [vmem:[%s10967_s29 + $0x70] ss:$8 sps:$4 sm:$0xff]  }
  0x8e   :  { %538 = vmatmul.mubr.bf16.gmra.mrb[8].mxu1 %v360_v56 }
  0x8f   :  { %669 = vmatpush1.bf16.msra.mxu1 %v10226_v53  ;;  %8380 = vmatprep.mubr.msk.bf16.mxu1 %vm472_vm1, %v363_v57  ;;  %v739_v53 = vpack.c.bf16 %v310_v38, %v308_v29  ;;  %v1036_v57 = vld [vmem:[%s11017_s27 + $0x80] sm:$0xff]  ;;  %v1034_v38 = vld [vmem:[%s11017_s27 + $0x70] sm:$0xff] }
  0x90   :  { %670 = vmatprep.subr.bf16.mxu1 %v10231_v55  ;;  %v733_v55 = vld [vmem:[%s10947_s13 + $0x100] sm:$0xff] }
  0x91   :  { %v741_v56 = vpack.c.bf16 %v733_v55, %v312_v39 }
  0x93   :  { %671 = vmatpush1.bf16.msra.mxu1 %v10229_v58  ;;  %v1037_v58 = vld [vmem:[%s11017_s27 + $0x88] sm:$0xff] }
  0x94   :  { %672 = vmatprep.subr.bf16.mxu1 %v10234_v61  ;;  %v9752_v59 = vpack.c.bf16 %v1037_v58, %v1036_v57  ;;  %v1021_v61 = vld [vmem:[%s11017_s27 + $0x8] sm:$0xff] }
  0x95   :  { %v11310_v62 = vpack.c.bf16 %v1021_v61, %v1020_v60 }
  0x96   :  { %548 = vmatmul.mubr.bf16.gmra.mrb[12].mxu1 %v362_v2  ;;  %9753 = vmatprep.subr.bf16.mxu0 %v9752_v59  ;;  %v1022_v2 = vld [vmem:[%s11017_s27 + $0x10] sm:$0xff] }
  0x97   :  { %673 = vmatpush1.bf16.msra.mxu1 %v10232_v0  ;;  %8399 = vmatprep.mubr.msk.bf16.mxu1 %vm472_vm1, %v315_v3  ;;  %v1039_v0 = vld [vmem:[%s11017_s27 + $0x98] sm:$0xff] }
  0x98   :  { %674 = vmatprep.subr.bf16.mxu1 %v10237_v1  ;;  %9755 = vmatpush3.bf16.msra.mxu0 %v11310_v62  ;;  %v11315_v1 = vpack.c.bf16 %v1039_v0, %v1038_v63  ;;  %v1023_v3 = vld [vmem:[%s11017_s27 + $0x18] sm:$0xff] }
  0x9a   :  { %9757 = vmatprep.subr.bf16.mxu0 %v11315_v1 }
  0x9b   :  { %675 = vmatpush1.bf16.msra.mxu1 %v10235_v4  ;;  %v11319_v4 = vpack.c.bf16 %v1023_v3, %v1022_v2 }
  0x9c   :  { %676 = vmatprep.subr.bf16.mxu1 %v10240_v5  ;;  %v1040_v5 = vld [vmem:[%s11017_s27 + $0xa0] sm:$0xff] }
  0x9d   :  { %9759 = vmatpush3.bf16.msra.mxu0 %v11319_v4 }
  0x9f   :  { %677 = vmatpush1.bf16.msra.mxu1 %v10238_v7  ;;  %v1041_v7 = vld [vmem:[%s11017_s27 + $0xa8] sm:$0xff] }
  0xa0   :  { %863 = vmatprep.subr.bf16.mxu1 %v10243_v10  ;;  %v11325_v8 = vpack.c.bf16 %v1041_v7, %v1040_v5  ;;  %v1025_v10 = vld [vmem:[%s11017_s27 + $0x28] sm:$0xff] }
  0xa1   :  { %v11329_v11 = vpack.c.bf16 %v1025_v10, %v1024_v9 }
  0xa2   :  { %693 = vmatmul.mubr.bf16.vlgmr.msra.gmra.mrb[0].mxu1 %v314_v14  ;;  %9761 = vmatprep.subr.bf16.mxu0 %v11325_v8 }
  0xa3   :  { %864 = vmatpush1.bf16.msra.mxu1 %v10241_v13  ;;  %8400 = vmatprep.mubr.msk.bf16.mxu1 %vm472_vm1, %v317_v16  ;;  %v1043_v13 = vld [vmem:[%s11017_s27 + $0xb8] sm:$0xff] }
  0xa4   :  { %865 = vmatprep.subr.bf16.mxu1 %v10246_v15  ;;  %9763 = vmatpush3.bf16.msra.mxu0 %v11329_v11  ;;  %v11335_v14 = vpack.c.bf16 %v1043_v13, %v1042_v12  ;;  %v1026_v15 = vld [vmem:[%s11017_s27 + $0x30] sm:$0xff]  ;;  %v1027_v16 = vld [vmem:[%s11017_s27 + $0x38] sm:$0xff] }
  0xa6   :  { %9765 = vmatprep.subr.bf16.mxu0 %v11335_v14 }
  0xa7   :  { %866 = vmatpush1.bf16.msra.mxu1 %v10244_v17  ;;  %v11339_v17 = vpack.c.bf16 %v1027_v16, %v1026_v15 }
  0xa8   :  { %867 = vmatprep.subr.bf16.mxu1 %v10249_v20  ;;  %v11345_v20 = vpack.c.bf16 %v1045_v19, %v1044_v18 }
  0xa9   :  { %9767 = vmatpush3.bf16.msra.mxu0 %v11339_v17 }
  0xaa   :  { %703 = vmatmul.mubr.bf16.gmra.mrb[4].mxu1 %v316_v24  ;;  %9769 = vmatprep.subr.bf16.mxu0 %v11345_v20  ;;  %v1046_v24 = vld [vmem:[%s11017_s27 + $0xd0] sm:$0xff] }
  0xab   :  { %868 = vmatpush1.bf16.msra.mxu1 %v10247_v23  ;;  %8401 = vmatprep.mubr.msk.bf16.mxu1 %vm472_vm1, %v319_v26  ;;  %v11349_v23 = vpack.c.bf16 %v1029_v22, %v1028_v21 }
  0xac   :  { %869 = vmatprep.subr.bf16.mxu1 %v10252_v25  ;;  %v1047_v25 = vld [vmem:[%s11017_s27 + $0xd8] sm:$0xff] }
  0xad   :  { %9771 = vmatpush3.bf16.msra.mxu0 %v11349_v23  ;;  %v11355_v26 = vpack.c.bf16 %v1047_v25, %v1046_v24 }
  0xaf   :  { %870 = vmatpush1.bf16.msra.mxu1 %v10250_v27  ;;  %v1030_v27 = vld [vmem:[%s11017_s27 + $0x50] sm:$0xff]  ;;  %9773 = vmatprep.subr.bf16.mxu0 %v11355_v26 }
  0xb0   :  { %871 = vmatprep.subr.bf16.mxu1 %v10255_v30  ;;  %v11359_v29 = vpack.c.bf16 %v1031_v28, %v1030_v27  ;;  %v1048_v30 = vld [vmem:[%s11017_s27 + $0xe0] sm:$0xff] }
  0xb1   :  { %v11365_v32 = vpack.c.bf16 %v1049_v31, %v1048_v30 }
  0xb2   :  { %713 = vmatmul.mubr.bf16.gmra.mrb[8].mxu1 %v318_v34  ;;  %9775 = vmatpush3.bf16.msra.mxu0 %v11359_v29  ;;  %v1033_v34 = vld [vmem:[%s11017_s27 + $0x68] sm:$0xff] }
  0xb3   :  { %872 = vmatpush1.bf16.msra.mxu1 %v10253_v33  ;;  %8402 = vmatprep.mubr.msk.bf16.mxu1 %vm472_vm1, %v321_v36  ;;  %v1032_v33 = vld [vmem:[%s11017_s27 + $0x60] sm:$0xff]  ;;  %v1050_v36 = vld [vmem:[%s11017_s27 + $0xf0] sm:$0xff] }
  0xb4   :  { %873 = vmatprep.subr.bf16.mxu1 %v10258_v35  ;;  %v11369_v35 = vpack.c.bf16 %v1033_v34, %v1032_v33  ;;  %9777 = vmatprep.subr.bf16.mxu0 %v11365_v32 }
  0xb6   :  { %9779 = vmatpush3.bf16.msra.mxu0 %v11369_v35 }
  0xb7   :  { %874 = vmatpush1.bf16.msra.mxu1 %v10256_v37  ;;  %v1051_v37 = vld [vmem:[%s11017_s27 + $0xf8] sm:$0xff] }
  0xb8   :  { %875 = vmatprep.subr.bf16.mxu1 %v10261_v40  ;;  %v11376_v39 = vpack.c.bf16 %v1051_v37, %v1050_v36  ;;  %v1035_v40 = vld [vmem:[%s11017_s27 + $0x78] sm:$0xff] }
  0xba   :  { %723 = vmatmul.mubr.bf16.gmra.mrb[12].mxu1 %v320_v42  ;;  %9781 = vmatprep.subr.bf16.mxu0 %v11376_v39 }
  0xbb   :  { %876 = vmatpush1.bf16.msra.mxu1 %v10259_v41  ;;  %8421 = vmatprep.mubr.msk.bf16.mxu1 %vm472_vm1, %v736_v44  ;;  %v11379_v41 = vpack.c.bf16 %v1035_v40, %v1034_v38 }
  0xbc   :  { %877 = vmatprep.subr.bf16.mxu1 %v10264_v43 }
  0xbd   :  { %9783 = vmatpush3.bf16.msra.mxu0 %v11379_v41 }
  0xbe   :  { %9785 = vmatprep.subr.bf16.mxu0 %v9752_v59 }
  0xbf   :  { %878 = vmatpush1.bf16.msra.mxu1 %v10262_v45 }
  0xc0   :  { %879 = vmatprep.subr.bf16.mxu1 %v10267_v46 }
  0xc3   :  { %880 = vmatpush1.bf16.msra.mxu1 %v10265_v47 }
  0xc6   :  { %896 = vmatmul.mubr.bf16.vlgmr.msra.gmra.mrb[0].mxu1 %v735_v48 }
  0xc7   :  { %8422 = vmatprep.mubr.msk.bf16.mxu1 %vm472_vm1, %v738_v49 }
  0xce   :  { %906 = vmatmul.mubr.bf16.gmra.mrb[4].mxu1 %v737_v50 }
  0xcf   :  { %8423 = vmatprep.mubr.msk.bf16.mxu1 %vm472_vm1, %v740_v51 }
  0xd6   :  { %916 = vmatmul.mubr.bf16.gmra.mrb[8].mxu1 %v739_v53 }
  0xd7   :  { %8424 = vmatprep.mubr.msk.bf16.mxu1 %vm472_vm1, %v742_v54 }
  0xde   :  { %926 = vmatmul.mubr.bf16.gmra.mrb[12].mxu1 %v741_v56 }
  0xdf   :  { %106 = vsyncpa [#allocation6], 0  ;;  %vm1207_vm5 = vcmask 261120   ;;  %s12655_s0 = sld [smem:[#allocation9_spill]]  ;;  %s12656_s5 = sld [smem:[#allocation10_spill]]  ;;  %vm262_vm6 = vcmask 523264  }
  0xe0   :  { %s12657_s13 = sld [smem:[#allocation14_spill]]  ;;  %s12658_s17 = sld [smem:[#allocation16_spill]]  ;;  %vm4606_vm7 = vcmask 64512   ;;  %vm5084_vm8 = vcmask 392192   ;;  %vm5224_vm9 = vcmask 785408   ;;  %vm5750_vm10 = vcmask 654336  }
  0xe1   :  { %s12659_s21 = sld [smem:[#allocation12_spill]]  ;;  %s12660_s25 = sld [smem:[#allocation11_spill]]  ;;  %vm6649_vm11 = vcmask 916480  }
  0xe2   :  { %s12661_s29 = sld [smem:[#allocation13_spill]]  ;;  %s12667_s27 = sld [smem:[#allocation8_spill]] }
  0xe3   :  { %s12669_s15 = sld [smem:[#allocation22_spill]]  ;;  %s12670_s16 = sld [smem:[#allocation23_spill]] }
  0xe4   :  { %s12671_s18 = sld [smem:[#allocation25_spill]]  ;;  %s10921_s22 = smov 96  }
  0xe5   :  { %s12672_s23 = sld [smem:[#allocation24_spill]]  ;;  %s12673_s26 = sld [smem:[#allocation26_spill]] }
  0xe6   :  { %s12674_s28 = sld [smem:[#allocation28_spill]]  ;;  %s10922_s1 = smov 80  }
  0xe7   :  { %s12675_s2 = sld [smem:[#allocation27_spill]]  ;;  %s12676_s7 = sld [smem:[#allocation29_spill]] }
  0xe8   :  { %s12677_s10 = sld [smem:[#allocation31_spill]]  ;;  %s12678_s11 = sld [smem:[#allocation30_spill]] }
 0x13e   :  { %v11383_v42 = vpop.f32.mrb[0].mxu0 }
 0x13f   :  { %v9293_v43 = vpop.f32.mrb[1].mxu0 }
 0x140   :  { %v259_v44 = vpop.f32.mrb[2].mxu0 }
 0x141   :  { %v9294_v45 = vpop.f32.mrb[3].mxu0 }
 0x199   :  { %v11385_v46 = vpop.f32.mrb[0].mxu1 }
 0x19a   :  { %v11387_v47 = vpop.f32.mrb[1].mxu1  ;;  %v978_v49 = vmul.f32 %v11385_v46, %v11385_v46 }
 0x19b   :  { %v11389_v48 = vpop.f32.mrb[2].mxu1  ;;  %v979_v53 = vmul.f32 %v11387_v47, %v11387_v47 }
 0x19c   :  { %v952_v50 = vadd.f32 %v11389_v48, %v11385_v46  ;;  %v980_v51 = vmul.f32 %v11389_v48, %v11389_v48  ;;  %v11397_v52 = vpop.f32.mrb[3].mxu1 }
 0x19d   :  { %v965_v54 = vadd.f32 %v11397_v52, %v11387_v47  ;;  %v981_v55 = vmul.f32 %v11397_v52, %v11397_v52 }
 0x19e   :  { %v994_v56 = vadd.f32 %v980_v51, %v978_v49 }
 0x19f   :  { %v1007_v57 = vadd.f32 %v981_v55, %v979_v53 }
 0x1a1   :  { %v11405_v58 = vpop.f32.mrb[4].mxu1 }
 0x1a2   :  { %v953_v59 = vadd.f32 %v952_v50, %v11405_v58  ;;  %v982_v60 = vmul.f32 %v11405_v58, %v11405_v58  ;;  %v11410_v61 = vpop.f32.mrb[5].mxu1 }
 0x1a3   :  { %v966_v63 = vadd.f32 %v965_v54, %v11410_v61  ;;  %v983_v0 = vmul.f32 %v11410_v61, %v11410_v61  ;;  %v11415_v2 = vpop.f32.mrb[6].mxu1 }
 0x1a4   :  { %v995_v3 = vadd.f32 %v994_v56, %v982_v60  ;;  %v954_v5 = vadd.f32 %v953_v59, %v11415_v2  ;;  %v984_v7 = vmul.f32 %v11415_v2, %v11415_v2  ;;  %v11420_v9 = vpop.f32.mrb[7].mxu1 }
 0x1a5   :  { %v1008_v10 = vadd.f32 %v1007_v57, %v983_v0  ;;  %v967_v12 = vadd.f32 %v966_v63, %v11420_v9  ;;  %v985_v13 = vmul.f32 %v11420_v9, %v11420_v9 }
 0x1a6   :  { %v996_v15 = vadd.f32 %v995_v3, %v984_v7 }
 0x1a7   :  { %v1009_v16 = vadd.f32 %v1008_v10, %v985_v13 }
 0x1a9   :  { %v11425_v18 = vpop.f32.mrb[8].mxu1 }
 0x1aa   :  { %v955_v19 = vadd.f32 %v954_v5, %v11425_v18  ;;  %v986_v21 = vmul.f32 %v11425_v18, %v11425_v18  ;;  %v11430_v22 = vpop.f32.mrb[9].mxu1 }
 0x1ab   :  { %v968_v24 = vadd.f32 %v967_v12, %v11430_v22  ;;  %v987_v25 = vmul.f32 %v11430_v22, %v11430_v22  ;;  %v11435_v27 = vpop.f32.mrb[10].mxu1 }
 0x1ac   :  { %v997_v28 = vadd.f32 %v996_v15, %v986_v21  ;;  %v956_v30 = vadd.f32 %v955_v19, %v11435_v27  ;;  %v988_v31 = vmul.f32 %v11435_v27, %v11435_v27  ;;  %v11440_v33 = vpop.f32.mrb[11].mxu1 }
 0x1ad   :  { %v1010_v34 = vadd.f32 %v1009_v16, %v987_v25  ;;  %v969_v36 = vadd.f32 %v968_v24, %v11440_v33  ;;  %v989_v37 = vmul.f32 %v11440_v33, %v11440_v33 }
 0x1ae   :  { %v998_v38 = vadd.f32 %v997_v28, %v988_v31 }
 0x1af   :  { %v1011_v40 = vadd.f32 %v1010_v34, %v989_v37 }
 0x1b1   :  { %v11445_v43 = vpop.f32.mrb[12].mxu1 }
 0x1b2   :  { %v957_v44 = vadd.f32 %v956_v30, %v11445_v43  ;;  %v990_v45 = vmul.f32 %v11445_v43, %v11445_v43  ;;  %v11450_v49 = vpop.f32.mrb[13].mxu1 }
 0x1b3   :  { %v970_v50 = vadd.f32 %v969_v36, %v11450_v49  ;;  %v991_v51 = vmul.f32 %v11450_v49, %v11450_v49  ;;  %v11455_v53 = vpop.f32.mrb[14].mxu1 }
 0x1b4   :  { %v999_v54 = vadd.f32 %v998_v38, %v990_v45  ;;  %v958_v55 = vadd.f32 %v957_v44, %v11455_v53  ;;  %v992_v56 = vmul.f32 %v11455_v53, %v11455_v53  ;;  %v11460_v57 = vpop.f32.mrb[15].mxu1  ;;  %v1056_v45 = vld [vmem:[%s11037_s6 + $0x20] sm:$0xff] }
 0x1b5   :  { %v1012_v59 = vadd.f32 %v1011_v40, %v991_v51  ;;  %v971_v60 = vadd.f32 %v970_v50, %v11460_v57  ;;  %v993_v63 = vmul.f32 %v11460_v57, %v11460_v57 }
 0x1b6   :  { %v959_v0 = vrot.slane %v958_v55, 4  ;;  %v1000_v3 = vadd.f32 %v999_v54, %v992_v56 }
 0x1b7   :  { %v972_v5 = vrot.slane %v971_v60, 4  ;;  %v1013_v7 = vadd.f32 %v1012_v59, %v993_v63 }
 0x1b8   :  { %v960_v10 = vadd.f32 %v959_v0, %v958_v55  ;;  %v1001_v40 = vrot.slane %v1000_v3, 4 }
 0x1b9   :  { %v973_v12 = vadd.f32 %v972_v5, %v971_v60  ;;  %v1014_v13 = vrot.slane %v1013_v7, 4 }
 0x1ba   :  { %v961_v15 = vrot.slane %v960_v10, 2  ;;  %v1002_v44 = vadd.f32 %v1001_v40, %v1000_v3  ;;  %v10286_v40 = vld [vmem:[%s10977_s8 + $0x60] ss:$8 sps:$4 sm:$0xff]  }
 0x1bb   :  { %v974_v16 = vrot.slane %v973_v12, 2  ;;  %v1015_v19 = vadd.f32 %v1014_v13, %v1013_v7 }
 0x1bc   :  { %v962_v21 = vadd.f32 %v961_v15, %v960_v10  ;;  %v10270_v15 = vld [vmem:[%s10977_s8 + $0x4] ss:$8 sps:$4 sm:$0xff]  }
 0x1bd   :  { %v975_v24 = vadd.f32 %v974_v16, %v973_v12  ;;  %v1016_v25 = vrot.slane %v1015_v19, 2  ;;  %v10268_v16 = vld [vmem:[%s10977_s8] ss:$8 sps:$4 sm:$0xff]  }
 0x1be   :  { %v963_v28 = vrot.slane %v962_v21, 1 }
 0x1bf   :  { %v976_v30 = vrot.slane %v975_v24, 1  ;;  %v1017_v31 = vadd.f32 %v1016_v25, %v1015_v19  ;;  %v10273_v19 = vld [vmem:[%s10977_s8 + $0x14] ss:$8 sps:$4 sm:$0xff]   ;;  %v10274_v25 = vld [vmem:[%s10977_s8 + $0x20] ss:$8 sps:$4 sm:$0xff]  }
 0x1c0   :  { %v964_v37 = vadd.f32 %v963_v28, %v962_v21  ;;  %v10271_v21 = vld [vmem:[%s10977_s8 + $0x10] ss:$8 sps:$4 sm:$0xff]   ;;  %v10279_v28 = vld [vmem:[%s10977_s8 + $0x34] ss:$8 sps:$4 sm:$0xff]  }
 0x1c1   :  { %v977_v34 = vadd.f32 %v976_v30, %v975_v24  ;;  %v1018_v36 = vrot.slane %v1017_v31, 1  ;;  %v10276_v24 = vld [vmem:[%s10977_s8 + $0x24] ss:$8 sps:$4 sm:$0xff]   ;;  %v10277_v30 = vld [vmem:[%s10977_s8 + $0x30] ss:$8 sps:$4 sm:$0xff]  }
 0x1c3   :  { %1124 = vmatprep.mubr.f32.mxu0 %v977_v34  ;;  %v1019_v38 = vadd.f32 %v1018_v36, %v1017_v31  ;;  %v10282_v31 = vld [vmem:[%s10977_s8 + $0x44] ss:$8 sps:$4 sm:$0xff]   ;;  %v10280_v34 = vld [vmem:[%s10977_s8 + $0x40] ss:$8 sps:$4 sm:$0xff]   ;;  %v10285_v36 = vld [vmem:[%s10977_s8 + $0x54] ss:$8 sps:$4 sm:$0xff]  }
 0x1c4   :  { %1125 = vmatmul.mubr.f32.vlgmr.msra.gmra.mrb[4].mxu0 %v964_v37  ;;  %v10283_v37 = vld [vmem:[%s10977_s8 + $0x50] ss:$8 sps:$4 sm:$0xff]  }
 0x1c5   :  { %9787 = vmatpush3.bf16.msra.mxu0 %v11310_v62  ;;  %1195 = vmatprep.mubr.f32.mxu0 %v1019_v38  ;;  %v1003_v62 = vrot.slane %v1002_v44, 2  ;;  %v10288_v38 = vld [vmem:[%s10977_s8 + $0x64] ss:$8 sps:$4 sm:$0xff]  }
 0x1c6   :  { %9789 = vmatprep.subr.bf16.mxu0 %v11315_v1 }
 0x1c7   :  { %v1004_v1 = vadd.f32 %v1003_v62, %v1002_v44  ;;  %v10291_v44 = vld [vmem:[%s10977_s8 + $0x74] ss:$8 sps:$4 sm:$0xff]   ;;  %v10289_v62 = vld [vmem:[%s10977_s8 + $0x70] ss:$8 sps:$4 sm:$0xff]  }
 0x1c9   :  { %9791 = vmatpush3.bf16.msra.mxu0 %v11319_v4  ;;  %v1005_v4 = vrot.slane %v1004_v1, 1 }
 0x1ca   :  { %9793 = vmatprep.subr.bf16.mxu0 %v11325_v8 }
 0x1cb   :  { %v1006_v8 = vadd.f32 %v1005_v4, %v1004_v1  ;;  %v10294_v1 = vld [vmem:[%s10977_s8 + $0x84] ss:$8 sps:$4 sm:$0xff]   ;;  %v10292_v4 = vld [vmem:[%s10977_s8 + $0x80] ss:$8 sps:$4 sm:$0xff]  }
 0x1cd   :  { %9795 = vmatpush3.bf16.msra.mxu0 %v11329_v11  ;;  %v1053_v11 = vld [vmem:[%s11037_s6 + $0x8] sm:$0xff] }
 0x1ce   :  { %9797 = vmatprep.subr.bf16.mxu0 %v11335_v14  ;;  %v1055_v14 = vld [vmem:[%s11037_s6 + $0x18] sm:$0xff] }
 0x1d1   :  { %9799 = vmatpush3.bf16.msra.mxu0 %v11339_v17  ;;  %v9816_v17 = vpack.c.bf16 %v1055_v14, %v1053_v11  ;;  %v10295_v11 = vld [vmem:[%s10977_s8 + $0x90] ss:$8 sps:$4 sm:$0xff]   ;;  %v10300_v14 = vld [vmem:[%s10977_s8 + $0xa4] ss:$8 sps:$4 sm:$0xff]  }
 0x1d2   :  { %9801 = vmatprep.subr.bf16.mxu0 %v11345_v20  ;;  %v1052_v20 = vld [vmem:[%s11037_s6] sm:$0xff] }
 0x1d5   :  { %9803 = vmatpush3.bf16.msra.mxu0 %v11349_v23  ;;  %v1054_v23 = vld [vmem:[%s11037_s6 + $0x10] sm:$0xff] }
 0x1d6   :  { %9805 = vmatprep.subr.bf16.mxu0 %v11355_v26  ;;  %v1057_v26 = vld [vmem:[%s11037_s6 + $0x28] sm:$0xff] }
 0x1d9   :  { %9807 = vmatpush3.bf16.msra.mxu0 %v11359_v29  ;;  %v9818_v29 = vpack.c.bf16 %v1054_v23, %v1052_v20  ;;  %v10303_v20 = vld [vmem:[%s10977_s8 + $0xb4] ss:$8 sps:$4 sm:$0xff]   ;;  %v10301_v23 = vld [vmem:[%s10977_s8 + $0xb0] ss:$8 sps:$4 sm:$0xff]  }
 0x1da   :  { %9809 = vmatprep.subr.bf16.mxu0 %v11365_v32  ;;  %v1059_v32 = vld [vmem:[%s11037_s6 + $0x38] sm:$0xff] }
 0x1db   :  { %v9820_v50 = vpack.c.bf16 %v1059_v32, %v1057_v26  ;;  %v10306_v26 = vld [vmem:[%s10977_s8 + $0xc4] ss:$8 sps:$4 sm:$0xff]   ;;  %v10309_v32 = vld [vmem:[%s10977_s8 + $0xd4] ss:$8 sps:$4 sm:$0xff]  }
 0x1dd   :  { %9811 = vmatpush3.bf16.msra.mxu0 %v11369_v35  ;;  %v1058_v35 = vld [vmem:[%s11037_s6 + $0x30] sm:$0xff]  ;;  %s12665_s6 = sld [smem:[#allocation18_spill]] }
 0x1de   :  { %9813 = vmatprep.subr.bf16.mxu0 %v11376_v39  ;;  %v9822_v39 = vpack.c.bf16 %v1058_v35, %v1056_v45  ;;  %v10307_v45 = vld [vmem:[%s10977_s8 + $0xd0] ss:$8 sps:$4 sm:$0xff]   ;;  %v10312_v35 = vld [vmem:[%s10977_s8 + $0xe4] ss:$8 sps:$4 sm:$0xff]  }
 0x1e1   :  { %9815 = vmatpush3.bf16.msra.mxu0 %v11379_v41 }
 0x1e2   :  { %9817 = vmatprep.subr.bf16.mxu0 %v9816_v17 }
 0x1e4   :  { %1196 = vmatmul.mubr.f32.vlgmr.msra.gmra.mrb[6].mxu0 %v1006_v8  ;;  %v10297_v8 = vld [vmem:[%s10977_s8 + $0x94] ss:$8 sps:$4 sm:$0xff]  }
 0x1e5   :  { %1275 = vmatprep.mubr.f32.mxu0 %v10916_v6  ;;  %9819 = vmatpush1.bf16.msra.mxu0 %v9818_v29 }
 0x1e6   :  { %9821 = vmatprep.subr.bf16.mxu0 %v9820_v50 }
 0x1e9   :  { %9823 = vmatpush1.bf16.msra.mxu0 %v9822_v39 }
 0x1ea   :  { %9825 = vmatprep.subr.bf16.mxu0 %v9816_v17  ;;  %v10298_v17 = vld [vmem:[%s10977_s8 + $0xa0] ss:$8 sps:$4 sm:$0xff]  }
 0x297   :  { %v8895_v41 = vpop.f32.mrb[4].mxu0 }
 0x298   :  { %v8896_v51 = vpop.f32.mrb[5].mxu0 }
 0x299   :  { %v8897_v54 = vadd.f32 %v8896_v51, %v8895_v41  ;;  %v10313_v41 = vld [vmem:[%s10977_s8 + $0xf0] ss:$8 sps:$4 sm:$0xff]   ;;  %v10318_v51 = vld [vmem:[%s10972_s3 + $0x4] ss:$8 sps:$4 sm:$0xff]  }
 0x29b   :  { %v1130_v55 = vmul.f32 0.001953125, %v8897_v54  ;;  %v1358_v54 = vlaneseq }
 0x29d   :  { %v1202_v63 = vmul.f32 %v1130_v55, %v1130_v55  ;;  %v1282_v10 = vsub.f32 0.0, %v1130_v55  ;;  %v1359_v55 = vshrl.u32 %v1358_v54, 7 }
 0x2b7   :  { %v8930_v56 = vpop.f32.mrb[6].mxu0 }
 0x2b8   :  { %v8931_v59 = vpop.f32.mrb[7].mxu0 }
 0x2b9   :  { %v8932_v60 = vadd.f32 %v8931_v59, %v8930_v56  ;;  %v11525_v56 = vsub.s32 0, %v1359_v55  ;;  %v10319_v55 = vld [vmem:[%s10972_s3 + $0x10] ss:$8 sps:$4 sm:$0xff]  }
 0x2bb   :  { %v1201_v0 = vmul.f32 0.001953125, %v8932_v60 }
 0x2bd   :  { %v1203_v3 = vsub.f32 %v1201_v0, %v1202_v63 }
 0x2bf   :  { %v1204_v5 = vmax.f32 %v1203_v3, 0.0 }
 0x2c1   :  { %v1205_v7 = vadd.f32 1e-05, %v1204_v5 }
 0x2c3   :  { %10785 = vrsqrt.f32 %v1205_v7 }
 0x2cd   :  { %v10786_v12 = vpop.eup %10785 }
 0x2ce   :  { %8425 = vmatmul.mubr.msk.f32.vlgmr.msra.gmra.mrb[8].mxu0 %vm1207_vm5, %v10786_v12  ;;  %v1283_v13 = vmul.f32 %v10786_v12, %v1282_v10 }
 0x2cf   :  { %9827 = vmatpush1.bf16.msra.mxu0 %v9818_v29  ;;  %1351 = vmatprep.mubr.f32.mxu0 %v10916_v6  ;;  %v10304_v29 = vld [vmem:[%s10977_s8 + $0xc0] ss:$8 sps:$4 sm:$0xff]  }
 0x2d0   :  { %9829 = vmatprep.subr.bf16.mxu0 %v9820_v50  ;;  %v10310_v50 = vld [vmem:[%s10977_s8 + $0xe0] ss:$8 sps:$4 sm:$0xff]  }
 0x2d3   :  { %9831 = vmatpush1.bf16.msra.mxu0 %v9822_v39  ;;  %v10315_v39 = vld [vmem:[%s10977_s8 + $0xf4] ss:$8 sps:$4 sm:$0xff]   ;;  %s12663_s8 = sld [smem:[#allocation17_spill]] }
 0x2d4   :  { %1696 = vmatprep.subr.bf16.mxu0 %v10270_v15 }
 0x2d6   :  { %8426 = vmatmul.mubr.msk.f32.vlgmr.msra.gmra.mrb[10].mxu0 %vm1207_vm5, %v1283_v13 }
 0x2d7   :  { %1697 = vmatpush1.bf16.msra.mxu0 %v10268_v16 }
 0x2d8   :  { %1698 = vmatprep.subr.bf16.mxu0 %v10273_v19 }
 0x2db   :  { %1699 = vmatpush1.bf16.msra.mxu0 %v10271_v21 }
 0x2dc   :  { %1700 = vmatprep.subr.bf16.mxu0 %v10276_v24 }
 0x2df   :  { %1701 = vmatpush1.bf16.msra.mxu0 %v10274_v25 }
 0x2e0   :  { %1702 = vmatprep.subr.bf16.mxu0 %v10279_v28 }
 0x2e3   :  { %1703 = vmatpush1.bf16.msra.mxu0 %v10277_v30 }
 0x2e4   :  { %1704 = vmatprep.subr.bf16.mxu0 %v10282_v31 }
 0x2e7   :  { %1705 = vmatpush1.bf16.msra.mxu0 %v10280_v34 }
 0x2e8   :  { %1706 = vmatprep.subr.bf16.mxu0 %v10285_v36 }
 0x2eb   :  { %1707 = vmatpush1.bf16.msra.mxu0 %v10283_v37 }
 0x2ec   :  { %1708 = vmatprep.subr.bf16.mxu0 %v10288_v38 }
 0x2ef   :  { %1709 = vmatpush1.bf16.msra.mxu0 %v10286_v40 }
 0x2f0   :  { %1710 = vmatprep.subr.bf16.mxu0 %v10291_v44 }
 0x2f3   :  { %1711 = vmatpush1.bf16.msra.mxu0 %v10289_v62 }
 0x2f4   :  { %1712 = vmatprep.subr.bf16.mxu0 %v10294_v1 }
 0x2f7   :  { %1713 = vmatpush1.bf16.msra.mxu0 %v10292_v4 }
 0x2f8   :  { %1714 = vmatprep.subr.bf16.mxu0 %v10297_v8  ;;  %v10316_v8 = vld [vmem:[%s10972_s3] ss:$8 sps:$4 sm:$0xff]  }
 0x2fb   :  { %1715 = vmatpush1.bf16.msra.mxu0 %v10295_v11 }
 0x2fc   :  { %1716 = vmatprep.subr.bf16.mxu0 %v10300_v14 }
 0x2ff   :  { %1717 = vmatpush1.bf16.msra.mxu0 %v10298_v17 }
 0x300   :  { %1718 = vmatprep.subr.bf16.mxu0 %v10303_v20  ;;  %v10321_v20 = vld [vmem:[%s10972_s3 + $0x14] ss:$8 sps:$4 sm:$0xff]  }
 0x303   :  { %1719 = vmatpush1.bf16.msra.mxu0 %v10301_v23 }
 0x304   :  { %1720 = vmatprep.subr.bf16.mxu0 %v10306_v26 }
 0x307   :  { %1721 = vmatpush1.bf16.msra.mxu0 %v10304_v29 }
 0x308   :  { %1722 = vmatprep.subr.bf16.mxu0 %v10309_v32 }
 0x30b   :  { %1723 = vmatpush1.bf16.msra.mxu0 %v10307_v45 }
 0x30c   :  { %1724 = vmatprep.subr.bf16.mxu0 %v10312_v35 }
 0x30f   :  { %1725 = vmatpush1.bf16.msra.mxu0 %v10310_v50 }
 0x310   :  { %1726 = vmatprep.subr.bf16.mxu0 %v10315_v39 }
 0x313   :  { %1727 = vmatpush1.bf16.msra.mxu0 %v10313_v41 }
 0x314   :  { %1929 = vmatprep.subr.bf16.mxu0 %v10318_v51 }
 0x3a1   :  { %v1277_v59 = vpop.f32.mrb[8].mxu0 }
 0x3a2   :  { %v1361_v60 = vrot.slane %v1277_v59, %v11525_v56  ;;  %v1279_v63 = vpop.f32.mrb[9].mxu0 }
 0x3a3   :  { %v1365_v0 = vrot.slane %v1279_v63, %v11525_v56 }
 0x3a4   :  { %v1366_v3 = vmul.f32 %v1361_v60, %v11385_v46  ;;  %v1368_v5 = vmul.f32 %v1361_v60, %v11389_v48  ;;  %v1370_v7 = vmul.f32 %v1361_v60, %v11405_v58  ;;  %v1372_v10 = vmul.f32 %v1361_v60, %v11415_v2 }
 0x3a5   :  { %v1367_v12 = vmul.f32 %v1365_v0, %v11387_v47  ;;  %v1369_v13 = vmul.f32 %v1365_v0, %v11397_v52  ;;  %v1371_v15 = vmul.f32 %v1365_v0, %v11410_v61  ;;  %v1373_v16 = vmul.f32 %v1365_v0, %v11420_v9 }
 0x3a6   :  { %v1375_v19 = vmul.f32 %v1365_v0, %v11430_v22  ;;  %v1377_v21 = vmul.f32 %v1365_v0, %v11440_v33  ;;  %v1374_v46 = vmul.f32 %v1361_v60, %v11425_v18  ;;  %v1376_v48 = vmul.f32 %v1361_v60, %v11435_v27 }
 0x3a7   :  { %v1379_v58 = vmul.f32 %v1365_v0, %v11450_v49  ;;  %v1381_v2 = vmul.f32 %v1365_v0, %v11460_v57  ;;  %v1378_v47 = vmul.f32 %v1361_v60, %v11445_v43  ;;  %v1380_v52 = vmul.f32 %v1361_v60, %v11455_v53 }
 0x3a9   :  { %v1353_v24 = vpop.f32.mrb[10].mxu0 }
 0x3aa   :  { %v1385_v61 = vrot.slane %v1353_v24, %v11525_v56  ;;  %v1355_v9 = vpop.f32.mrb[11].mxu0  ;;  %v10336_v24 = vld [vmem:[%s10972_s3 + $0x64] ss:$8 sps:$4 sm:$0xff]  }
 0x3ab   :  { %v1389_v22 = vrot.slane %v1355_v9, %v11525_v56  ;;  %v10339_v9 = vld [vmem:[%s10972_s3 + $0x74] ss:$8 sps:$4 sm:$0xff]  }
 0x3ac   :  { %v11547_v25 = vadd.f32 %v1385_v61, %v1366_v3  ;;  %v1392_v33 = vadd.f32 %v1385_v61, %v1368_v5  ;;  %v1394_v18 = vadd.f32 %v1385_v61, %v1370_v7  ;;  %v1396_v28 = vadd.f32 %v1385_v61, %v1372_v10  ;;  %v10324_v3 = vld [vmem:[%s10972_s3 + $0x24] ss:$8 sps:$4 sm:$0xff]  }
 0x3ad   :  { %v11549_v27 = vadd.f32 %v1389_v22, %v1367_v12  ;;  %v1393_v49 = vadd.f32 %v1389_v22, %v1369_v13  ;;  %v1395_v57 = vadd.f32 %v1389_v22, %v1371_v15  ;;  %v1397_v30 = vadd.f32 %v1389_v22, %v1373_v16 }
 0x3ae   :  { %v1406_v43 = vmax.f32 %v11547_v25, 0.0  ;;  %v1408_v53 = vmax.f32 %v1392_v33, 0.0  ;;  %v1410_v31 = vmax.f32 %v1394_v18, 0.0  ;;  %v1412_v34 = vmax.f32 %v1396_v28, 0.0  ;;  %v10337_v33 = vld [vmem:[%s10972_s3 + $0x70] ss:$8 sps:$4 sm:$0xff]  }
 0x3af   :  { %v1407_v36 = vmax.f32 %v11549_v27, 0.0  ;;  %v1409_v37 = vmax.f32 %v1393_v49, 0.0  ;;  %v1411_v38 = vmax.f32 %v1395_v57, 0.0  ;;  %v1413_v40 = vmax.f32 %v1397_v30, 0.0  ;;  %v10342_v18 = vld [vmem:[%s10972_s3 + $0x84] ss:$8 sps:$4 sm:$0xff]  }
 0x3b0   :  { %v1496_v44 = vpack.c.bf16 %v1408_v53, %v1406_v43  ;;  %v1498_v62 = vpack.c.bf16 %v1412_v34, %v1410_v31  ;;  %v1399_v1 = vadd.f32 %v1389_v22, %v1375_v19  ;;  %v1401_v14 = vadd.f32 %v1389_v22, %v1377_v21  ;;  %v10322_v21 = vld [vmem:[%s10972_s3 + $0x20] ss:$8 sps:$4 sm:$0xff]   ;;  %v10345_v49 = vld [vmem:[%s10972_s3 + $0x94] ss:$8 sps:$4 sm:$0xff]   ;;  %v10343_v57 = vld [vmem:[%s10972_s3 + $0x90] ss:$8 sps:$4 sm:$0xff]  }
 0x3b1   :  { %v1497_v4 = vpack.c.bf16 %v1409_v37, %v1407_v36  ;;  %v1499_v11 = vpack.c.bf16 %v1413_v40, %v1411_v38  ;;  %v1398_v17 = vadd.f32 %v1385_v61, %v1374_v46  ;;  %v1400_v26 = vadd.f32 %v1385_v61, %v1376_v48  ;;  %v10327_v46 = vld [vmem:[%s10972_s3 + $0x34] ss:$8 sps:$4 sm:$0xff]   ;;  %v10325_v48 = vld [vmem:[%s10972_s3 + $0x30] ss:$8 sps:$4 sm:$0xff]   ;;  %v10340_v28 = vld [vmem:[%s10972_s3 + $0x80] ss:$8 sps:$4 sm:$0xff]  }
 0x3b2   :  { %v1415_v23 = vmax.f32 %v1399_v1, 0.0  ;;  %v1403_v29 = vadd.f32 %v1389_v22, %v1379_v58  ;;  %v11559_v32 = vadd.f32 %v1389_v22, %v1381_v2  ;;  %v1417_v45 = vmax.f32 %v1401_v14, 0.0  ;;  %v10330_v58 = vld [vmem:[%s10972_s3 + $0x44] ss:$8 sps:$4 sm:$0xff]   ;;  %v10328_v2 = vld [vmem:[%s10972_s3 + $0x40] ss:$8 sps:$4 sm:$0xff]  }
 0x3b3   :  { %1728 = vmatprep.mubr.bf16.mxu0 %v1497_v4  ;;  %v1414_v35 = vmax.f32 %v1398_v17, 0.0  ;;  %v1402_v50 = vadd.f32 %v1385_v61, %v1378_v47  ;;  %v11561_v39 = vadd.f32 %v1385_v61, %v1380_v52  ;;  %v1416_v41 = vmax.f32 %v1400_v26, 0.0  ;;  %v10333_v47 = vld [vmem:[%s10972_s3 + $0x54] ss:$8 sps:$4 sm:$0xff]   ;;  %v10331_v52 = vld [vmem:[%s10972_s3 + $0x50] ss:$8 sps:$4 sm:$0xff]  }
 0x3b4   :  { %1729 = vmatmul.mubr.bf16.vlgmr.msra.gmra.mrb[12].mxu0 %v1496_v44  ;;  %v1419_v51 = vmax.f32 %v1403_v29, 0.0  ;;  %v1421_v54 = vmax.f32 %v11559_v32, 0.0  ;;  %v1501_v59 = vpack.c.bf16 %v1417_v45, %v1415_v23  ;;  %v11566_v0 = vpack.c.bf16 %v1411_v38, %v1409_v37  ;;  %v10334_v61 = vld [vmem:[%s10972_s3 + $0x60] ss:$8 sps:$4 sm:$0xff]   ;;  %v10348_v27 = vld [vmem:[%s10972_s3 + $0xa4] ss:$8 sps:$4 sm:$0xff]  }
 0x3b5   :  { %1930 = vmatpush1.bf16.msra.mxu0 %v10316_v8  ;;  %1738 = vmatprep.mubr.bf16.mxu0 %v1499_v11  ;;  %v1418_v60 = vmax.f32 %v1402_v50, 0.0  ;;  %v1420_v63 = vmax.f32 %v11561_v39, 0.0  ;;  %v1500_v5 = vpack.c.bf16 %v1416_v41, %v1414_v35  ;;  %v11571_v10 = vpack.c.bf16 %v1410_v31, %v1408_v53  ;;  %v10346_v30 = vld [vmem:[%s10972_s3 + $0xa0] ss:$8 sps:$4 sm:$0xff]   ;;  %v10351_v53 = vld [vmem:[%s10972_s3 + $0xb4] ss:$8 sps:$4 sm:$0xff]  }
 0x3b6   :  { %1931 = vmatprep.subr.bf16.mxu0 %v10321_v20  ;;  %v1503_v7 = vpack.c.bf16 %v1421_v54, %v1419_v51  ;;  %v11573_v12 = vpack.c.bf16 %v1415_v23, %v1413_v40  ;;  %v11577_v15 = vpack.c.bf16 %v1414_v35, %v1412_v34  ;;  %v11579_v16 = vpack.c.bf16 %v1419_v51, %v1417_v45  ;;  %v10349_v31 = vld [vmem:[%s10972_s3 + $0xb0] ss:$8 sps:$4 sm:$0xff]   ;;  %v10354_v34 = vld [vmem:[%s10972_s3 + $0xc4] ss:$8 sps:$4 sm:$0xff]   ;;  %v10357_v37 = vld [vmem:[%s10972_s3 + $0xd4] ss:$8 sps:$4 sm:$0xff]  }
 0x3b7   :  { %v1502_v13 = vpack.c.bf16 %v1420_v63, %v1418_v60  ;;  %v11581_v19 = vpack.c.bf16 %v1418_v60, %v1416_v41  ;;  %v1455_v22 = vpack.c.bf16 %v1407_v36, %v10916_v6  ;;  %v10352_v36 = vld [vmem:[%s10972_s3 + $0xc0] ss:$8 sps:$4 sm:$0xff]   ;;  %v10355_v38 = vld [vmem:[%s10972_s3 + $0xd0] ss:$8 sps:$4 sm:$0xff]   ;;  %v10360_v40 = vld [vmem:[%s10972_s3 + $0xe4] ss:$8 sps:$4 sm:$0xff]   ;;  %v1454_v11 = vpack.c.bf16 %v1406_v43, %v10916_v6 }
 0x3b8   :  { %v10358_v44 = vld [vmem:[%s10972_s3 + $0xe0] ss:$8 sps:$4 sm:$0xff]   ;;  %v10361_v1 = vld [vmem:[%s10972_s3 + $0xf0] ss:$8 sps:$4 sm:$0xff]   ;;  %v10366_v4 = vld [vmem:[%s10982_s14 + $0x4] ss:$8 sps:$4 sm:$0xff]  }
 0x3b9   :  { %1932 = vmatpush1.bf16.msra.mxu0 %v10319_v55  ;;  %v10364_v8 = vld [vmem:[%s10982_s14] ss:$8 sps:$4 sm:$0xff]   ;;  %v10369_v14 = vld [vmem:[%s10982_s14 + $0x14] ss:$8 sps:$4 sm:$0xff]   ;;  %v10367_v17 = vld [vmem:[%s10982_s14 + $0x10] ss:$8 sps:$4 sm:$0xff]  }
 0x3ba   :  { %1933 = vmatprep.subr.bf16.mxu0 %v10324_v3  ;;  %v10372_v20 = vld [vmem:[%s10982_s14 + $0x24] ss:$8 sps:$4 sm:$0xff]   ;;  %v10370_v23 = vld [vmem:[%s10982_s14 + $0x20] ss:$8 sps:$4 sm:$0xff]   ;;  %v10375_v26 = vld [vmem:[%s10982_s14 + $0x34] ss:$8 sps:$4 sm:$0xff]  }
 0x3bb   :  { %v10373_v25 = vld [vmem:[%s10982_s14 + $0x30] ss:$8 sps:$4 sm:$0xff]   ;;  %v10378_v43 = vld [vmem:[%s10982_s14 + $0x44] ss:$8 sps:$4 sm:$0xff]   ;;  %v10376_v29 = vld [vmem:[%s10982_s14 + $0x40] ss:$8 sps:$4 sm:$0xff]  }
 0x3bc   :  { %1739 = vmatmul.mubr.bf16.gmra.mrb[16].mxu0 %v1498_v62  ;;  %v10363_v62 = vld [vmem:[%s10972_s3 + $0xf4] ss:$8 sps:$4 sm:$0xff]   ;;  %v10379_v35 = vld [vmem:[%s10982_s14 + $0x50] ss:$8 sps:$4 sm:$0xff]   ;;  %v10384_v50 = vld [vmem:[%s10982_s14 + $0x64] ss:$8 sps:$4 sm:$0xff]  }
 0x3bd   :  { %1934 = vmatpush1.bf16.msra.mxu0 %v10322_v21  ;;  %1748 = vmatprep.mubr.bf16.mxu0 %v1501_v59  ;;  %v10381_v45 = vld [vmem:[%s10982_s14 + $0x54] ss:$8 sps:$4 sm:$0xff]   ;;  %v10382_v41 = vld [vmem:[%s10982_s14 + $0x60] ss:$8 sps:$4 sm:$0xff]   ;;  %v10385_v55 = vld [vmem:[%s10982_s14 + $0x70] ss:$8 sps:$4 sm:$0xff]  }
 0x3be   :  { %1935 = vmatprep.subr.bf16.mxu0 %v10327_v46  ;;  %v10387_v51 = vld [vmem:[%s10982_s14 + $0x74] ss:$8 sps:$4 sm:$0xff]   ;;  %v10390_v59 = vld [vmem:[%s10982_s14 + $0x84] ss:$8 sps:$4 sm:$0xff]   ;;  %v10388_v60 = vld [vmem:[%s10982_s14 + $0x80] ss:$8 sps:$4 sm:$0xff]  }
 0x3bf   :  { %v10393_v3 = vld [vmem:[%s10982_s14 + $0x94] ss:$8 sps:$4 sm:$0xff]   ;;  %v10397_v21 = vld [vmem:[%s10982_s14 + $0xb0] ss:$8 sps:$4 sm:$0xff]   ;;  %v10402_v46 = vld [vmem:[%s10982_s14 + $0xc4] ss:$8 sps:$4 sm:$0xff]  }
 0x3c0   :  { %v2375_v32 = vld [vmem:[%s11022_s4] sm:$0xff]  ;;  %v2394_v39 = vld [vmem:[%s11022_s4 + $0x98] sm:$0xff]  ;;  %s12662_s3 = sld [smem:[#allocation15_spill]] }
 0x3c1   :  { %1936 = vmatpush1.bf16.msra.mxu0 %v10325_v48  ;;  %v10400_v48 = vld [vmem:[%s10982_s14 + $0xc0] ss:$8 sps:$4 sm:$0xff]  }
 0x3c2   :  { %1937 = vmatprep.subr.bf16.mxu0 %v10330_v58  ;;  %v10405_v58 = vld [vmem:[%s10982_s14 + $0xd4] ss:$8 sps:$4 sm:$0xff]  }
 0x3c4   :  { %1749 = vmatmul.mubr.bf16.gmra.mrb[20].mxu0 %v1500_v5  ;;  %v10391_v5 = vld [vmem:[%s10982_s14 + $0x90] ss:$8 sps:$4 sm:$0xff]  }
 0x3c5   :  { %1938 = vmatpush1.bf16.msra.mxu0 %v10328_v2  ;;  %1758 = vmatprep.mubr.bf16.mxu0 %v1503_v7  ;;  %v10396_v7 = vld [vmem:[%s10982_s14 + $0xa4] ss:$8 sps:$4 sm:$0xff]   ;;  %v10403_v2 = vld [vmem:[%s10982_s14 + $0xd0] ss:$8 sps:$4 sm:$0xff]  }
 0x3c6   :  { %1939 = vmatprep.subr.bf16.mxu0 %v10333_v47  ;;  %v10408_v47 = vld [vmem:[%s10982_s14 + $0xe4] ss:$8 sps:$4 sm:$0xff]  }
 0x3c9   :  { %1940 = vmatpush1.bf16.msra.mxu0 %v10331_v52  ;;  %v10406_v52 = vld [vmem:[%s10982_s14 + $0xe0] ss:$8 sps:$4 sm:$0xff]  }
 0x3ca   :  { %1941 = vmatprep.subr.bf16.mxu0 %v10336_v24  ;;  %v10411_v24 = vld [vmem:[%s10982_s14 + $0xf4] ss:$8 sps:$4 sm:$0xff]  }
 0x3cc   :  { %1759 = vmatmul.mubr.bf16.gmra.mrb[24].mxu0 %v1502_v13  ;;  %v10394_v13 = vld [vmem:[%s10982_s14 + $0xa0] ss:$8 sps:$4 sm:$0xff]  }
 0x3cd   :  { %1942 = vmatpush1.bf16.msra.mxu0 %v10334_v61  ;;  %1961 = vmatprep.mubr.bf16.mxu0 %v1455_v22  ;;  %v10409_v61 = vld [vmem:[%s10982_s14 + $0xf0] ss:$8 sps:$4 sm:$0xff]   ;;  %v2376_v22 = vld [vmem:[%s11022_s4 + $0x8] sm:$0xff] }
 0x3ce   :  { %1943 = vmatprep.subr.bf16.mxu0 %v10339_v9  ;;  %v2025_v9 = vpack.c.bf16 %v10916_v6, %v1421_v54  ;;  %v2393_v54 = vld [vmem:[%s11022_s4 + $0x90] sm:$0xff] }
 0x3d1   :  { %1944 = vmatpush1.bf16.msra.mxu0 %v10337_v33  ;;  %v2378_v33 = vld [vmem:[%s11022_s4 + $0x18] sm:$0xff] }
 0x3d2   :  { %1945 = vmatprep.subr.bf16.mxu0 %v10342_v18  ;;  %v11678_v18 = vpack.c.bf16 %v2394_v39, %v2393_v54 }
 0x3d5   :  { %1946 = vmatpush1.bf16.msra.mxu0 %v10340_v28 }
 0x3d6   :  { %1947 = vmatprep.subr.bf16.mxu0 %v10345_v49  ;;  %v2395_v49 = vld [vmem:[%s11022_s4 + $0xa0] sm:$0xff] }
 0x3d9   :  { %1948 = vmatpush1.bf16.msra.mxu0 %v10343_v57  ;;  %v2396_v57 = vld [vmem:[%s11022_s4 + $0xa8] sm:$0xff] }
 0x3da   :  { %1949 = vmatprep.subr.bf16.mxu0 %v10348_v27  ;;  %v11687_v27 = vpack.c.bf16 %v2396_v57, %v2395_v49 }
 0x3dd   :  { %1950 = vmatpush1.bf16.msra.mxu0 %v10346_v30  ;;  %v2379_v30 = vld [vmem:[%s11022_s4 + $0x20] sm:$0xff] }
 0x3de   :  { %1951 = vmatprep.subr.bf16.mxu0 %v10351_v53  ;;  %v2380_v53 = vld [vmem:[%s11022_s4 + $0x28] sm:$0xff] }
 0x3e1   :  { %1952 = vmatpush1.bf16.msra.mxu0 %v10349_v31  ;;  %v2397_v31 = vld [vmem:[%s11022_s4 + $0xb0] sm:$0xff] }
 0x3e2   :  { %1953 = vmatprep.subr.bf16.mxu0 %v10354_v34  ;;  %v11692_v34 = vpack.c.bf16 %v2380_v53, %v2379_v30 }
 0x3e5   :  { %1954 = vmatpush1.bf16.msra.mxu0 %v10352_v36  ;;  %v2398_v36 = vld [vmem:[%s11022_s4 + $0xb8] sm:$0xff] }
 0x3e6   :  { %1955 = vmatprep.subr.bf16.mxu0 %v10357_v37  ;;  %v2381_v37 = vld [vmem:[%s11022_s4 + $0x30] sm:$0xff] }
 0x3e9   :  { %1956 = vmatpush1.bf16.msra.mxu0 %v10355_v38  ;;  %v2382_v38 = vld [vmem:[%s11022_s4 + $0x38] sm:$0xff] }
 0x3ea   :  { %1957 = vmatprep.subr.bf16.mxu0 %v10360_v40  ;;  %v11698_v40 = vpack.c.bf16 %v2398_v36, %v2397_v31 }
 0x3ed   :  { %1958 = vmatpush1.bf16.msra.mxu0 %v10358_v44  ;;  %v11701_v44 = vpack.c.bf16 %v2382_v38, %v2381_v37 }
 0x3ee   :  { %1959 = vmatprep.subr.bf16.mxu0 %v10363_v62  ;;  %v2399_v62 = vld [vmem:[%s11022_s4 + $0xc0] sm:$0xff] }
 0x3f1   :  { %1960 = vmatpush1.bf16.msra.mxu0 %v10361_v1  ;;  %v2400_v1 = vld [vmem:[%s11022_s4 + $0xc8] sm:$0xff] }
 0x3f2   :  { %2218 = vmatprep.subr.bf16.mxu0 %v10366_v4  ;;  %v11707_v4 = vpack.c.bf16 %v2400_v1, %v2399_v62 }
 0x3f4   :  { %1962 = vmatmul.mubr.bf16.vlgmr.msra.gmra.mrb[12].mxu0 %v1454_v11  ;;  %v2384_v11 = vld [vmem:[%s11022_s4 + $0x48] sm:$0xff] }
 0x3f5   :  { %1971 = vmatprep.mubr.bf16.mxu0 %v11566_v0  ;;  %2219 = vmatpush1.bf16.msra.mxu0 %v10364_v8  ;;  %v2383_v8 = vld [vmem:[%s11022_s4 + $0x40] sm:$0xff] }
 0x3f6   :  { %2220 = vmatprep.subr.bf16.mxu0 %v10369_v14  ;;  %v11711_v14 = vpack.c.bf16 %v2384_v11, %v2383_v8 }
 0x3f9   :  { %2221 = vmatpush1.bf16.msra.mxu0 %v10367_v17  ;;  %v2401_v17 = vld [vmem:[%s11022_s4 + $0xd0] sm:$0xff] }
 0x3fa   :  { %2222 = vmatprep.subr.bf16.mxu0 %v10372_v20  ;;  %v2402_v20 = vld [vmem:[%s11022_s4 + $0xd8] sm:$0xff] }
 0x3fc   :  { %1972 = vmatmul.mubr.bf16.gmra.mrb[16].mxu0 %v11571_v10 }
 0x3fd   :  { %1981 = vmatprep.mubr.bf16.mxu0 %v11573_v12  ;;  %2223 = vmatpush1.bf16.msra.mxu0 %v10370_v23  ;;  %v11717_v23 = vpack.c.bf16 %v2402_v20, %v2401_v17 }
 0x3fe   :  { %2224 = vmatprep.subr.bf16.mxu0 %v10375_v26  ;;  %v2385_v26 = vld [vmem:[%s11022_s4 + $0x50] sm:$0xff] }
 0x401   :  { %2225 = vmatpush1.bf16.msra.mxu0 %v10373_v25  ;;  %v2386_v25 = vld [vmem:[%s11022_s4 + $0x58] sm:$0xff] }
 0x402   :  { %2226 = vmatprep.subr.bf16.mxu0 %v10378_v43  ;;  %v11721_v43 = vpack.c.bf16 %v2386_v25, %v2385_v26 }
 0x404   :  { %1982 = vmatmul.mubr.bf16.gmra.mrb[20].mxu0 %v11577_v15 }
 0x405   :  { %1991 = vmatprep.mubr.bf16.mxu0 %v11579_v16  ;;  %2227 = vmatpush1.bf16.msra.mxu0 %v10376_v29  ;;  %v2403_v29 = vld [vmem:[%s11022_s4 + $0xe0] sm:$0xff] }
 0x406   :  { %2228 = vmatprep.subr.bf16.mxu0 %v10381_v45  ;;  %v2404_v45 = vld [vmem:[%s11022_s4 + $0xe8] sm:$0xff] }
 0x409   :  { %2229 = vmatpush1.bf16.msra.mxu0 %v10379_v35  ;;  %v11727_v35 = vpack.c.bf16 %v2404_v45, %v2403_v29 }
 0x40a   :  { %2230 = vmatprep.subr.bf16.mxu0 %v10384_v50  ;;  %v2387_v50 = vld [vmem:[%s11022_s4 + $0x60] sm:$0xff] }
 0x40c   :  { %1992 = vmatmul.mubr.bf16.gmra.mrb[24].mxu0 %v11581_v19 }
 0x40d   :  { %2231 = vmatpush1.bf16.msra.mxu0 %v10382_v41  ;;  %2250 = vmatprep.mubr.bf16.mxu0 %v11566_v0  ;;  %v10399_v0 = vld [vmem:[%s10982_s14 + $0xb4] ss:$8 sps:$4 sm:$0xff]   ;;  %v2388_v41 = vld [vmem:[%s11022_s4 + $0x68] sm:$0xff]  ;;  %s12664_s14 = sld [smem:[#allocation19_spill]] }
 0x40e   :  { %2232 = vmatprep.subr.bf16.mxu0 %v10387_v51  ;;  %v2405_v51 = vld [vmem:[%s11022_s4 + $0xf0] sm:$0xff] }
 0x411   :  { %2233 = vmatpush1.bf16.msra.mxu0 %v10385_v55  ;;  %v11732_v55 = vpack.c.bf16 %v2388_v41, %v2387_v50 }
 0x412   :  { %2234 = vmatprep.subr.bf16.mxu0 %v10390_v59  ;;  %v2406_v59 = vld [vmem:[%s11022_s4 + $0xf8] sm:$0xff] }
 0x415   :  { %2235 = vmatpush1.bf16.msra.mxu0 %v10388_v60  ;;  %v2389_v60 = vld [vmem:[%s11022_s4 + $0x70] sm:$0xff] }
 0x416   :  { %2236 = vmatprep.subr.bf16.mxu0 %v10393_v3  ;;  %v2390_v3 = vld [vmem:[%s11022_s4 + $0x78] sm:$0xff] }
 0x419   :  { %2237 = vmatpush1.bf16.msra.mxu0 %v10391_v5  ;;  %v11738_v5 = vpack.c.bf16 %v2406_v59, %v2405_v51 }
 0x41a   :  { %2238 = vmatprep.subr.bf16.mxu0 %v10396_v7  ;;  %v11741_v7 = vpack.c.bf16 %v2390_v3, %v2389_v60 }
 0x41d   :  { %2239 = vmatpush1.bf16.msra.mxu0 %v10394_v13 }
 0x41e   :  { %2240 = vmatprep.subr.bf16.mxu0 %v10399_v0 }
 0x421   :  { %2241 = vmatpush1.bf16.msra.mxu0 %v10397_v21 }
 0x422   :  { %2242 = vmatprep.subr.bf16.mxu0 %v10402_v46 }
 0x425   :  { %2243 = vmatpush1.bf16.msra.mxu0 %v10400_v48 }
 0x426   :  { %2244 = vmatprep.subr.bf16.mxu0 %v10405_v58 }
 0x429   :  { %2245 = vmatpush1.bf16.msra.mxu0 %v10403_v2 }
 0x42a   :  { %2246 = vmatprep.subr.bf16.mxu0 %v10408_v47 }
 0x42d   :  { %2247 = vmatpush1.bf16.msra.mxu0 %v10406_v52 }
 0x42e   :  { %2248 = vmatprep.subr.bf16.mxu0 %v10411_v24 }
 0x431   :  { %2249 = vmatpush1.bf16.msra.mxu0 %v10409_v61 }
 0x434   :  { %2251 = vmatmul.mubr.bf16.vlgmr.msra.gmra.mrb[12].mxu0 %v11571_v10  ;;  %v2024_v10 = vpack.c.bf16 %v10916_v6, %v1420_v63  ;;  %v2377_v63 = vld [vmem:[%s11022_s4 + $0x10] sm:$0xff] }
 0x435   :  { %2260 = vmatprep.mubr.bf16.mxu0 %v11573_v12  ;;  %v2391_v12 = vld [vmem:[%s11022_s4 + $0x80] sm:$0xff]  ;;  %v11681_v28 = vpack.c.bf16 %v2378_v33, %v2377_v63 }
 0x43c   :  { %2261 = vmatmul.mubr.bf16.gmra.mrb[16].mxu0 %v11577_v15  ;;  %v2392_v15 = vld [vmem:[%s11022_s4 + $0x88] sm:$0xff]  ;;  %s12668_s4 = sld [smem:[#allocation20_spill]] }
 0x43d   :  { %2270 = vmatprep.mubr.bf16.mxu0 %v11579_v16  ;;  %v9832_v16 = vpack.c.bf16 %v2392_v15, %v2391_v12 }
 0x43f   :  { %9833 = vmatprep.subr.bf16.mxu1 %v9832_v16 }
 0x444   :  { %2271 = vmatmul.mubr.bf16.gmra.mrb[20].mxu0 %v11581_v19  ;;  %v11673_v19 = vpack.c.bf16 %v2376_v22, %v2375_v32 }
 0x445   :  { %2280 = vmatprep.mubr.bf16.mxu0 %v2025_v9 }
 0x446   :  { %9835 = vmatpush3.bf16.msra.mxu1 %v11673_v19 }
 0x447   :  { %9837 = vmatprep.subr.bf16.mxu1 %v11678_v18 }
 0x44a   :  { %9839 = vmatpush3.bf16.msra.mxu1 %v11681_v28 }
 0x44b   :  { %9841 = vmatprep.subr.bf16.mxu1 %v11687_v27 }
 0x44c   :  { %2281 = vmatmul.mubr.bf16.gmra.mrb[24].mxu0 %v2024_v10 }
 0x44d   :  { %9327 = vmatprep.mubr.msk.f32.mxu0 %vm10917_vm0, %v10916_v6 }
 0x44e   :  { %9843 = vmatpush3.bf16.msra.mxu1 %v11692_v34 }
 0x44f   :  { %9845 = vmatprep.subr.bf16.mxu1 %v11698_v40 }
 0x452   :  { %9847 = vmatpush3.bf16.msra.mxu1 %v11701_v44 }
 0x453   :  { %9849 = vmatprep.subr.bf16.mxu1 %v11707_v4 }
 0x456   :  { %9851 = vmatpush3.bf16.msra.mxu1 %v11711_v14 }
 0x457   :  { %9853 = vmatprep.subr.bf16.mxu1 %v11717_v23 }
 0x45a   :  { %9855 = vmatpush3.bf16.msra.mxu1 %v11721_v43 }
 0x45b   :  { %9857 = vmatprep.subr.bf16.mxu1 %v11727_v35 }
 0x45e   :  { %9859 = vmatpush3.bf16.msra.mxu1 %v11732_v55 }
 0x45f   :  { %9861 = vmatprep.subr.bf16.mxu1 %v11738_v5 }
 0x462   :  { %9863 = vmatpush3.bf16.msra.mxu1 %v11741_v7 }
 0x463   :  { %9865 = vmatprep.subr.bf16.mxu1 %v9832_v16 }
 0x507   :  { %v11745_v13 = vpop.f32.mrb[12].mxu0 }
 0x508   :  { %v11747_v0 = vpop.f32.mrb[13].mxu0  ;;  %v2333_v46 = vmul.f32 %v11745_v13, %v11745_v13 }
 0x509   :  { %v11749_v21 = vpop.f32.mrb[14].mxu0  ;;  %v2334_v47 = vmul.f32 %v11747_v0, %v11747_v0 }
 0x50a   :  { %v2307_v48 = vadd.f32 %v11749_v21, %v11745_v13  ;;  %v2335_v58 = vmul.f32 %v11749_v21, %v11749_v21  ;;  %v11757_v2 = vpop.f32.mrb[15].mxu0 }
 0x50b   :  { %v2320_v52 = vadd.f32 %v11757_v2, %v11747_v0  ;;  %v2336_v24 = vmul.f32 %v11757_v2, %v11757_v2 }
 0x50c   :  { %v2349_v61 = vadd.f32 %v2335_v58, %v2333_v46 }
 0x50d   :  { %v2362_v9 = vadd.f32 %v2336_v24, %v2334_v47 }
 0x50f   :  { %v11765_v10 = vpop.f32.mrb[16].mxu0 }
 0x510   :  { %v2308_v12 = vadd.f32 %v2307_v48, %v11765_v10  ;;  %v2337_v15 = vmul.f32 %v11765_v10, %v11765_v10  ;;  %v11770_v16 = vpop.f32.mrb[17].mxu0 }
 0x511   :  { %v2321_v32 = vadd.f32 %v2320_v52, %v11770_v16  ;;  %v2338_v22 = vmul.f32 %v11770_v16, %v11770_v16  ;;  %v11775_v54 = vpop.f32.mrb[18].mxu0 }
 0x512   :  { %v2350_v39 = vadd.f32 %v2349_v61, %v2337_v15  ;;  %v2309_v63 = vadd.f32 %v2308_v12, %v11775_v54  ;;  %v2339_v33 = vmul.f32 %v11775_v54, %v11775_v54  ;;  %v11780_v49 = vpop.f32.mrb[19].mxu0 }
 0x513   :  { %v2363_v57 = vadd.f32 %v2362_v9, %v2338_v22  ;;  %v2322_v30 = vadd.f32 %v2321_v32, %v11780_v49  ;;  %v2340_v53 = vmul.f32 %v11780_v49, %v11780_v49 }
 0x514   :  { %v2351_v31 = vadd.f32 %v2350_v39, %v2339_v33 }
 0x515   :  { %v2364_v36 = vadd.f32 %v2363_v57, %v2340_v53 }
 0x517   :  { %v11785_v37 = vpop.f32.mrb[20].mxu0 }
 0x518   :  { %v2310_v38 = vadd.f32 %v2309_v63, %v11785_v37  ;;  %v2341_v62 = vmul.f32 %v11785_v37, %v11785_v37  ;;  %v11790_v1 = vpop.f32.mrb[21].mxu0 }
 0x519   :  { %v2323_v8 = vadd.f32 %v2322_v30, %v11790_v1  ;;  %v2342_v11 = vmul.f32 %v11790_v1, %v11790_v1  ;;  %v11795_v17 = vpop.f32.mrb[22].mxu0 }
 0x51a   :  { %v2352_v20 = vadd.f32 %v2351_v31, %v2341_v62  ;;  %v2311_v26 = vadd.f32 %v2310_v38, %v11795_v17  ;;  %v2343_v25 = vmul.f32 %v11795_v17, %v11795_v17  ;;  %v11800_v29 = vpop.f32.mrb[23].mxu0 }
 0x51b   :  { %v2365_v45 = vadd.f32 %v2364_v36, %v2342_v11  ;;  %v2324_v50 = vadd.f32 %v2323_v8, %v11800_v29  ;;  %v2344_v41 = vmul.f32 %v11800_v29, %v11800_v29 }
 0x51c   :  { %v2353_v51 = vadd.f32 %v2352_v20, %v2343_v25 }
 0x51d   :  { %v2366_v59 = vadd.f32 %v2365_v45, %v2344_v41 }
 0x51f   :  { %v11805_v60 = vpop.f32.mrb[24].mxu0 }
 0x520   :  { %v2312_v3 = vadd.f32 %v2311_v26, %v11805_v60  ;;  %v2345_v46 = vmul.f32 %v11805_v60, %v11805_v60  ;;  %v11810_v48 = vpop.f32.mrb[25].mxu0 }
 0x521   :  { %v2325_v58 = vadd.f32 %v2324_v50, %v11810_v48  ;;  %v2346_v47 = vmul.f32 %v11810_v48, %v11810_v48  ;;  %v11815_v52 = vpop.f32.mrb[26].mxu0 }
 0x522   :  { %v2354_v24 = vadd.f32 %v2353_v51, %v2345_v46  ;;  %v2313_v61 = vadd.f32 %v2312_v3, %v11815_v52  ;;  %v2347_v9 = vmul.f32 %v11815_v52, %v11815_v52  ;;  %v11820_v12 = vpop.f32.mrb[27].mxu0 }
 0x523   :  { %v2367_v15 = vadd.f32 %v2366_v59, %v2346_v47  ;;  %v2326_v32 = vadd.f32 %v2325_v58, %v11820_v12  ;;  %v2348_v22 = vmul.f32 %v11820_v12, %v11820_v12  ;;  %v2411_v58 = vld [vmem:[%s11042_s12 + $0x20] sm:$0xff]  ;;  %v2413_v47 = vld [vmem:[%s11042_s12 + $0x30] sm:$0xff] }
 0x524   :  { %v2314_v39 = vrot.slane %v2313_v61, 4  ;;  %v2355_v63 = vadd.f32 %v2354_v24, %v2347_v9 }
 0x525   :  { %v2327_v33 = vrot.slane %v2326_v32, 4  ;;  %v2368_v57 = vadd.f32 %v2367_v15, %v2348_v22 }
 0x526   :  { %v2315_v30 = vadd.f32 %v2314_v39, %v2313_v61  ;;  %v2356_v3 = vrot.slane %v2355_v63, 4 }
 0x527   :  { %v2328_v53 = vadd.f32 %v2327_v33, %v2326_v32  ;;  %v2369_v31 = vrot.slane %v2368_v57, 4 }
 0x528   :  { %v2316_v36 = vrot.slane %v2315_v30, 2  ;;  %v2357_v46 = vadd.f32 %v2356_v3, %v2355_v63  ;;  %v10424_v3 = vld [vmem:[%s10992_s24 + $0x70] sm:$0xff]  }
 0x529   :  { %v2329_v38 = vrot.slane %v2328_v53, 2  ;;  %v2370_v62 = vadd.f32 %v2369_v31, %v2368_v57 }
 0x52a   :  { %v2317_v8 = vadd.f32 %v2316_v36, %v2315_v30 }
 0x52b   :  { %v2330_v11 = vadd.f32 %v2329_v38, %v2328_v53  ;;  %v2371_v20 = vrot.slane %v2370_v62, 2  ;;  %v10412_v38 = vld [vmem:[%s10992_s24 + $0x40] sm:$0xff]  }
 0x52c   :  { %v2318_v26 = vrot.slane %v2317_v8, 1 }
 0x52d   :  { %v2331_v25 = vrot.slane %v2330_v11, 1  ;;  %v2372_v45 = vadd.f32 %v2371_v20, %v2370_v62  ;;  %v10413_v62 = vld [vmem:[%s10992_s24] sm:$0xff]   ;;  %v10416_v20 = vld [vmem:[%s10992_s24 + $0x50] sm:$0xff]  }
 0x52e   :  { %v2319_v51 = vadd.f32 %v2318_v26, %v2317_v8  ;;  %v10414_v8 = vld [vmem:[%s10992_s24 + $0x48] sm:$0xff]   ;;  %v10417_v26 = vld [vmem:[%s10992_s24 + $0x10] sm:$0xff]  }
 0x52f   :  { %v2332_v50 = vadd.f32 %v2331_v25, %v2330_v11  ;;  %v2373_v41 = vrot.slane %v2372_v45, 1  ;;  %v10415_v11 = vld [vmem:[%s10992_s24 + $0x8] sm:$0xff]   ;;  %v10418_v25 = vld [vmem:[%s10992_s24 + $0x58] sm:$0xff]  }
 0x531   :  { %2479 = vmatprep.mubr.f32.mxu1 %v2332_v50  ;;  %v2374_v59 = vadd.f32 %v2373_v41, %v2372_v45  ;;  %v10419_v45 = vld [vmem:[%s10992_s24 + $0x18] sm:$0xff]   ;;  %v10420_v50 = vld [vmem:[%s10992_s24 + $0x60] sm:$0xff]  }
 0x532   :  { %2480 = vmatmul.mubr.f32.vlgmr.msra.gmra.mrb[16].mxu1 %v2319_v51  ;;  %v10421_v41 = vld [vmem:[%s10992_s24 + $0x20] sm:$0xff]   ;;  %v10422_v51 = vld [vmem:[%s10992_s24 + $0x68] sm:$0xff]  }
 0x533   :  { %9867 = vmatpush3.bf16.msra.mxu1 %v11673_v19  ;;  %2550 = vmatprep.mubr.f32.mxu1 %v2374_v59  ;;  %v2358_v19 = vrot.slane %v2357_v46, 2  ;;  %v10423_v59 = vld [vmem:[%s10992_s24 + $0x28] sm:$0xff]  }
 0x534   :  { %9869 = vmatprep.subr.bf16.mxu1 %v11678_v18 }
 0x535   :  { %v2359_v18 = vadd.f32 %v2358_v19, %v2357_v46  ;;  %v10425_v46 = vld [vmem:[%s10992_s24 + $0x30] sm:$0xff]   ;;  %v10426_v19 = vld [vmem:[%s10992_s24 + $0x78] sm:$0xff]  }
 0x537   :  { %9871 = vmatpush3.bf16.msra.mxu1 %v11681_v28  ;;  %v2360_v28 = vrot.slane %v2359_v18, 1 }
 0x538   :  { %9873 = vmatprep.subr.bf16.mxu1 %v11687_v27 }
 0x539   :  { %v2361_v27 = vadd.f32 %v2360_v28, %v2359_v18  ;;  %v10427_v18 = vld [vmem:[%s10992_s24 + $0x38] sm:$0xff]   ;;  %v10428_v28 = vld [vmem:[%s12655_s0 + $0x40] sm:$0xff]   ;;  %s10920_s24 = smov 64  }
 0x53b   :  { %9875 = vmatpush3.bf16.msra.mxu1 %v11692_v34  ;;  %v2408_v34 = vld [vmem:[%s11042_s12 + $0x8] sm:$0xff] }
 0x53c   :  { %9877 = vmatprep.subr.bf16.mxu1 %v11698_v40  ;;  %v2410_v40 = vld [vmem:[%s11042_s12 + $0x18] sm:$0xff] }
 0x53f   :  { %9879 = vmatpush3.bf16.msra.mxu1 %v11701_v44  ;;  %v2407_v44 = vld [vmem:[%s11042_s12] sm:$0xff] }
 0x540   :  { %9881 = vmatprep.subr.bf16.mxu1 %v11707_v4  ;;  %v9896_v4 = vpack.c.bf16 %v2410_v40, %v2408_v34 }
 0x543   :  { %9883 = vmatpush3.bf16.msra.mxu1 %v11711_v14  ;;  %v2409_v14 = vld [vmem:[%s11042_s12 + $0x10] sm:$0xff] }
 0x544   :  { %9885 = vmatprep.subr.bf16.mxu1 %v11717_v23  ;;  %v2412_v23 = vld [vmem:[%s11042_s12 + $0x28] sm:$0xff] }
 0x547   :  { %9887 = vmatpush3.bf16.msra.mxu1 %v11721_v43  ;;  %v2414_v43 = vld [vmem:[%s11042_s12 + $0x38] sm:$0xff]  ;;  %s12666_s12 = sld [smem:[#allocation21_spill]] }
 0x548   :  { %9889 = vmatprep.subr.bf16.mxu1 %v11727_v35  ;;  %v9898_v35 = vpack.c.bf16 %v2409_v14, %v2407_v44 }
 0x54b   :  { %9891 = vmatpush3.bf16.msra.mxu1 %v11732_v55  ;;  %v9900_v55 = vpack.c.bf16 %v2414_v43, %v2412_v23 }
 0x54c   :  { %9893 = vmatprep.subr.bf16.mxu1 %v11738_v5  ;;  %v9902_v5 = vpack.c.bf16 %v2413_v47, %v2411_v58 }
 0x54f   :  { %9895 = vmatpush3.bf16.msra.mxu1 %v11741_v7 }
 0x550   :  { %9897 = vmatprep.subr.bf16.mxu1 %v9896_v4 }
 0x552   :  { %2551 = vmatmul.mubr.f32.vlgmr.msra.gmra.mrb[18].mxu1 %v2361_v27 }
 0x553   :  { %2629 = vmatprep.mubr.f32.mxu1 %v10916_v6  ;;  %9899 = vmatpush1.bf16.msra.mxu1 %v9898_v35 }
 0x554   :  { %9901 = vmatprep.subr.bf16.mxu1 %v9900_v55 }
 0x557   :  { %9903 = vmatpush1.bf16.msra.mxu1 %v9902_v5 }
 0x558   :  { %9905 = vmatprep.subr.bf16.mxu1 %v9896_v4 }
 0x605   :  { %v8965_v7 = vpop.f32.mrb[16].mxu1 }
 0x606   :  { %v8966_v24 = vpop.f32.mrb[17].mxu1 }
 0x607   :  { %v8967_v61 = vadd.f32 %v8966_v24, %v8965_v7 }
 0x609   :  { %v2485_v9 = vmul.f32 0.001953125, %v8967_v61 }
 0x60b   :  { %v2557_v39 = vmul.f32 %v2485_v9, %v2485_v9  ;;  %v2636_v53 = vsub.f32 0.0, %v2485_v9 }
 0x625   :  { %v9000_v15 = vpop.f32.mrb[18].mxu1 }
 0x626   :  { %v9001_v32 = vpop.f32.mrb[19].mxu1 }
 0x627   :  { %v9002_v22 = vadd.f32 %v9001_v32, %v9000_v15 }
 0x629   :  { %v2556_v63 = vmul.f32 0.001953125, %v9002_v22 }
 0x62b   :  { %v2558_v33 = vsub.f32 %v2556_v63, %v2557_v39 }
 0x62d   :  { %v2559_v57 = vmax.f32 %v2558_v33, 0.0 }
 0x62f   :  { %v2560_v30 = vadd.f32 1e-05, %v2559_v57 }
 0x631   :  { %10787 = vrsqrt.f32 %v2560_v30 }
 0x63b   :  { %v10788_v31 = vpop.eup %10787 }
 0x63c   :  { %8523 = vmatmul.mubr.msk.f32.vlgmr.msra.gmra.mrb[20].mxu1 %vm1207_vm5, %v10788_v31  ;;  %v2637_v36 = vmul.f32 %v10788_v31, %v2636_v53 }
 0x63d   :  { %9907 = vmatpush1.bf16.msra.mxu1 %v9898_v35  ;;  %2705 = vmatprep.mubr.f32.mxu1 %v10916_v6 }
 0x63e   :  { %9909 = vmatprep.subr.bf16.mxu1 %v9900_v55 }
 0x641   :  { %9911 = vmatpush1.bf16.msra.mxu1 %v9902_v5 }
 0x642   :  { %9003 = vmatprep.subr.bf16.mxu1 %v10412_v38 }
 0x644   :  { %8524 = vmatmul.mubr.msk.f32.vlgmr.msra.gmra.mrb[22].mxu1 %vm1207_vm5, %v2637_v36 }
 0x645   :  { %9004 = vmatpush3.bf16.msra.mxu1 %v10413_v62  ;;  %v10429_v62 = vld [vmem:[%s12655_s0] sm:$0xff]  }
 0x646   :  { %9005 = vmatprep.subr.bf16.mxu1 %v10414_v8 }
 0x649   :  { %9006 = vmatpush3.bf16.msra.mxu1 %v10415_v11 }
 0x64a   :  { %9007 = vmatprep.subr.bf16.mxu1 %v10416_v20 }
 0x64d   :  { %9008 = vmatpush3.bf16.msra.mxu1 %v10417_v26  ;;  %v10430_v26 = vld [vmem:[%s12655_s0 + $0x48] sm:$0xff]  }
 0x64e   :  { %9009 = vmatprep.subr.bf16.mxu1 %v10418_v25 }
 0x651   :  { %9010 = vmatpush3.bf16.msra.mxu1 %v10419_v45 }
 0x652   :  { %9011 = vmatprep.subr.bf16.mxu1 %v10420_v50 }
 0x655   :  { %9012 = vmatpush3.bf16.msra.mxu1 %v10421_v41 }
 0x656   :  { %9013 = vmatprep.subr.bf16.mxu1 %v10422_v51 }
 0x659   :  { %9014 = vmatpush3.bf16.msra.mxu1 %v10423_v59 }
 0x65a   :  { %9015 = vmatprep.subr.bf16.mxu1 %v10424_v3 }
 0x65d   :  { %9016 = vmatpush3.bf16.msra.mxu1 %v10425_v46 }
 0x65e   :  { %9017 = vmatprep.subr.bf16.mxu1 %v10426_v19 }
 0x661   :  { %9018 = vmatpush3.bf16.msra.mxu1 %v10427_v18 }
 0x662   :  { %9031 = vmatprep.subr.bf16.mxu1 %v10428_v28  ;;  %v10431_v28 = vld [vmem:[%s12655_s0 + $0x8] sm:$0xff]  }
 0x70f   :  { %v2631_v27 = vpop.f32.mrb[20].mxu1 }
 0x710   :  { %v2715_v34 = vrot.slane %v2631_v27, %v11525_v56  ;;  %v2633_v40 = vpop.f32.mrb[21].mxu1 }
 0x711   :  { %v2719_v44 = vrot.slane %v2633_v40, %v11525_v56 }
 0x712   :  { %v2720_v4 = vmul.f32 %v2715_v34, %v11745_v13  ;;  %v2724_v14 = vmul.f32 %v2715_v34, %v11765_v10  ;;  %v2728_v23 = vmul.f32 %v2715_v34, %v11785_v37  ;;  %v2732_v43 = vmul.f32 %v2715_v34, %v11805_v60 }
 0x713   :  { %v2721_v35 = vmul.f32 %v2719_v44, %v11747_v0  ;;  %v2725_v55 = vmul.f32 %v2719_v44, %v11770_v16  ;;  %v2729_v58 = vmul.f32 %v2719_v44, %v11790_v1  ;;  %v2733_v47 = vmul.f32 %v2719_v44, %v11810_v48 }
 0x714   :  { %v2723_v5 = vmul.f32 %v2719_v44, %v11757_v2  ;;  %v2722_v7 = vmul.f32 %v2715_v34, %v11749_v21  ;;  %v2727_v13 = vmul.f32 %v2719_v44, %v11780_v49  ;;  %v2731_v10 = vmul.f32 %v2719_v44, %v11800_v29 }
 0x715   :  { %v2726_v37 = vmul.f32 %v2715_v34, %v11775_v54  ;;  %v2730_v60 = vmul.f32 %v2715_v34, %v11795_v17  ;;  %v2735_v0 = vmul.f32 %v2719_v44, %v11820_v12  ;;  %v2734_v16 = vmul.f32 %v2715_v34, %v11815_v52 }
 0x717   :  { %v2707_v24 = vpop.f32.mrb[22].mxu1 }
 0x718   :  { %v2739_v1 = vrot.slane %v2707_v24, %v11525_v56  ;;  %v2709_v48 = vpop.f32.mrb[23].mxu1  ;;  %v10443_v24 = vld [vmem:[%s12655_s0 + $0x38] sm:$0xff]  }
 0x719   :  { %v2743_v2 = vrot.slane %v2709_v48, %v11525_v56  ;;  %v10445_v48 = vld [vmem:[%s12656_s5] sm:$0xff]  }
 0x71a   :  { %v2744_v61 = vadd.f32 %v2739_v1, %v2720_v4  ;;  %v2748_v21 = vadd.f32 %v2739_v1, %v2724_v14  ;;  %v2752_v9 = vadd.f32 %v2739_v1, %v2728_v23  ;;  %v2756_v49 = vadd.f32 %v2739_v1, %v2732_v43  ;;  %v10432_v4 = vld [vmem:[%s12655_s0 + $0x50] sm:$0xff]  }
 0x71b   :  { %v2745_v15 = vadd.f32 %v2743_v2, %v2721_v35  ;;  %v2749_v29 = vadd.f32 %v2743_v2, %v2725_v55  ;;  %v2753_v54 = vadd.f32 %v2743_v2, %v2729_v58  ;;  %v2757_v32 = vadd.f32 %v2743_v2, %v2733_v47  ;;  %v10433_v55 = vld [vmem:[%s12655_s0 + $0x10] sm:$0xff]   ;;  %v10434_v58 = vld [vmem:[%s12655_s0 + $0x58] sm:$0xff]  }
 0x71c   :  { %v2760_v17 = vmax.f32 %v2744_v61, 0.0  ;;  %v2764_v22 = vmax.f32 %v2748_v21, 0.0  ;;  %v2768_v12 = vmax.f32 %v2752_v9, 0.0  ;;  %v2772_v52 = vmax.f32 %v2756_v49, 0.0  ;;  %v10446_v61 = vld [vmem:[%s12656_s5 + $0x48] sm:$0xff]   ;;  %v10448_v9 = vld [vmem:[%s12656_s5 + $0x50] sm:$0xff]  }
 0x71d   :  { %v2761_v39 = vmax.f32 %v2745_v15, 0.0  ;;  %v2765_v63 = vmax.f32 %v2749_v29, 0.0  ;;  %v2769_v33 = vmax.f32 %v2753_v54, 0.0  ;;  %v2773_v57 = vmax.f32 %v2757_v32, 0.0  ;;  %v10447_v21 = vld [vmem:[%s12656_s5 + $0x8] sm:$0xff]   ;;  %v10449_v49 = vld [vmem:[%s12656_s5 + $0x10] sm:$0xff]  }
 0x71e   :  { %v2844_v30 = vpack.c.bf16 %v2764_v22, %v2760_v17  ;;  %v2846_v53 = vpack.c.bf16 %v2772_v52, %v2768_v12  ;;  %v2747_v31 = vadd.f32 %v2743_v2, %v2723_v5  ;;  %v2746_v36 = vadd.f32 %v2739_v1, %v2722_v7  ;;  %v10435_v5 = vld [vmem:[%s12655_s0 + $0x18] sm:$0xff]   ;;  %v10436_v7 = vld [vmem:[%s12655_s0 + $0x60] sm:$0xff]   ;;  %v10454_v17 = vld [vmem:[%s12656_s5 + $0x68] sm:$0xff]  }
 0x71f   :  { %v2845_v38 = vpack.c.bf16 %v2765_v63, %v2761_v39  ;;  %v2847_v8 = vpack.c.bf16 %v2773_v57, %v2769_v33  ;;  %v2751_v11 = vadd.f32 %v2743_v2, %v2727_v13  ;;  %v2755_v20 = vadd.f32 %v2743_v2, %v2731_v10  ;;  %v10437_v13 = vld [vmem:[%s12655_s0 + $0x20] sm:$0xff]   ;;  %v10438_v10 = vld [vmem:[%s12655_s0 + $0x68] sm:$0xff]   ;;  %v10450_v15 = vld [vmem:[%s12656_s5 + $0x58] sm:$0xff]  }
 0x720   :  { %v2763_v25 = vmax.f32 %v2747_v31, 0.0  ;;  %v2762_v45 = vmax.f32 %v2746_v36, 0.0  ;;  %v2750_v50 = vadd.f32 %v2739_v1, %v2726_v37  ;;  %v2754_v41 = vadd.f32 %v2739_v1, %v2730_v60  ;;  %v10439_v37 = vld [vmem:[%s12655_s0 + $0x28] sm:$0xff]   ;;  %v10440_v60 = vld [vmem:[%s12655_s0 + $0x70] sm:$0xff]   ;;  %v10451_v29 = vld [vmem:[%s12656_s5 + $0x18] sm:$0xff]  }
 0x721   :  { %3008 = vmatprep.mubr.bf16.mxu1 %v2845_v38  ;;  %v2767_v51 = vmax.f32 %v2751_v11, 0.0  ;;  %v2771_v59 = vmax.f32 %v2755_v20, 0.0  ;;  %v2759_v3 = vadd.f32 %v2743_v2, %v2735_v0  ;;  %v2758_v46 = vadd.f32 %v2739_v1, %v2734_v16  ;;  %v10441_v0 = vld [vmem:[%s12655_s0 + $0x30] sm:$0xff]   ;;  %v10442_v16 = vld [vmem:[%s12655_s0 + $0x78] sm:$0xff]   ;;  %v10444_v1 = vld [vmem:[%s12656_s5 + $0x40] sm:$0xff]   ;;  %s12679_s0 = sld [smem:[#allocation32_spill]] }
 0x722   :  { %3009 = vmatmul.mubr.bf16.vlgmr.msra.gmra.mrb[24].mxu1 %v2844_v30  ;;  %v2766_v19 = vmax.f32 %v2750_v50, 0.0  ;;  %v2770_v18 = vmax.f32 %v2754_v41, 0.0  ;;  %v2801_v47 = vpack.c.bf16 %v2763_v25, %v10916_v6  ;;  %v2800_v2 = vpack.c.bf16 %v2762_v45, %v10916_v6  ;;  %v10452_v54 = vld [vmem:[%s12656_s5 + $0x60] sm:$0xff]   ;;  %v10455_v22 = vld [vmem:[%s12656_s5 + $0x28] sm:$0xff]   ;;  %v10456_v12 = vld [vmem:[%s12656_s5 + $0x70] sm:$0xff]  }
 0x723   :  { %9032 = vmatpush3.bf16.msra.mxu1 %v10429_v62  ;;  %3016 = vmatprep.mubr.bf16.mxu1 %v2847_v8  ;;  %v2803_v27 = vpack.c.bf16 %v2771_v59, %v2767_v51  ;;  %v3173_v34 = vpack.c.bf16 %v2767_v51, %v2763_v25  ;;  %v2775_v40 = vmax.f32 %v2759_v3, 0.0  ;;  %v2774_v44 = vmax.f32 %v2758_v46, 0.0  ;;  %v10453_v32 = vld [vmem:[%s12656_s5 + $0x20] sm:$0xff]   ;;  %v10457_v52 = vld [vmem:[%s12656_s5 + $0x30] sm:$0xff]   ;;  %v10458_v39 = vld [vmem:[%s12656_s5 + $0x78] sm:$0xff]  }
 0x724   :  { %9033 = vmatprep.subr.bf16.mxu1 %v10430_v26  ;;  %v2802_v14 = vpack.c.bf16 %v2770_v18, %v2766_v19  ;;  %v11893_v23 = vpack.c.bf16 %v2766_v19, %v2762_v45  ;;  %v10459_v63 = vld [vmem:[%s12656_s5 + $0x38] sm:$0xff]   ;;  %v3379_v33 = vld [vmem:[%s12657_s13] sm:$0xff]  ;;  %v3380_v57 = vld [vmem:[%s12657_s13 + $0x8] sm:$0xff]  ;;  %v10919_v30 = vmov 0.0|0.0   ;;  %s12680_s5 = sld [smem:[#allocation34_spill]] }
 0x725   :  { %v11895_v43 = vpack.c.bf16 %v2775_v40, %v2771_v59  ;;  %v11897_v35 = vpack.c.bf16 %v2774_v44, %v2770_v18  ;;  %9912 = vmatprep.subr.bf16.mxu0 %v10919_v30  ;;  %v3381_v31 = vld [vmem:[%s12657_s13 + $0x10] sm:$0xff]  ;;  %v3382_v36 = vld [vmem:[%s12657_s13 + $0x18] sm:$0xff]  ;;  %v3383_v62 = vld [vmem:[%s12657_s13 + $0x20] sm:$0xff] }
 0x726   :  { %v9916_v38 = vpack.c.bf16 %v3382_v36, %v3381_v31  ;;  %v3384_v8 = vld [vmem:[%s12657_s13 + $0x28] sm:$0xff]  ;;  %v3385_v20 = vld [vmem:[%s12657_s13 + $0x30] sm:$0xff]  ;;  %v3386_v26 = vld [vmem:[%s12657_s13 + $0x38] sm:$0xff] }
 0x727   :  { %9034 = vmatpush3.bf16.msra.mxu1 %v10431_v28  ;;  %v9919_v11 = vpack.c.bf16 %v3384_v8, %v3383_v62  ;;  %v9922_v25 = vpack.c.bf16 %v3386_v26, %v3385_v20  ;;  %v3387_v45 = vld [vmem:[%s12657_s13 + $0x40] sm:$0xff]  ;;  %v3388_v50 = vld [vmem:[%s12657_s13 + $0x48] sm:$0xff]  ;;  %v3389_v51 = vld [vmem:[%s12657_s13 + $0x50] sm:$0xff] }
 0x728   :  { %9035 = vmatprep.subr.bf16.mxu1 %v10432_v4  ;;  %v9925_v41 = vpack.c.bf16 %v3388_v50, %v3387_v45  ;;  %v3390_v59 = vld [vmem:[%s12657_s13 + $0x58] sm:$0xff]  ;;  %v3391_v46 = vld [vmem:[%s12657_s13 + $0x60] sm:$0xff]  ;;  %v3392_v19 = vld [vmem:[%s12657_s13 + $0x68] sm:$0xff] }
 0x729   :  { %v9928_v3 = vpack.c.bf16 %v3390_v59, %v3389_v51  ;;  %v3393_v18 = vld [vmem:[%s12657_s13 + $0x70] sm:$0xff]  ;;  %v9931_v28 = vpack.c.bf16 %v3392_v19, %v3391_v46 }
 0x72a   :  { %3017 = vmatmul.mubr.bf16.gmra.mrb[28].mxu1 %v2846_v53  ;;  %v9913_v53 = vpack.c.bf16 %v3380_v57, %v3379_v33 }
 0x72b   :  { %9036 = vmatpush3.bf16.msra.mxu1 %v10433_v55  ;;  %3153 = vmatprep.mubr.bf16.mxu1 %v2801_v47 }
 0x72c   :  { %9037 = vmatprep.subr.bf16.mxu1 %v10434_v58  ;;  %9914 = vmatpush3.bf16.msra.mxu0 %v9913_v53 }
 0x72d   :  { %9915 = vmatprep.subr.bf16.mxu0 %v10919_v30 }
 0x72f   :  { %9038 = vmatpush3.bf16.msra.mxu1 %v10435_v5 }
 0x730   :  { %9039 = vmatprep.subr.bf16.mxu1 %v10436_v7  ;;  %9917 = vmatpush3.bf16.msra.mxu0 %v9916_v38 }
 0x731   :  { %9918 = vmatprep.subr.bf16.mxu0 %v10919_v30 }
 0x733   :  { %9040 = vmatpush3.bf16.msra.mxu1 %v10437_v13 }
 0x734   :  { %9041 = vmatprep.subr.bf16.mxu1 %v10438_v10  ;;  %9920 = vmatpush3.bf16.msra.mxu0 %v9919_v11 }
 0x735   :  { %9921 = vmatprep.subr.bf16.mxu0 %v10919_v30 }
 0x737   :  { %9042 = vmatpush3.bf16.msra.mxu1 %v10439_v37 }
 0x738   :  { %9043 = vmatprep.subr.bf16.mxu1 %v10440_v60  ;;  %9923 = vmatpush3.bf16.msra.mxu0 %v9922_v25 }
 0x739   :  { %9924 = vmatprep.subr.bf16.mxu0 %v10919_v30 }
 0x73b   :  { %9044 = vmatpush3.bf16.msra.mxu1 %v10441_v0 }
 0x73c   :  { %9045 = vmatprep.subr.bf16.mxu1 %v10442_v16  ;;  %9926 = vmatpush3.bf16.msra.mxu0 %v9925_v41 }
 0x73d   :  { %9927 = vmatprep.subr.bf16.mxu0 %v10919_v30 }
 0x73f   :  { %9046 = vmatpush3.bf16.msra.mxu1 %v10443_v24 }
 0x740   :  { %9059 = vmatprep.subr.bf16.mxu1 %v10444_v1  ;;  %9929 = vmatpush3.bf16.msra.mxu0 %v9928_v3 }
 0x741   :  { %9930 = vmatprep.subr.bf16.mxu0 %v10919_v30 }
 0x742   :  { %3154 = vmatmul.mubr.bf16.vlgmr.msra.gmra.mrb[32].mxu1 %v2800_v2 }
 0x743   :  { %3161 = vmatprep.mubr.bf16.mxu1 %v2803_v27  ;;  %9060 = vmatpush3.bf16.msra.mxu1 %v10445_v48  ;;  %v3394_v27 = vld [vmem:[%s12657_s13 + $0x78] sm:$0xff]  ;;  %s10924_s13 = smov 48  }
 0x744   :  { %9061 = vmatprep.subr.bf16.mxu1 %v10446_v61  ;;  %9932 = vmatpush3.bf16.msra.mxu0 %v9931_v28 }
 0x745   :  { %9933 = vmatprep.subr.bf16.mxu0 %v10919_v30 }
 0x747   :  { %9062 = vmatpush3.bf16.msra.mxu1 %v10447_v21 }
 0x748   :  { %9063 = vmatprep.subr.bf16.mxu1 %v10448_v9 }
 0x74a   :  { %3162 = vmatmul.mubr.bf16.gmra.mrb[36].mxu1 %v2802_v14 }
 0x74b   :  { %9064 = vmatpush3.bf16.msra.mxu1 %v10449_v49  ;;  %3336 = vmatprep.mubr.bf16.mxu1 %v3173_v34  ;;  %v9934_v34 = vpack.c.bf16 %v3394_v27, %v3393_v18 }
 0x74c   :  { %9065 = vmatprep.subr.bf16.mxu1 %v10450_v15 }
 0x74d   :  { %9935 = vmatpush3.bf16.msra.mxu0 %v9934_v34 }
 0x74e   :  { %9960 = vmatprep.subr.bf16.mxu0 %v10919_v30 }
 0x74f   :  { %9066 = vmatpush3.bf16.msra.mxu1 %v10451_v29 }
 0x750   :  { %9067 = vmatprep.subr.bf16.mxu1 %v10452_v54 }
 0x753   :  { %9068 = vmatpush3.bf16.msra.mxu1 %v10453_v32 }
 0x754   :  { %9069 = vmatprep.subr.bf16.mxu1 %v10454_v17 }
 0x757   :  { %9070 = vmatpush3.bf16.msra.mxu1 %v10455_v22 }
 0x758   :  { %9071 = vmatprep.subr.bf16.mxu1 %v10456_v12 }
 0x75b   :  { %9072 = vmatpush3.bf16.msra.mxu1 %v10457_v52 }
 0x75c   :  { %9073 = vmatprep.subr.bf16.mxu1 %v10458_v39 }
 0x75f   :  { %9074 = vmatpush3.bf16.msra.mxu1 %v10459_v63 }
 0x760   :  { %9936 = vmatprep.subr.bf16.mxu1 %v10919_v30 }
 0x762   :  { %3337 = vmatmul.mubr.bf16.vlgmr.msra.gmra.mrb[40].mxu1 %v11893_v23 }
 0x763   :  { %3344 = vmatprep.mubr.bf16.mxu1 %v11895_v43  ;;  %9938 = vmatpush3.bf16.msra.mxu1 %v9913_v53 }
 0x764   :  { %9939 = vmatprep.subr.bf16.mxu1 %v10919_v30 }
 0x767   :  { %9941 = vmatpush3.bf16.msra.mxu1 %v9916_v38 }
 0x768   :  { %9942 = vmatprep.subr.bf16.mxu1 %v10919_v30 }
 0x76a   :  { %3345 = vmatmul.mubr.bf16.gmra.mrb[44].mxu1 %v11897_v35 }
 0x76b   :  { %9362 = vmatprep.mubr.msk.f32.mxu1 %vm10917_vm0, %v10916_v6  ;;  %9944 = vmatpush3.bf16.msra.mxu1 %v9919_v11 }
 0x76c   :  { %9945 = vmatprep.subr.bf16.mxu1 %v10919_v30 }
 0x76f   :  { %9947 = vmatpush3.bf16.msra.mxu1 %v9922_v25 }
 0x770   :  { %9948 = vmatprep.subr.bf16.mxu1 %v10919_v30 }
 0x773   :  { %9950 = vmatpush3.bf16.msra.mxu1 %v9925_v41 }
 0x774   :  { %9951 = vmatprep.subr.bf16.mxu1 %v10919_v30 }
 0x777   :  { %9953 = vmatpush3.bf16.msra.mxu1 %v9928_v3 }
 0x778   :  { %9954 = vmatprep.subr.bf16.mxu1 %v10919_v30 }
 0x77b   :  { %9956 = vmatpush3.bf16.msra.mxu1 %v9931_v28 }
 0x77c   :  { %9957 = vmatprep.subr.bf16.mxu1 %v10919_v30 }
 0x77f   :  { %9959 = vmatpush3.bf16.msra.mxu1 %v9934_v34 }
 0x780   :  { %9387 = vmatprep.subr.bf16.mxu1 %v10916_v6 }
 0x7f5   :  { %v9019_v40 = vpop.f32.mrb[24].mxu1 }
 0x7f6   :  { %v9020_v44 = vpop.f32.mrb[25].mxu1 }
 0x7f7   :  { %v9021_v4 = vadd.f32 %v9020_v44, %v9019_v40  ;;  %v9022_v14 = vpop.f32.mrb[26].mxu1 }
 0x7f8   :  { %v9023_v23 = vpop.f32.mrb[27].mxu1 }
 0x7f9   :  { %v9024_v43 = vadd.f32 %v9023_v23, %v9022_v14 }
 0x7fd   :  { %v9025_v35 = vpop.f32.mrb[28].mxu1 }
 0x7fe   :  { %v9026_v55 = vpop.f32.mrb[29].mxu1 }
 0x7ff   :  { %v9027_v58 = vadd.f32 %v9026_v55, %v9025_v35  ;;  %v9028_v47 = vpop.f32.mrb[30].mxu1  ;;  %v3395_v35 = vld [vmem:[%s12658_s17] sm:$0xff]  ;;  %v3396_v55 = vld [vmem:[%s12658_s17 + $0x8] sm:$0xff] }
 0x800   :  { %v9029_v5 = vpop.f32.mrb[31].mxu1 }
 0x801   :  { %v9030_v7 = vadd.f32 %v9029_v5, %v9028_v47  ;;  %v9961_v47 = vpack.c.bf16 %v3396_v55, %v3395_v35  ;;  %v3398_v5 = vld [vmem:[%s12658_s17 + $0x18] sm:$0xff]  ;;  %v10482_v35 = vld [vmem:[%s12661_s29 + $0x30] sm:$0xff]  }
 0x802   :  { %v10483_v55 = vld [vmem:[%s12661_s29 + $0x38] sm:$0xff]  }
 0x815   :  { %v9047_v13 = vpop.f32.mrb[32].mxu1 }
 0x816   :  { %v9048_v10 = vpop.f32.mrb[33].mxu1 }
 0x817   :  { %v9049_v37 = vadd.f32 %v9048_v10, %v9047_v13  ;;  %v9050_v60 = vpop.f32.mrb[34].mxu1  ;;  %v10460_v13 = vld [vmem:[%s12659_s21] sm:$0xff]   ;;  %v10461_v10 = vld [vmem:[%s12659_s21 + $0x8] sm:$0xff]  }
 0x818   :  { %v9051_v0 = vpop.f32.mrb[35].mxu1 }
 0x819   :  { %v3156_v16 = vadd.f32 %v9049_v37, %v9021_v4  ;;  %v9052_v24 = vadd.f32 %v9051_v0, %v9050_v60  ;;  %v10462_v37 = vld [vmem:[%s12659_s21 + $0x10] sm:$0xff]   ;;  %v10463_v60 = vld [vmem:[%s12659_s21 + $0x18] sm:$0xff]  }
 0x81b   :  { %v3159_v1 = vadd.f32 %v9052_v24, %v9024_v43 }
 0x81d   :  { %v9053_v48 = vpop.f32.mrb[36].mxu1 }
 0x81e   :  { %v9054_v2 = vpop.f32.mrb[37].mxu1 }
 0x81f   :  { %v9055_v61 = vadd.f32 %v9054_v2, %v9053_v48  ;;  %v9056_v21 = vpop.f32.mrb[38].mxu1 }
 0x820   :  { %v9057_v9 = vpop.f32.mrb[39].mxu1 }
 0x821   :  { %v3164_v49 = vadd.f32 %v9055_v61, %v9027_v58  ;;  %v9058_v15 = vadd.f32 %v9057_v9, %v9056_v21  ;;  %v3397_v58 = vld [vmem:[%s12658_s17 + $0x10] sm:$0xff]  ;;  %s12681_s17 = sld [smem:[#allocation33_spill]] }
 0x823   :  { %v3167_v29 = vadd.f32 %v9058_v15, %v9030_v7  ;;  %v9964_v7 = vpack.c.bf16 %v3398_v5, %v3397_v58  ;;  %v4064_v5 = vld [vmem:[%s12662_s3] sm:$0xff] }
 0x835   :  { %v9075_v54 = vpop.f32.mrb[40].mxu1 }
 0x836   :  { %v9076_v32 = vpop.f32.mrb[41].mxu1 }
 0x837   :  { %v9077_v17 = vadd.f32 %v9076_v32, %v9075_v54  ;;  %v9078_v22 = vpop.f32.mrb[42].mxu1  ;;  %v10464_v32 = vld [vmem:[%s12659_s21 + $0x20] sm:$0xff]  }
 0x838   :  { %v9079_v12 = vpop.f32.mrb[43].mxu1 }
 0x839   :  { %v11967_v52 = vadd.f32 %v9077_v17, %v3156_v16  ;;  %v9080_v39 = vadd.f32 %v9079_v12, %v9078_v22  ;;  %v10465_v17 = vld [vmem:[%s12659_s21 + $0x28] sm:$0xff]   ;;  %v10466_v22 = vld [vmem:[%s12659_s21 + $0x30] sm:$0xff]   ;;  %v10467_v12 = vld [vmem:[%s12659_s21 + $0x38] sm:$0xff]   ;;  %s12682_s21 = sld [smem:[#allocation35_spill]] }
 0x83b   :  { %v11969_v63 = vadd.f32 %v9080_v39, %v3159_v1  ;;  %v3366_v62 = vmul.f32 %v11967_v52, %v11967_v52 }
 0x83d   :  { %v9081_v33 = vpop.f32.mrb[44].mxu1  ;;  %v3367_v53 = vmul.f32 %v11969_v63, %v11969_v63  ;;  %v3357_v8 = vadd.f32 %v11969_v63, %v11967_v52 }
 0x83e   :  { %v9082_v57 = vpop.f32.mrb[45].mxu1 }
 0x83f   :  { %v9083_v31 = vadd.f32 %v9082_v57, %v9081_v33  ;;  %v9084_v36 = vpop.f32.mrb[46].mxu1  ;;  %v3370_v26 = vadd.f32 %v3367_v53, %v3366_v62 }
 0x840   :  { %v9085_v38 = vpop.f32.mrb[47].mxu1 }
 0x841   :  { %v11977_v11 = vadd.f32 %v9083_v31, %v3164_v49  ;;  %v9086_v20 = vadd.f32 %v9085_v38, %v9084_v36 }
 0x843   :  { %v3358_v25 = vadd.f32 %v3357_v8, %v11977_v11  ;;  %v3368_v45 = vmul.f32 %v11977_v11, %v11977_v11  ;;  %v11982_v50 = vadd.f32 %v9086_v20, %v3167_v29 }
 0x845   :  { %v3371_v41 = vadd.f32 %v3370_v26, %v3368_v45  ;;  %v3359_v51 = vadd.f32 %v3358_v25, %v11982_v50  ;;  %v3369_v59 = vmul.f32 %v11982_v50, %v11982_v50 }
 0x847   :  { %v3360_v3 = vrot.slane %v3359_v51, 4  ;;  %v3372_v46 = vadd.f32 %v3371_v41, %v3369_v59  ;;  %v10468_v59 = vld [vmem:[%s12660_s25] sm:$0xff]  }
 0x849   :  { %v3361_v19 = vadd.f32 %v3360_v3, %v3359_v51  ;;  %v3373_v18 = vrot.slane %v3372_v46, 4 }
 0x84b   :  { %v3362_v28 = vrot.slane %v3361_v19, 2  ;;  %v3374_v27 = vadd.f32 %v3373_v18, %v3372_v46  ;;  %v10472_v46 = vld [vmem:[%s12660_s25 + $0x20] sm:$0xff]   ;;  %v10474_v18 = vld [vmem:[%s12660_s25 + $0x30] sm:$0xff]  }
 0x84d   :  { %v3363_v34 = vadd.f32 %v3362_v28, %v3361_v19  ;;  %v3375_v40 = vrot.slane %v3374_v27, 2  ;;  %v10473_v19 = vld [vmem:[%s12660_s25 + $0x28] sm:$0xff]   ;;  %v10475_v28 = vld [vmem:[%s12660_s25 + $0x38] sm:$0xff]  }
 0x84f   :  { %v3364_v44 = vrot.slane %v3363_v34, 1  ;;  %v3376_v4 = vadd.f32 %v3375_v40, %v3374_v27 }
 0x851   :  { %v3365_v14 = vadd.f32 %v3364_v44, %v3363_v34  ;;  %v3377_v23 = vrot.slane %v3376_v4, 1  ;;  %v10476_v34 = vld [vmem:[%s12661_s29] sm:$0xff]   ;;  %v10477_v44 = vld [vmem:[%s12661_s29 + $0x8] sm:$0xff]  }
 0x853   :  { %9328 = vmatmul.mubr.f32.vlgmr.msra.gmra.mrb[28].mxu0 %v3365_v14  ;;  %v3378_v43 = vadd.f32 %v3377_v23, %v3376_v4  ;;  %v10478_v4 = vld [vmem:[%s12661_s29 + $0x10] sm:$0xff]   ;;  %v10479_v14 = vld [vmem:[%s12661_s29 + $0x18] sm:$0xff]   ;;  %v10480_v23 = vld [vmem:[%s12661_s29 + $0x20] sm:$0xff]  }
 0x854   :  { %9373 = vmatprep.mubr.msk.f32.mxu0 %vm10917_vm0, %v10916_v6  ;;  %9962 = vmatpush3.bf16.msra.mxu0 %v9961_v47 }
 0x855   :  { %9363 = vmatmul.mubr.f32.vlgmr.msra.gmra.mrb[48].mxu1 %v3378_v43  ;;  %9963 = vmatprep.subr.bf16.mxu0 %v10919_v30  ;;  %v10481_v43 = vld [vmem:[%s12661_s29 + $0x28] sm:$0xff]   ;;  %s10925_s29 = smov 32  }
 0x856   :  { %9403 = vmatprep.mubr.msk.bf16.mxu1 %vm10917_vm0, %v10916_v6  ;;  %9388 = vmatpush3.bf16.msra.mxu1 %v10460_v13 }
 0x857   :  { %9389 = vmatprep.subr.bf16.mxu1 %v10916_v6 }
 0x858   :  { %9965 = vmatpush3.bf16.msra.mxu0 %v9964_v7 }
 0x859   :  { %9966 = vmatprep.subr.bf16.mxu0 %v10919_v30 }
 0x85a   :  { %9390 = vmatpush3.bf16.msra.mxu1 %v10461_v10  ;;  %v4066_v10 = vld [vmem:[%s12662_s3 + $0x10] sm:$0xff] }
 0x85b   :  { %9391 = vmatprep.subr.bf16.mxu1 %v10916_v6 }
 0x85e   :  { %9392 = vmatpush3.bf16.msra.mxu1 %v10462_v37  ;;  %v4067_v37 = vld [vmem:[%s12662_s3 + $0x18] sm:$0xff] }
 0x85f   :  { %9393 = vmatprep.subr.bf16.mxu1 %v10916_v6 }
 0x862   :  { %9394 = vmatpush3.bf16.msra.mxu1 %v10463_v60  ;;  %v9976_v60 = vpack.c.bf16 %v4067_v37, %v4066_v10 }
 0x863   :  { %9395 = vmatprep.subr.bf16.mxu1 %v10916_v6 }
 0x866   :  { %9396 = vmatpush3.bf16.msra.mxu1 %v10464_v32 }
 0x867   :  { %9397 = vmatprep.subr.bf16.mxu1 %v10916_v6 }
 0x86a   :  { %9398 = vmatpush3.bf16.msra.mxu1 %v10465_v17 }
 0x86b   :  { %9399 = vmatprep.subr.bf16.mxu1 %v10916_v6 }
 0x86e   :  { %9400 = vmatpush3.bf16.msra.mxu1 %v10466_v22 }
 0x86f   :  { %9401 = vmatprep.subr.bf16.mxu1 %v10916_v6 }
 0x872   :  { %9402 = vmatpush3.bf16.msra.mxu1 %v10467_v12 }
 0x873   :  { %9407 = vmatprep.subr.bf16.mxu1 %v10916_v6 }
 0x926   :  { %v3465_v0 = vpop.f32.mrb[28].mxu0 }
 0x927   :  { %v3469_v16 = vmul.f32 0.0078125, %v3465_v0  ;;  %v9329_v24 = vpop.f32.mrb[29].mxu0  ;;  %v4068_v0 = vld [vmem:[%s12662_s3 + $0x20] sm:$0xff] }
 0x928   :  { %v3536_v1 = vpop.f32.mrb[48].mxu1 }
 0x929   :  { %v3541_v48 = vmul.f32 %v3469_v16, %v3469_v16  ;;  %v3540_v2 = vmul.f32 0.0078125, %v3536_v1  ;;  %v9364_v61 = vpop.f32.mrb[49].mxu1  ;;  %v3619_v15 = vsub.f32 0.0, %v3469_v16  ;;  %v4069_v16 = vld [vmem:[%s12662_s3 + $0x28] sm:$0xff]  ;;  %v4070_v1 = vld [vmem:[%s12662_s3 + $0x30] sm:$0xff] }
 0x92a   :  { %v9979_v24 = vpack.c.bf16 %v4069_v16, %v4068_v0 }
 0x92b   :  { %v3542_v21 = vsub.f32 %v3540_v2, %v3541_v48  ;;  %v4071_v48 = vld [vmem:[%s12662_s3 + $0x38] sm:$0xff] }
 0x92c   :  { %v9982_v2 = vpack.c.bf16 %v4071_v48, %v4070_v1 }
 0x92d   :  { %v3543_v9 = vmax.f32 %v3542_v21, 0.0 }
 0x92f   :  { %v3544_v49 = vadd.f32 1e-05, %v3543_v9 }
 0x931   :  { %10789 = vrsqrt.f32 %v3544_v49 }
 0x93b   :  { %v10790_v29 = vpop.eup %10789 }
 0x93c   :  { %9374 = vmatmul.mubr.msk.f32.vlgmr.msra.gmra.mrb[30].mxu0 %vm1207_vm5, %v10790_v29  ;;  %v3620_v54 = vmul.f32 %v10790_v29, %v3619_v15 }
 0x93d   :  { %9968 = vmatpush3.bf16.msra.mxu0 %v9961_v47  ;;  %9384 = vmatprep.mubr.msk.f32.mxu0 %vm10917_vm0, %v10916_v6 }
 0x93e   :  { %9969 = vmatprep.subr.bf16.mxu0 %v10919_v30 }
 0x941   :  { %9971 = vmatpush3.bf16.msra.mxu0 %v9964_v7  ;;  %v4065_v7 = vld [vmem:[%s12662_s3 + $0x8] sm:$0xff]  ;;  %s12684_s3 = sld [smem:[#allocation36_spill]] }
 0x942   :  { %9972 = vmatprep.subr.bf16.mxu0 %v10919_v30  ;;  %v9973_v13 = vpack.c.bf16 %v4065_v7, %v4064_v5  ;;  %v10490_v5 = vld [vmem:[%s12664_s14 + $0x30] sm:$0xff]   ;;  %v10491_v7 = vld [vmem:[%s12664_s14 + $0x38] sm:$0xff]  }
 0x944   :  { %9385 = vmatmul.mubr.msk.f32.vlgmr.msra.gmra.mrb[32].mxu0 %vm1207_vm5, %v3620_v54 }
 0x945   :  { %9463 = vmatprep.mubr.msk.f32.mxu0 %vm10917_vm0, %v10916_v6  ;;  %9974 = vmatpush3.bf16.msra.mxu0 %v9973_v13 }
 0x946   :  { %9975 = vmatprep.subr.bf16.mxu0 %v10919_v30 }
 0x949   :  { %9977 = vmatpush3.bf16.msra.mxu0 %v9976_v60 }
 0x94a   :  { %9978 = vmatprep.subr.bf16.mxu0 %v10919_v30 }
 0x94d   :  { %9980 = vmatpush3.bf16.msra.mxu0 %v9979_v24 }
 0x94e   :  { %9981 = vmatprep.subr.bf16.mxu0 %v10919_v30 }
 0x951   :  { %9983 = vmatpush3.bf16.msra.mxu0 %v9982_v2 }
 0x952   :  { %9984 = vmatprep.subr.bf16.mxu0 %v10919_v30 }
 0xa0f   :  { %v3615_v39 = vpop.f32.mrb[30].mxu0 }
 0xa10   :  { %v9375_v33 = vpop.f32.mrb[31].mxu0  ;;  %v3697_v57 = vrot.slane %v3615_v39, %v11525_v56 }
 0xa12   :  { %v3698_v53 = vmul.f32 %v3697_v57, %v11967_v52  ;;  %v3699_v36 = vmul.f32 %v3697_v57, %v11969_v63  ;;  %v3700_v38 = vmul.f32 %v3697_v57, %v11977_v11  ;;  %v3701_v62 = vmul.f32 %v3697_v57, %v11982_v50  ;;  %v10469_v63 = vld [vmem:[%s12660_s25 + $0x8] sm:$0xff]   ;;  %v10470_v11 = vld [vmem:[%s12660_s25 + $0x10] sm:$0xff]   ;;  %v10471_v50 = vld [vmem:[%s12660_s25 + $0x18] sm:$0xff]   ;;  %s12683_s25 = sld [smem:[#allocation37_spill]] }
 0xa17   :  { %v3690_v31 = vpop.f32.mrb[32].mxu0 }
 0xa18   :  { %v3705_v8 = vrot.slane %v3690_v31, %v11525_v56  ;;  %v9386_v20 = vpop.f32.mrb[33].mxu0 }
 0xa1a   :  { %v3706_v26 = vadd.f32 %v3705_v8, %v3698_v53  ;;  %v3707_v25 = vadd.f32 %v3705_v8, %v3699_v36  ;;  %v3708_v45 = vadd.f32 %v3705_v8, %v3700_v38  ;;  %v3709_v41 = vadd.f32 %v3705_v8, %v3701_v62 }
 0xa1c   :  { %v3711_v51 = vmax.f32 %v3707_v25, 0.0  ;;  %v3712_v52 = vmax.f32 %v3708_v45, 0.0  ;;  %v3710_v27 = vmax.f32 %v3706_v26, 0.0  ;;  %v3713_v58 = vmax.f32 %v3709_v41, 0.0  ;;  %v4072_v41 = vld [vmem:[%s12663_s8] sm:$0xff] }
 0xa1e   :  { %v3739_v3 = vpack.c.bf16 %v3712_v52, %v3711_v51  ;;  %v3720_v40 = vpack.c.bf16 %v3710_v27, %v10916_v6  ;;  %v3936_v47 = vpack.c.bf16 %v10916_v6, %v3713_v58  ;;  %v4073_v51 = vld [vmem:[%s12663_s8 + $0x8] sm:$0xff]  ;;  %v4074_v52 = vld [vmem:[%s12663_s8 + $0x10] sm:$0xff]  ;;  %v10488_v58 = vld [vmem:[%s12664_s14 + $0x20] sm:$0xff]  }
 0xa20   :  { %9404 = vmatmul.mubr.bf16.vlgmr.msra.gmra.mrb[52].mxu1 %v3739_v3  ;;  %v4075_v3 = vld [vmem:[%s12663_s8 + $0x18] sm:$0xff]  ;;  %s12685_s8 = sld [smem:[#allocation38_spill]] }
 0xa21   :  { %9408 = vmatpush3.bf16.msra.mxu1 %v10468_v59  ;;  %9423 = vmatprep.mubr.msk.bf16.mxu1 %vm10917_vm0, %v10916_v6  ;;  %v9997_v59 = vpack.c.bf16 %v4073_v51, %v4072_v41  ;;  %v10492_v41 = vld [vmem:[%s12665_s6] sm:$0xff]  }
 0xa22   :  { %9409 = vmatprep.subr.bf16.mxu1 %v10916_v6 }
 0xa25   :  { %9410 = vmatpush3.bf16.msra.mxu1 %v10469_v63  ;;  %v10000_v63 = vpack.c.bf16 %v4075_v3, %v4074_v52  ;;  %v10493_v52 = vld [vmem:[%s12665_s6 + $0x8] sm:$0xff]  }
 0xa26   :  { %9411 = vmatprep.subr.bf16.mxu1 %v10916_v6 }
 0xa29   :  { %9412 = vmatpush3.bf16.msra.mxu1 %v10470_v11 }
 0xa2a   :  { %9413 = vmatprep.subr.bf16.mxu1 %v10916_v6 }
 0xa2d   :  { %9414 = vmatpush3.bf16.msra.mxu1 %v10471_v50 }
 0xa2e   :  { %9415 = vmatprep.subr.bf16.mxu1 %v10916_v6 }
 0xa31   :  { %9416 = vmatpush3.bf16.msra.mxu1 %v10472_v46 }
 0xa32   :  { %9417 = vmatprep.subr.bf16.mxu1 %v10916_v6 }
 0xa35   :  { %9418 = vmatpush3.bf16.msra.mxu1 %v10473_v19 }
 0xa36   :  { %9419 = vmatprep.subr.bf16.mxu1 %v10916_v6 }
 0xa39   :  { %9420 = vmatpush3.bf16.msra.mxu1 %v10474_v18 }
 0xa3a   :  { %9421 = vmatprep.subr.bf16.mxu1 %v10916_v6 }
 0xa3d   :  { %9422 = vmatpush3.bf16.msra.mxu1 %v10475_v28 }
 0xa3e   :  { %9427 = vmatprep.subr.bf16.mxu1 %v10916_v6 }
 0xa40   :  { %9424 = vmatmul.mubr.bf16.vlgmr.msra.gmra.mrb[52].mxu1 %v3720_v40 }
 0xa41   :  { %9428 = vmatpush3.bf16.msra.mxu1 %v10476_v34  ;;  %9443 = vmatprep.mubr.msk.bf16.mxu1 %vm10917_vm0, %v10916_v6 }
 0xa42   :  { %9429 = vmatprep.subr.bf16.mxu1 %v10916_v6 }
 0xa45   :  { %9430 = vmatpush3.bf16.msra.mxu1 %v10477_v44 }
 0xa46   :  { %9431 = vmatprep.subr.bf16.mxu1 %v10916_v6 }
 0xa49   :  { %9432 = vmatpush3.bf16.msra.mxu1 %v10478_v4 }
 0xa4a   :  { %9433 = vmatprep.subr.bf16.mxu1 %v10916_v6 }
 0xa4d   :  { %9434 = vmatpush3.bf16.msra.mxu1 %v10479_v14 }
 0xa4e   :  { %9435 = vmatprep.subr.bf16.mxu1 %v10916_v6 }
 0xa51   :  { %9436 = vmatpush3.bf16.msra.mxu1 %v10480_v23  ;;  %v10484_v23 = vld [vmem:[%s12664_s14] sm:$0xff]  }
 0xa52   :  { %9437 = vmatprep.subr.bf16.mxu1 %v10916_v6 }
 0xa55   :  { %9438 = vmatpush3.bf16.msra.mxu1 %v10481_v43  ;;  %v10485_v43 = vld [vmem:[%s12664_s14 + $0x8] sm:$0xff]  }
 0xa56   :  { %9439 = vmatprep.subr.bf16.mxu1 %v10916_v6 }
 0xa59   :  { %9440 = vmatpush3.bf16.msra.mxu1 %v10482_v35  ;;  %v10486_v35 = vld [vmem:[%s12664_s14 + $0x10] sm:$0xff]  }
 0xa5a   :  { %9441 = vmatprep.subr.bf16.mxu1 %v10916_v6 }
 0xa5d   :  { %9442 = vmatpush3.bf16.msra.mxu1 %v10483_v55  ;;  %v10487_v55 = vld [vmem:[%s12664_s14 + $0x18] sm:$0xff]  }
 0xa5e   :  { %9996 = vmatprep.subr.bf16.mxu1 %v10919_v30 }
 0xa60   :  { %9444 = vmatmul.mubr.bf16.vlgmr.msra.gmra.mrb[52].mxu1 %v3936_v47  ;;  %v10489_v47 = vld [vmem:[%s12664_s14 + $0x28] sm:$0xff]   ;;  %s12686_s14 = sld [smem:[#allocation40_spill]] }
 0xa61   :  { %9493 = vmatprep.mubr.msk.f32.mxu1 %vm10917_vm0, %v10916_v6  ;;  %9998 = vmatpush3.bf16.msra.mxu1 %v9997_v59 }
 0xa62   :  { %9999 = vmatprep.subr.bf16.mxu1 %v10919_v30 }
 0xa65   :  { %10001 = vmatpush3.bf16.msra.mxu1 %v10000_v63 }
 0xa66   :  { %9539 = vmatprep.subr.mxu1 %v10916_v6 }
 0xb33   :  { %v12079_v61 = vpop.f32.mrb[52].mxu1 }
 0xb34   :  { %v4053_v21 = vmul.f32 %v12079_v61, %v12079_v61  ;;  %v9445_v9 = vpop.f32.mrb[53].mxu1  ;;  %v4044_v15 = vsel %vm262_vm6, %v12079_v61, 0.0 }
 0xb35   :  { %v12083_v49 = vpop.f32.mrb[54].mxu1  ;;  %v263_v9 = vsel %vm262_vm6, %v11383_v42, 0.0 }
 0xb36   :  { %v4045_v29 = vsel %vm262_vm6, %v12083_v49, 0.0  ;;  %v4054_v54 = vmul.f32 %v12083_v49, %v12083_v49  ;;  %v9446_v32 = vpop.f32.mrb[55].mxu1  ;;  %v4055_v22 = vsel %vm262_vm6, %v4053_v21, 0.0 }
 0xb37   :  { %v4046_v17 = vadd.f32 %v4045_v29, %v4044_v15  ;;  %v271_v15 = vmul.f32 %v11383_v42, %v11383_v42  ;;  %v264_v29 = vrot.slane %v263_v9, 4 }
 0xb38   :  { %v4056_v12 = vsel %vm262_vm6, %v4054_v54, 0.0 }
 0xb39   :  { %v4047_v39 = vrot.slane %v4046_v17, 4  ;;  %v4057_v33 = vadd.f32 %v4056_v12, %v4055_v22  ;;  %v265_v54 = vadd.f32 %v264_v29, %v263_v9 }
 0xb3b   :  { %v4048_v57 = vadd.f32 %v4047_v39, %v4046_v17  ;;  %v4058_v36 = vrot.slane %v4057_v33, 4  ;;  %v266_v32 = vrot.slane %v265_v54, 2 }
 0xb3d   :  { %v4049_v53 = vrot.slane %v4048_v57, 2  ;;  %v4059_v8 = vadd.f32 %v4058_v36, %v4057_v33  ;;  %v267_v17 = vadd.f32 %v266_v32, %v265_v54 }
 0xb3f   :  { %v4050_v31 = vadd.f32 %v4049_v53, %v4048_v57  ;;  %v4060_v20 = vrot.slane %v4059_v8, 2  ;;  %v268_v12 = vrot.slane %v267_v17, 1 }
 0xb41   :  { %v4051_v38 = vrot.slane %v4050_v31, 1  ;;  %v4061_v26 = vadd.f32 %v4060_v20, %v4059_v8  ;;  %v269_v33 = vadd.f32 %v268_v12, %v267_v17 }
 0xb43   :  { %v4052_v62 = vadd.f32 %v4051_v38, %v4050_v31  ;;  %v4062_v25 = vrot.slane %v4061_v26, 1  ;;  %v270_v53 = vmul.f32 0.125, %v269_v33  ;;  %v10504_v33 = vld [vmem:[%s12669_s15 + $0x10] sm:$0xff]  }
 0xb45   :  { %9464 = vmatmul.mubr.msk.f32.vlgmr.msra.gmra.mrb[34].mxu0 %vm262_vm6, %v4052_v62  ;;  %v4063_v45 = vadd.f32 %v4062_v25, %v4061_v26  ;;  %v280_v38 = vmul.f32 %v270_v53, %v270_v53 }
 0xb46   :  { %9986 = vmatpush3.bf16.msra.mxu0 %v9973_v13  ;;  %9482 = vmatprep.mubr.msk.f32.mxu0 %vm10917_vm0, %v10916_v6 }
 0xb47   :  { %9987 = vmatprep.subr.bf16.mxu0 %v10919_v30 }
 0xb4a   :  { %9989 = vmatpush3.bf16.msra.mxu0 %v9976_v60 }
 0xb4b   :  { %9990 = vmatprep.subr.bf16.mxu0 %v10919_v30 }
 0xb4e   :  { %9992 = vmatpush3.bf16.msra.mxu0 %v9979_v24 }
 0xb4f   :  { %9993 = vmatprep.subr.bf16.mxu0 %v10919_v30 }
 0xb52   :  { %9995 = vmatpush3.bf16.msra.mxu0 %v9982_v2 }
 0xb53   :  { %10002 = vmatprep.subr.bf16.mxu0 %v10919_v30 }
 0xb55   :  { %9483 = vmatmul.mubr.msk.f32.vlgmr.msra.gmra.mrb[36].mxu0 %vm262_vm6, %v4063_v45 }
 0xb56   :  { %9504 = vmatprep.mubr.msk.f32.mxu0 %vm10917_vm0, %v10916_v6  ;;  %10004 = vmatpush3.bf16.msra.mxu0 %v9997_v59  ;;  %v283_v59 = vsub.f32 %v11383_v42, %v270_v53  ;;  %v10497_v42 = vld [vmem:[%s12666_s12 + $0x8] sm:$0xff]   ;;  %v10506_v53 = vld [vmem:[%s12669_s15 + $0x20] sm:$0xff]  }
 0xb57   :  { %10005 = vmatprep.subr.bf16.mxu0 %v10919_v30 }
 0xb5a   :  { %10007 = vmatpush3.bf16.msra.mxu0 %v10000_v63  ;;  %v10494_v63 = vld [vmem:[%s12665_s6 + $0x10] sm:$0xff]  }
 0xb5b   :  { %9507 = vmatprep.subr.bf16.mxu0 %v10916_v6 }
 0xc18   :  { %v4145_v11 = vpop.f32.mrb[34].mxu0 }
 0xc19   :  { %v9465_v50 = vpop.f32.mrb[35].mxu0  ;;  %v4149_v46 = vmul.f32 0.03125, %v4145_v11 }
 0xc1a   :  { %v10495_v50 = vld [vmem:[%s12665_s6 + $0x18] sm:$0xff]   ;;  %s12687_s6 = sld [smem:[#allocation39_spill]] }
 0xc1b   :  { %v4224_v18 = vmul.f32 %v4149_v46, %v4149_v46  ;;  %v4302_v30 = vsub.f32 0.0, %v4149_v46 }
 0xc28   :  { %v4219_v19 = vpop.f32.mrb[36].mxu0 }
 0xc29   :  { %v4223_v28 = vmul.f32 0.03125, %v4219_v19  ;;  %v9484_v27 = vpop.f32.mrb[37].mxu0  ;;  %v10496_v19 = vld [vmem:[%s12666_s12] sm:$0xff]  }
 0xc2a   :  { %v10499_v27 = vld [vmem:[%s12666_s12 + $0x18] sm:$0xff]  }
 0xc2b   :  { %v4225_v34 = vsub.f32 %v4223_v28, %v4224_v18  ;;  %v10498_v28 = vld [vmem:[%s12666_s12 + $0x10] sm:$0xff]  }
 0xc2d   :  { %v4226_v40 = vmax.f32 %v4225_v34, 0.0  ;;  %v12173_v34 = vld [vmem:[%s12667_s27] sm:$0xff] }
 0xc2f   :  { %v4227_v44 = vadd.f32 1e-05, %v4226_v40 }
 0xc31   :  { %10791 = vrsqrt.f32 %v4227_v44 }
 0xc3b   :  { %v10792_v4 = vpop.eup %10791 }
 0xc3c   :  { %9494 = vmatmul.mubr.msk.f32.vlgmr.msra.gmra.mrb[50].mxu1 %vm1207_vm5, %v10792_v4  ;;  %v4303_v14 = vmul.f32 %v10792_v4, %v4302_v30 }
 0xc3d   :  { %9541 = vmatprep.mubr.msk.f32.mxu1 %vm10917_vm0, %v10916_v6 }
 0xc3e   :  { %9505 = vmatmul.mubr.msk.f32.vlgmr.msra.gmra.mrb[38].mxu0 %vm1207_vm5, %v4303_v14  ;;  %v10500_v14 = vld [vmem:[%s12668_s4] sm:$0xff]  }
 0xc3f   :  { %9523 = vmatprep.mubr.msk.bf16.mxu0 %vm10917_vm0, %v10916_v6  ;;  %9508 = vmatpush3.bf16.msra.mxu0 %v10484_v23  ;;  %v10501_v23 = vld [vmem:[%s12668_s4 + $0x8] sm:$0xff]  }
 0xc40   :  { %9509 = vmatprep.subr.bf16.mxu0 %v10916_v6 }
 0xc43   :  { %9510 = vmatpush3.bf16.msra.mxu0 %v10485_v43 }
 0xc44   :  { %9511 = vmatprep.subr.bf16.mxu0 %v10916_v6 }
 0xc47   :  { %9512 = vmatpush3.bf16.msra.mxu0 %v10486_v35 }
 0xc48   :  { %9513 = vmatprep.subr.bf16.mxu0 %v10916_v6 }
 0xc4b   :  { %9514 = vmatpush3.bf16.msra.mxu0 %v10487_v55 }
 0xc4c   :  { %9515 = vmatprep.subr.bf16.mxu0 %v10916_v6 }
 0xc4f   :  { %9516 = vmatpush3.bf16.msra.mxu0 %v10488_v58 }
 0xc50   :  { %9517 = vmatprep.subr.bf16.mxu0 %v10916_v6 }
 0xc53   :  { %9518 = vmatpush3.bf16.msra.mxu0 %v10489_v47 }
 0xc54   :  { %9519 = vmatprep.subr.bf16.mxu0 %v10916_v6 }
 0xc57   :  { %9520 = vmatpush3.bf16.msra.mxu0 %v10490_v5 }
 0xc58   :  { %9521 = vmatprep.subr.bf16.mxu0 %v10916_v6 }
 0xc5b   :  { %9522 = vmatpush3.bf16.msra.mxu0 %v10491_v7 }
 0xc5c   :  { %9527 = vmatprep.subr.bf16.mxu0 %v10916_v6 }
 0xd0f   :  { %v4298_v13 = vpop.f32.mrb[50].mxu1 }
 0xd10   :  { %v4380_v10 = vrot.slane %v4298_v13, %v11525_v56  ;;  %v9495_v37 = vpop.f32.mrb[51].mxu1 }
 0xd11   :  { %v4373_v60 = vpop.f32.mrb[38].mxu0 }
 0xd12   :  { %v4381_v0 = vmul.f32 %v4380_v10, %v12079_v61  ;;  %v4382_v16 = vmul.f32 %v4380_v10, %v12083_v49  ;;  %v4386_v24 = vrot.slane %v4373_v60, %v11525_v56  ;;  %v9506_v1 = vpop.f32.mrb[39].mxu0  ;;  %v272_v61 = vsel %vm262_vm6, %v271_v15, 0.0 }
 0xd13   :  { %v273_v49 = vrot.slane %v272_v61, 4 }
 0xd14   :  { %v4387_v48 = vadd.f32 %v4386_v24, %v4381_v0  ;;  %v4388_v2 = vadd.f32 %v4386_v24, %v4382_v16 }
 0xd15   :  { %v274_v56 = vadd.f32 %v273_v49, %v272_v61 }
 0xd16   :  { %v4390_v21 = vmax.f32 %v4388_v2, 0.0  ;;  %v4389_v26 = vmax.f32 %v4387_v48, 0.0 }
 0xd17   :  { %v275_v22 = vrot.slane %v274_v56, 2 }
 0xd18   :  { %4392 = vrot.lane.b32.xlu0 %v4390_v21, %s10920_s24 }
 0xd19   :  { %v276_v39 = vadd.f32 %v275_v22, %v274_v56  ;;  %v10502_v22 = vld [vmem:[%s12669_s15] sm:$0xff]  }
 0xd1b   :  { %v277_v57 = vrot.slane %v276_v39, 1 }
 0xd1d   :  { %v278_v31 = vadd.f32 %v277_v57, %v276_v39  ;;  %v10503_v39 = vld [vmem:[%s12669_s15 + $0x8] sm:$0xff]   ;;  %v10505_v57 = vld [vmem:[%s12669_s15 + $0x18] sm:$0xff]  }
 0xd1f   :  { %v279_v36 = vmul.f32 0.125, %v278_v31  ;;  %v10507_v31 = vld [vmem:[%s12669_s15 + $0x28] sm:$0xff]  }
 0xd21   :  { %v281_v62 = vsub.f32 %v279_v36, %v280_v38  ;;  %v10508_v36 = vld [vmem:[%s12669_s15 + $0x30] sm:$0xff]   ;;  %v10509_v38 = vld [vmem:[%s12669_s15 + $0x38] sm:$0xff]  }
 0xd23   :  { %v282_v8 = vmax.f32 %v281_v62, 0.0  ;;  %v10510_v62 = vld [vmem:[%s12670_s16] sm:$0xff]  }
 0xd25   :  { %v284_v20 = vadd.f32 1e-05, %v282_v8 }
 0xd27   :  { %10793 = vrsqrt.f32 %v284_v20 }
 0xd31   :  { %v10794_v3 = vpop.eup %10793 }
 0xd32   :  { %v286_v11 = vmul.f32 %v10794_v3, %v283_v59 }
 0xd34   :  { %v287_v46 = vmax.f32 %v286_v11, 0.0 }
 0xd36   :  { %v4397_v18 = vpack.c.bf16 %v287_v46, %v287_v46 }
 0xd8a   :  { %v4393_v25 = vpop.permute.xlu0 %4392 }
 0xd8b   :  { %v4395_v45 = vsel %vm262_vm6, %v4389_v26, %v4393_v25 }
 0xd8c   :  { %v12145_v51 = vpack.c.bf16 %v4395_v45, %v4395_v45 }
 0xd8e   :  { %9524 = vmatmul.mubr.bf16.vlgmr.msra.gmra.mrb[40].mxu0 %v12145_v51 }
 0xd8f   :  { %9528 = vmatpush3.bf16.msra.mxu0 %v10492_v41  ;;  %9535 = vmatprep.mubr.msk.bf16.mxu0 %vm10917_vm0, %v10916_v6 }
 0xd90   :  { %9529 = vmatprep.subr.bf16.mxu0 %v10916_v6 }
 0xd93   :  { %9530 = vmatpush3.bf16.msra.mxu0 %v10493_v52 }
 0xd94   :  { %9531 = vmatprep.subr.bf16.mxu0 %v10916_v6 }
 0xd97   :  { %9532 = vmatpush3.bf16.msra.mxu0 %v10494_v63 }
 0xd98   :  { %9533 = vmatprep.subr.bf16.mxu0 %v10916_v6 }
 0xd9b   :  { %9534 = vmatpush3.bf16.msra.mxu0 %v10495_v50 }
 0xd9c   :  { %9544 = vmatprep.subr.bf16.mxu0 %v10916_v6 }
 0xd9e   :  { %9536 = vmatmul.mubr.msk.bf16.vlgmr.msra.gmra.mrb[40].mxu0 %vm262_vm6, %v4397_v18 }
 0xd9f   :  { %9545 = vmatpush3.bf16.msra.mxu0 %v10496_v19  ;;  %9552 = vmatprep.mubr.msk.bf16.mxu0 %vm10917_vm0, %v10916_v6 }
 0xda0   :  { %9546 = vmatprep.subr.bf16.mxu0 %v10916_v6 }
 0xda3   :  { %9547 = vmatpush3.bf16.msra.mxu0 %v10497_v42 }
 0xda4   :  { %9548 = vmatprep.subr.bf16.mxu0 %v10916_v6 }
 0xda7   :  { %9549 = vmatpush3.bf16.msra.mxu0 %v10498_v28 }
 0xda8   :  { %9550 = vmatprep.subr.bf16.mxu0 %v10916_v6 }
 0xdab   :  { %9551 = vmatpush3.bf16.msra.mxu0 %v10499_v27 }
 0xdac   :  { %9556 = vmatprep.subr.bf16.mxu0 %v10916_v6 }
 0xdae   :  { %9553 = vmatmul.mubr.msk.bf16.vlgmr.msra.gmra.mrb[44].mxu0 %vm262_vm6, %v4397_v18 }
 0xdaf   :  { %9560 = vmatprep.mubr.msk.bf16.mxu0 %vm10917_vm0, %v10916_v6  ;;  %9557 = vmatpush3.bf16.msra.mxu0 %v10500_v14 }
 0xdb0   :  { %9558 = vmatprep.subr.bf16.mxu0 %v10916_v6 }
 0xdb3   :  { %9559 = vmatpush3.bf16.msra.mxu0 %v10501_v23 }
 0xdb4   :  { %9564 = vmatprep.subr.bf16.mxu0 %v10916_v6 }
 0xe71   :  { %v4600_v40 = vpop.f32.mrb[40].mxu0 }
 0xe72   :  { %v9537_v44 = vpop.f32.mrb[41].mxu0  ;;  %9540 = vmatpush3.msra.mxu1 %v4600_v40 }
 0xe73   :  { %v4603_v30 = vpop.f32.mrb[42].mxu0  ;;  %9542 = vmatmul.mubr.msk.f32.vlgmr.msra.gmra.mrb[56].mxu1 %vm4606_vm7, %v12173_v34  ;;  %9584 = vmatprep.subr.bf16.mxu1 %v10916_v6 }
 0xe74   :  { %v9538_v4 = vpop.f32.mrb[43].mxu0  ;;  %9588 = vmatprep.mubr.msk.bf16.mxu1 %vm10917_vm0, %v10916_v6  ;;  %9585 = vmatpush3.bf16.msra.mxu1 %v10510_v62 }
 0xe75   :  { %9586 = vmatprep.subr.bf16.mxu1 %v10916_v6 }
 0xf46   :  { %v4676_v43 = vpop.f32.mrb[56].mxu1 }
 0xf47   :  { %v4680_v35 = vsel %vm1207_vm5, %v4676_v43, 0.0  ;;  %v4688_v55 = vmul.f32 %v4676_v43, %v4676_v43  ;;  %v9543_v58 = vpop.f32.mrb[57].mxu1 }
 0xf48   :  { %v4681_v47 = vrot.slane %v4680_v35, 4 }
 0xf49   :  { %v4689_v5 = vsel %vm1207_vm5, %v4688_v55, 0.0 }
 0xf4a   :  { %v4682_v7 = vadd.f32 %v4681_v47, %v4680_v35  ;;  %v4690_v13 = vrot.slane %v4689_v5, 4 }
 0xf4c   :  { %v4683_v10 = vrot.slane %v4682_v7, 2  ;;  %v4691_v37 = vadd.f32 %v4690_v13, %v4689_v5 }
 0xf4e   :  { %v4684_v60 = vadd.f32 %v4683_v10, %v4682_v7  ;;  %v4692_v0 = vrot.slane %v4691_v37, 2  ;;  %v10512_v10 = vld [vmem:[%s12671_s18] sm:$0xff]  }
 0xf50   :  { %v4685_v16 = vrot.slane %v4684_v60, 1  ;;  %v4693_v24 = vadd.f32 %v4692_v0, %v4691_v37 }
 0xf52   :  { %v4686_v1 = vadd.f32 %v4685_v16, %v4684_v60  ;;  %v4694_v48 = vrot.slane %v4693_v24, 1 }
 0xf54   :  { %v4687_v2 = vmul.f32 0.125, %v4686_v1  ;;  %v4695_v21 = vadd.f32 %v4694_v48, %v4693_v24  ;;  %v10513_v24 = vld [vmem:[%s12671_s18 + $0x8] sm:$0xff]   ;;  %v10514_v1 = vld [vmem:[%s12672_s23] sm:$0xff]  }
 0xf55   :  { %v10515_v48 = vld [vmem:[%s12672_s23 + $0x8] sm:$0xff]  }
 0xf56   :  { %v4696_v9 = vmul.f32 0.125, %v4695_v21  ;;  %v4697_v15 = vmul.f32 %v4687_v2, %v4687_v2  ;;  %v4700_v49 = vsub.f32 %v4676_v43, %v4687_v2  ;;  %v10511_v43 = vld [vmem:[%s12670_s16 + $0x8] sm:$0xff]   ;;  %v10516_v2 = vld [vmem:[%s12672_s23 + $0x10] sm:$0xff]  }
 0xf57   :  { %9587 = vmatpush3.bf16.msra.mxu1 %v10511_v43 }
 0xf58   :  { %v4698_v29 = vsub.f32 %v4696_v9, %v4697_v15  ;;  %9592 = vmatprep.subr.mxu1 %v10916_v6 }
 0xf5a   :  { %v4699_v61 = vmax.f32 %v4698_v29, 0.0 }
 0xf5c   :  { %v4701_v54 = vadd.f32 1e-05, %v4699_v61 }
 0xf5e   :  { %10795 = vrsqrt.f32 %v4701_v54 }
 0xf68   :  { %v10796_v32 = vpop.eup %10795 }
 0xf69   :  { %v4703_v56 = vmul.f32 %v10796_v32, %v4700_v49 }
 0xf6b   :  { %v4704_v17 = vmax.f32 %v4703_v56, 0.0 }
 0xf6d   :  { %v4705_v12 = vpack.c.bf16 %v4704_v17, %v4704_v17 }
 0xf6f   :  { %9561 = vmatmul.mubr.msk.bf16.vlgmr.msra.gmra.mrb[44].mxu0 %vm1207_vm5, %v4705_v12 }
 0xf70   :  { %9565 = vmatpush3.bf16.msra.mxu0 %v10502_v22  ;;  %9580 = vmatprep.mubr.msk.bf16.mxu0 %vm10917_vm0, %v10916_v6 }
 0xf71   :  { %9566 = vmatprep.subr.bf16.mxu0 %v10916_v6 }
 0xf74   :  { %9567 = vmatpush3.bf16.msra.mxu0 %v10503_v39 }
 0xf75   :  { %9568 = vmatprep.subr.bf16.mxu0 %v10916_v6 }
 0xf78   :  { %9569 = vmatpush3.bf16.msra.mxu0 %v10504_v33 }
 0xf79   :  { %9570 = vmatprep.subr.bf16.mxu0 %v10916_v6 }
 0xf7c   :  { %9571 = vmatpush3.bf16.msra.mxu0 %v10505_v57 }
 0xf7d   :  { %9572 = vmatprep.subr.bf16.mxu0 %v10916_v6 }
 0xf80   :  { %9573 = vmatpush3.bf16.msra.mxu0 %v10506_v53 }
 0xf81   :  { %9574 = vmatprep.subr.bf16.mxu0 %v10916_v6 }
 0xf84   :  { %9575 = vmatpush3.bf16.msra.mxu0 %v10507_v31 }
 0xf85   :  { %9576 = vmatprep.subr.bf16.mxu0 %v10916_v6 }
 0xf88   :  { %9577 = vmatpush3.bf16.msra.mxu0 %v10508_v36 }
 0xf89   :  { %9578 = vmatprep.subr.bf16.mxu0 %v10916_v6 }
 0xf8c   :  { %9579 = vmatpush3.bf16.msra.mxu0 %v10509_v38 }
 0xf8d   :  { %9630 = vmatprep.subr.bf16.mxu0 %v10916_v6 }
 0xf8f   :  { %9581 = vmatmul.mubr.bf16.vlgmr.msra.gmra.mrb[44].mxu0 %v12145_v51 }
 0xf90   :  { %9636 = vmatprep.mubr.msk.bf16.mxu0 %vm10917_vm0, %v10916_v6 }
0x1062   :  { %v4907_v8 = vpop.f32.mrb[44].mxu0 }
0x1063   :  { %v4914_v20 = vsel %vm262_vm6, %v4907_v8, 0.0  ;;  %v4922_v26 = vmul.f32 %v4907_v8, %v4907_v8  ;;  %v9582_v25 = vpop.f32.mrb[45].mxu0 }
0x1064   :  { %v4915_v45 = vrot.slane %v4914_v20, 4  ;;  %v4910_v41 = vpop.f32.mrb[46].mxu0 }
0x1065   :  { %v4923_v52 = vsel %vm262_vm6, %v4922_v26, 0.0  ;;  %v9583_v59 = vpop.f32.mrb[47].mxu0 }
0x1066   :  { %v4916_v3 = vadd.f32 %v4915_v45, %v4914_v20  ;;  %v4924_v63 = vrot.slane %v4923_v52, 4 }
0x1068   :  { %v4917_v51 = vrot.slane %v4916_v3, 2  ;;  %v4925_v11 = vadd.f32 %v4924_v63, %v4923_v52  ;;  %v10518_v63 = vld [vmem:[%s12674_s28] sm:$0xff]  }
0x1069   :  { %9631 = vmatpush3.bf16.msra.mxu0 %v10518_v63 }
0x106a   :  { %v4918_v50 = vadd.f32 %v4917_v51, %v4916_v3  ;;  %v4926_v46 = vrot.slane %v4925_v11, 2  ;;  %v10517_v3 = vld [vmem:[%s12673_s26] sm:$0xff]   ;;  %v10519_v51 = vld [vmem:[%s12673_s26 + $0x8] sm:$0xff]   ;;  %9632 = vmatprep.subr.bf16.mxu0 %v10916_v6 }
0x106c   :  { %v4919_v19 = vrot.slane %v4918_v50, 1  ;;  %v4927_v18 = vadd.f32 %v4926_v46, %v4925_v11  ;;  %v10520_v11 = vld [vmem:[%s12674_s28 + $0x8] sm:$0xff]  }
0x106d   :  { %9633 = vmatpush3.bf16.msra.mxu0 %v10520_v11 }
0x106e   :  { %v4920_v42 = vadd.f32 %v4919_v19, %v4918_v50  ;;  %v4928_v28 = vrot.slane %v4927_v18, 1  ;;  %9634 = vmatprep.subr.bf16.mxu0 %v10916_v6 }
0x1070   :  { %v4921_v27 = vmul.f32 0.125, %v4920_v42  ;;  %v4929_v40 = vadd.f32 %v4928_v28, %v4927_v18 }
0x1072   :  { %v4930_v44 = vmul.f32 0.125, %v4929_v40  ;;  %v4931_v30 = vmul.f32 %v4921_v27, %v4921_v27  ;;  %v4934_v35 = vsub.f32 %v4907_v8, %v4921_v27 }
0x1074   :  { %v4932_v4 = vsub.f32 %v4930_v44, %v4931_v30 }
0x1076   :  { %v4933_v14 = vmax.f32 %v4932_v4, 0.0 }
0x1078   :  { %v4935_v23 = vadd.f32 1e-05, %v4933_v14 }
0x107a   :  { %10797 = vrsqrt.f32 %v4935_v23 }
0x1084   :  { %v10798_v55 = vpop.eup %10797 }
0x1085   :  { %v4937_v58 = vmul.f32 %v10798_v55, %v4934_v35 }
0x1087   :  { %4939 = vrot.lane.b32.xlu0 %v4937_v58, %s10921_s22 }
0x10f9   :  { %v4940_v47 = vpop.permute.xlu0 %4939 }
0x10fa   :  { %v4942_v5 = vadd.f32 %v4940_v47, %v4937_v58 }
0x10fc   :  { %v4943_v7 = vmax.f32 %v4942_v5, 0.0 }
0x10fe   :  { %v4958_v13 = vpack.c.bf16 %v4943_v7, %v4943_v7 }
0x1100   :  { %9589 = vmatmul.mubr.msk.bf16.vlgmr.msra.gmra.mrb[60].mxu1 %vm1207_vm5, %v4958_v13 }
0x1101   :  { %9594 = vmatprep.mubr.msk.f32.mxu1 %vm10917_vm0, %v10916_v6 }
0x11d3   :  { %v5008_v37 = vpop.f32.mrb[60].mxu1 }
0x11d4   :  { %v9590_v60 = vpop.f32.mrb[61].mxu1  ;;  %9593 = vmatpush3.msra.mxu1 %v5008_v37 }
0x11d5   :  { %v5011_v0 = vpop.f32.mrb[62].mxu1  ;;  %9595 = vmatmul.mubr.msk.f32.vlgmr.msra.gmra.mrb[58].mxu1 %vm4606_vm7, %v12173_v34  ;;  %9597 = vmatprep.subr.bf16.mxu1 %v10916_v6 }
0x11d6   :  { %v9591_v16 = vpop.f32.mrb[63].mxu1  ;;  %9598 = vmatpush3.bf16.msra.mxu1 %v10512_v10  ;;  %9601 = vmatprep.mubr.msk.bf16.mxu1 %vm10917_vm0, %v10916_v6 }
0x11d7   :  { %9599 = vmatprep.subr.bf16.mxu1 %v10916_v6  ;;  %v10521_v16 = vld [vmem:[%s12673_s26 + $0x10] sm:$0xff]  }
0x11da   :  { %9600 = vmatpush3.bf16.msra.mxu1 %v10513_v24  ;;  %v10522_v24 = vld [vmem:[%s12674_s28 + $0x10] sm:$0xff]  }
0x11db   :  { %9605 = vmatprep.subr.bf16.mxu1 %v10916_v6  ;;  %9635 = vmatpush3.bf16.msra.mxu0 %v10522_v24 }
0x11dc   :  { %9640 = vmatprep.subr.bf16.mxu0 %v10916_v6 }
0x11dd   :  { %9602 = vmatmul.mubr.msk.bf16.vlgmr.msra.gmra.mrb[64].mxu1 %vm1207_vm5, %v4958_v13 }
0x11de   :  { %9611 = vmatprep.mubr.msk.bf16.mxu1 %vm10917_vm0, %v10916_v6  ;;  %9606 = vmatpush3.bf16.msra.mxu1 %v10514_v1 }
0x11df   :  { %9607 = vmatprep.subr.bf16.mxu1 %v10916_v6 }
0x11e2   :  { %9608 = vmatpush3.bf16.msra.mxu1 %v10515_v48 }
0x11e3   :  { %9609 = vmatprep.subr.bf16.mxu1 %v10916_v6 }
0x11e6   :  { %9610 = vmatpush3.bf16.msra.mxu1 %v10516_v2 }
0x11e7   :  { %9615 = vmatprep.subr.bf16.mxu1 %v10916_v6 }
0x12a8   :  { %v5080_v21 = vpop.f32.mrb[58].mxu1 }
0x12a9   :  { %v5085_v9 = vsel %vm5084_vm8, %v5080_v21, 0.0  ;;  %v5093_v15 = vmul.f32 %v5080_v21, %v5080_v21  ;;  %v9596_v29 = vpop.f32.mrb[59].mxu1 }
0x12aa   :  { %v5086_v61 = vrot.slane %v5085_v9, 4 }
0x12ab   :  { %v5094_v54 = vsel %vm5084_vm8, %v5093_v15, 0.0 }
0x12ac   :  { %v5087_v49 = vadd.f32 %v5086_v61, %v5085_v9  ;;  %v5095_v32 = vrot.slane %v5094_v54, 4 }
0x12ae   :  { %v5088_v56 = vrot.slane %v5087_v49, 2  ;;  %v5096_v17 = vadd.f32 %v5095_v32, %v5094_v54 }
0x12b0   :  { %v5089_v22 = vadd.f32 %v5088_v56, %v5087_v49  ;;  %v5097_v12 = vrot.slane %v5096_v17, 2  ;;  %v10523_v56 = vld [vmem:[%s12675_s2] sm:$0xff]  }
0x12b2   :  { %v5090_v39 = vrot.slane %v5089_v22, 1  ;;  %v5098_v33 = vadd.f32 %v5097_v12, %v5096_v17  ;;  %v10524_v17 = vld [vmem:[%s12675_s2 + $0x8] sm:$0xff]   ;;  %v10526_v12 = vld [vmem:[%s12675_s2 + $0x18] sm:$0xff]  }
0x12b4   :  { %v5091_v57 = vadd.f32 %v5090_v39, %v5089_v22  ;;  %v5099_v53 = vrot.slane %v5098_v33, 1  ;;  %v10525_v22 = vld [vmem:[%s12675_s2 + $0x10] sm:$0xff]  }
0x12b6   :  { %v5092_v31 = vmul.f32 0.125, %v5091_v57  ;;  %v5100_v36 = vadd.f32 %v5099_v53, %v5098_v33 }
0x12b8   :  { %v5101_v38 = vmul.f32 0.125, %v5100_v36  ;;  %v5102_v62 = vmul.f32 %v5092_v31, %v5092_v31  ;;  %v5105_v25 = vsub.f32 %v5080_v21, %v5092_v31 }
0x12ba   :  { %v5103_v8 = vsub.f32 %v5101_v38, %v5102_v62 }
0x12bc   :  { %v5104_v20 = vmax.f32 %v5103_v8, 0.0 }
0x12be   :  { %v5106_v26 = vadd.f32 1e-05, %v5104_v20 }
0x12c0   :  { %10799 = vrsqrt.f32 %v5106_v26 }
0x12ca   :  { %v10800_v45 = vpop.eup %10799 }
0x12cb   :  { %v5108_v41 = vmul.f32 %v10800_v45, %v5105_v25 }
0x12cd   :  { %v5109_v52 = vmax.f32 %v5108_v41, 0.0 }
0x12cf   :  { %v5110_v59 = vpack.c.bf16 %v5109_v52, %v5109_v52 }
0x12d1   :  { %9612 = vmatmul.mubr.msk.bf16.vlgmr.msra.gmra.mrb[64].mxu1 %vm5084_vm8, %v5110_v59 }
0x12d2   :  { %9621 = vmatprep.mubr.msk.bf16.mxu1 %vm10917_vm0, %v10916_v6  ;;  %9616 = vmatpush3.bf16.msra.mxu1 %v10517_v3 }
0x12d3   :  { %9617 = vmatprep.subr.bf16.mxu1 %v10916_v6 }
0x12d6   :  { %9618 = vmatpush3.bf16.msra.mxu1 %v10519_v51 }
0x12d7   :  { %9619 = vmatprep.subr.bf16.mxu1 %v10916_v6 }
0x12da   :  { %9620 = vmatpush3.bf16.msra.mxu1 %v10521_v16 }
0x12db   :  { %9625 = vmatprep.subr.mxu1 %v10916_v6 }
0x13a4   :  { %v5218_v50 = vpop.f32.mrb[64].mxu1 }
0x13a5   :  { %v5225_v46 = vsel %vm5224_vm9, %v5218_v50, 0.0  ;;  %v5233_v19 = vmul.f32 %v5218_v50, %v5218_v50  ;;  %v9613_v18 = vpop.f32.mrb[65].mxu1 }
0x13a6   :  { %v5226_v42 = vrot.slane %v5225_v46, 4  ;;  %v5221_v28 = vpop.f32.mrb[66].mxu1 }
0x13a7   :  { %v5234_v27 = vsel %vm5224_vm9, %v5233_v19, 0.0  ;;  %v9614_v40 = vpop.f32.mrb[67].mxu1 }
0x13a8   :  { %v5227_v44 = vadd.f32 %v5226_v42, %v5225_v46  ;;  %v5235_v30 = vrot.slane %v5234_v27, 4 }
0x13aa   :  { %v5228_v4 = vrot.slane %v5227_v44, 2  ;;  %v5236_v14 = vadd.f32 %v5235_v30, %v5234_v27  ;;  %v10528_v30 = vld [vmem:[%s12676_s7 + $0x8] sm:$0xff]  }
0x13ac   :  { %v5229_v23 = vadd.f32 %v5228_v4, %v5227_v44  ;;  %v5237_v43 = vrot.slane %v5236_v14, 2  ;;  %v10527_v44 = vld [vmem:[%s12676_s7] sm:$0xff]   ;;  %v10529_v4 = vld [vmem:[%s12676_s7 + $0x10] sm:$0xff]  }
0x13ae   :  { %v5238_v35 = vadd.f32 %v5237_v43, %v5236_v14  ;;  %v5230_v55 = vrot.slane %v5229_v23, 1 }
0x13b0   :  { %v5239_v58 = vrot.slane %v5238_v35, 1  ;;  %v5231_v47 = vadd.f32 %v5230_v55, %v5229_v23 }
0x13b2   :  { %v5240_v5 = vadd.f32 %v5239_v58, %v5238_v35  ;;  %v5232_v7 = vmul.f32 0.125, %v5231_v47 }
0x13b4   :  { %v5241_v13 = vmul.f32 0.125, %v5240_v5  ;;  %v5242_v10 = vmul.f32 %v5232_v7, %v5232_v7  ;;  %v5245_v1 = vsub.f32 %v5218_v50, %v5232_v7 }
0x13b6   :  { %v5243_v37 = vsub.f32 %v5241_v13, %v5242_v10 }
0x13b8   :  { %v5244_v60 = vmax.f32 %v5243_v37, 0.0 }
0x13ba   :  { %v5246_v0 = vadd.f32 1e-05, %v5244_v60 }
0x13bc   :  { %10801 = vrsqrt.f32 %v5246_v0 }
0x13c6   :  { %v10802_v48 = vpop.eup %10801 }
0x13c7   :  { %v5248_v2 = vmul.f32 %v10802_v48, %v5245_v1 }
0x13c9   :  { %5250 = vrot.lane.b32.xlu1 %v5248_v2, %s10922_s1 }
0x143b   :  { %v5251_v21 = vpop.permute.xlu1 %5250 }
0x143c   :  { %v5253_v9 = vadd.f32 %v5251_v21, %v5248_v2 }
0x143e   :  { %v5254_v15 = vmax.f32 %v5253_v9, 0.0 }
0x1440   :  { %v5275_v29 = vpack.c.bf16 %v5254_v15, %v5254_v15 }
0x1442   :  { %9622 = vmatmul.mubr.msk.bf16.vlgmr.msra.gmra.mrb[68].mxu1 %vm5084_vm8, %v5275_v29  ;;  %9637 = vmatmul.mubr.msk.bf16.vlgmr.msra.gmra.mrb[48].mxu0 %vm5084_vm8, %v5275_v29 }
0x1443   :  { %9627 = vmatprep.mubr.msk.f32.mxu1 %vm10917_vm0, %v10916_v6  ;;  %9648 = vmatprep.mubr.msk.bf16.mxu0 %vm10917_vm0, %v10916_v6 }
0x1444   :  { %9641 = vmatpush3.bf16.msra.mxu0 %v10523_v56 }
0x1445   :  { %9642 = vmatprep.subr.bf16.mxu0 %v10916_v6 }
0x1448   :  { %9643 = vmatpush3.bf16.msra.mxu0 %v10524_v17 }
0x1449   :  { %9644 = vmatprep.subr.bf16.mxu0 %v10916_v6 }
0x144c   :  { %9645 = vmatpush3.bf16.msra.mxu0 %v10525_v22 }
0x144d   :  { %9646 = vmatprep.subr.bf16.mxu0 %v10916_v6 }
0x1450   :  { %9647 = vmatpush3.bf16.msra.mxu0 %v10526_v12 }
0x1451   :  { %9669 = vmatprep.subr.bf16.mxu0 %v10916_v6 }
0x1515   :  { %v5331_v61 = vpop.f32.mrb[68].mxu1 }
0x1516   :  { %v9623_v54 = vpop.f32.mrb[69].mxu1  ;;  %9626 = vmatpush3.msra.mxu1 %v5331_v61  ;;  %v10530_v61 = vld [vmem:[%s12676_s7 + $0x18] sm:$0xff]  }
0x1517   :  { %v5334_v49 = vpop.f32.mrb[70].mxu1  ;;  %9628 = vmatmul.mubr.msk.f32.vlgmr.msra.gmra.mrb[72].mxu1 %vm4606_vm7, %v12173_v34  ;;  %9652 = vmatprep.subr.bf16.mxu1 %v10916_v6 }
0x1518   :  { %v9624_v32 = vpop.f32.mrb[71].mxu1  ;;  %9660 = vmatprep.mubr.msk.bf16.mxu1 %vm10917_vm0, %v10916_v6  ;;  %9653 = vmatpush3.bf16.msra.mxu1 %v10527_v44 }
0x1519   :  { %9654 = vmatprep.subr.bf16.mxu1 %v10916_v6 }
0x151c   :  { %9655 = vmatpush3.bf16.msra.mxu1 %v10528_v30 }
0x151d   :  { %9656 = vmatprep.subr.bf16.mxu1 %v10916_v6 }
0x1520   :  { %9657 = vmatpush3.bf16.msra.mxu1 %v10529_v4 }
0x1521   :  { %9658 = vmatprep.subr.bf16.mxu1 %v10916_v6 }
0x1524   :  { %9659 = vmatpush3.bf16.msra.mxu1 %v10530_v61 }
0x1525   :  { %9664 = vmatprep.subr.mxu1 %v10916_v6 }
0x15ea   :  { %v5403_v39 = vpop.f32.mrb[72].mxu1 }
0x15eb   :  { %v5407_v33 = vsel %vm262_vm6, %v5403_v39, 0.0  ;;  %v5415_v57 = vmul.f32 %v5403_v39, %v5403_v39  ;;  %v9629_v53 = vpop.f32.mrb[73].mxu1 }
0x15ec   :  { %v5408_v31 = vrot.slane %v5407_v33, 4  ;;  %v10536_v53 = vld [vmem:[%s12677_s10 + $0x14] ss:$8 sps:$4 sm:$0xff]  }
0x15ed   :  { %v5416_v36 = vsel %vm262_vm6, %v5415_v57, 0.0 }
0x15ee   :  { %v5409_v38 = vadd.f32 %v5408_v31, %v5407_v33  ;;  %v5417_v62 = vrot.slane %v5416_v36, 4  ;;  %v10531_v33 = vld [vmem:[%s12677_s10] ss:$8 sps:$4 sm:$0xff]  }
0x15f0   :  { %v5410_v8 = vrot.slane %v5409_v38, 2  ;;  %v5418_v20 = vadd.f32 %v5417_v62, %v5416_v36  ;;  %v10534_v62 = vld [vmem:[%s12677_s10 + $0x10] ss:$8 sps:$4 sm:$0xff]  }
0x15f2   :  { %v5411_v26 = vadd.f32 %v5410_v8, %v5409_v38  ;;  %v5419_v25 = vrot.slane %v5418_v20, 2  ;;  %v10923_v8 = vmov 0  }
0x15f4   :  { %v5412_v45 = vrot.slane %v5411_v26, 1  ;;  %v5420_v41 = vadd.f32 %v5419_v25, %v5418_v20  ;;  %v10539_v20 = vld [vmem:[%s12677_s10 + $0x24] ss:$8 sps:$4 sm:$0xff]   ;;  %v10542_v25 = vld [vmem:[%s12677_s10 + $0x34] ss:$8 sps:$4 sm:$0xff]  }
0x15f6   :  { %v5413_v52 = vadd.f32 %v5412_v45, %v5411_v26  ;;  %v5421_v59 = vrot.slane %v5420_v41, 1  ;;  %v10537_v26 = vld [vmem:[%s12677_s10 + $0x20] ss:$8 sps:$4 sm:$0xff]   ;;  %v10540_v45 = vld [vmem:[%s12677_s10 + $0x30] ss:$8 sps:$4 sm:$0xff]  }
0x15f8   :  { %v5414_v3 = vmul.f32 0.125, %v5413_v52  ;;  %v5422_v63 = vadd.f32 %v5421_v59, %v5420_v41  ;;  %v10545_v41 = vld [vmem:[%s12678_s11 + $0x4] ss:$8 sps:$4 sm:$0xff]   ;;  %v10543_v52 = vld [vmem:[%s12678_s11] ss:$8 sps:$4 sm:$0xff]  }
0x15f9   :  { %v10548_v59 = vld [vmem:[%s12678_s11 + $0x14] ss:$8 sps:$4 sm:$0xff]  }
0x15fa   :  { %v5423_v51 = vmul.f32 0.125, %v5422_v63  ;;  %v5424_v11 = vmul.f32 %v5414_v3, %v5414_v3  ;;  %v5427_v18 = vsub.f32 %v5403_v39, %v5414_v3  ;;  %v10533_v39 = vld [vmem:[%s12677_s10 + $0x4] ss:$8 sps:$4 sm:$0xff]   ;;  %v10546_v3 = vld [vmem:[%s12678_s11 + $0x10] ss:$8 sps:$4 sm:$0xff]  }
0x15fb   :  { %v10551_v63 = vld [vmem:[%s12678_s11 + $0x24] ss:$8 sps:$4 sm:$0xff]  }
0x15fc   :  { %v5425_v50 = vsub.f32 %v5423_v51, %v5424_v11  ;;  %v10549_v51 = vld [vmem:[%s12678_s11 + $0x20] ss:$8 sps:$4 sm:$0xff]   ;;  %v10554_v11 = vld [vmem:[%s12678_s11 + $0x34] ss:$8 sps:$4 sm:$0xff]  }
0x15fe   :  { %v5426_v46 = vmax.f32 %v5425_v50, 0.0  ;;  %v10552_v50 = vld [vmem:[%s12678_s11 + $0x30] ss:$8 sps:$4 sm:$0xff]  }
0x1600   :  { %v5428_v19 = vadd.f32 1e-05, %v5426_v46  ;;  %v10557_v46 = vld [vmem:[%s12678_s11 + $0x44] ss:$8 sps:$4 sm:$0xff]  }
0x1602   :  { %10803 = vrsqrt.f32 %v5428_v19  ;;  %v10555_v19 = vld [vmem:[%s12678_s11 + $0x40] ss:$8 sps:$4 sm:$0xff]  }
0x160c   :  { %v10804_v42 = vpop.eup %10803 }
0x160d   :  { %v5430_v28 = vmul.f32 %v10804_v42, %v5427_v18 }
0x160f   :  { %v5431_v27 = vmax.f32 %v5430_v28, 0.0 }
0x1611   :  { %v5432_v40 = vpack.c.bf16 %v5431_v27, %v5431_v27 }
0x1613   :  { %9649 = vmatmul.mubr.msk.bf16.vlgmr.msra.gmra.mrb[48].mxu0 %vm262_vm6, %v5432_v40 }
0x1614   :  { %9679 = vmatprep.mubr.msk.bf16.mxu0 %vm10917_vm0, %v10916_v6 }
0x16e6   :  { %v5552_v14 = vpop.f32.mrb[48].mxu0 }
0x16e7   :  { %v5558_v23 = vrot.slane %v5552_v14, 4  ;;  %v5565_v43 = vmul.f32 %v5552_v14, %v5552_v14  ;;  %v9650_v35 = vpop.f32.mrb[49].mxu0 }
0x16e8   :  { %v5555_v55 = vpop.f32.mrb[50].mxu0 }
0x16e9   :  { %v5559_v58 = vadd.f32 %v5558_v23, %v5552_v14  ;;  %v5566_v47 = vrot.slane %v5565_v43, 4  ;;  %v9651_v5 = vpop.f32.mrb[51].mxu0 }
0x16eb   :  { %v5560_v7 = vrot.slane %v5559_v58, 2  ;;  %v5567_v13 = vadd.f32 %v5566_v47, %v5565_v43 }
0x16ed   :  { %v5561_v10 = vadd.f32 %v5560_v7, %v5559_v58  ;;  %v5568_v37 = vrot.slane %v5567_v13, 2 }
0x16ef   :  { %v5562_v60 = vrot.slane %v5561_v10, 1  ;;  %v5569_v0 = vadd.f32 %v5568_v37, %v5567_v13 }
0x16f1   :  { %v5563_v16 = vadd.f32 %v5562_v60, %v5561_v10  ;;  %v5570_v24 = vrot.slane %v5569_v0, 1 }
0x16f3   :  { %v5564_v1 = vmul.f32 0.125, %v5563_v16  ;;  %v5571_v48 = vadd.f32 %v5570_v24, %v5569_v0 }
0x16f5   :  { %v5572_v2 = vmul.f32 0.125, %v5571_v48  ;;  %v5573_v21 = vmul.f32 %v5564_v1, %v5564_v1  ;;  %v5576_v54 = vsub.f32 %v5552_v14, %v5564_v1 }
0x16f7   :  { %v5574_v9 = vsub.f32 %v5572_v2, %v5573_v21 }
0x16f9   :  { %v5575_v15 = vmax.f32 %v5574_v9, 0.0  ;;  %v10558_v9 = vld [vmem:[%s12679_s0] sm:$0xff]  }
0x16fa   :  { %9670 = vmatpush3.bf16.msra.mxu0 %v10558_v9  ;;  %v10565_v9 = vld [vmem:[%s12680_s5 + $0x4] ss:$8 sps:$4 sm:$0xff]  }
0x16fb   :  { %v5577_v29 = vadd.f32 1e-05, %v5575_v15  ;;  %v10559_v15 = vld [vmem:[%s12679_s0 + $0x8] sm:$0xff]   ;;  %9671 = vmatprep.subr.bf16.mxu0 %v10916_v6 }
0x16fd   :  { %10805 = vrsqrt.f32 %v5577_v29  ;;  %v10560_v29 = vld [vmem:[%s12679_s0 + $0x10] sm:$0xff]  }
0x16fe   :  { %9672 = vmatpush3.bf16.msra.mxu0 %v10559_v15  ;;  %v10563_v15 = vld [vmem:[%s12680_s5] ss:$8 sps:$4 sm:$0xff]  }
0x16ff   :  { %9673 = vmatprep.subr.bf16.mxu0 %v10916_v6 }
0x1702   :  { %9674 = vmatpush3.bf16.msra.mxu0 %v10560_v29 }
0x1703   :  { %9675 = vmatprep.subr.bf16.mxu0 %v10916_v6 }
0x1707   :  { %v10806_v49 = vpop.eup %10805 }
0x1708   :  { %v5579_v32 = vmul.f32 %v10806_v49, %v5576_v54 }
0x170a   :  { %5581 = vrot.lane.b32.xlu1 %v5579_v32, %s10920_s24  ;;  %s10926_s24 = smov 16  }
0x177c   :  { %v5582_v56 = vpop.permute.xlu1 %5581 }
0x177d   :  { %v5584_v17 = vadd.f32 %v5582_v56, %v5579_v32 }
0x177f   :  { %v5585_v22 = vmax.f32 %v5584_v17, 0.0 }
0x1781   :  { %v5612_v12 = vpack.c.bf16 %v5585_v22, %v5585_v22 }
0x1783   :  { %9661 = vmatmul.mubr.msk.bf16.vlgmr.msra.gmra.mrb[76].mxu1 %vm262_vm6, %v5612_v12 }
0x1784   :  { %9666 = vmatprep.mubr.msk.f32.mxu1 %vm10917_vm0, %v10916_v6 }
0x1856   :  { %v5674_v57 = vpop.f32.mrb[76].mxu1 }
0x1857   :  { %v9662_v31 = vpop.f32.mrb[77].mxu1  ;;  %9665 = vmatpush3.msra.mxu1 %v5674_v57 }
0x1858   :  { %v5677_v36 = vpop.f32.mrb[78].mxu1  ;;  %9667 = vmatmul.mubr.msk.f32.vlgmr.msra.gmra.mrb[74].mxu1 %vm4606_vm7, %v12173_v34  ;;  %5817 = vmatprep.subr.bf16.mxu1 %v10533_v39 }
0x1859   :  { %v9663_v38 = vpop.f32.mrb[79].mxu1  ;;  %5818 = vmatpush1.bf16.msra.mxu1 %v10531_v33  ;;  %5849 = vmatprep.mubr.bf16.mxu1 %v10923_v8 }
0x185a   :  { %5819 = vmatprep.subr.bf16.mxu1 %v10536_v53 }
0x185d   :  { %5820 = vmatpush1.bf16.msra.mxu1 %v10534_v62 }
0x185e   :  { %5821 = vmatprep.subr.bf16.mxu1 %v10539_v20 }
0x1861   :  { %5822 = vmatpush1.bf16.msra.mxu1 %v10537_v26 }
0x1862   :  { %5823 = vmatprep.subr.bf16.mxu1 %v10542_v25 }
0x1865   :  { %5824 = vmatpush1.bf16.msra.mxu1 %v10540_v45 }
0x1866   :  { %5911 = vmatprep.subr.bf16.mxu1 %v10545_v41 }
0x1868   :  { %8672 = vmatmul.mubr.msk.bf16.vlgmr.msra.gmra.mrb[80].mxu1 %vm262_vm6, %v5612_v12 }
0x1869   :  { %5943 = vmatprep.mubr.bf16.mxu1 %v10923_v8  ;;  %5912 = vmatpush1.bf16.msra.mxu1 %v10543_v52 }
0x186a   :  { %5913 = vmatprep.subr.bf16.mxu1 %v10548_v59 }
0x186d   :  { %5914 = vmatpush1.bf16.msra.mxu1 %v10546_v3 }
0x186e   :  { %5915 = vmatprep.subr.bf16.mxu1 %v10551_v63 }
0x1871   :  { %5916 = vmatpush1.bf16.msra.mxu1 %v10549_v51 }
0x1872   :  { %5917 = vmatprep.subr.bf16.mxu1 %v10554_v11 }
0x1875   :  { %5918 = vmatpush1.bf16.msra.mxu1 %v10552_v50 }
0x1876   :  { %5919 = vmatprep.subr.bf16.mxu1 %v10557_v46 }
0x1879   :  { %5920 = vmatpush1.bf16.msra.mxu1 %v10555_v19 }
0x187a   :  { %9688 = vmatprep.subr.bf16.mxu1 %v10916_v6 }
0x192b   :  { %v5746_v18 = vpop.f32.mrb[74].mxu1 }
0x192c   :  { %v5751_v42 = vsel %vm5750_vm10, %v5746_v18, 0.0  ;;  %v5759_v28 = vmul.f32 %v5746_v18, %v5746_v18  ;;  %v9668_v27 = vpop.f32.mrb[75].mxu1 }
0x192d   :  { %v5752_v40 = vrot.slane %v5751_v42, 4 }
0x192e   :  { %v5760_v44 = vsel %vm5750_vm10, %v5759_v28, 0.0 }
0x192f   :  { %v5753_v30 = vadd.f32 %v5752_v40, %v5751_v42  ;;  %v5761_v4 = vrot.slane %v5760_v44, 4 }
0x1931   :  { %v5754_v14 = vrot.slane %v5753_v30, 2  ;;  %v5762_v23 = vadd.f32 %v5761_v4, %v5760_v44 }
0x1933   :  { %v5755_v43 = vadd.f32 %v5754_v14, %v5753_v30  ;;  %v5763_v35 = vrot.slane %v5762_v23, 2 }
0x1935   :  { %v5756_v55 = vrot.slane %v5755_v43, 1  ;;  %v5764_v58 = vadd.f32 %v5763_v35, %v5762_v23 }
0x1937   :  { %v5757_v47 = vadd.f32 %v5756_v55, %v5755_v43  ;;  %v5765_v5 = vrot.slane %v5764_v58, 1 }
0x1939   :  { %v5758_v7 = vmul.f32 0.125, %v5757_v47  ;;  %v5766_v13 = vadd.f32 %v5765_v5, %v5764_v58  ;;  %v10561_v47 = vld [vmem:[%s12679_s0 + $0x18] sm:$0xff]   ;;  %v10562_v5 = vld [vmem:[%s12679_s0 + $0x20] sm:$0xff]  }
0x193a   :  { %9676 = vmatpush3.bf16.msra.mxu0 %v10561_v47 }
0x193b   :  { %v5767_v10 = vmul.f32 0.125, %v5766_v13  ;;  %v5768_v37 = vmul.f32 %v5758_v7, %v5758_v7  ;;  %v5771_v24 = vsub.f32 %v5746_v18, %v5758_v7  ;;  %9677 = vmatprep.subr.bf16.mxu0 %v10916_v6 }
0x193d   :  { %v5769_v60 = vsub.f32 %v5767_v10, %v5768_v37 }
0x193e   :  { %9678 = vmatpush3.bf16.msra.mxu0 %v10562_v5 }
0x193f   :  { %v5770_v0 = vmax.f32 %v5769_v60, 0.0  ;;  %9683 = vmatprep.subr.mxu0 %v10916_v6 }
0x1941   :  { %v5772_v16 = vadd.f32 1e-05, %v5770_v0 }
0x1943   :  { %10807 = vrsqrt.f32 %v5772_v16 }
0x194d   :  { %v10808_v1 = vpop.eup %10807 }
0x194e   :  { %v5774_v48 = vmul.f32 %v10808_v1, %v5771_v24 }
0x1950   :  { %v5775_v2 = vmax.f32 %v5774_v48, 0.0 }
0x1952   :  { %v5776_v21 = vpack.c.bf16 %v5775_v2, %v5775_v2 }
0x1954   :  { %8683 = vmatmul.mubr.msk.bf16.vlgmr.msra.gmra.mrb[80].mxu1 %vm5750_vm10, %v5776_v21 }
0x1955   :  { %9700 = vmatprep.mubr.msk.bf16.mxu1 %vm10917_vm0, %v10916_v6 }
0x1a27   :  { %v5945_v61 = vpop.f32.mrb[80].mxu1 }
0x1a28   :  { %v5952_v54 = vrot.slane %v5945_v61, 4  ;;  %v5967_v49 = vmul.f32 %v5945_v61, %v5945_v61  ;;  %v5947_v32 = vpop.f32.mrb[81].mxu1 }
0x1a29   :  { %v5958_v56 = vsel %vm1207_vm5, %v5947_v32, 0.0  ;;  %v5968_v17 = vmul.f32 %v5947_v32, %v5947_v32  ;;  %v5949_v22 = vpop.f32.mrb[82].mxu1 }
0x1a2a   :  { %v5953_v12 = vadd.f32 %v5952_v54, %v5945_v61  ;;  %v5969_v39 = vrot.slane %v5967_v49, 4  ;;  %v5959_v33 = vrot.slane %v5958_v56, 4  ;;  %v5950_v57 = vpop.f32.mrb[83].mxu1  ;;  %v10569_v22 = vld [vmem:[%s12680_s5 + $0x20] ss:$8 sps:$4 sm:$0xff]  }
0x1a2b   :  { %v5975_v53 = vsel %vm1207_vm5, %v5968_v17, 0.0  ;;  %v10571_v17 = vld [vmem:[%s12680_s5 + $0x24] ss:$8 sps:$4 sm:$0xff]  }
0x1a2c   :  { %v5954_v31 = vrot.slane %v5953_v12, 2  ;;  %v5970_v36 = vadd.f32 %v5969_v39, %v5967_v49  ;;  %v5960_v38 = vadd.f32 %v5959_v33, %v5958_v56  ;;  %v5976_v62 = vrot.slane %v5975_v53, 4  ;;  %v10566_v56 = vld [vmem:[%s12680_s5 + $0x10] ss:$8 sps:$4 sm:$0xff]   ;;  %v10575_v33 = vld [vmem:[%s12680_s5 + $0x40] ss:$8 sps:$4 sm:$0xff]  }
0x1a2d   :  { %v10572_v39 = vld [vmem:[%s12680_s5 + $0x30] ss:$8 sps:$4 sm:$0xff]   ;;  %v10580_v57 = vld [vmem:[%s12681_s17 + $0x4] ss:$8 sps:$4 sm:$0xff]  }
0x1a2e   :  { %v5955_v20 = vadd.f32 %v5954_v31, %v5953_v12  ;;  %v5971_v26 = vrot.slane %v5970_v36, 2  ;;  %v5961_v25 = vrot.slane %v5960_v38, 2  ;;  %v5977_v45 = vadd.f32 %v5976_v62, %v5975_v53  ;;  %v10574_v12 = vld [vmem:[%s12680_s5 + $0x34] ss:$8 sps:$4 sm:$0xff]   ;;  %v10578_v53 = vld [vmem:[%s12681_s17] ss:$8 sps:$4 sm:$0xff]  }
0x1a2f   :  { %v10583_v31 = vld [vmem:[%s12681_s17 + $0x14] ss:$8 sps:$4 sm:$0xff]   ;;  %v10584_v62 = vld [vmem:[%s12681_s17 + $0x20] ss:$8 sps:$4 sm:$0xff]  }
0x1a30   :  { %v5956_v41 = vrot.slane %v5955_v20, 1  ;;  %v5972_v52 = vadd.f32 %v5971_v26, %v5970_v36  ;;  %v5962_v59 = vadd.f32 %v5961_v25, %v5960_v38  ;;  %v5978_v3 = vrot.slane %v5977_v45, 2  ;;  %v10581_v36 = vld [vmem:[%s12681_s17 + $0x10] ss:$8 sps:$4 sm:$0xff]   ;;  %v10586_v38 = vld [vmem:[%s12681_s17 + $0x24] ss:$8 sps:$4 sm:$0xff]  }
0x1a31   :  { %v10587_v26 = vld [vmem:[%s12681_s17 + $0x30] ss:$8 sps:$4 sm:$0xff]   ;;  %v10592_v25 = vld [vmem:[%s12681_s17 + $0x44] ss:$8 sps:$4 sm:$0xff]  }
0x1a32   :  { %v5957_v63 = vadd.f32 %v5956_v41, %v5955_v20  ;;  %v5973_v51 = vrot.slane %v5972_v52, 1  ;;  %v5963_v11 = vrot.slane %v5962_v59, 1  ;;  %v5979_v50 = vadd.f32 %v5978_v3, %v5977_v45  ;;  %v10589_v20 = vld [vmem:[%s12681_s17 + $0x34] ss:$8 sps:$4 sm:$0xff]   ;;  %v10590_v45 = vld [vmem:[%s12681_s17 + $0x40] ss:$8 sps:$4 sm:$0xff]  }
0x1a33   :  { %v10595_v41 = vld [vmem:[%s12681_s17 + $0x54] ss:$8 sps:$4 sm:$0xff]  }
0x1a34   :  { %v5965_v46 = vmul.f32 0.125, %v5957_v63  ;;  %v5974_v19 = vadd.f32 %v5973_v51, %v5972_v52  ;;  %v5964_v18 = vadd.f32 %v5963_v11, %v5962_v59  ;;  %v5980_v42 = vrot.slane %v5979_v50, 1  ;;  %v10593_v52 = vld [vmem:[%s12681_s17 + $0x50] ss:$8 sps:$4 sm:$0xff]  }
0x1a36   :  { %v5982_v28 = vmul.f32 0.125, %v5974_v19  ;;  %v5984_v27 = vmul.f32 %v5965_v46, %v5965_v46  ;;  %v5966_v40 = vmul.f32 0.125, %v5964_v18  ;;  %v5981_v44 = vadd.f32 %v5980_v42, %v5979_v50 }
0x1a37   :  { %v5990_v7 = vsub.f32 %v5945_v61, %v5965_v46  ;;  %v10568_v61 = vld [vmem:[%s12680_s5 + $0x14] ss:$8 sps:$4 sm:$0xff]  }
0x1a38   :  { %v5986_v30 = vsub.f32 %v5982_v28, %v5984_v27  ;;  %v5985_v4 = vmul.f32 %v5966_v40, %v5966_v40  ;;  %v5983_v14 = vmul.f32 0.125, %v5981_v44  ;;  %v5991_v37 = vsub.f32 %v5947_v32, %v5966_v40 }
0x1a3a   :  { %v5988_v23 = vmax.f32 %v5986_v30, 0.0  ;;  %v5987_v43 = vsub.f32 %v5983_v14, %v5985_v4 }
0x1a3c   :  { %v5992_v35 = vadd.f32 1e-05, %v5988_v23  ;;  %v5989_v55 = vmax.f32 %v5987_v43, 0.0 }
0x1a3e   :  { %10809 = vrsqrt.f32 %v5992_v35  ;;  %v5993_v58 = vadd.f32 1e-05, %v5989_v55 }
0x1a40   :  { %10811 = vrsqrt.f32 %v5993_v58 }
0x1a48   :  { %v10810_v13 = vpop.eup %10809 }
0x1a49   :  { %v5996_v10 = vmul.f32 %v10810_v13, %v5990_v7 }
0x1a4a   :  { %v10812_v60 = vpop.eup %10811 }
0x1a4b   :  { %6000 = vrot.lane.b32.xlu0 %v5996_v10, %s10924_s13  ;;  %v5997_v0 = vmul.f32 %v10812_v60, %v5991_v37  ;;  %v10596_v60 = vld [vmem:[%s12682_s21] sm:$0xff]  }
0x1a4c   :  { %9689 = vmatpush3.bf16.msra.mxu1 %v10596_v60  ;;  %v10604_v60 = vld [vmem:[%s12683_s25 + $0x4] ss:$8 sps:$4 sm:$0xff]  }
0x1a4d   :  { %6002 = vrot.lane.b32.xlu1 %v5997_v0, %s10924_s13  ;;  %v10597_v0 = vld [vmem:[%s12682_s21 + $0x8] sm:$0xff]   ;;  %9690 = vmatprep.subr.bf16.mxu1 %v10916_v6 }
0x1a50   :  { %9691 = vmatpush3.bf16.msra.mxu1 %v10597_v0  ;;  %v10602_v0 = vld [vmem:[%s12683_s25] ss:$8 sps:$4 sm:$0xff]  }
0x1a51   :  { %9692 = vmatprep.subr.bf16.mxu1 %v10916_v6 }
0x1abd   :  { %v6001_v16 = vpop.permute.xlu0 %6000 }
0x1abf   :  { %v6003_v24 = vpop.permute.xlu1 %6002 }
0x1ac0   :  { %v6004_v1 = vsel %vm5084_vm8, %v6001_v16, %v6003_v24  ;;  %v10598_v16 = vld [vmem:[%s12682_s21 + $0x10] sm:$0xff]   ;;  %v10599_v24 = vld [vmem:[%s12682_s21 + $0x18] sm:$0xff]  }
0x1ac1   :  { %v6006_v48 = vadd.f32 %v6004_v1, %v5996_v10  ;;  %9693 = vmatpush3.bf16.msra.mxu1 %v10598_v16 }
0x1ac2   :  { %9694 = vmatprep.subr.bf16.mxu1 %v10916_v6 }
0x1ac3   :  { %v6007_v2 = vmax.f32 %v6006_v48, 0.0 }
0x1ac5   :  { %v6040_v21 = vpack.c.bf16 %v6007_v2, %v6007_v2  ;;  %9695 = vmatpush3.bf16.msra.mxu1 %v10599_v24  ;;  %v10607_v24 = vld [vmem:[%s12683_s25 + $0x14] ss:$8 sps:$4 sm:$0xff]  }
0x1ac6   :  { %9696 = vmatprep.subr.bf16.mxu1 %v10916_v6 }
0x1ac7   :  { %9680 = vmatmul.mubr.msk.bf16.vlgmr.msra.gmra.mrb[52].mxu0 %vm5750_vm10, %v6040_v21 }
0x1ac8   :  { %9685 = vmatprep.mubr.msk.f32.mxu0 %vm10917_vm0, %v10916_v6 }
0x1b9a   :  { %v6108_v29 = vpop.f32.mrb[52].mxu0 }
0x1b9b   :  { %v9681_v54 = vpop.f32.mrb[53].mxu0  ;;  %9684 = vmatpush3.msra.mxu0 %v6108_v29 }
0x1b9c   :  { %v6111_v49 = vpop.f32.mrb[54].mxu0  ;;  %9686 = vmatmul.mubr.msk.f32.vlgmr.msra.gmra.mrb[56].mxu0 %vm4606_vm7, %v12173_v34  ;;  %6260 = vmatprep.subr.bf16.mxu0 %v10565_v9  ;;  %v10577_v34 = vld [vmem:[%s12680_s5 + $0x44] ss:$8 sps:$4 sm:$0xff]  }
0x1b9d   :  { %v9682_v32 = vpop.f32.mrb[55].mxu0  ;;  %6261 = vmatpush1.bf16.msra.mxu0 %v10563_v15  ;;  %6292 = vmatprep.mubr.bf16.mxu0 %v10923_v8 }
0x1b9e   :  { %6262 = vmatprep.subr.bf16.mxu0 %v10568_v61 }
0x1ba1   :  { %6263 = vmatpush1.bf16.msra.mxu0 %v10566_v56 }
0x1ba2   :  { %6264 = vmatprep.subr.bf16.mxu0 %v10571_v17 }
0x1ba5   :  { %6265 = vmatpush1.bf16.msra.mxu0 %v10569_v22 }
0x1ba6   :  { %6266 = vmatprep.subr.bf16.mxu0 %v10574_v12 }
0x1ba9   :  { %6267 = vmatpush1.bf16.msra.mxu0 %v10572_v39 }
0x1baa   :  { %6268 = vmatprep.subr.bf16.mxu0 %v10577_v34 }
0x1bad   :  { %6269 = vmatpush1.bf16.msra.mxu0 %v10575_v33 }
0x1bae   :  { %6364 = vmatprep.subr.bf16.mxu0 %v10580_v57 }
0x1bb0   :  { %8701 = vmatmul.mubr.msk.bf16.vlgmr.msra.gmra.mrb[60].mxu0 %vm5750_vm10, %v6040_v21 }
0x1bb1   :  { %6396 = vmatprep.mubr.bf16.mxu0 %v10923_v8  ;;  %6365 = vmatpush1.bf16.msra.mxu0 %v10578_v53 }
0x1bb2   :  { %6366 = vmatprep.subr.bf16.mxu0 %v10583_v31 }
0x1bb5   :  { %6367 = vmatpush1.bf16.msra.mxu0 %v10581_v36 }
0x1bb6   :  { %6368 = vmatprep.subr.bf16.mxu0 %v10586_v38 }
0x1bb9   :  { %6369 = vmatpush1.bf16.msra.mxu0 %v10584_v62 }
0x1bba   :  { %6370 = vmatprep.subr.bf16.mxu0 %v10589_v20 }
0x1bbd   :  { %6371 = vmatpush1.bf16.msra.mxu0 %v10587_v26 }
0x1bbe   :  { %6372 = vmatprep.subr.bf16.mxu0 %v10592_v25 }
0x1bc1   :  { %6373 = vmatpush1.bf16.msra.mxu0 %v10590_v45 }
0x1bc2   :  { %6374 = vmatprep.subr.bf16.mxu0 %v10595_v41 }
0x1bc5   :  { %6375 = vmatpush1.bf16.msra.mxu0 %v10593_v52 }
0x1bc6   :  { %9709 = vmatprep.subr.bf16.mxu0 %v10916_v6 }
0x1c6f   :  { %v6180_v59 = vpop.f32.mrb[56].mxu0 }
0x1c70   :  { %v6184_v3 = vsel %vm5224_vm9, %v6180_v59, 0.0  ;;  %v6192_v63 = vmul.f32 %v6180_v59, %v6180_v59  ;;  %v9687_v51 = vpop.f32.mrb[57].mxu0 }
0x1c71   :  { %v6185_v11 = vrot.slane %v6184_v3, 4 }
0x1c72   :  { %v6193_v50 = vsel %vm5224_vm9, %v6192_v63, 0.0 }
0x1c73   :  { %v6186_v46 = vadd.f32 %v6185_v11, %v6184_v3  ;;  %v6194_v19 = vrot.slane %v6193_v50, 4 }
0x1c75   :  { %v6187_v18 = vrot.slane %v6186_v46, 2  ;;  %v6195_v42 = vadd.f32 %v6194_v19, %v6193_v50 }
0x1c77   :  { %v6188_v28 = vadd.f32 %v6187_v18, %v6186_v46  ;;  %v6196_v27 = vrot.slane %v6195_v42, 2 }
0x1c79   :  { %v6189_v40 = vrot.slane %v6188_v28, 1  ;;  %v6197_v44 = vadd.f32 %v6196_v27, %v6195_v42 }
0x1c7b   :  { %v6190_v30 = vadd.f32 %v6189_v40, %v6188_v28  ;;  %v6198_v4 = vrot.slane %v6197_v44, 1 }
0x1c7d   :  { %v6191_v14 = vmul.f32 0.125, %v6190_v30  ;;  %v6199_v23 = vadd.f32 %v6198_v4, %v6197_v44  ;;  %v10600_v30 = vld [vmem:[%s12682_s21 + $0x20] sm:$0xff]   ;;  %v10601_v4 = vld [vmem:[%s12682_s21 + $0x28] sm:$0xff]  }
0x1c7e   :  { %9697 = vmatpush3.bf16.msra.mxu1 %v10600_v30 }
0x1c7f   :  { %v6200_v43 = vmul.f32 0.125, %v6199_v23  ;;  %v6201_v35 = vmul.f32 %v6191_v14, %v6191_v14  ;;  %v6204_v5 = vsub.f32 %v6180_v59, %v6191_v14  ;;  %9698 = vmatprep.subr.bf16.mxu1 %v10916_v6 }
0x1c81   :  { %v6202_v55 = vsub.f32 %v6200_v43, %v6201_v35 }
0x1c82   :  { %9699 = vmatpush3.bf16.msra.mxu1 %v10601_v4 }
0x1c83   :  { %v6203_v58 = vmax.f32 %v6202_v55, 0.0  ;;  %9704 = vmatprep.subr.mxu1 %v10916_v6 }
0x1c85   :  { %v6205_v47 = vadd.f32 1e-05, %v6203_v58 }
0x1c87   :  { %10813 = vrsqrt.f32 %v6205_v47 }
0x1c91   :  { %v10814_v7 = vpop.eup %10813 }
0x1c92   :  { %v6207_v13 = vmul.f32 %v10814_v7, %v6204_v5 }
0x1c94   :  { %v6208_v10 = vmax.f32 %v6207_v13, 0.0 }
0x1c96   :  { %v6209_v37 = vpack.c.bf16 %v6208_v10, %v6208_v10 }
0x1c98   :  { %8714 = vmatmul.mubr.msk.bf16.vlgmr.msra.gmra.mrb[60].mxu0 %vm5224_vm9, %v6209_v37 }
0x1c99   :  { %9723 = vmatprep.mubr.msk.bf16.mxu0 %vm10917_vm0, %v10916_v6 }
0x1d6b   :  { %v6398_v1 = vpop.f32.mrb[60].mxu0 }
0x1d6c   :  { %v6405_v48 = vrot.slane %v6398_v1, 4  ;;  %v6420_v2 = vmul.f32 %v6398_v1, %v6398_v1  ;;  %v6400_v21 = vpop.f32.mrb[61].mxu0 }
0x1d6d   :  { %v6411_v9 = vsel %vm262_vm6, %v6400_v21, 0.0  ;;  %v6421_v15 = vmul.f32 %v6400_v21, %v6400_v21  ;;  %v6402_v29 = vpop.f32.mrb[62].mxu0 }
0x1d6e   :  { %v6406_v61 = vadd.f32 %v6405_v48, %v6398_v1  ;;  %v6422_v54 = vrot.slane %v6420_v2, 4  ;;  %v6412_v49 = vrot.slane %v6411_v9, 4  ;;  %v6403_v32 = vpop.f32.mrb[63].mxu0  ;;  %v10608_v29 = vld [vmem:[%s12683_s25 + $0x20] ss:$8 sps:$4 sm:$0xff]  }
0x1d6f   :  { %v6428_v56 = vsel %vm262_vm6, %v6421_v15, 0.0  ;;  %v10610_v15 = vld [vmem:[%s12683_s25 + $0x24] ss:$8 sps:$4 sm:$0xff]   ;;  %v10614_v32 = vld [vmem:[%s12683_s25 + $0x40] ss:$8 sps:$4 sm:$0xff]  }
0x1d70   :  { %v6407_v17 = vrot.slane %v6406_v61, 2  ;;  %v6423_v22 = vadd.f32 %v6422_v54, %v6420_v2  ;;  %v6413_v12 = vadd.f32 %v6412_v49, %v6411_v9  ;;  %v6429_v39 = vrot.slane %v6428_v56, 4  ;;  %v12390_v2 = vld [vmem:[%s12667_s27] sm:$0xff]  ;;  %v10605_v9 = vld [vmem:[%s12683_s25 + $0x10] ss:$8 sps:$4 sm:$0xff]  }
0x1d71   :  { %v10611_v54 = vld [vmem:[%s12683_s25 + $0x30] ss:$8 sps:$4 sm:$0xff]   ;;  %v10616_v49 = vld [vmem:[%s12683_s25 + $0x44] ss:$8 sps:$4 sm:$0xff]  }
0x1d72   :  { %v6408_v34 = vadd.f32 %v6407_v17, %v6406_v61  ;;  %v6424_v33 = vrot.slane %v6423_v22, 2  ;;  %v6414_v57 = vrot.slane %v6413_v12, 2  ;;  %v6430_v53 = vadd.f32 %v6429_v39, %v6428_v56  ;;  %v10613_v61 = vld [vmem:[%s12683_s25 + $0x34] ss:$8 sps:$4 sm:$0xff]   ;;  %v10617_v17 = vld [vmem:[%s12683_s25 + $0x50] ss:$8 sps:$4 sm:$0xff]  }
0x1d73   :  { %v10619_v56 = vld [vmem:[%s12683_s25 + $0x54] ss:$8 sps:$4 sm:$0xff]  }
0x1d74   :  { %v6409_v31 = vrot.slane %v6408_v34, 1  ;;  %v6425_v36 = vadd.f32 %v6424_v33, %v6423_v22  ;;  %v6415_v38 = vadd.f32 %v6414_v57, %v6413_v12  ;;  %v6431_v62 = vrot.slane %v6430_v53, 2  ;;  %v10622_v22 = vld [vmem:[%s12684_s3 + $0x4] ss:$8 sps:$4 sm:$0xff]   ;;  %v10620_v12 = vld [vmem:[%s12684_s3] ss:$8 sps:$4 sm:$0xff]  }
0x1d75   :  { %v10625_v39 = vld [vmem:[%s12684_s3 + $0x14] ss:$8 sps:$4 sm:$0xff]   ;;  %v10628_v33 = vld [vmem:[%s12684_s3 + $0x24] ss:$8 sps:$4 sm:$0xff]   ;;  %v10626_v57 = vld [vmem:[%s12684_s3 + $0x20] ss:$8 sps:$4 sm:$0xff]  }
0x1d76   :  { %v6410_v20 = vadd.f32 %v6409_v31, %v6408_v34  ;;  %v6426_v26 = vrot.slane %v6425_v36, 1  ;;  %v6416_v25 = vrot.slane %v6415_v38, 1  ;;  %v6432_v45 = vadd.f32 %v6431_v62, %v6430_v53  ;;  %v10623_v34 = vld [vmem:[%s12684_s3 + $0x10] ss:$8 sps:$4 sm:$0xff]   ;;  %v10631_v53 = vld [vmem:[%s12684_s3 + $0x34] ss:$8 sps:$4 sm:$0xff]  }
0x1d77   :  { %v10629_v31 = vld [vmem:[%s12684_s3 + $0x30] ss:$8 sps:$4 sm:$0xff]   ;;  %v10637_v62 = vld [vmem:[%s12684_s3 + $0x54] ss:$8 sps:$4 sm:$0xff]  }
0x1d78   :  { %v6418_v41 = vmul.f32 0.125, %v6410_v20  ;;  %v6427_v52 = vadd.f32 %v6426_v26, %v6425_v36  ;;  %v6417_v59 = vadd.f32 %v6416_v25, %v6415_v38  ;;  %v6433_v3 = vrot.slane %v6432_v45, 1  ;;  %v10634_v36 = vld [vmem:[%s12684_s3 + $0x44] ss:$8 sps:$4 sm:$0xff]   ;;  %v10632_v38 = vld [vmem:[%s12684_s3 + $0x40] ss:$8 sps:$4 sm:$0xff]  }
0x1d79   :  { %v10635_v20 = vld [vmem:[%s12684_s3 + $0x50] ss:$8 sps:$4 sm:$0xff]   ;;  %v10640_v26 = vld [vmem:[%s12684_s3 + $0x64] ss:$8 sps:$4 sm:$0xff]   ;;  %v10638_v25 = vld [vmem:[%s12684_s3 + $0x60] ss:$8 sps:$4 sm:$0xff]  }
0x1d7a   :  { %v6435_v63 = vmul.f32 0.125, %v6427_v52  ;;  %v6437_v51 = vmul.f32 %v6418_v41, %v6418_v41  ;;  %v6419_v11 = vmul.f32 0.125, %v6417_v59  ;;  %v6434_v50 = vadd.f32 %v6433_v3, %v6432_v45 }
0x1d7b   :  { %v6443_v14 = vsub.f32 %v6398_v1, %v6418_v41 }
0x1d7c   :  { %v6439_v46 = vsub.f32 %v6435_v63, %v6437_v51  ;;  %v6438_v19 = vmul.f32 %v6419_v11, %v6419_v11  ;;  %v6436_v18 = vmul.f32 0.125, %v6434_v50  ;;  %v6444_v35 = vsub.f32 %v6400_v21, %v6419_v11 }
0x1d7e   :  { %v6441_v42 = vmax.f32 %v6439_v46, 0.0  ;;  %v6440_v28 = vsub.f32 %v6436_v18, %v6438_v19 }
0x1d80   :  { %v6445_v27 = vadd.f32 1e-05, %v6441_v42  ;;  %v6442_v40 = vmax.f32 %v6440_v28, 0.0 }
0x1d82   :  { %10815 = vrsqrt.f32 %v6445_v27  ;;  %v6446_v44 = vadd.f32 1e-05, %v6442_v40 }
0x1d84   :  { %10817 = vrsqrt.f32 %v6446_v44 }
0x1d8c   :  { %v10816_v23 = vpop.eup %10815 }
0x1d8d   :  { %v6449_v43 = vmul.f32 %v10816_v23, %v6443_v14 }
0x1d8e   :  { %v10818_v55 = vpop.eup %10817 }
0x1d8f   :  { %6453 = vrot.lane.b32.xlu0 %v6449_v43, %s10925_s29  ;;  %v6450_v58 = vmul.f32 %v10818_v55, %v6444_v35 }
0x1d91   :  { %6455 = vrot.lane.b32.xlu1 %v6450_v58, %s10925_s29 }
0x1e01   :  { %v6454_v47 = vpop.permute.xlu0 %6453 }
0x1e03   :  { %v6456_v5 = vpop.permute.xlu1 %6455 }
0x1e04   :  { %v6457_v7 = vsel %vm1207_vm5, %v6454_v47, %v6456_v5 }
0x1e05   :  { %v6459_v13 = vadd.f32 %v6457_v7, %v6449_v43 }
0x1e07   :  { %v6460_v10 = vmax.f32 %v6459_v13, 0.0  ;;  %v10641_v13 = vld [vmem:[%s12685_s8] sm:$0xff]  }
0x1e08   :  { %9710 = vmatpush3.bf16.msra.mxu0 %v10641_v13 }
0x1e09   :  { %v6499_v37 = vpack.c.bf16 %v6460_v10, %v6460_v10  ;;  %v10642_v10 = vld [vmem:[%s12685_s8 + $0x8] sm:$0xff]   ;;  %9711 = vmatprep.subr.bf16.mxu0 %v10916_v6 }
0x1e0b   :  { %9701 = vmatmul.mubr.msk.bf16.vlgmr.msra.gmra.mrb[84].mxu1 %vm5224_vm9, %v6499_v37 }
0x1e0c   :  { %9706 = vmatprep.mubr.msk.f32.mxu1 %vm10917_vm0, %v10916_v6  ;;  %9712 = vmatpush3.bf16.msra.mxu0 %v10642_v10 }
0x1e0d   :  { %9713 = vmatprep.subr.bf16.mxu0 %v10916_v6 }
0x1ede   :  { %v6573_v16 = vpop.f32.mrb[84].mxu1 }
0x1edf   :  { %v9702_v1 = vpop.f32.mrb[85].mxu1  ;;  %9705 = vmatpush3.msra.mxu1 %v6573_v16 }
0x1ee0   :  { %v6576_v48 = vpop.f32.mrb[86].mxu1  ;;  %9707 = vmatmul.mubr.msk.f32.vlgmr.msra.gmra.mrb[88].mxu1 %vm4606_vm7, %v12390_v2  ;;  %6736 = vmatprep.subr.bf16.mxu1 %v10604_v60  ;;  %v10644_v60 = vld [vmem:[%s12685_s8 + $0x18] sm:$0xff]  }
0x1ee1   :  { %v9703_v21 = vpop.f32.mrb[87].mxu1  ;;  %6737 = vmatpush1.bf16.msra.mxu1 %v10602_v0  ;;  %6768 = vmatprep.mubr.bf16.mxu1 %v10923_v8  ;;  %v10645_v0 = vld [vmem:[%s12685_s8 + $0x20] sm:$0xff]  }
0x1ee2   :  { %6738 = vmatprep.subr.bf16.mxu1 %v10607_v24 }
0x1ee5   :  { %6739 = vmatpush1.bf16.msra.mxu1 %v10605_v9 }
0x1ee6   :  { %6740 = vmatprep.subr.bf16.mxu1 %v10610_v15 }
0x1ee9   :  { %6741 = vmatpush1.bf16.msra.mxu1 %v10608_v29 }
0x1eea   :  { %6742 = vmatprep.subr.bf16.mxu1 %v10613_v61 }
0x1eed   :  { %6743 = vmatpush1.bf16.msra.mxu1 %v10611_v54 }
0x1eee   :  { %6744 = vmatprep.subr.bf16.mxu1 %v10616_v49 }
0x1ef1   :  { %6745 = vmatpush1.bf16.msra.mxu1 %v10614_v32 }
0x1ef2   :  { %6746 = vmatprep.subr.bf16.mxu1 %v10619_v56 }
0x1ef5   :  { %6747 = vmatpush1.bf16.msra.mxu1 %v10617_v17 }
0x1ef6   :  { %6850 = vmatprep.subr.bf16.mxu1 %v10622_v22 }
0x1ef8   :  { %8735 = vmatmul.mubr.msk.bf16.vlgmr.msra.gmra.mrb[92].mxu1 %vm5224_vm9, %v6499_v37  ;;  %v10643_v37 = vld [vmem:[%s12685_s8 + $0x10] sm:$0xff]  }
0x1ef9   :  { %6882 = vmatprep.mubr.bf16.mxu1 %v10923_v8  ;;  %6851 = vmatpush1.bf16.msra.mxu1 %v10620_v12 }
0x1efa   :  { %6852 = vmatprep.subr.bf16.mxu1 %v10625_v39  ;;  %9714 = vmatpush3.bf16.msra.mxu0 %v10643_v37  ;;  %v10650_v37 = vld [vmem:[%s12686_s14 + $0x4] ss:$8 sps:$4 sm:$0xff]  }
0x1efb   :  { %9715 = vmatprep.subr.bf16.mxu0 %v10916_v6 }
0x1efd   :  { %6853 = vmatpush1.bf16.msra.mxu1 %v10623_v34 }
0x1efe   :  { %6854 = vmatprep.subr.bf16.mxu1 %v10628_v33  ;;  %9716 = vmatpush3.bf16.msra.mxu0 %v10644_v60  ;;  %v10648_v60 = vld [vmem:[%s12686_s14] ss:$8 sps:$4 sm:$0xff]  }
0x1eff   :  { %9717 = vmatprep.subr.bf16.mxu0 %v10916_v6 }
0x1f01   :  { %6855 = vmatpush1.bf16.msra.mxu1 %v10626_v57 }
0x1f02   :  { %6856 = vmatprep.subr.bf16.mxu1 %v10631_v53  ;;  %9718 = vmatpush3.bf16.msra.mxu0 %v10645_v0 }
0x1f03   :  { %9719 = vmatprep.subr.bf16.mxu0 %v10916_v6 }
0x1f05   :  { %6857 = vmatpush1.bf16.msra.mxu1 %v10629_v31 }
0x1f06   :  { %6858 = vmatprep.subr.bf16.mxu1 %v10634_v36 }
0x1f09   :  { %6859 = vmatpush1.bf16.msra.mxu1 %v10632_v38 }
0x1f0a   :  { %6860 = vmatprep.subr.bf16.mxu1 %v10637_v62 }
0x1f0d   :  { %6861 = vmatpush1.bf16.msra.mxu1 %v10635_v20 }
0x1f0e   :  { %6862 = vmatprep.subr.bf16.mxu1 %v10640_v26 }
0x1f11   :  { %6863 = vmatpush1.bf16.msra.mxu1 %v10638_v25 }
0x1fb3   :  { %v6645_v45 = vpop.f32.mrb[88].mxu1 }
0x1fb4   :  { %v6650_v41 = vsel %vm6649_vm11, %v6645_v45, 0.0  ;;  %v6658_v52 = vmul.f32 %v6645_v45, %v6645_v45  ;;  %v9708_v59 = vpop.f32.mrb[89].mxu1 }
0x1fb5   :  { %v6651_v3 = vrot.slane %v6650_v41, 4 }
0x1fb6   :  { %v6659_v63 = vsel %vm6649_vm11, %v6658_v52, 0.0 }
0x1fb7   :  { %v6652_v51 = vadd.f32 %v6651_v3, %v6650_v41  ;;  %v6660_v11 = vrot.slane %v6659_v63, 4 }
0x1fb9   :  { %v6653_v50 = vrot.slane %v6652_v51, 2  ;;  %v6661_v46 = vadd.f32 %v6660_v11, %v6659_v63 }
0x1fbb   :  { %v6654_v19 = vadd.f32 %v6653_v50, %v6652_v51  ;;  %v6662_v18 = vrot.slane %v6661_v46, 2 }
0x1fbd   :  { %v6655_v42 = vrot.slane %v6654_v19, 1  ;;  %v6663_v28 = vadd.f32 %v6662_v18, %v6661_v46 }
0x1fbf   :  { %v6656_v27 = vadd.f32 %v6655_v42, %v6654_v19  ;;  %v6664_v40 = vrot.slane %v6663_v28, 1 }
0x1fc1   :  { %v6657_v44 = vmul.f32 0.125, %v6656_v27  ;;  %v6665_v30 = vadd.f32 %v6664_v40, %v6663_v28 }
0x1fc3   :  { %v6666_v4 = vmul.f32 0.125, %v6665_v30  ;;  %v6667_v14 = vmul.f32 %v6657_v44, %v6657_v44  ;;  %v6670_v55 = vsub.f32 %v6645_v45, %v6657_v44  ;;  %v10646_v44 = vld [vmem:[%s12685_s8 + $0x28] sm:$0xff]   ;;  %v10647_v30 = vld [vmem:[%s12685_s8 + $0x30] sm:$0xff]  }
0x1fc4   :  { %9720 = vmatpush3.bf16.msra.mxu0 %v10646_v44 }
0x1fc5   :  { %v6668_v23 = vsub.f32 %v6666_v4, %v6667_v14  ;;  %9721 = vmatprep.subr.bf16.mxu0 %v10916_v6 }
0x1fc7   :  { %v6669_v43 = vmax.f32 %v6668_v23, 0.0 }
0x1fc8   :  { %9722 = vmatpush3.bf16.msra.mxu0 %v10647_v30 }
0x1fc9   :  { %v6671_v35 = vadd.f32 1e-05, %v6669_v43  ;;  %9727 = vmatprep.subr.mxu0 %v10916_v6 }
0x1fcb   :  { %10819 = vrsqrt.f32 %v6671_v35 }
0x1fd5   :  { %v10820_v58 = vpop.eup %10819 }
0x1fd6   :  { %v6673_v47 = vmul.f32 %v10820_v58, %v6670_v55 }
0x1fd8   :  { %v6674_v5 = vmax.f32 %v6673_v47, 0.0 }
0x1fda   :  { %v6675_v7 = vpack.c.bf16 %v6674_v5, %v6674_v5 }
0x1fdc   :  { %8750 = vmatmul.mubr.msk.bf16.vlgmr.msra.gmra.mrb[92].mxu1 %vm6649_vm11, %v6675_v7 }
0x1fdd   :  { %7646 = vmatprep.mubr.bf16.mxu1 %v10923_v8 }
0x20af   :  { %v6884_v16 = vpop.f32.mrb[92].mxu1 }
0x20b0   :  { %v6891_v24 = vrot.slane %v6884_v16, 4  ;;  %v6906_v1 = vmul.f32 %v6884_v16, %v6884_v16  ;;  %v6886_v48 = vpop.f32.mrb[93].mxu1 }
0x20b1   :  { %v6897_v21 = vsel %vm5224_vm9, %v6886_v48, 0.0  ;;  %v6907_v9 = vmul.f32 %v6886_v48, %v6886_v48  ;;  %v6888_v15 = vpop.f32.mrb[94].mxu1 }
0x20b2   :  { %v6892_v29 = vadd.f32 %v6891_v24, %v6884_v16  ;;  %v6908_v61 = vrot.slane %v6906_v1, 4  ;;  %v6898_v54 = vrot.slane %v6897_v21, 4  ;;  %v6889_v49 = vpop.f32.mrb[95].mxu1  ;;  %v10654_v15 = vld [vmem:[%s12686_s14 + $0x20] ss:$8 sps:$4 sm:$0xff]  }
0x20b3   :  { %v6914_v32 = vsel %vm5224_vm9, %v6907_v9, 0.0  ;;  %v10656_v9 = vld [vmem:[%s12686_s14 + $0x24] ss:$8 sps:$4 sm:$0xff]   ;;  %v10660_v49 = vld [vmem:[%s12686_s14 + $0x40] ss:$8 sps:$4 sm:$0xff]  }
0x20b4   :  { %v6893_v56 = vrot.slane %v6892_v29, 2  ;;  %v6909_v17 = vadd.f32 %v6908_v61, %v6906_v1  ;;  %v6899_v22 = vadd.f32 %v6898_v54, %v6897_v21  ;;  %v6915_v12 = vrot.slane %v6914_v32, 4  ;;  %v10651_v21 = vld [vmem:[%s12686_s14 + $0x10] ss:$8 sps:$4 sm:$0xff]   ;;  %v10662_v54 = vld [vmem:[%s12686_s14 + $0x44] ss:$8 sps:$4 sm:$0xff]  }
0x20b5   :  { %v10657_v61 = vld [vmem:[%s12686_s14 + $0x30] ss:$8 sps:$4 sm:$0xff]  }
0x20b6   :  { %v6894_v39 = vadd.f32 %v6893_v56, %v6892_v29  ;;  %v6910_v34 = vrot.slane %v6909_v17, 2  ;;  %v6900_v33 = vrot.slane %v6899_v22, 2  ;;  %v6916_v57 = vadd.f32 %v6915_v12, %v6914_v32  ;;  %v10659_v29 = vld [vmem:[%s12686_s14 + $0x34] ss:$8 sps:$4 sm:$0xff]   ;;  %v10663_v56 = vld [vmem:[%s12686_s14 + $0x50] ss:$8 sps:$4 sm:$0xff]  }
0x20b7   :  { %v10665_v32 = vld [vmem:[%s12686_s14 + $0x54] ss:$8 sps:$4 sm:$0xff]   ;;  %v10671_v12 = vld [vmem:[%s12687_s6 + $0x4] ss:$8 sps:$4 sm:$0xff]  }
0x20b8   :  { %v6895_v53 = vrot.slane %v6894_v39, 1  ;;  %v6911_v31 = vadd.f32 %v6910_v34, %v6909_v17  ;;  %v6901_v36 = vadd.f32 %v6900_v33, %v6899_v22  ;;  %v6917_v38 = vrot.slane %v6916_v57, 2  ;;  %v10668_v17 = vld [vmem:[%s12686_s14 + $0x64] ss:$8 sps:$4 sm:$0xff]   ;;  %v10666_v22 = vld [vmem:[%s12686_s14 + $0x60] ss:$8 sps:$4 sm:$0xff]  }
0x20b9   :  { %v10674_v34 = vld [vmem:[%s12687_s6 + $0x14] ss:$8 sps:$4 sm:$0xff]   ;;  %v10672_v33 = vld [vmem:[%s12687_s6 + $0x10] ss:$8 sps:$4 sm:$0xff]  }
0x20ba   :  { %v6896_v62 = vadd.f32 %v6895_v53, %v6894_v39  ;;  %v6912_v20 = vrot.slane %v6911_v31, 1  ;;  %v6902_v26 = vrot.slane %v6901_v36, 1  ;;  %v6918_v25 = vadd.f32 %v6917_v38, %v6916_v57  ;;  %v10669_v39 = vld [vmem:[%s12687_s6] ss:$8 sps:$4 sm:$0xff]   ;;  %v10677_v57 = vld [vmem:[%s12687_s6 + $0x24] ss:$8 sps:$4 sm:$0xff]  }
0x20bb   :  { %v10675_v53 = vld [vmem:[%s12687_s6 + $0x20] ss:$8 sps:$4 sm:$0xff]   ;;  %v10683_v38 = vld [vmem:[%s12687_s6 + $0x44] ss:$8 sps:$4 sm:$0xff]  }
0x20bc   :  { %v6904_v45 = vmul.f32 0.125, %v6896_v62  ;;  %v6913_v41 = vadd.f32 %v6912_v20, %v6911_v31  ;;  %v6903_v52 = vadd.f32 %v6902_v26, %v6901_v36  ;;  %v6919_v59 = vrot.slane %v6918_v25, 1  ;;  %v10680_v31 = vld [vmem:[%s12687_s6 + $0x34] ss:$8 sps:$4 sm:$0xff]   ;;  %v10678_v36 = vld [vmem:[%s12687_s6 + $0x30] ss:$8 sps:$4 sm:$0xff]  }
0x20bd   :  { %v10681_v62 = vld [vmem:[%s12687_s6 + $0x40] ss:$8 sps:$4 sm:$0xff]   ;;  %v10686_v20 = vld [vmem:[%s12687_s6 + $0x54] ss:$8 sps:$4 sm:$0xff]   ;;  %v10684_v26 = vld [vmem:[%s12687_s6 + $0x50] ss:$8 sps:$4 sm:$0xff]  }
0x20be   :  { %v6921_v3 = vmul.f32 0.125, %v6913_v41  ;;  %v6923_v63 = vmul.f32 %v6904_v45, %v6904_v45  ;;  %v6905_v51 = vmul.f32 0.125, %v6903_v52  ;;  %v6920_v11 = vadd.f32 %v6919_v59, %v6918_v25  ;;  %v10689_v25 = vld [vmem:[%s12687_s6 + $0x64] ss:$8 sps:$4 sm:$0xff]   ;;  %v10690_v41 = vld [vmem:[%s12687_s6 + $0x70] ss:$8 sps:$4 sm:$0xff]  }
0x20bf   :  { %v6929_v4 = vsub.f32 %v6884_v16, %v6904_v45  ;;  %v10653_v16 = vld [vmem:[%s12686_s14 + $0x14] ss:$8 sps:$4 sm:$0xff]   ;;  %v10687_v45 = vld [vmem:[%s12687_s6 + $0x60] ss:$8 sps:$4 sm:$0xff]  }
0x20c0   :  { %v6925_v50 = vsub.f32 %v6921_v3, %v6923_v63  ;;  %v6924_v46 = vmul.f32 %v6905_v51, %v6905_v51  ;;  %v6922_v19 = vmul.f32 0.125, %v6920_v11  ;;  %v6930_v43 = vsub.f32 %v6886_v48, %v6905_v51  ;;  %v10692_v52 = vld [vmem:[%s12687_s6 + $0x74] ss:$8 sps:$4 sm:$0xff]  }
0x20c2   :  { %v6927_v18 = vmax.f32 %v6925_v50, 0.0  ;;  %v6926_v42 = vsub.f32 %v6922_v19, %v6924_v46 }
0x20c4   :  { %v6931_v28 = vadd.f32 1e-05, %v6927_v18  ;;  %v6928_v27 = vmax.f32 %v6926_v42, 0.0 }
0x20c6   :  { %10821 = vrsqrt.f32 %v6931_v28  ;;  %v6932_v40 = vadd.f32 1e-05, %v6928_v27 }
0x20c8   :  { %10823 = vrsqrt.f32 %v6932_v40 }
0x20d0   :  { %v10822_v14 = vpop.eup %10821 }
0x20d1   :  { %v6935_v23 = vmul.f32 %v10822_v14, %v6929_v4 }
0x20d2   :  { %v10824_v35 = vpop.eup %10823 }
0x20d3   :  { %6939 = vrot.lane.b32.xlu0 %v6935_v23, %s10926_s24  ;;  %v6936_v55 = vmul.f32 %v10824_v35, %v6930_v43 }
0x20d5   :  { %6941 = vrot.lane.b32.xlu1 %v6936_v55, %s10926_s24 }
0x2145   :  { %v6940_v58 = vpop.permute.xlu0 %6939 }
0x2147   :  { %v6942_v47 = vpop.permute.xlu1 %6941 }
0x2148   :  { %v6943_v5 = vsel %vm472_vm1, %v6940_v58, %v6942_v47 }
0x2149   :  { %v6945_v7 = vadd.f32 %v6943_v5, %v6935_v23 }
0x214b   :  { %v6946_v13 = vmax.f32 %v6945_v7, 0.0 }
0x214d   :  { %v6991_v10 = vpack.c.bf16 %v6946_v13, %v6946_v13 }
0x214f   :  { %9724 = vmatmul.mubr.msk.bf16.vlgmr.msra.gmra.mrb[64].mxu0 %vm6649_vm11, %v6991_v10 }
0x2150   :  { %9729 = vmatprep.mubr.msk.f32.mxu0 %vm10917_vm0, %v10916_v6 }
0x2222   :  { %v7071_v0 = vpop.f32.mrb[64].mxu0 }
0x2223   :  { %v9725_v24 = vpop.f32.mrb[65].mxu0  ;;  %9728 = vmatpush3.msra.mxu0 %v7071_v0  ;;  %v10699_v0 = vld [vmem:[%s11172_s20 + $0x14] ss:$8 sps:$4 sm:$0xff]  }
0x2224   :  { %v7074_v1 = vpop.f32.mrb[66].mxu0  ;;  %9730 = vmatmul.mubr.msk.f32.vlgmr.msra.gmra.mrb[58].mxu0 %vm4606_vm7, %v12390_v2  ;;  %7241 = vmatprep.subr.bf16.mxu0 %v10650_v37  ;;  %v10693_v37 = vld [vmem:[%s11172_s20] ss:$8 sps:$4 sm:$0xff]  }
0x2225   :  { %v9726_v48 = vpop.f32.mrb[67].mxu0  ;;  %7242 = vmatpush1.bf16.msra.mxu0 %v10648_v60  ;;  %7273 = vmatprep.mubr.bf16.mxu0 %v10923_v8  ;;  %v10696_v60 = vld [vmem:[%s11182_s19 + $0x8] ss:$12 sps:$4 sm:$0xff]   ;;  %v10700_v24 = vld [vmem:[%s11182_s19 + $0x20] ss:$12 sps:$4 sm:$0xff]  }
0x2226   :  { %7243 = vmatprep.subr.bf16.mxu0 %v10653_v16  ;;  %v10697_v16 = vld [vmem:[%s11172_s20 + $0x10] ss:$8 sps:$4 sm:$0xff]   ;;  %v10703_v1 = vld [vmem:[%s11172_s20 + $0x24] ss:$8 sps:$4 sm:$0xff]   ;;  %v10701_v48 = vld [vmem:[%s11172_s20 + $0x20] ss:$8 sps:$4 sm:$0xff]  }
0x2229   :  { %7244 = vmatpush1.bf16.msra.mxu0 %v10651_v21  ;;  %v10704_v21 = vld [vmem:[%s11182_s19 + $0x38] ss:$12 sps:$4 sm:$0xff]  }
0x222a   :  { %7245 = vmatprep.subr.bf16.mxu0 %v10656_v9  ;;  %v10707_v9 = vld [vmem:[%s11172_s20 + $0x34] ss:$8 sps:$4 sm:$0xff]  }
0x222d   :  { %7246 = vmatpush1.bf16.msra.mxu0 %v10654_v15  ;;  %v10705_v15 = vld [vmem:[%s11172_s20 + $0x30] ss:$8 sps:$4 sm:$0xff]  }
0x222e   :  { %7247 = vmatprep.subr.bf16.mxu0 %v10659_v29  ;;  %v10708_v29 = vld [vmem:[%s11182_s19 + $0x50] ss:$12 sps:$4 sm:$0xff]  }
0x2231   :  { %7248 = vmatpush1.bf16.msra.mxu0 %v10657_v61  ;;  %v10711_v61 = vld [vmem:[%s11172_s20 + $0x44] ss:$8 sps:$4 sm:$0xff]  }
0x2232   :  { %7249 = vmatprep.subr.bf16.mxu0 %v10662_v54  ;;  %v10709_v54 = vld [vmem:[%s11172_s20 + $0x40] ss:$8 sps:$4 sm:$0xff]  }
0x2235   :  { %7250 = vmatpush1.bf16.msra.mxu0 %v10660_v49  ;;  %v10712_v49 = vld [vmem:[%s11182_s19 + $0x68] ss:$12 sps:$4 sm:$0xff]  }
0x2236   :  { %7251 = vmatprep.subr.bf16.mxu0 %v10665_v32  ;;  %v10715_v32 = vld [vmem:[%s11172_s20 + $0x54] ss:$8 sps:$4 sm:$0xff]  }
0x2239   :  { %7252 = vmatpush1.bf16.msra.mxu0 %v10663_v56  ;;  %v10713_v56 = vld [vmem:[%s11172_s20 + $0x50] ss:$8 sps:$4 sm:$0xff]  }
0x223a   :  { %7253 = vmatprep.subr.bf16.mxu0 %v10668_v17  ;;  %v10716_v17 = vld [vmem:[%s11182_s19 + $0x80] ss:$12 sps:$4 sm:$0xff]  }
0x223d   :  { %7254 = vmatpush1.bf16.msra.mxu0 %v10666_v22  ;;  %v10719_v22 = vld [vmem:[%s11172_s20 + $0x64] ss:$8 sps:$4 sm:$0xff]  }
0x223e   :  { %7362 = vmatprep.subr.bf16.mxu0 %v10671_v12  ;;  %v10717_v12 = vld [vmem:[%s11172_s20 + $0x60] ss:$8 sps:$4 sm:$0xff]  }
0x2240   :  { %8774 = vmatmul.mubr.msk.bf16.vlgmr.msra.gmra.mrb[68].mxu0 %vm6649_vm11, %v6991_v10  ;;  %v10695_v10 = vld [vmem:[%s11172_s20 + $0x4] ss:$8 sps:$4 sm:$0xff]  }
0x2241   :  { %7394 = vmatprep.mubr.bf16.mxu0 %v10923_v8  ;;  %7363 = vmatpush1.bf16.msra.mxu0 %v10669_v39  ;;  %v10720_v39 = vld [vmem:[%s11182_s19 + $0x98] ss:$12 sps:$4 sm:$0xff]  }
0x2242   :  { %7364 = vmatprep.subr.bf16.mxu0 %v10674_v34  ;;  %7614 = vmatprep.subr.bf16.mxu1 %v10695_v10  ;;  %v10723_v34 = vld [vmem:[%s11172_s20 + $0x74] ss:$8 sps:$4 sm:$0xff]  }
0x2243   :  { %7615 = vmatpush1.bf16.msra.mxu1 %v10693_v37 }
0x2244   :  { %7616 = vmatprep.subr.bf16.mxu1 %v10699_v0 }
0x2245   :  { %7365 = vmatpush1.bf16.msra.mxu0 %v10672_v33  ;;  %v10721_v33 = vld [vmem:[%s11172_s20 + $0x70] ss:$8 sps:$4 sm:$0xff]  }
0x2246   :  { %7366 = vmatprep.subr.bf16.mxu0 %v10677_v57  ;;  %v10724_v57 = vld [vmem:[%s11182_s19 + $0xb0] ss:$12 sps:$4 sm:$0xff]  }
0x2247   :  { %7617 = vmatpush1.bf16.msra.mxu1 %v10697_v16 }
0x2248   :  { %7618 = vmatprep.subr.bf16.mxu1 %v10703_v1 }
0x2249   :  { %7367 = vmatpush1.bf16.msra.mxu0 %v10675_v53 }
0x224a   :  { %7368 = vmatprep.subr.bf16.mxu0 %v10680_v31 }
0x224b   :  { %7619 = vmatpush1.bf16.msra.mxu1 %v10701_v48 }
0x224c   :  { %7620 = vmatprep.subr.bf16.mxu1 %v10707_v9 }
0x224d   :  { %7369 = vmatpush1.bf16.msra.mxu0 %v10678_v36 }
0x224e   :  { %7370 = vmatprep.subr.bf16.mxu0 %v10683_v38 }
0x224f   :  { %7621 = vmatpush1.bf16.msra.mxu1 %v10705_v15 }
0x2250   :  { %7622 = vmatprep.subr.bf16.mxu1 %v10711_v61 }
0x2251   :  { %7371 = vmatpush1.bf16.msra.mxu0 %v10681_v62 }
0x2252   :  { %7372 = vmatprep.subr.bf16.mxu0 %v10686_v20 }
0x2253   :  { %7623 = vmatpush1.bf16.msra.mxu1 %v10709_v54 }
0x2254   :  { %7624 = vmatprep.subr.bf16.mxu1 %v10715_v32  ;;  %v10727_v32 = vld [vmem:[%s11182_s19 + $0x4] ss:$12 sps:$4 sm:$0xff]  }
0x2255   :  { %7373 = vmatpush1.bf16.msra.mxu0 %v10684_v26 }
0x2256   :  { %7374 = vmatprep.subr.bf16.mxu0 %v10689_v25 }
0x2257   :  { %7625 = vmatpush1.bf16.msra.mxu1 %v10713_v56 }
0x2258   :  { %7626 = vmatprep.subr.bf16.mxu1 %v10719_v22 }
0x2259   :  { %7375 = vmatpush1.bf16.msra.mxu0 %v10687_v45 }
0x225a   :  { %7376 = vmatprep.subr.bf16.mxu0 %v10692_v52 }
0x225b   :  { %7627 = vmatpush1.bf16.msra.mxu1 %v10717_v12  ;;  %v10730_v12 = vld [vmem:[%s11182_s19 + $0x1c] ss:$12 sps:$4 sm:$0xff]  }
0x225c   :  { %7628 = vmatprep.subr.bf16.mxu1 %v10723_v34  ;;  %v10733_v34 = vld [vmem:[%s11182_s19 + $0x34] ss:$12 sps:$4 sm:$0xff]  }
0x225d   :  { %7377 = vmatpush1.bf16.msra.mxu0 %v10690_v41 }
0x225e   :  { %9732 = vmatprep.subr.bf16.mxu0 %v10916_v6 }
0x225f   :  { %7629 = vmatpush1.bf16.msra.mxu1 %v10721_v33  ;;  %v10731_v33 = vld [vmem:[%s11182_s19 + $0x30] ss:$12 sps:$4 sm:$0xff]  }
0x22f7   :  { %v7143_v59 = vpop.f32.mrb[58].mxu0 }
0x22f8   :  { %v7147_v3 = vrot.slane %v7143_v59, 4  ;;  %v7154_v63 = vmul.f32 %v7143_v59, %v7143_v59  ;;  %v9731_v51 = vpop.f32.mrb[59].mxu0 }
0x22fa   :  { %v7148_v11 = vadd.f32 %v7147_v3, %v7143_v59  ;;  %v7155_v50 = vrot.slane %v7154_v63, 4 }
0x22fc   :  { %v7149_v46 = vrot.slane %v7148_v11, 2  ;;  %v7156_v19 = vadd.f32 %v7155_v50, %v7154_v63 }
0x22fe   :  { %v7150_v18 = vadd.f32 %v7149_v46, %v7148_v11  ;;  %v7157_v42 = vrot.slane %v7156_v19, 2 }
0x2300   :  { %v7151_v28 = vrot.slane %v7150_v18, 1  ;;  %v7158_v27 = vadd.f32 %v7157_v42, %v7156_v19 }
0x2302   :  { %v7152_v40 = vadd.f32 %v7151_v28, %v7150_v18  ;;  %v7159_v44 = vrot.slane %v7158_v27, 1 }
0x2304   :  { %v7153_v30 = vmul.f32 0.125, %v7152_v40  ;;  %v7160_v4 = vadd.f32 %v7159_v44, %v7158_v27 }
0x2306   :  { %v7161_v14 = vmul.f32 0.125, %v7160_v4  ;;  %v7162_v23 = vmul.f32 %v7153_v30, %v7153_v30  ;;  %v7165_v58 = vsub.f32 %v7143_v59, %v7153_v30 }
0x2308   :  { %v7163_v43 = vsub.f32 %v7161_v14, %v7162_v23 }
0x230a   :  { %v7164_v35 = vmax.f32 %v7163_v43, 0.0 }
0x230c   :  { %v7166_v55 = vadd.f32 1e-05, %v7164_v35 }
0x230e   :  { %10825 = vrsqrt.f32 %v7166_v55 }
0x2318   :  { %v10826_v47 = vpop.eup %10825 }
0x2319   :  { %v7168_v5 = vmul.f32 %v10826_v47, %v7165_v58 }
0x231b   :  { %v7169_v7 = vmax.f32 %v7168_v5, 0.0 }
0x231d   :  { %v7170_v13 = vpack.c.bf16 %v7169_v7, %v7169_v7 }
0x231f   :  { %7395 = vmatmul.mubr.bf16.vlgmr.msra.gmra.mrb[68].mxu0 %v7170_v13 }
0x2320   :  { %9748 = vmatprep.mubr.msk.bf16.mxu0 %vm10917_vm0, %v10916_v6  ;;  %9733 = vmatpush3.bf16.msra.mxu0 %v10696_v60 }
0x2321   :  { %9734 = vmatprep.subr.bf16.mxu0 %v10916_v6 }
0x2324   :  { %9735 = vmatpush3.bf16.msra.mxu0 %v10700_v24 }
0x2325   :  { %9736 = vmatprep.subr.bf16.mxu0 %v10916_v6 }
0x2328   :  { %9737 = vmatpush3.bf16.msra.mxu0 %v10704_v21 }
0x2329   :  { %9738 = vmatprep.subr.bf16.mxu0 %v10916_v6 }
0x232c   :  { %9739 = vmatpush3.bf16.msra.mxu0 %v10708_v29 }
0x232d   :  { %9740 = vmatprep.subr.bf16.mxu0 %v10916_v6 }
0x2330   :  { %9741 = vmatpush3.bf16.msra.mxu0 %v10712_v49 }
0x2331   :  { %9742 = vmatprep.subr.bf16.mxu0 %v10916_v6 }
0x2334   :  { %9743 = vmatpush3.bf16.msra.mxu0 %v10716_v17  ;;  %v10725_v17 = vld [vmem:[%s11182_s19] ss:$12 sps:$4 sm:$0xff]  }
0x2335   :  { %9744 = vmatprep.subr.bf16.mxu0 %v10916_v6 }
0x2338   :  { %9745 = vmatpush3.bf16.msra.mxu0 %v10720_v39 }
0x2339   :  { %9746 = vmatprep.subr.bf16.mxu0 %v10916_v6 }
0x233c   :  { %9747 = vmatpush3.bf16.msra.mxu0 %v10724_v57  ;;  %v10736_v57 = vld [vmem:[%s11182_s19 + $0x4c] ss:$12 sps:$4 sm:$0xff]  }
0x233d   :  { %8173 = vmatprep.subr.bf16.mxu0 %v10923_v8 }
0x23f2   :  { %v7396_v53 = vpop.f32.mrb[68].mxu0 }
0x23f3   :  { %v7403_v31 = vrot.slane %v7396_v53, 4  ;;  %v7417_v36 = vmul.f32 %v7396_v53, %v7396_v53  ;;  %v7398_v38 = vpop.f32.mrb[69].mxu0 }
0x23f4   :  { %v7409_v62 = vrot.slane %v7398_v38, 4  ;;  %v7418_v20 = vmul.f32 %v7398_v38, %v7398_v38  ;;  %v7400_v26 = vpop.f32.mrb[70].mxu0 }
0x23f5   :  { %v7404_v25 = vadd.f32 %v7403_v31, %v7396_v53  ;;  %v7419_v45 = vrot.slane %v7417_v36, 4  ;;  %v7401_v41 = vpop.f32.mrb[71].mxu0  ;;  %v10737_v31 = vld [vmem:[%s11182_s19 + $0x60] ss:$12 sps:$4 sm:$0xff]  }
0x23f6   :  { %v7410_v52 = vadd.f32 %v7409_v62, %v7398_v38  ;;  %v7425_v59 = vrot.slane %v7418_v20, 4  ;;  %v10745_v62 = vld [vmem:[%s11182_s19 + $0x94] ss:$12 sps:$4 sm:$0xff]   ;;  %v10748_v26 = vld [vmem:[%s11182_s19 + $0xac] ss:$12 sps:$4 sm:$0xff]  }
0x23f7   :  { %v7405_v3 = vrot.slane %v7404_v25, 2  ;;  %v7420_v63 = vadd.f32 %v7419_v45, %v7417_v36  ;;  %v10742_v36 = vld [vmem:[%s11182_s19 + $0x7c] ss:$12 sps:$4 sm:$0xff]   ;;  %v10751_v45 = vld [vmem:[%s11177_s30 + $0x4] ss:$12 sps:$4 sm:$0xff]  }
0x23f8   :  { %v7411_v51 = vrot.slane %v7410_v52, 2  ;;  %v7426_v11 = vadd.f32 %v7425_v59, %v7418_v20  ;;  %v10743_v20 = vld [vmem:[%s11182_s19 + $0x90] ss:$12 sps:$4 sm:$0xff]   ;;  %v10749_v41 = vld [vmem:[%s11177_s30] ss:$12 sps:$4 sm:$0xff]  }
0x23f9   :  { %v7406_v50 = vadd.f32 %v7405_v3, %v7404_v25  ;;  %v7421_v46 = vrot.slane %v7420_v63, 2  ;;  %v10746_v25 = vld [vmem:[%s11182_s19 + $0xa8] ss:$12 sps:$4 sm:$0xff]   ;;  %v10753_v3 = vld [vmem:[%s11177_s30 + $0x18] ss:$12 sps:$4 sm:$0xff]  }
0x23fa   :  { %v7412_v19 = vadd.f32 %v7411_v51, %v7410_v52  ;;  %v7427_v18 = vrot.slane %v7426_v11, 2  ;;  %v10752_v52 = vld [vmem:[%s11177_s30 + $0x8] ss:$12 sps:$4 sm:$0xff]  }
0x23fb   :  { %v7407_v42 = vrot.slane %v7406_v50, 1  ;;  %v7422_v28 = vadd.f32 %v7421_v46, %v7420_v63  ;;  %v10755_v59 = vld [vmem:[%s11177_s30 + $0x1c] ss:$12 sps:$4 sm:$0xff]   ;;  %v10756_v63 = vld [vmem:[%s11177_s30 + $0x20] ss:$12 sps:$4 sm:$0xff]  }
0x23fc   :  { %v7413_v27 = vrot.slane %v7412_v19, 1  ;;  %v7428_v40 = vadd.f32 %v7427_v18, %v7426_v11  ;;  %v10759_v51 = vld [vmem:[%s11177_s30 + $0x34] ss:$12 sps:$4 sm:$0xff]   ;;  %v10757_v11 = vld [vmem:[%s11177_s30 + $0x30] ss:$12 sps:$4 sm:$0xff]  }
0x23fd   :  { %v7408_v44 = vadd.f32 %v7407_v42, %v7406_v50  ;;  %v7423_v30 = vrot.slane %v7422_v28, 1  ;;  %v10760_v50 = vld [vmem:[%s11177_s30 + $0x38] ss:$12 sps:$4 sm:$0xff]   ;;  %v10764_v18 = vld [vmem:[%s11177_s30 + $0x50] ss:$12 sps:$4 sm:$0xff]  }
0x23fe   :  { %v7414_v4 = vadd.f32 %v7413_v27, %v7412_v19  ;;  %v7429_v14 = vrot.slane %v7428_v40, 1  ;;  %v10763_v46 = vld [vmem:[%s11177_s30 + $0x4c] ss:$12 sps:$4 sm:$0xff]   ;;  %v10761_v19 = vld [vmem:[%s11177_s30 + $0x48] ss:$12 sps:$4 sm:$0xff]  }
0x23ff   :  { %v7415_v23 = vmul.f32 0.125, %v7408_v44  ;;  %v7424_v43 = vadd.f32 %v7423_v30, %v7422_v28  ;;  %v10767_v42 = vld [vmem:[%s11177_s30 + $0x64] ss:$12 sps:$4 sm:$0xff]   ;;  %v10765_v28 = vld [vmem:[%s11177_s30 + $0x60] ss:$12 sps:$4 sm:$0xff]  }
0x2400   :  { %v7416_v35 = vmul.f32 0.125, %v7414_v4  ;;  %v7430_v55 = vadd.f32 %v7429_v14, %v7428_v40  ;;  %v10768_v27 = vld [vmem:[%s11177_s30 + $0x68] ss:$12 sps:$4 sm:$0xff]   ;;  %v10769_v44 = vld [vmem:[%s11177_s30 + $0x78] ss:$12 sps:$4 sm:$0xff]  }
0x2401   :  { %v7431_v58 = vmul.f32 0.125, %v7424_v43  ;;  %v7433_v47 = vmul.f32 %v7415_v23, %v7415_v23  ;;  %v7439_v24 = vsub.f32 %v7396_v53, %v7415_v23  ;;  %v10734_v53 = vld [vmem:[%s11182_s19 + $0x48] ss:$12 sps:$4 sm:$0xff]   ;;  %v10772_v30 = vld [vmem:[%s11177_s30 + $0x80] ss:$12 sps:$4 sm:$0xff]  }
0x2402   :  { %v7432_v5 = vmul.f32 0.125, %v7430_v55  ;;  %v7434_v7 = vmul.f32 %v7416_v35, %v7416_v35  ;;  %v7440_v48 = vsub.f32 %v7398_v38, %v7416_v35  ;;  %v10740_v38 = vld [vmem:[%s11182_s19 + $0x78] ss:$12 sps:$4 sm:$0xff]   ;;  %v10771_v40 = vld [vmem:[%s11177_s30 + $0x7c] ss:$12 sps:$4 sm:$0xff]  }
0x2403   :  { %v7435_v13 = vsub.f32 %v7431_v58, %v7433_v47  ;;  %v10775_v4 = vld [vmem:[%s11177_s30 + $0x94] ss:$12 sps:$4 sm:$0xff]   ;;  %v10773_v14 = vld [vmem:[%s11177_s30 + $0x90] ss:$12 sps:$4 sm:$0xff]   ;;  %v10776_v23 = vld [vmem:[%s11177_s30 + $0x98] ss:$12 sps:$4 sm:$0xff]  }
0x2404   :  { %v7436_v10 = vsub.f32 %v7432_v5, %v7434_v7  ;;  %v10779_v43 = vld [vmem:[%s11177_s30 + $0xac] ss:$12 sps:$4 sm:$0xff]   ;;  %v10777_v35 = vld [vmem:[%s11177_s30 + $0xa8] ss:$12 sps:$4 sm:$0xff]   ;;  %v10780_v55 = vld [vmem:[%s11177_s30 + $0xb0] ss:$12 sps:$4 sm:$0xff]  }
0x2405   :  { %v7437_v37 = vmax.f32 %v7435_v13, 0.0  ;;  %v10783_v58 = vld [vmem:[%s11177_s30 + $0xc4] ss:$12 sps:$4 sm:$0xff]   ;;  %v10781_v47 = vld [vmem:[%s11177_s30 + $0xc0] ss:$12 sps:$4 sm:$0xff]  }
0x2406   :  { %v7438_v60 = vmax.f32 %v7436_v10, 0.0  ;;  %v10784_v5 = vld [vmem:[%s11177_s30 + $0xc8] ss:$12 sps:$4 sm:$0xff]   ;;  %s10928_s30 = smov [#allocation5]  }
0x2407   :  { %v7441_v0 = vadd.f32 1e-05, %v7437_v37  ;;  %s8300_s20 = sshll.u32 %s10928_s30, 4  ;;  %s8301_s20 = int_to_ptr.vmem [resolvable:$true] %s8300_s20 }
0x2408   :  { %v7442_v16 = vadd.f32 1e-05, %v7438_v60  ;;  %s10842_s12 = scalar_lea.vmem %s8301_s20, 256  ;;  %p10847_p1 = scmp.lt.s32.totalorder %s8301_s20, %s8301_s20 }
0x2409   :  { %10827 = vrsqrt.f32 %v7441_v0  ;;  %p10843_p0 = scmp.ne.s32.totalorder %s8301_s20, %s10842_s12  ;;  %p10848_p2 = scmp.lt.s32.totalorder %s10842_s12, %s10842_s12 }
0x240a   :  { %10829 = vrsqrt.f32 %v7442_v16 }
0x240b   :  { %p10849_p3 = por %p10848_p2, %p10847_p1 }
0x240d   :  { %p10850_p4 = pnand %p10849_p3, %p10843_p0 }
0x2413   :  { %v10828_v1 = vpop.eup %10827 }
0x2414   :  { %v10830_v21 = vpop.eup %10829  ;;  %v7445_v9 = vmul.f32 %v10828_v1, %v7439_v24 }
0x2415   :  { %v7446_v15 = vmul.f32 %v10830_v21, %v7440_v48 }
0x2417   :  { %v7447_v29 = vadd.f32 %v7446_v15, %v7445_v9 }
0x2419   :  { %v7448_v61 = vmax.f32 %v7447_v29, 0.0 }
0x241b   :  { %v7533_v54 = vpack.c.bf16 %v7448_v61, %v7448_v61 }
0x241d   :  { %7647 = vmatmul.mubr.bf16.vlgmr.msra.gmra.mrb[96].mxu1 %v7533_v54  ;;  %9749 = vmatmul.mubr.bf16.vlgmr.msra.gmra.mrb[72].mxu0 %v7533_v54 }
0x241e   :  { %7719 = vmatprep.mubr.f32.mxu1 %v10916_v6  ;;  %v10728_v6 = vld [vmem:[%s11182_s19 + $0x18] ss:$12 sps:$4 sm:$0xff]   ;;  %8174 = vmatpush1.bf16.msra.mxu0 %v10752_v52 }
0x241f   :  { %8175 = vmatprep.subr.bf16.mxu0 %v10923_v8 }
0x2422   :  { %8176 = vmatpush1.bf16.msra.mxu0 %v10756_v63 }
0x2423   :  { %8177 = vmatprep.subr.bf16.mxu0 %v10923_v8 }
0x2426   :  { %8178 = vmatpush1.bf16.msra.mxu0 %v10760_v50 }
0x2427   :  { %8179 = vmatprep.subr.bf16.mxu0 %v10923_v8 }
0x242a   :  { %8180 = vmatpush1.bf16.msra.mxu0 %v10764_v18 }
0x242b   :  { %8181 = vmatprep.subr.bf16.mxu0 %v10923_v8 }
0x242e   :  { %8182 = vmatpush1.bf16.msra.mxu0 %v10768_v27 }
0x242f   :  { %8183 = vmatprep.subr.bf16.mxu0 %v10923_v8 }
0x2432   :  { %8184 = vmatpush1.bf16.msra.mxu0 %v10772_v30 }
0x2433   :  { %8185 = vmatprep.subr.bf16.mxu0 %v10923_v8 }
0x2436   :  { %8186 = vmatpush1.bf16.msra.mxu0 %v10776_v23 }
0x2437   :  { %8187 = vmatprep.subr.bf16.mxu0 %v10923_v8 }
0x243a   :  { %8188 = vmatpush1.bf16.msra.mxu0 %v10780_v55 }
0x243b   :  { %8189 = vmatprep.subr.bf16.mxu0 %v10923_v8 }
0x243e   :  { %8190 = vmatpush1.bf16.msra.mxu0 %v10784_v5 }
0x24f0   :  { %v7648_v49 = vpop.f32.mrb[96].mxu1 }
0x24f1   :  { %v7650_v56 = vpop.f32.mrb[97].mxu1 }
0x24f2   :  { %v7652_v22 = vpop.f32.mrb[98].mxu1  ;;  %7655 = vmatprep.subr.mxu1 %v7650_v56 }
0x24f3   :  { %v7653_v39 = vpop.f32.mrb[99].mxu1  ;;  %7656 = vmatpush1.msra.mxu1 %v7648_v49 }
0x24f4   :  { %8807 = vmatmul.mubr.msk.f32.vlgmr.msra.gmra.mrb[90].mxu1 %vm4606_vm7, %v12390_v2  ;;  %7904 = vmatprep.subr.bf16.mxu1 %v10727_v32  ;;  %v10739_v2 = vld [vmem:[%s11182_s19 + $0x64] ss:$12 sps:$4 sm:$0xff]   ;;  %s10927_s19 = smov 112  }
0x24f5   :  { %7905 = vmatpush1.bf16.msra.mxu1 %v10725_v17  ;;  %7936 = vmatprep.mubr.bf16.mxu1 %v10923_v8 }
0x24f6   :  { %7906 = vmatprep.subr.bf16.mxu1 %v10730_v12 }
0x24f9   :  { %7907 = vmatpush1.bf16.msra.mxu1 %v10728_v6 }
0x24fa   :  { %7908 = vmatprep.subr.bf16.mxu1 %v10733_v34 }
0x24fd   :  { %7909 = vmatpush1.bf16.msra.mxu1 %v10731_v33 }
0x24fe   :  { %7910 = vmatprep.subr.bf16.mxu1 %v10736_v57 }
0x2501   :  { %7911 = vmatpush1.bf16.msra.mxu1 %v10734_v53 }
0x2502   :  { %7912 = vmatprep.subr.bf16.mxu1 %v10739_v2 }
0x2505   :  { %7913 = vmatpush1.bf16.msra.mxu1 %v10737_v31 }
0x2506   :  { %7914 = vmatprep.subr.bf16.mxu1 %v10742_v36 }
0x2509   :  { %7915 = vmatpush1.bf16.msra.mxu1 %v10740_v38 }
0x250a   :  { %7916 = vmatprep.subr.bf16.mxu1 %v10745_v62 }
0x250d   :  { %7917 = vmatpush1.bf16.msra.mxu1 %v10743_v20 }
0x250e   :  { %7918 = vmatprep.subr.bf16.mxu1 %v10748_v26 }
0x2511   :  { %7919 = vmatpush1.bf16.msra.mxu1 %v10746_v25 }
0x2512   :  { %8132 = vmatprep.subr.bf16.mxu1 %v10751_v45 }
0x2514   :  { %7937 = vmatmul.mubr.bf16.vlgmr.msra.gmra.mrb[100].mxu1 %v7533_v54 }
0x2515   :  { %8133 = vmatpush1.bf16.msra.mxu1 %v10749_v41 }
0x2516   :  { %8134 = vmatprep.subr.bf16.mxu1 %v10755_v59 }
0x2519   :  { %8135 = vmatpush1.bf16.msra.mxu1 %v10753_v3 }
0x251a   :  { %8136 = vmatprep.subr.bf16.mxu1 %v10759_v51 }
0x251d   :  { %8137 = vmatpush1.bf16.msra.mxu1 %v10757_v11 }
0x251e   :  { %8138 = vmatprep.subr.bf16.mxu1 %v10763_v46 }
0x2521   :  { %8139 = vmatpush1.bf16.msra.mxu1 %v10761_v19 }
0x2522   :  { %8140 = vmatprep.subr.bf16.mxu1 %v10767_v42 }
0x2525   :  { %8141 = vmatpush1.bf16.msra.mxu1 %v10765_v28 }
0x2526   :  { %8142 = vmatprep.subr.bf16.mxu1 %v10771_v40 }
0x2529   :  { %8143 = vmatpush1.bf16.msra.mxu1 %v10769_v44 }
0x252a   :  { %8144 = vmatprep.subr.bf16.mxu1 %v10775_v4 }
0x252d   :  { %8145 = vmatpush1.bf16.msra.mxu1 %v10773_v14 }
0x252e   :  { %8146 = vmatprep.subr.bf16.mxu1 %v10779_v43 }
0x2531   :  { %8147 = vmatpush1.bf16.msra.mxu1 %v10777_v35 }
0x2532   :  { %8148 = vmatprep.subr.bf16.mxu1 %v10783_v58 }
0x2535   :  { %8149 = vmatpush1.bf16.msra.mxu1 %v10781_v47 }
0x25c7   :  { %v7721_v7 = vpop.f32.mrb[90].mxu1 }
0x25c8   :  { %v7726_v13 = vrot.slane %v7721_v7, 4  ;;  %v7741_v10 = vmul.f32 %v7721_v7, %v7721_v7  ;;  %v7723_v37 = vpop.f32.mrb[91].mxu1 }
0x25c9   :  { %v7732_v60 = vsel %vm472_vm1, %v7723_v37, 0.0  ;;  %v7742_v0 = vmul.f32 %v7723_v37, %v7723_v37 }
0x25ca   :  { %v7727_v16 = vadd.f32 %v7726_v13, %v7721_v7  ;;  %v7743_v24 = vrot.slane %v7741_v10, 4  ;;  %v7733_v1 = vrot.slane %v7732_v60, 4 }
0x25cb   :  { %v7749_v48 = vsel %vm472_vm1, %v7742_v0, 0.0 }
0x25cc   :  { %v7728_v21 = vrot.slane %v7727_v16, 2  ;;  %v7744_v9 = vadd.f32 %v7743_v24, %v7741_v10  ;;  %v7734_v8 = vadd.f32 %v7733_v1, %v7732_v60  ;;  %v7750_v15 = vrot.slane %v7749_v48, 4 }
0x25ce   :  { %v7729_v29 = vadd.f32 %v7728_v21, %v7727_v16  ;;  %v7745_v61 = vrot.slane %v7744_v9, 2  ;;  %v7735_v54 = vrot.slane %v7734_v8, 2  ;;  %v7751_v49 = vadd.f32 %v7750_v15, %v7749_v48 }
0x25d0   :  { %v7730_v32 = vrot.slane %v7729_v29, 1  ;;  %v7746_v56 = vadd.f32 %v7745_v61, %v7744_v9  ;;  %v7736_v17 = vadd.f32 %v7735_v54, %v7734_v8  ;;  %v7752_v22 = vrot.slane %v7751_v49, 2 }
0x25d2   :  { %v7731_v12 = vadd.f32 %v7730_v32, %v7729_v29  ;;  %v7747_v39 = vrot.slane %v7746_v56, 1  ;;  %v7737_v6 = vrot.slane %v7736_v17, 1  ;;  %v7753_v34 = vadd.f32 %v7752_v22, %v7751_v49 }
0x25d4   :  { %v7739_v33 = vmul.f32 0.125, %v7731_v12  ;;  %v7748_v57 = vadd.f32 %v7747_v39, %v7746_v56  ;;  %v7738_v53 = vadd.f32 %v7737_v6, %v7736_v17  ;;  %v7754_v2 = vrot.slane %v7753_v34, 1 }
0x25d6   :  { %v7756_v31 = vmul.f32 0.125, %v7748_v57  ;;  %v7758_v36 = vmul.f32 %v7739_v33, %v7739_v33  ;;  %v7740_v38 = vmul.f32 0.125, %v7738_v53  ;;  %v7755_v62 = vadd.f32 %v7754_v2, %v7753_v34 }
0x25d7   :  { %v7764_v63 = vsub.f32 %v7721_v7, %v7739_v33 }
0x25d8   :  { %v7760_v20 = vsub.f32 %v7756_v31, %v7758_v36  ;;  %v7759_v26 = vmul.f32 %v7740_v38, %v7740_v38  ;;  %v7757_v25 = vmul.f32 0.125, %v7755_v62  ;;  %v7765_v50 = vsub.f32 %v7723_v37, %v7740_v38 }
0x25da   :  { %v7762_v45 = vmax.f32 %v7760_v20, 0.0  ;;  %v7761_v41 = vsub.f32 %v7757_v25, %v7759_v26 }
0x25dc   :  { %v7766_v52 = vadd.f32 1e-05, %v7762_v45  ;;  %v7763_v59 = vmax.f32 %v7761_v41, 0.0 }
0x25de   :  { %10831 = vrsqrt.f32 %v7766_v52  ;;  %v7767_v3 = vadd.f32 1e-05, %v7763_v59 }
0x25e0   :  { %10833 = vrsqrt.f32 %v7767_v3 }
0x25e8   :  { %v10832_v51 = vpop.eup %10831 }
0x25e9   :  { %v7770_v11 = vmul.f32 %v10832_v51, %v7764_v63 }
0x25ea   :  { %v10834_v46 = vpop.eup %10833 }
0x25eb   :  { %v7771_v19 = vmul.f32 %v10834_v46, %v7765_v50  ;;  %v7772_v18 = vmax.f32 %v7770_v11, 0.0 }
0x25ed   :  { %v7773_v42 = vmax.f32 %v7771_v19, 0.0  ;;  %v7774_v27 = vpack.c.bf16 %v7772_v18, %v7772_v18 }
0x25ef   :  { %v7775_v28 = vpack.c.bf16 %v7773_v42, %v7773_v42 }
0x25f1   :  { %8859 = vmatprep.mubr.msk.bf16.mxu1 %vm472_vm1, %v7775_v28  ;;  %8860 = vmatprep.mubr.msk.bf16.mxu0 %vm472_vm1, %v7775_v28 }
0x25f2   :  { %8165 = vmatmul.mubr.bf16.vlgmr.msra.gmra.mrb[100].mxu1 %v7774_v27  ;;  %8206 = vmatmul.mubr.bf16.vlgmr.msra.gmra.mrb[72].mxu0 %v7774_v27 }
0x26c5   :  { %v12573_v40 = vpop.f32.mrb[100].mxu1  ;;  %v8207_v44 = vpop.f32.mrb[72].mxu0 }
0x26c6   :  { %v8225_v30 = vsel %vm1207_vm5, %v8207_v44, 0.0  ;;  %v8237_v4 = vmul.f32 %v8207_v44, %v8207_v44  ;;  %v8168_v14 = vpop.f32.mrb[101].mxu1  ;;  %v8209_v23 = vpop.f32.mrb[73].mxu0  ;;  %v8213_v63 = vrot.slane %v12573_v40, 4  ;;  %v8235_v51 = vmul.f32 %v12573_v40, %v12573_v40 }
0x26c7   :  { %v8226_v43 = vrot.slane %v8225_v30, 4  ;;  %v8219_v35 = vrot.slane %v8168_v14, 4  ;;  %v8236_v55 = vmul.f32 %v8168_v14, %v8168_v14  ;;  %v8170_v58 = vpop.f32.mrb[102].mxu1  ;;  %v8210_v47 = vpop.f32.mrb[74].mxu0 }
0x26c8   :  { %v8250_v5 = vsel %vm1207_vm5, %v8237_v4, 0.0  ;;  %v8171_v7 = vpop.f32.mrb[103].mxu1  ;;  %v8211_v13 = vpop.f32.mrb[75].mxu0  ;;  %v8214_v11 = vadd.f32 %v8213_v63, %v12573_v40  ;;  %v8238_v50 = vrot.slane %v8235_v51, 4 }
0x26c9   :  { %v8227_v10 = vadd.f32 %v8226_v43, %v8225_v30  ;;  %v8251_v37 = vrot.slane %v8250_v5, 4  ;;  %v8220_v60 = vadd.f32 %v8219_v35, %v8168_v14  ;;  %v8244_v0 = vrot.slane %v8236_v55, 4 }
0x26ca   :  { %v8215_v46 = vrot.slane %v8214_v11, 2  ;;  %v8239_v19 = vadd.f32 %v8238_v50, %v8235_v51 }
0x26cb   :  { %v8228_v16 = vrot.slane %v8227_v10, 2  ;;  %v8252_v24 = vadd.f32 %v8251_v37, %v8250_v5  ;;  %v8221_v1 = vrot.slane %v8220_v60, 2  ;;  %v8245_v48 = vadd.f32 %v8244_v0, %v8236_v55 }
0x26cc   :  { %v8216_v18 = vadd.f32 %v8215_v46, %v8214_v11  ;;  %v8240_v42 = vrot.slane %v8239_v19, 2 }
0x26cd   :  { %v8229_v21 = vadd.f32 %v8228_v16, %v8227_v10  ;;  %v8253_v9 = vrot.slane %v8252_v24, 2  ;;  %v8222_v8 = vadd.f32 %v8221_v1, %v8220_v60  ;;  %v8246_v15 = vrot.slane %v8245_v48, 2 }
0x26ce   :  { %v8217_v28 = vrot.slane %v8216_v18, 1  ;;  %v8241_v27 = vadd.f32 %v8240_v42, %v8239_v19 }
0x26cf   :  { %v8230_v29 = vrot.slane %v8229_v21, 1  ;;  %v8254_v61 = vadd.f32 %v8253_v9, %v8252_v24  ;;  %v8223_v54 = vrot.slane %v8222_v8, 1  ;;  %v8247_v49 = vadd.f32 %v8246_v15, %v8245_v48 }
0x26d0   :  { %v8242_v30 = vrot.slane %v8241_v27, 1 }
0x26d1   :  { %v8231_v32 = vadd.f32 %v8230_v29, %v8229_v21  ;;  %v8255_v56 = vrot.slane %v8254_v61, 1  ;;  %v8224_v17 = vadd.f32 %v8223_v54, %v8222_v8  ;;  %v8248_v22 = vrot.slane %v8247_v49, 1 }
0x26d3   :  { %v8234_v12 = vmul.f32 0.125, %v8231_v32  ;;  %v8256_v39 = vadd.f32 %v8255_v56, %v8254_v61  ;;  %v8233_v6 = vmul.f32 0.125, %v8224_v17  ;;  %v8249_v34 = vadd.f32 %v8248_v22, %v8247_v49 }
0x26d5   :  { %v8259_v33 = vmul.f32 0.125, %v8256_v39  ;;  %v8262_v57 = vmul.f32 %v8234_v12, %v8234_v12  ;;  %v8258_v53 = vmul.f32 0.125, %v8249_v34  ;;  %v8261_v2 = vmul.f32 %v8233_v6, %v8233_v6 }
0x26d6   :  { %v8271_v25 = vsub.f32 %v8207_v44, %v8234_v12  ;;  %v8270_v41 = vsub.f32 %v8168_v14, %v8233_v6  ;;  %v8218_v44 = vadd.f32 %v8217_v28, %v8216_v18  ;;  %v8243_v14 = vadd.f32 %v8242_v30, %v8241_v27 }
0x26d7   :  { %v8265_v31 = vsub.f32 %v8259_v33, %v8262_v57  ;;  %v8264_v36 = vsub.f32 %v8258_v53, %v8261_v2 }
0x26d8   :  { %v8232_v4 = vmul.f32 0.125, %v8218_v44  ;;  %v8257_v23 = vmul.f32 0.125, %v8243_v14 }
0x26d9   :  { %v8268_v38 = vmax.f32 %v8265_v31, 0.0  ;;  %v8267_v62 = vmax.f32 %v8264_v36, 0.0 }
0x26da   :  { %v8260_v43 = vmul.f32 %v8232_v4, %v8232_v4  ;;  %v8269_v5 = vsub.f32 %v12573_v40, %v8232_v4 }
0x26db   :  { %v8274_v20 = vadd.f32 1e-05, %v8268_v38  ;;  %v8273_v26 = vadd.f32 1e-05, %v8267_v62 }
0x26dc   :  { %v8263_v35 = vsub.f32 %v8257_v23, %v8260_v43 }
0x26dd   :  { %10835 = vrsqrt.f32 %v8274_v20 }
0x26de   :  { %10837 = vrsqrt.f32 %v8273_v26  ;;  %v8266_v55 = vmax.f32 %v8263_v35, 0.0 }
0x26e0   :  { %v8272_v58 = vadd.f32 1e-05, %v8266_v55 }
0x26e2   :  { %10839 = vrsqrt.f32 %v8272_v58 }
0x26e7   :  { %v10836_v45 = vpop.eup %10835 }
0x26e8   :  { %v10838_v52 = vpop.eup %10837  ;;  %v8280_v59 = vmul.f32 %v10836_v45, %v8271_v25 }
0x26e9   :  { %v8279_v3 = vmul.f32 %v10838_v52, %v8270_v41 }
0x26ea   :  { %8285 = vrot.lane.b32.xlu1 %v8280_v59, %s10927_s19 }
0x26eb   :  { %8283 = vrot.lane.b32.xlu0 %v8279_v3, %s10927_s19 }
0x26ec   :  { %v10840_v47 = vpop.eup %10839 }
0x26ed   :  { %v8278_v10 = vmul.f32 %v10840_v47, %v8269_v5 }
0x275c   :  { %v8286_v7 = vpop.permute.xlu1 %8285 }
0x275d   :  { %v8284_v13 = vpop.permute.xlu0 %8283  ;;  %v8291_v37 = vadd.f32 %v8286_v7, %v8279_v3 }
0x275e   :  { %v8287_v60 = vsel %vm6649_vm11, %v8284_v13, %v8286_v7 }
0x275f   :  { %v8290_v0 = vadd.f32 %v8287_v60, %v8278_v10  ;;  %8293 = vst.msk [vmem:[#allocation5 + $0x8] sm:$0xff] %vm472_vm1, %v8291_v37 }
0x2761   :  { %8292 = vst [vmem:[#allocation5] sm:$0xff] %v8290_v0 }
0x2762   :  { %10853 = shalt.err (!%p10850_p4)
}
0x2763   :  { %s10854_s27 = scalar_lea.hbm %s11187_s9, 256 }
0x2764   :  { %p10855_p5 = scmp.ne.s32.totalorder %s11187_s9, %s10854_s27  ;;  %p10858_p6 = scmp.lt.u32.totalorder %s10854_s27, %s11187_s9 }
0x2766   :  { %p10860_p7 = pnand %p10858_p6, %p10855_p5 }
0x2768   :  { %10863 = shalt.err (!%p10860_p7)
}
0x2769   :  { %8303 = dma.vmem_to_hbm [thread:$0]  %s8301_s20, 256, %s11187_s9, [#allocation6]  }
0x276a   :  { %10864 = dma.done.wait [#allocation6], 256  }
0x276b   :  { %10865 = vsyncadd [#allocation6], 4294967040 }
0x276c   :  { %8307 = vsyncpa [#allocation6], 1 }

</bundles_post_ra>
